<compile_context>
chip_gen: v7x
topology: tpu7x:2x2x1
jax: 0.10.0
libtpu: 0.0.40
codegen_flags: <defaults>
</compile_context>

<pallas_src>
import functools

import jax
import jax.numpy as jnp
from jax.experimental import pallas as pl
from jax.experimental.pallas import tpu as pltpu

LANE = 128
_VMEM_LIMIT = 32 * 1024 * 1024  # conservative across v5e / v6e / v7x


def _rup(n, m=LANE):
    return ((n + m - 1) // m) * m


def _pad_axis_to(x, axis, size):
    if x.shape[axis] == size:
        return x
    pads = [(0, 0)] * x.ndim
    pads[axis] = (0, size - x.shape[axis])
    return jnp.pad(x, pads)


def _pick_block(n, max_b=8):
    # NOTE: on v7x (2 TensorCores / chip) pick the block so n // b >= 2.
    b = min(n, max_b)
    while n % b:
        b -= 1
    return b


# ------------------------------ kernels ------------------------------------ #


def _conv_gemm_kernel(p_ref, w_ref, b_ref, a_ref, st_ref):
    """Strided conv as a single merged-tap GEMM + bias + ReLU + BN partial stats.

    p_ref : (B, HW, K)  bf16  im2col patches (K = 4*4*Cin, real channels)
    w_ref : (K, C)      bf16  merged-tap weight (lane-padded C)
    b_ref : (1, C)      f32   bias (pad lanes zero)
    a_ref : (B, HW, C)  bf16  ReLU(conv + bias)
    st_ref: (1, 2, C)   f32   per-block [sum, sum-of-squares] over rows
    """
    bb, hw, k = p_ref.shape
    c = w_ref.shape[1]
    p = p_ref[...].reshape(bb * hw, k)
    act = jnp.dot(p, w_ref[...], preferred_element_type=jnp.float32)
    act = jnp.maximum(act + b_ref[...], 0.0)
    a_ref[...] = act.reshape(bb, hw, c).astype(a_ref.dtype)
    st_ref[0] = jnp.concatenate(
        [jnp.sum(act, axis=0, keepdims=True),
         jnp.sum(act * act, axis=0, keepdims=True)], axis=0)


def _tail_kernel(a2_ref, sc_ref, sh_ref, w3_ref, b3_ref, wr3_ref, wr1_ref,
                 w4_ref, b4_ref, w5_ref, b5_ref, wfc_ref, bfc_ref, out_ref,
                 *, side, n_res, c5_real):
    """BN2 affine -> conv3 -> residual stack -> conv4 -> conv5 -> fc1.

    One batch block per grid step; the activation stays a flat
    (B_blk*side*side, C) f32 VMEM value throughout.
    """
    f32, bf16 = jnp.float32, jnp.bfloat16
    bb, hw, c2 = a2_ref.shape
    n3 = bb * hw

    # Column-validity masks for the 3x3 convs, hoisted out of every tap loop.
    wcol = jax.lax.broadcasted_iota(jnp.int32, (1, hw, 1), 1) % side
    col_ok = (wcol >= 1, None, wcol < side - 1)          # dj = 0, 1, 2

    def conv3x3(v, w_val):
        """3x3 / stride-1 / pad-1 conv on a flat (B, hw, Cin) activation.

        The 9 shifted (and column-masked) slabs are concatenated along the lane
        axis and fed to ONE K = 9*Cin MXU matmul (no per-tap accumulator chain).
        Row out-of-range is handled by the per-sample zero row padding; column
        wrap is handled by the hoisted masks.  Returns (B*hw, Cout) f32.
        """
        cin = v.shape[-1]
        vb = v.astype(bf16)
        zpad = jnp.zeros((bb, 2 * side, cin), bf16)
        xe = jnp.concatenate([zpad, vb, zpad], axis=1)   # (bb, hw + 4*side, cin)
        slabs = []
        for di in range(3):
            for dj in range(3):
                s = (di - 1) * side + (dj - 1)
                p = xe[:, 2 * side + s: 2 * side + s + hw, :]
                if col_ok[dj] is not None:
                    p = jnp.where(col_ok[dj], p, jnp.zeros((), bf16))
                slabs.append(p)
        slab = jnp.concatenate(slabs, axis=-1)           # (bb, hw, 9*cin)
        return jnp.dot(slab.reshape(n3, 9 * cin), w_val,
                       preferred_element_type=f32)

    # BatchNorm-2 affine prologue (pad lanes of scale/shift are exactly 0).
    x3d = a2_ref[...].astype(f32) * sc_ref[...] + sh_ref[...]    # (bb, hw, c2)

    # conv3: 3x3, bias, no activation before the residual stack.
    x = conv3x3(x3d, w3_ref[...]) + b3_ref[...]                  # (n3, C2P) f32

    # Residual stack: x += conv1x1(relu(conv3x3(relu(x)))); trailing ReLU.
    for layer in range(n_res):
        h = jnp.maximum(x, 0.0).reshape(bb, hw, c2)
        h = conv3x3(h, wr3_ref[layer])                           # (n3, RHP)
        h = jnp.maximum(h, 0.0)
        x = x + jnp.dot(h.astype(bf16), wr1_ref[layer],
                        preferred_element_type=f32)
    x = jnp.maximum(x, 0.0)

    # conv4 (1x1) + ReLU, conv5 (1x1) + ReLU.
    x = jnp.maximum(jnp.dot(x.astype(bf16), w4_ref[...],
                            preferred_element_type=f32) + b4_ref[...], 0.0)
    x = jnp.maximum(jnp.dot(x.astype(bf16), w5_ref[...],
                            preferred_element_type=f32) + b5_ref[...], 0.0)

    # fc1: flatten each sample in PyTorch NCHW order (channel-major, then h*w)
    # via a transpose + lane-concat, then ONE (bb, c5*hw) x (c5*hw, EDP) matmul.
    rows = []
    for b in range(bb):
        xt = x[b * hw:(b + 1) * hw, :].T                         # (C5P, hw)
        rows.append(jnp.concatenate(
            [xt[c:c + 1, :] for c in range(c5_real)], axis=1))   # (1, c5*hw)
    xcat = jnp.concatenate(rows, axis=0)                         # (bb, c5*hw)
    out = jnp.dot(xcat.astype(bf16), wfc_ref[...],
                  preferred_element_type=f32) + bfc_ref[...]
    out_ref[:, 0, :] = out


# ----------------------------- pallas wrappers ------------------------------ #


def _conv_stage(patches, w, bias):
    n, hw, k = patches.shape
    c = w.shape[1]
    bb = _pick_block(n)
    nb = n // bb
    flops = 2 * n * hw * k * c
    bytes_accessed = int(patches.size * 2 + w.size * 2 + bias.size * 4
                         + n * hw * c * 2 + nb * 2 * c * 4)
    return pl.pallas_call(
        _conv_gemm_kernel,
        out_shape=(jax.ShapeDtypeStruct((n, hw, c), jnp.bfloat16),
                   jax.ShapeDtypeStruct((nb, 2, c), jnp.float32)),
        grid=(nb,),
        in_specs=[pl.BlockSpec((bb, hw, k), lambda i: (i, 0, 0)),
                  pl.BlockSpec((k, c), lambda i: (0, 0)),
                  pl.BlockSpec((1, c), lambda i: (0, 0))],
        out_specs=(pl.BlockSpec((bb, hw, c), lambda i: (i, 0, 0)),
                   pl.BlockSpec((1, 2, c), lambda i: (i, 0, 0))),
        compiler_params=pltpu.CompilerParams(
            dimension_semantics=("parallel",),
            vmem_limit_bytes=_VMEM_LIMIT),
        cost_estimate=pl.CostEstimate(flops=int(flops), transcendentals=0,
                                      bytes_accessed=bytes_accessed),
    )(patches, w, bias)


def _tail_stage(a2, sc2, sh2, kp, cfg):
    n = a2.shape[0]
    c2p, rhp, c4p, c5p, edp = (cfg["C2P"], cfg["RHP"], cfg["C4P"],
                               cfg["C5P"], cfg["EDP"])
    side, n_res, c5 = cfg["side"], cfg["n_res"], cfg["C5"]
    hw = side * side
    bb = _pick_block(n)
    nb = n // bb
    kern = functools.partial(_tail_kernel, side=side, n_res=n_res, c5_real=c5)
    flops = 2 * n * hw * (9 * c2p * c2p
                          + n_res * (9 * c2p * rhp + rhp * c2p)
                          + c2p * c4p + c4p * c5p) + 2 * n * c5 * hw * edp
    bytes_accessed = int(a2.size * 2 + kp["w3k"].size * 2 + kp["wr3k"].size * 2
                         + kp["wr1k"].size * 2 + kp["w4p"].size * 2
                         + kp["w5p"].size * 2 + kp["wfck"].size * 2
                         + n * edp * 4)
    return pl.pallas_call(
        kern,
        out_shape=jax.ShapeDtypeStruct((n, 1, edp), jnp.float32),
        grid=(nb,),
        in_specs=[
            pl.BlockSpec((bb, hw, c2p), lambda i: (i, 0, 0)),
            pl.BlockSpec((1, c2p), lambda i: (0, 0)),
            pl.BlockSpec((1, c2p), lambda i: (0, 0)),
            pl.BlockSpec((9 * c2p, c2p), lambda i: (0, 0)),
            pl.BlockSpec((1, c2p), lambda i: (0, 0)),
            pl.BlockSpec((n_res, 9 * c2p, rhp), lambda i: (0, 0, 0)),
            pl.BlockSpec((n_res, rhp, c2p), lambda i: (0, 0, 0)),
            pl.BlockSpec((c2p, c4p), lambda i: (0, 0)),
            pl.BlockSpec((1, c4p), lambda i: (0, 0)),
            pl.BlockSpec((c4p, c5p), lambda i: (0, 0)),
            pl.BlockSpec((1, c5p), lambda i: (0, 0)),
            pl.BlockSpec((c5 * hw, edp), lambda i: (0, 0)),
            pl.BlockSpec((1, edp), lambda i: (0, 0)),
        ],
        out_specs=pl.BlockSpec((bb, 1, edp), lambda i: (i, 0, 0)),
        compiler_params=pltpu.CompilerParams(
            dimension_semantics=("parallel",),
            vmem_limit_bytes=_VMEM_LIMIT),
        cost_estimate=pl.CostEstimate(flops=int(flops), transcendentals=0,
                                      bytes_accessed=bytes_accessed),
    )(a2, sc2, sh2, kp["w3k"], kp["b3p"], kp["wr3k"], kp["wr1k"],
      kp["w4p"], kp["b4p"], kp["w5p"], kp["b5p"], kp["wfck"], kp["bfcp"])


# ------------------------------- JAX glue ----------------------------------- #


def _im2col_s2(x_nhwc, ho, wo):
    """im2col for a 4x4 / stride-2 / pad-1 conv; feature order (kh, kw, cin)."""
    n, _, _, c = x_nhwc.shape
    xp = jnp.pad(x_nhwc, ((0, 0), (1, 1), (1, 1), (0, 0)))
    cols = [xp[:, di:di + 2 * ho:2, dj:dj + 2 * wo:2, :]
            for di in range(4) for dj in range(4)]
    return jnp.concatenate(cols, axis=-1).reshape(n, ho * wo, 16 * c)


def _bn_affine(stats, gamma, beta, count, eps=1e-5):
    """Training-mode BatchNorm (biased var) folded into a per-channel affine."""
    # TODO(synk): one-pass E[x^2]-E[x]^2; use a two-pass/shifted reduction if
    # exact PyTorch parity is required under large activation means.
    c = gamma.shape[0]
    total = jnp.sum(stats[:, 0, :c], axis=0)
    total_sq = jnp.sum(stats[:, 1, :c], axis=0)
    mean = total / count
    var = jnp.maximum(total_sq / count - mean * mean, 0.0)
    scale = gamma * jax.lax.rsqrt(var + eps)
    shift = beta - mean * scale
    return scale, shift


def make_config(in_channels, num_hiddens, num_residual_layers,
                num_residual_hiddens, embedding_dim, spatial):
    assert spatial // 4 == 8, "fc1 hard-codes an 8x8 post-downsample grid"
    c1, c2 = num_hiddens // 2, num_hiddens
    rh, c4, c5 = num_residual_hiddens, num_hiddens // 2, num_hiddens // 16
    return dict(
        Cin=in_channels, C1=c1, C2=c2, RH=rh, C4=c4, C5=c5, ED=embedding_dim,
        C1P=_rup(c1), C2P=_rup(c2), RHP=_rup(rh), C4P=_rup(c4),
        C5P=_rup(c5), EDP=_rup(embedding_dim),
        side=spatial // 4, n_res=num_residual_layers)


def init_canonical_params(key, in_channels, num_hiddens, num_residual_layers,
                          num_residual_hiddens, embedding_dim):
    """Synthetic parameters in PyTorch-equivalent layouts (convs as HWIO)."""
    c1, c2 = num_hiddens // 2, num_hiddens
    rh, c4, c5 = num_residual_hiddens, num_hiddens // 2, num_hiddens // 16
    keys = iter(jax.random.split(key, 32))

    def w(shape):
        return 0.05 * jax.random.normal(next(keys), shape, jnp.float32)

    return {
        "w1": w((4, 4, in_channels, c1)), "b1": w((c1,)),
        "g1": jnp.ones((c1,), jnp.float32), "be1": jnp.zeros((c1,), jnp.float32),
        "w2": w((4, 4, c1, c2)), "b2": w((c2,)),
        "g2": jnp.ones((c2,), jnp.float32), "be2": jnp.zeros((c2,), jnp.float32),
        "w3": w((3, 3, c2, c2)), "b3": w((c2,)),
        "res": [(w((3, 3, c2, rh)), w((rh, c2)))
                for _ in range(num_residual_layers)],
        "w4": w((c2, c4)), "b4": w((c4,)),
        "w5": w((c4, c5)), "b5": w((c5,)),
        # fc1 in PyTorch Linear layout (out, in); the "in" index follows the
        # NCHW flatten order c*64 + h*8 + w.
        "wfc": w((embedding_dim, 8 * 8 * c5)), "bfc": w((embedding_dim,)),
    }


def prepare_params(p, cfg):
    """Rearrange / zero-pad / bf16-cast the parameters once for the kernels."""
    c1p, c2p, rhp, c4p, c5p, edp = (cfg["C1P"], cfg["C2P"], cfg["RHP"],
                                    cfg["C4P"], cfg["C5P"], cfg["EDP"])

    def gemm4x4(wc, c_out_p):
        # (4,4,Cin,Cout) -> (16*Cin, Cout_pad): merged-tap weight, (kh,kw,cin) order.
        k = 16 * wc.shape[2]
        return _pad_axis_to(wc.reshape(k, wc.shape[3]), 1,
                            c_out_p).astype(jnp.bfloat16)

    def gemm3x3(wc, c_in_p, c_out_p):
        # (3,3,Cin,Cout) -> (9*Cin_pad, Cout_pad): per-tap input channels padded
        # so the kernel's lane-padded slabs line up; pad rows/cols are zero.
        t = wc.reshape(9, wc.shape[2], wc.shape[3])
        t = _pad_axis_to(_pad_axis_to(t, 1, c_in_p), 2, c_out_p)
        return t.reshape(9 * c_in_p, c_out_p).astype(jnp.bfloat16)

    def mat(wm, c_in_p, c_out_p):
        return _pad_axis_to(_pad_axis_to(wm, 0, c_in_p), 1,
                            c_out_p).astype(jnp.bfloat16)

    def bias(b, cp):
        return _pad_axis_to(b, 0, cp).reshape(1, cp).astype(jnp.float32)

    # fc1: PyTorch flatten order is c*64 + h*8 + w, exactly the (channel-major,
    # then row-major spatial) order the kernel builds -> just transpose.
    wfck = _pad_axis_to(p["wfc"].T, 1, edp).astype(jnp.bfloat16)

    return {
        "w1k": gemm4x4(p["w1"], c1p), "b1p": bias(p["b1"], c1p),
        "g1": p["g1"], "be1": p["be1"],
        "w2k": gemm4x4(p["w2"], c2p), "b2p": bias(p["b2"], c2p),
        "g2": p["g2"], "be2": p["be2"],
        "w3k": gemm3x3(p["w3"], c2p, c2p), "b3p": bias(p["b3"], c2p),
        "wr3k": jnp.stack([gemm3x3(w3r, c2p, rhp) for (w3r, _) in p["res"]], 0),
        "wr1k": jnp.stack([mat(w1r, rhp, c2p) for (_, w1r) in p["res"]], 0),
        "w4p": mat(p["w4"], c2p, c4p), "b4p": bias(p["b4"], c4p),
        "w5p": mat(p["w5"], c4p, c5p), "b5p": bias(p["b5"], c5p),
        "wfck": wfck, "bfcp": bias(p["bfc"], edp),
    }


def encoder_forward(x_nchw, kp, cfg):
    n = x_nchw.shape[0]
    c1, ed = cfg["C1"], cfg["ED"]
    side = cfg["side"]
    h1 = 2 * side

    x = jnp.transpose(x_nchw, (0, 2, 3, 1)).astype(jnp.float32)   # NCHW -> NHWC

    # stage 1: conv1 (merged-tap im2col GEMM) + ReLU + BN1 partial stats.
    p1 = _im2col_s2(x, h1, h1).astype(jnp.bfloat16)               # (N, 256, 16*Cin)
    a1, st1 = _conv_stage(p1, kp["w1k"], kp["b1p"])
    scale1, shift1 = _bn_affine(st1, kp["g1"], kp["be1"],
                                count=float(n * h1 * h1))

    # BN1 affine folded into the (real-channel) conv2 im2col patch build.
    a1n = a1[..., :c1].astype(jnp.float32) * scale1 + shift1
    p2 = _im2col_s2(a1n.reshape(n, h1, h1, c1), side,
                    side).astype(jnp.bfloat16)                    # (N, 64, 16*C1)

    # stage 2: conv2 + ReLU + BN2 partial stats (K = 16*C1, MXU-friendly).
    a2, st2 = _conv_stage(p2, kp["w2k"], kp["b2p"])
    scale2, shift2 = _bn_affine(st2, kp["g2"], kp["be2"],
                                count=float(n * side * side))
    sc2 = _pad_axis_to(scale2, 0, cfg["C2P"]).reshape(1, cfg["C2P"])
    sh2 = _pad_axis_to(shift2, 0, cfg["C2P"]).reshape(1, cfg["C2P"])

    # stage 3: BN2 affine + conv3 + residual stack + conv4 + conv5 + fc1.
    out = _tail_stage(a2, sc2, sh2, kp, cfg)
    return out[:, 0, :ed]


if __name__ == "__main__":
    # Small, module-consistent shapes: 32x32 input so the post-downsample
    # spatial is 8x8 (required by the hard-coded view / fc1).
    batch, in_channels, H, W = 2, 3, 32, 32
    num_hiddens, num_residual_layers, num_residual_hiddens = 32, 2, 8
    embedding_dim = 16

    cfg = make_config(in_channels, num_hiddens, num_residual_layers,
                      num_residual_hiddens, embedding_dim, H)

    key = jax.random.PRNGKey(0)
    k_x, k_p = jax.random.split(key)
    x = jax.random.normal(k_x, (batch, in_channels, H, W), jnp.float32)
    params = init_canonical_params(k_p, in_channels, num_hiddens,
                                   num_residual_layers, num_residual_hiddens,
                                   embedding_dim)
    kparams = prepare_params(params, cfg)

    fwd = jax.jit(functools.partial(encoder_forward, cfg=cfg))
    out = fwd(x, kparams)
    out = jax.block_until_ready(out)
    assert out.shape == (batch, embedding_dim), out.shape
    print("KERNEL_OK")
</pallas_src>

<mosaic_0001>
module attributes {stable_mosaic.version = 11 : i64} {
  func.func @_conv_gemm_kernel(%arg0: i32, %arg1: memref<2x256x48xbf16, #tpu.memory_space<vmem>>, %arg2: memref<48x128xbf16, #tpu.memory_space<vmem>>, %arg3: memref<1x128xf32, #tpu.memory_space<vmem>>, %arg4: memref<2x256x128xbf16, #tpu.memory_space<vmem>>, %arg5: memref<1x2x128xf32, #tpu.memory_space<vmem>>) attributes {dimension_semantics = [#tpu.dimension_semantics<parallel>], iteration_bounds = array<i64: 1>, scalar_prefetch = 0 : i64, scratch_operands = 0 : i64, tpu.core_type = #tpu.core_type<tc>, window_params = [{transform_indices = @transform_0, window_bounds = array<i64: 2, 256, 48>}, {pipeline_mode = #tpu.pipeline_mode<synchronous>, transform_indices = @transform_1, window_bounds = array<i64: 48, 128>}, {pipeline_mode = #tpu.pipeline_mode<synchronous>, transform_indices = @transform_2, window_bounds = array<i64: 1, 128>}, {transform_indices = @transform_3, window_bounds = array<i64: 2, 256, 128>}, {transform_indices = @transform_4, window_bounds = array<i64: 1, 2, 128>}]} {
    %c0 = arith.constant 0 : index
    %c0_0 = arith.constant 0 : index
    %c0_1 = arith.constant 0 : index
    %0 = vector.load %arg1[%c0, %c0_0, %c0_1] : memref<2x256x48xbf16, #tpu.memory_space<vmem>>, vector<2x256x48xbf16>
    %1 = vector.shape_cast %0 : vector<2x256x48xbf16> to vector<512x48xbf16>
    %c0_2 = arith.constant 0 : index
    %c0_3 = arith.constant 0 : index
    %2 = vector.load %arg2[%c0_2, %c0_3] : memref<48x128xbf16, #tpu.memory_space<vmem>>, vector<48x128xbf16>
    %cst = arith.constant dense<0.000000e+00> : vector<512x128xf32>
    %3 = tpu.matmul %1, %2, %cst {dimension_numbers = #tpu.dot_dimension_numbers<[1], [0], [0], [1], [0, 0, 1, 1], [], []>} : vector<512x48xbf16>, vector<48x128xbf16>, vector<512x128xf32> -> vector<512x128xf32>
    %c0_4 = arith.constant 0 : index
    %c0_5 = arith.constant 0 : index
    %4 = vector.load %arg3[%c0_4, %c0_5] : memref<1x128xf32, #tpu.memory_space<vmem>>, vector<1x128xf32>
    %5 = vector.broadcast %4 : vector<1x128xf32> to vector<512x128xf32>
    %6 = arith.addf %3, %5 : vector<512x128xf32>
    %cst_6 = arith.constant 0.000000e+00 : f32
    %7 = vector.broadcast %cst_6 : f32 to vector<512x128xf32>
    %8 = arith.maximumf %6, %7 : vector<512x128xf32>
    %9 = vector.shape_cast %8 : vector<512x128xf32> to vector<2x256x128xf32>
    %10 = arith.truncf %9 : vector<2x256x128xf32> to vector<2x256x128xbf16>
    %c0_7 = arith.constant 0 : index
    %c0_8 = arith.constant 0 : index
    %c0_9 = arith.constant 0 : index
    %11 = vector.load %arg4[%c0_7, %c0_8, %c0_9] : memref<2x256x128xbf16, #tpu.memory_space<vmem>>, vector<2x256x128xbf16>
    tpu.vector_store %arg4[%c0_7, %c0_8, %c0_9], %10 {strides = array<i32>} : memref<2x256x128xbf16, #tpu.memory_space<vmem>>, vector<2x256x128xbf16>,
    %cst_10 = arith.constant dense<0.000000e+00> : vector<128xf32>
    %12 = vector.multi_reduction <add>, %8, %cst_10 [0] : vector<512x128xf32> to vector<128xf32>
    %13 = vector.shape_cast %12 : vector<128xf32> to vector<1x128xf32>
    %14 = arith.mulf %8, %8 : vector<512x128xf32>
    %cst_11 = arith.constant dense<0.000000e+00> : vector<128xf32>
    %15 = vector.multi_reduction <add>, %14, %cst_11 [0] : vector<512x128xf32> to vector<128xf32>
    %16 = vector.shape_cast %15 : vector<128xf32> to vector<1x128xf32>
    %17 = tpu.concatenate %13, %16 in 0 : vector<1x128xf32>, vector<1x128xf32> -> vector<2x128xf32>
    %c0_12 = arith.constant 0 : index
    %c0_13 = arith.constant 0 : index
    %c0_14 = arith.constant 0 : index
    %18 = vector.load %arg5[%c0_12, %c0_13, %c0_14] : memref<1x2x128xf32, #tpu.memory_space<vmem>>, vector<1x2x128xf32>
    %19 = vector.shape_cast %18 : vector<1x2x128xf32> to vector<2x128xf32>
    %20 = vector.shape_cast %17 : vector<2x128xf32> to vector<1x2x128xf32>
    tpu.vector_store %arg5[%c0_12, %c0_13, %c0_14], %20 {strides = array<i32>} : memref<1x2x128xf32, #tpu.memory_space<vmem>>, vector<1x2x128xf32>,
    return
  }
  func.func @transform_0(%arg0: i32) -> (i32, i32, i32) {
    %c0_i32 = arith.constant 0 : i32
    %c0_i32_0 = arith.constant 0 : i32
    %c0_i32_1 = arith.constant 0 : i32
    return %arg0, %c0_i32, %c0_i32_0 : i32, i32, i32
  }
  func.func @transform_1(%arg0: i32) -> (i32, i32) {
    %c0_i32 = arith.constant 0 : i32
    %c0_i32_0 = arith.constant 0 : i32
    %c0_i32_1 = arith.constant 0 : i32
    return %c0_i32, %c0_i32_0 : i32, i32
  }
  func.func @transform_2(%arg0: i32) -> (i32, i32) {
    %c0_i32 = arith.constant 0 : i32
    %c0_i32_0 = arith.constant 0 : i32
    %c0_i32_1 = arith.constant 0 : i32
    return %c0_i32, %c0_i32_0 : i32, i32
  }
  func.func @transform_3(%arg0: i32) -> (i32, i32, i32) {
    %c0_i32 = arith.constant 0 : i32
    %c0_i32_0 = arith.constant 0 : i32
    %c0_i32_1 = arith.constant 0 : i32
    return %arg0, %c0_i32, %c0_i32_0 : i32, i32, i32
  }
  func.func @transform_4(%arg0: i32) -> (i32, i32, i32) {
    %c0_i32 = arith.constant 0 : i32
    %c0_i32_0 = arith.constant 0 : i32
    %c0_i32_1 = arith.constant 0 : i32
    return %arg0, %c0_i32, %c0_i32_0 : i32, i32, i32
  }
}

module attributes {stable_mosaic.version = 11 : i64} {
  func.func @_conv_gemm_kernel(%arg0: i32, %arg1: memref<2x64x256xbf16, #tpu.memory_space<vmem>>, %arg2: memref<256x128xbf16, #tpu.memory_space<vmem>>, %arg3: memref<1x128xf32, #tpu.memory_space<vmem>>, %arg4: memref<2x64x128xbf16, #tpu.memory_space<vmem>>, %arg5: memref<1x2x128xf32, #tpu.memory_space<vmem>>) attributes {dimension_semantics = [#tpu.dimension_semantics<parallel>], iteration_bounds = array<i64: 1>, scalar_prefetch = 0 : i64, scratch_operands = 0 : i64, tpu.core_type = #tpu.core_type<tc>, window_params = [{transform_indices = @transform_0, window_bounds = array<i64: 2, 64, 256>}, {pipeline_mode = #tpu.pipeline_mode<synchronous>, transform_indices = @transform_1, window_bounds = array<i64: 256, 128>}, {pipeline_mode = #tpu.pipeline_mode<synchronous>, transform_indices = @transform_2, window_bounds = array<i64: 1, 128>}, {transform_indices = @transform_3, window_bounds = array<i64: 2, 64, 128>}, {transform_indices = @transform_4, window_bounds = array<i64: 1, 2, 128>}]} {
    %c0 = arith.constant 0 : index
    %c0_0 = arith.constant 0 : index
    %c0_1 = arith.constant 0 : index
    %0 = vector.load %arg1[%c0, %c0_0, %c0_1] : memref<2x64x256xbf16, #tpu.memory_space<vmem>>, vector<2x64x256xbf16>
    %1 = vector.shape_cast %0 : vector<2x64x256xbf16> to vector<128x256xbf16>
    %c0_2 = arith.constant 0 : index
    %c0_3 = arith.constant 0 : index
    %2 = vector.load %arg2[%c0_2, %c0_3] : memref<256x128xbf16, #tpu.memory_space<vmem>>, vector<256x128xbf16>
    %cst = arith.constant dense<0.000000e+00> : vector<128x128xf32>
    %3 = tpu.matmul %1, %2, %cst {dimension_numbers = #tpu.dot_dimension_numbers<[1], [0], [0], [1], [0, 0, 1, 1], [], []>} : vector<128x256xbf16>, vector<256x128xbf16>, vector<128x128xf32> -> vector<128x128xf32>
    %c0_4 = arith.constant 0 : index
    %c0_5 = arith.constant 0 : index
    %4 = vector.load %arg3[%c0_4, %c0_5] : memref<1x128xf32, #tpu.memory_space<vmem>>, vector<1x128xf32>
    %5 = vector.broadcast %4 : vector<1x128xf32> to vector<128x128xf32>
    %6 = arith.addf %3, %5 : vector<128x128xf32>
    %cst_6 = arith.constant 0.000000e+00 : f32
    %7 = vector.broadcast %cst_6 : f32 to vector<128x128xf32>
    %8 = arith.maximumf %6, %7 : vector<128x128xf32>
    %9 = vector.shape_cast %8 : vector<128x128xf32> to vector<2x64x128xf32>
    %10 = arith.truncf %9 : vector<2x64x128xf32> to vector<2x64x128xbf16>
    %c0_7 = arith.constant 0 : index
    %c0_8 = arith.constant 0 : index
    %c0_9 = arith.constant 0 : index
    %11 = vector.load %arg4[%c0_7, %c0_8, %c0_9] : memref<2x64x128xbf16, #tpu.memory_space<vmem>>, vector<2x64x128xbf16>
    tpu.vector_store %arg4[%c0_7, %c0_8, %c0_9], %10 {strides = array<i32>} : memref<2x64x128xbf16, #tpu.memory_space<vmem>>, vector<2x64x128xbf16>,
    %cst_10 = arith.constant dense<0.000000e+00> : vector<128xf32>
    %12 = vector.multi_reduction <add>, %8, %cst_10 [0] : vector<128x128xf32> to vector<128xf32>
    %13 = vector.shape_cast %12 : vector<128xf32> to vector<1x128xf32>
    %14 = arith.mulf %8, %8 : vector<128x128xf32>
    %cst_11 = arith.constant dense<0.000000e+00> : vector<128xf32>
    %15 = vector.multi_reduction <add>, %14, %cst_11 [0] : vector<128x128xf32> to vector<128xf32>
    %16 = vector.shape_cast %15 : vector<128xf32> to vector<1x128xf32>
    %17 = tpu.concatenate %13, %16 in 0 : vector<1x128xf32>, vector<1x128xf32> -> vector<2x128xf32>
    %c0_12 = arith.constant 0 : index
    %c0_13 = arith.constant 0 : index
    %c0_14 = arith.constant 0 : index
    %18 = vector.load %arg5[%c0_12, %c0_13, %c0_14] : memref<1x2x128xf32, #tpu.memory_space<vmem>>, vector<1x2x128xf32>
    %19 = vector.shape_cast %18 : vector<1x2x128xf32> to vector<2x128xf32>
    %20 = vector.shape_cast %17 : vector<2x128xf32> to vector<1x2x128xf32>
    tpu.vector_store %arg5[%c0_12, %c0_13, %c0_14], %20 {strides = array<i32>} : memref<1x2x128xf32, #tpu.memory_space<vmem>>, vector<1x2x128xf32>,
    return
  }
  func.func @transform_0(%arg0: i32) -> (i32, i32, i32) {
    %c0_i32 = arith.constant 0 : i32
    %c0_i32_0 = arith.constant 0 : i32
    %c0_i32_1 = arith.constant 0 : i32
    return %arg0, %c0_i32, %c0_i32_0 : i32, i32, i32
  }
  func.func @transform_1(%arg0: i32) -> (i32, i32) {
    %c0_i32 = arith.constant 0 : i32
    %c0_i32_0 = arith.constant 0 : i32
    %c0_i32_1 = arith.constant 0 : i32
    return %c0_i32, %c0_i32_0 : i32, i32
  }
  func.func @transform_2(%arg0: i32) -> (i32, i32) {
    %c0_i32 = arith.constant 0 : i32
    %c0_i32_0 = arith.constant 0 : i32
    %c0_i32_1 = arith.constant 0 : i32
    return %c0_i32, %c0_i32_0 : i32, i32
  }
  func.func @transform_3(%arg0: i32) -> (i32, i32, i32) {
    %c0_i32 = arith.constant 0 : i32
    %c0_i32_0 = arith.constant 0 : i32
    %c0_i32_1 = arith.constant 0 : i32
    return %arg0, %c0_i32, %c0_i32_0 : i32, i32, i32
  }
  func.func @transform_4(%arg0: i32) -> (i32, i32, i32) {
    %c0_i32 = arith.constant 0 : i32
    %c0_i32_0 = arith.constant 0 : i32
    %c0_i32_1 = arith.constant 0 : i32
    return %arg0, %c0_i32, %c0_i32_0 : i32, i32, i32
  }
}

module attributes {stable_mosaic.version = 11 : i64} {
  func.func @_tail_kernel(%arg0: i32, %arg1: memref<2x64x128xbf16, #tpu.memory_space<vmem>>, %arg2: memref<1x128xf32, #tpu.memory_space<vmem>>, %arg3: memref<1x128xf32, #tpu.memory_space<vmem>>, %arg4: memref<1152x128xbf16, #tpu.memory_space<vmem>>, %arg5: memref<1x128xf32, #tpu.memory_space<vmem>>, %arg6: memref<2x1152x128xbf16, #tpu.memory_space<vmem>>, %arg7: memref<2x128x128xbf16, #tpu.memory_space<vmem>>, %arg8: memref<128x128xbf16, #tpu.memory_space<vmem>>, %arg9: memref<1x128xf32, #tpu.memory_space<vmem>>, %arg10: memref<128x128xbf16, #tpu.memory_space<vmem>>, %arg11: memref<1x128xf32, #tpu.memory_space<vmem>>, %arg12: memref<128x128xbf16, #tpu.memory_space<vmem>>, %arg13: memref<1x128xf32, #tpu.memory_space<vmem>>, %arg14: memref<2x1x128xf32, #tpu.memory_space<vmem>>) attributes {dimension_semantics = [#tpu.dimension_semantics<parallel>], iteration_bounds = array<i64: 1>, scalar_prefetch = 0 : i64, scratch_operands = 0 : i64, tpu.core_type = #tpu.core_type<tc>, window_params = [{transform_indices = @transform_0, window_bounds = array<i64: 2, 64, 128>}, {pipeline_mode = #tpu.pipeline_mode<synchronous>, transform_indices = @transform_1, window_bounds = array<i64: 1, 128>}, {pipeline_mode = #tpu.pipeline_mode<synchronous>, transform_indices = @transform_2, window_bounds = array<i64: 1, 128>}, {pipeline_mode = #tpu.pipeline_mode<synchronous>, transform_indices = @transform_3, window_bounds = array<i64: 1152, 128>}, {pipeline_mode = #tpu.pipeline_mode<synchronous>, transform_indices = @transform_4, window_bounds = array<i64: 1, 128>}, {pipeline_mode = #tpu.pipeline_mode<synchronous>, transform_indices = @transform_5, window_bounds = array<i64: 2, 1152, 128>}, {pipeline_mode = #tpu.pipeline_mode<synchronous>, transform_indices = @transform_6, window_bounds = array<i64: 2, 128, 128>}, {pipeline_mode = #tpu.pipeline_mode<synchronous>, transform_indices = @transform_7, window_bounds = array<i64: 128, 128>}, {pipeline_mode = #tpu.pipeline_mode<synchronous>, transform_indices = @transform_8, window_bounds = array<i64: 1, 128>}, {pipeline_mode = #tpu.pipeline_mode<synchronous>, transform_indices = @transform_9, window_bounds = array<i64: 128, 128>}, {pipeline_mode = #tpu.pipeline_mode<synchronous>, transform_indices = @transform_10, window_bounds = array<i64: 1, 128>}, {pipeline_mode = #tpu.pipeline_mode<synchronous>, transform_indices = @transform_11, window_bounds = array<i64: 128, 128>}, {pipeline_mode = #tpu.pipeline_mode<synchronous>, transform_indices = @transform_12, window_bounds = array<i64: 1, 128>}, {transform_indices = @transform_13, window_bounds = array<i64: 2, 1, 128>}]} {
    %0 = tpu.iota {dimensions = array<i32: 1>} : vector<1x64x1xi32>
    %c8_i32 = arith.constant 8 : i32
    %c0_i32 = arith.constant 0 : i32
    %1 = arith.cmpi eq, %c8_i32, %c0_i32 : i32
    %c1_i32 = arith.constant 1 : i32
    %2 = arith.select %1, %c1_i32, %c8_i32 : i32
    %3 = vector.broadcast %2 : i32 to vector<1x64x1xi32>
    %4 = arith.remsi %0, %3 : vector<1x64x1xi32>
    %c0_i32_0 = arith.constant 0 : i32
    %5 = vector.broadcast %c0_i32_0 : i32 to vector<1x64x1xi32>
    %6 = arith.cmpi ne, %4, %5 : vector<1x64x1xi32>
    %c0_i32_1 = arith.constant 0 : i32
    %7 = vector.broadcast %c0_i32_1 : i32 to vector<1x64x1xi32>
    %8 = arith.cmpi slt, %4, %7 : vector<1x64x1xi32>
    %c0_i32_2 = arith.constant 0 : i32
    %9 = arith.cmpi slt, %2, %c0_i32_2 : i32
    %10 = vector.broadcast %9 : i1 to vector<1x64x1xi1>
    %11 = vector.broadcast %10 : vector<1x64x1xi1> to vector<1x64x1xi1>
    %12 = arith.xori %8, %11 : vector<1x64x1xi1>
    %13 = arith.andi %12, %6 : vector<1x64x1xi1>
    %14 = vector.broadcast %2 : i32 to vector<1x64x1xi32>
    %15 = arith.addi %4, %14 : vector<1x64x1xi32>
    %16 = arith.select %13, %15, %4 : vector<1x64x1xi1>, vector<1x64x1xi32>
    %c1_i32_3 = arith.constant 1 : i32
    %17 = vector.broadcast %c1_i32_3 : i32 to vector<1x64x1xi32>
    %18 = arith.cmpi sge, %16, %17 : vector<1x64x1xi32>
    %c7_i32 = arith.constant 7 : i32
    %19 = vector.broadcast %c7_i32 : i32 to vector<1x64x1xi32>
    %20 = arith.cmpi slt, %16, %19 : vector<1x64x1xi32>
    %c0 = arith.constant 0 : index
    %c0_4 = arith.constant 0 : index
    %c0_5 = arith.constant 0 : index
    %21 = vector.load %arg1[%c0, %c0_4, %c0_5] : memref<2x64x128xbf16, #tpu.memory_space<vmem>>, vector<2x64x128xbf16>
    %22 = arith.extf %21 : vector<2x64x128xbf16> to vector<2x64x128xf32>
    %c0_6 = arith.constant 0 : index
    %c0_7 = arith.constant 0 : index
    %23 = vector.load %arg2[%c0_6, %c0_7] : memref<1x128xf32, #tpu.memory_space<vmem>>, vector<1x128xf32>
    %24 = vector.shape_cast %23 : vector<1x128xf32> to vector<1x1x128xf32>
    %25 = vector.broadcast %24 : vector<1x1x128xf32> to vector<2x64x128xf32>
    %26 = arith.mulf %22, %25 : vector<2x64x128xf32>
    %c0_8 = arith.constant 0 : index
    %c0_9 = arith.constant 0 : index
    %27 = vector.load %arg3[%c0_8, %c0_9] : memref<1x128xf32, #tpu.memory_space<vmem>>, vector<1x128xf32>
    %28 = vector.shape_cast %27 : vector<1x128xf32> to vector<1x1x128xf32>
    %29 = vector.broadcast %28 : vector<1x1x128xf32> to vector<2x64x128xf32>
    %30 = arith.addf %26, %29 : vector<2x64x128xf32>
    %c0_10 = arith.constant 0 : index
    %c0_11 = arith.constant 0 : index
    %31 = vector.load %arg4[%c0_10, %c0_11] : memref<1152x128xbf16, #tpu.memory_space<vmem>>, vector<1152x128xbf16>
    %32 = arith.truncf %30 : vector<2x64x128xf32> to vector<2x64x128xbf16>
    %cst = arith.constant 0.000000e+00 : bf16
    %33 = vector.broadcast %cst : bf16 to vector<2x16x128xbf16>
    %34 = tpu.concatenate %33, %32, %33 in 1 : vector<2x16x128xbf16>, vector<2x64x128xbf16>, vector<2x16x128xbf16> -> vector<2x96x128xbf16>
    %35 = vector.extract_strided_slice %34 {offsets = [0, 7, 0], sizes = [2, 64, 128], strides = [1, 1, 1]} : vector<2x96x128xbf16> to vector<2x64x128xbf16>
    %cst_12 = arith.constant 0.000000e+00 : bf16
    %36 = vector.shape_cast %18 : vector<1x64x1xi1> to vector<1x64x1xi1>
    %37 = vector.broadcast %36 : vector<1x64x1xi1> to vector<2x64x128xi1>
    %38 = vector.broadcast %cst_12 : bf16 to vector<2x64x128xbf16>
    %39 = arith.select %37, %35, %38 : vector<2x64x128xi1>, vector<2x64x128xbf16>
    %40 = vector.extract_strided_slice %34 {offsets = [0, 8, 0], sizes = [2, 64, 128], strides = [1, 1, 1]} : vector<2x96x128xbf16> to vector<2x64x128xbf16>
    %41 = vector.extract_strided_slice %34 {offsets = [0, 9, 0], sizes = [2, 64, 128], strides = [1, 1, 1]} : vector<2x96x128xbf16> to vector<2x64x128xbf16>
    %cst_13 = arith.constant 0.000000e+00 : bf16
    %42 = vector.shape_cast %20 : vector<1x64x1xi1> to vector<1x64x1xi1>
    %43 = vector.broadcast %42 : vector<1x64x1xi1> to vector<2x64x128xi1>
    %44 = vector.broadcast %cst_13 : bf16 to vector<2x64x128xbf16>
    %45 = arith.select %43, %41, %44 : vector<2x64x128xi1>, vector<2x64x128xbf16>
    %46 = vector.extract_strided_slice %34 {offsets = [0, 15, 0], sizes = [2, 64, 128], strides = [1, 1, 1]} : vector<2x96x128xbf16> to vector<2x64x128xbf16>
    %cst_14 = arith.constant 0.000000e+00 : bf16
    %47 = vector.shape_cast %18 : vector<1x64x1xi1> to vector<1x64x1xi1>
    %48 = vector.broadcast %47 : vector<1x64x1xi1> to vector<2x64x128xi1>
    %49 = vector.broadcast %cst_14 : bf16 to vector<2x64x128xbf16>
    %50 = arith.select %48, %46, %49 : vector<2x64x128xi1>, vector<2x64x128xbf16>
    %51 = vector.extract_strided_slice %34 {offsets = [0, 16, 0], sizes = [2, 64, 128], strides = [1, 1, 1]} : vector<2x96x128xbf16> to vector<2x64x128xbf16>
    %52 = vector.extract_strided_slice %34 {offsets = [0, 17, 0], sizes = [2, 64, 128], strides = [1, 1, 1]} : vector<2x96x128xbf16> to vector<2x64x128xbf16>
    %cst_15 = arith.constant 0.000000e+00 : bf16
    %53 = vector.shape_cast %20 : vector<1x64x1xi1> to vector<1x64x1xi1>
    %54 = vector.broadcast %53 : vector<1x64x1xi1> to vector<2x64x128xi1>
    %55 = vector.broadcast %cst_15 : bf16 to vector<2x64x128xbf16>
    %56 = arith.select %54, %52, %55 : vector<2x64x128xi1>, vector<2x64x128xbf16>
    %57 = vector.extract_strided_slice %34 {offsets = [0, 23, 0], sizes = [2, 64, 128], strides = [1, 1, 1]} : vector<2x96x128xbf16> to vector<2x64x128xbf16>
    %cst_16 = arith.constant 0.000000e+00 : bf16
    %58 = vector.shape_cast %18 : vector<1x64x1xi1> to vector<1x64x1xi1>
    %59 = vector.broadcast %58 : vector<1x64x1xi1> to vector<2x64x128xi1>
    %60 = vector.broadcast %cst_16 : bf16 to vector<2x64x128xbf16>
    %61 = arith.select %59, %57, %60 : vector<2x64x128xi1>, vector<2x64x128xbf16>
    %62 = vector.extract_strided_slice %34 {offsets = [0, 24, 0], sizes = [2, 64, 128], strides = [1, 1, 1]} : vector<2x96x128xbf16> to vector<2x64x128xbf16>
    %63 = vector.extract_strided_slice %34 {offsets = [0, 25, 0], sizes = [2, 64, 128], strides = [1, 1, 1]} : vector<2x96x128xbf16> to vector<2x64x128xbf16>
    %cst_17 = arith.constant 0.000000e+00 : bf16
    %64 = vector.shape_cast %20 : vector<1x64x1xi1> to vector<1x64x1xi1>
    %65 = vector.broadcast %64 : vector<1x64x1xi1> to vector<2x64x128xi1>
    %66 = vector.broadcast %cst_17 : bf16 to vector<2x64x128xbf16>
    %67 = arith.select %65, %63, %66 : vector<2x64x128xi1>, vector<2x64x128xbf16>
    %68 = tpu.concatenate %39, %40, %45, %50, %51, %56, %61, %62, %67 in 2 : vector<2x64x128xbf16>, vector<2x64x128xbf16>, vector<2x64x128xbf16>, vector<2x64x128xbf16>, vector<2x64x128xbf16>, vector<2x64x128xbf16>, vector<2x64x128xbf16>, vector<2x64x128xbf16>, vector<2x64x128xbf16> -> vector<2x64x1152xbf16>
    %69 = vector.shape_cast %68 : vector<2x64x1152xbf16> to vector<128x1152xbf16>
    %cst_18 = arith.constant dense<0.000000e+00> : vector<128x128xf32>
    %70 = tpu.matmul %69, %31, %cst_18 {dimension_numbers = #tpu.dot_dimension_numbers<[1], [0], [0], [1], [0, 0, 1, 1], [], []>} : vector<128x1152xbf16>, vector<1152x128xbf16>, vector<128x128xf32> -> vector<128x128xf32>
    %c0_19 = arith.constant 0 : index
    %c0_20 = arith.constant 0 : index
    %71 = vector.load %arg5[%c0_19, %c0_20] : memref<1x128xf32, #tpu.memory_space<vmem>>, vector<1x128xf32>
    %72 = vector.broadcast %71 : vector<1x128xf32> to vector<128x128xf32>
    %73 = arith.addf %70, %72 : vector<128x128xf32>
    %cst_21 = arith.constant 0.000000e+00 : f32
    %74 = vector.broadcast %cst_21 : f32 to vector<128x128xf32>
    %75 = arith.maximumf %73, %74 : vector<128x128xf32>
    %76 = vector.shape_cast %75 : vector<128x128xf32> to vector<2x64x128xf32>
    %c0_22 = arith.constant 0 : index
    %c0_23 = arith.constant 0 : index
    %c0_24 = arith.constant 0 : index
    %77 = vector.load %arg6[%c0_22, %c0_23, %c0_24] : memref<2x1152x128xbf16, #tpu.memory_space<vmem>>, vector<1x1152x128xbf16>
    %78 = vector.shape_cast %77 : vector<1x1152x128xbf16> to vector<1152x128xbf16>
    %79 = arith.truncf %76 : vector<2x64x128xf32> to vector<2x64x128xbf16>
    %cst_25 = arith.constant 0.000000e+00 : bf16
    %80 = vector.broadcast %cst_25 : bf16 to vector<2x16x128xbf16>
    %81 = tpu.concatenate %80, %79, %80 in 1 : vector<2x16x128xbf16>, vector<2x64x128xbf16>, vector<2x16x128xbf16> -> vector<2x96x128xbf16>
    %82 = vector.extract_strided_slice %81 {offsets = [0, 7, 0], sizes = [2, 64, 128], strides = [1, 1, 1]} : vector<2x96x128xbf16> to vector<2x64x128xbf16>
    %cst_26 = arith.constant 0.000000e+00 : bf16
    %83 = vector.shape_cast %18 : vector<1x64x1xi1> to vector<1x64x1xi1>
    %84 = vector.broadcast %83 : vector<1x64x1xi1> to vector<2x64x128xi1>
    %85 = vector.broadcast %cst_26 : bf16 to vector<2x64x128xbf16>
    %86 = arith.select %84, %82, %85 : vector<2x64x128xi1>, vector<2x64x128xbf16>
    %87 = vector.extract_strided_slice %81 {offsets = [0, 8, 0], sizes = [2, 64, 128], strides = [1, 1, 1]} : vector<2x96x128xbf16> to vector<2x64x128xbf16>
    %88 = vector.extract_strided_slice %81 {offsets = [0, 9, 0], sizes = [2, 64, 128], strides = [1, 1, 1]} : vector<2x96x128xbf16> to vector<2x64x128xbf16>
    %cst_27 = arith.constant 0.000000e+00 : bf16
    %89 = vector.shape_cast %20 : vector<1x64x1xi1> to vector<1x64x1xi1>
    %90 = vector.broadcast %89 : vector<1x64x1xi1> to vector<2x64x128xi1>
    %91 = vector.broadcast %cst_27 : bf16 to vector<2x64x128xbf16>
    %92 = arith.select %90, %88, %91 : vector<2x64x128xi1>, vector<2x64x128xbf16>
    %93 = vector.extract_strided_slice %81 {offsets = [0, 15, 0], sizes = [2, 64, 128], strides = [1, 1, 1]} : vector<2x96x128xbf16> to vector<2x64x128xbf16>
    %cst_28 = arith.constant 0.000000e+00 : bf16
    %94 = vector.shape_cast %18 : vector<1x64x1xi1> to vector<1x64x1xi1>
    %95 = vector.broadcast %94 : vector<1x64x1xi1> to vector<2x64x128xi1>
    %96 = vector.broadcast %cst_28 : bf16 to vector<2x64x128xbf16>
    %97 = arith.select %95, %93, %96 : vector<2x64x128xi1>, vector<2x64x128xbf16>
    %98 = vector.extract_strided_slice %81 {offsets = [0, 16, 0], sizes = [2, 64, 128], strides = [1, 1, 1]} : vector<2x96x128xbf16> to vector<2x64x128xbf16>
    %99 = vector.extract_strided_slice %81 {offsets = [0, 17, 0], sizes = [2, 64, 128], strides = [1, 1, 1]} : vector<2x96x128xbf16> to vector<2x64x128xbf16>
    %cst_29 = arith.constant 0.000000e+00 : bf16
    %100 = vector.shape_cast %20 : vector<1x64x1xi1> to vector<1x64x1xi1>
    %101 = vector.broadcast %100 : vector<1x64x1xi1> to vector<2x64x128xi1>
    %102 = vector.broadcast %cst_29 : bf16 to vector<2x64x128xbf16>
    %103 = arith.select %101, %99, %102 : vector<2x64x128xi1>, vector<2x64x128xbf16>
    %104 = vector.extract_strided_slice %81 {offsets = [0, 23, 0], sizes = [2, 64, 128], strides = [1, 1, 1]} : vector<2x96x128xbf16> to vector<2x64x128xbf16>
    %cst_30 = arith.constant 0.000000e+00 : bf16
    %105 = vector.shape_cast %18 : vector<1x64x1xi1> to vector<1x64x1xi1>
    %106 = vector.broadcast %105 : vector<1x64x1xi1> to vector<2x64x128xi1>
    %107 = vector.broadcast %cst_30 : bf16 to vector<2x64x128xbf16>
    %108 = arith.select %106, %104, %107 : vector<2x64x128xi1>, vector<2x64x128xbf16>
    %109 = vector.extract_strided_slice %81 {offsets = [0, 24, 0], sizes = [2, 64, 128], strides = [1, 1, 1]} : vector<2x96x128xbf16> to vector<2x64x128xbf16>
    %110 = vector.extract_strided_slice %81 {offsets = [0, 25, 0], sizes = [2, 64, 128], strides = [1, 1, 1]} : vector<2x96x128xbf16> to vector<2x64x128xbf16>
    %cst_31 = arith.constant 0.000000e+00 : bf16
    %111 = vector.shape_cast %20 : vector<1x64x1xi1> to vector<1x64x1xi1>
    %112 = vector.broadcast %111 : vector<1x64x1xi1> to vector<2x64x128xi1>
    %113 = vector.broadcast %cst_31 : bf16 to vector<2x64x128xbf16>
    %114 = arith.select %112, %110, %113 : vector<2x64x128xi1>, vector<2x64x128xbf16>
    %115 = tpu.concatenate %86, %87, %92, %97, %98, %103, %108, %109, %114 in 2 : vector<2x64x128xbf16>, vector<2x64x128xbf16>, vector<2x64x128xbf16>, vector<2x64x128xbf16>, vector<2x64x128xbf16>, vector<2x64x128xbf16>, vector<2x64x128xbf16>, vector<2x64x128xbf16>, vector<2x64x128xbf16> -> vector<2x64x1152xbf16>
    %116 = vector.shape_cast %115 : vector<2x64x1152xbf16> to vector<128x1152xbf16>
    %cst_32 = arith.constant dense<0.000000e+00> : vector<128x128xf32>
    %117 = tpu.matmul %116, %78, %cst_32 {dimension_numbers = #tpu.dot_dimension_numbers<[1], [0], [0], [1], [0, 0, 1, 1], [], []>} : vector<128x1152xbf16>, vector<1152x128xbf16>, vector<128x128xf32> -> vector<128x128xf32>
    %cst_33 = arith.constant 0.000000e+00 : f32
    %118 = vector.broadcast %cst_33 : f32 to vector<128x128xf32>
    %119 = arith.maximumf %117, %118 : vector<128x128xf32>
    %120 = arith.truncf %119 : vector<128x128xf32> to vector<128x128xbf16>
    %c0_34 = arith.constant 0 : index
    %c0_35 = arith.constant 0 : index
    %c0_36 = arith.constant 0 : index
    %121 = vector.load %arg7[%c0_34, %c0_35, %c0_36] : memref<2x128x128xbf16, #tpu.memory_space<vmem>>, vector<1x128x128xbf16>
    %122 = vector.shape_cast %121 : vector<1x128x128xbf16> to vector<128x128xbf16>
    %cst_37 = arith.constant dense<0.000000e+00> : vector<128x128xf32>
    %123 = tpu.matmul %120, %122, %cst_37 {dimension_numbers = #tpu.dot_dimension_numbers<[1], [0], [0], [1], [0, 0, 1, 1], [], []>} : vector<128x128xbf16>, vector<128x128xbf16>, vector<128x128xf32> -> vector<128x128xf32>
    %124 = arith.addf %73, %123 : vector<128x128xf32>
    %cst_38 = arith.constant 0.000000e+00 : f32
    %125 = vector.broadcast %cst_38 : f32 to vector<128x128xf32>
    %126 = arith.maximumf %124, %125 : vector<128x128xf32>
    %127 = vector.shape_cast %126 : vector<128x128xf32> to vector<2x64x128xf32>
    %c1 = arith.constant 1 : index
    %c0_39 = arith.constant 0 : index
    %c0_40 = arith.constant 0 : index
    %128 = vector.load %arg6[%c1, %c0_39, %c0_40] : memref<2x1152x128xbf16, #tpu.memory_space<vmem>>, vector<1x1152x128xbf16>
    %129 = vector.shape_cast %128 : vector<1x1152x128xbf16> to vector<1152x128xbf16>
    %130 = arith.truncf %127 : vector<2x64x128xf32> to vector<2x64x128xbf16>
    %cst_41 = arith.constant 0.000000e+00 : bf16
    %131 = vector.broadcast %cst_41 : bf16 to vector<2x16x128xbf16>
    %132 = tpu.concatenate %131, %130, %131 in 1 : vector<2x16x128xbf16>, vector<2x64x128xbf16>, vector<2x16x128xbf16> -> vector<2x96x128xbf16>
    %133 = vector.extract_strided_slice %132 {offsets = [0, 7, 0], sizes = [2, 64, 128], strides = [1, 1, 1]} : vector<2x96x128xbf16> to vector<2x64x128xbf16>
    %cst_42 = arith.constant 0.000000e+00 : bf16
    %134 = vector.shape_cast %18 : vector<1x64x1xi1> to vector<1x64x1xi1>
    %135 = vector.broadcast %134 : vector<1x64x1xi1> to vector<2x64x128xi1>
    %136 = vector.broadcast %cst_42 : bf16 to vector<2x64x128xbf16>
    %137 = arith.select %135, %133, %136 : vector<2x64x128xi1>, vector<2x64x128xbf16>
    %138 = vector.extract_strided_slice %132 {offsets = [0, 8, 0], sizes = [2, 64, 128], strides = [1, 1, 1]} : vector<2x96x128xbf16> to vector<2x64x128xbf16>
    %139 = vector.extract_strided_slice %132 {offsets = [0, 9, 0], sizes = [2, 64, 128], strides = [1, 1, 1]} : vector<2x96x128xbf16> to vector<2x64x128xbf16>
    %cst_43 = arith.constant 0.000000e+00 : bf16
    %140 = vector.shape_cast %20 : vector<1x64x1xi1> to vector<1x64x1xi1>
    %141 = vector.broadcast %140 : vector<1x64x1xi1> to vector<2x64x128xi1>
    %142 = vector.broadcast %cst_43 : bf16 to vector<2x64x128xbf16>
    %143 = arith.select %141, %139, %142 : vector<2x64x128xi1>, vector<2x64x128xbf16>
    %144 = vector.extract_strided_slice %132 {offsets = [0, 15, 0], sizes = [2, 64, 128], strides = [1, 1, 1]} : vector<2x96x128xbf16> to vector<2x64x128xbf16>
    %cst_44 = arith.constant 0.000000e+00 : bf16
    %145 = vector.shape_cast %18 : vector<1x64x1xi1> to vector<1x64x1xi1>
    %146 = vector.broadcast %145 : vector<1x64x1xi1> to vector<2x64x128xi1>
    %147 = vector.broadcast %cst_44 : bf16 to vector<2x64x128xbf16>
    %148 = arith.select %146, %144, %147 : vector<2x64x128xi1>, vector<2x64x128xbf16>
    %149 = vector.extract_strided_slice %132 {offsets = [0, 16, 0], sizes = [2, 64, 128], strides = [1, 1, 1]} : vector<2x96x128xbf16> to vector<2x64x128xbf16>
    %150 = vector.extract_strided_slice %132 {offsets = [0, 17, 0], sizes = [2, 64, 128], strides = [1, 1, 1]} : vector<2x96x128xbf16> to vector<2x64x128xbf16>
    %cst_45 = arith.constant 0.000000e+00 : bf16
    %151 = vector.shape_cast %20 : vector<1x64x1xi1> to vector<1x64x1xi1>
    %152 = vector.broadcast %151 : vector<1x64x1xi1> to vector<2x64x128xi1>
    %153 = vector.broadcast %cst_45 : bf16 to vector<2x64x128xbf16>
    %154 = arith.select %152, %150, %153 : vector<2x64x128xi1>, vector<2x64x128xbf16>
    %155 = vector.extract_strided_slice %132 {offsets = [0, 23, 0], sizes = [2, 64, 128], strides = [1, 1, 1]} : vector<2x96x128xbf16> to vector<2x64x128xbf16>
    %cst_46 = arith.constant 0.000000e+00 : bf16
    %156 = vector.shape_cast %18 : vector<1x64x1xi1> to vector<1x64x1xi1>
    %157 = vector.broadcast %156 : vector<1x64x1xi1> to vector<2x64x128xi1>
    %158 = vector.broadcast %cst_46 : bf16 to vector<2x64x128xbf16>
    %159 = arith.select %157, %155, %158 : vector<2x64x128xi1>, vector<2x64x128xbf16>
    %160 = vector.extract_strided_slice %132 {offsets = [0, 24, 0], sizes = [2, 64, 128], strides = [1, 1, 1]} : vector<2x96x128xbf16> to vector<2x64x128xbf16>
    %161 = vector.extract_strided_slice %132 {offsets = [0, 25, 0], sizes = [2, 64, 128], strides = [1, 1, 1]} : vector<2x96x128xbf16> to vector<2x64x128xbf16>
    %cst_47 = arith.constant 0.000000e+00 : bf16
    %162 = vector.shape_cast %20 : vector<1x64x1xi1> to vector<1x64x1xi1>
    %163 = vector.broadcast %162 : vector<1x64x1xi1> to vector<2x64x128xi1>
    %164 = vector.broadcast %cst_47 : bf16 to vector<2x64x128xbf16>
    %165 = arith.select %163, %161, %164 : vector<2x64x128xi1>, vector<2x64x128xbf16>
    %166 = tpu.concatenate %137, %138, %143, %148, %149, %154, %159, %160, %165 in 2 : vector<2x64x128xbf16>, vector<2x64x128xbf16>, vector<2x64x128xbf16>, vector<2x64x128xbf16>, vector<2x64x128xbf16>, vector<2x64x128xbf16>, vector<2x64x128xbf16>, vector<2x64x128xbf16>, vector<2x64x128xbf16> -> vector<2x64x1152xbf16>
    %167 = vector.shape_cast %166 : vector<2x64x1152xbf16> to vector<128x1152xbf16>
    %cst_48 = arith.constant dense<0.000000e+00> : vector<128x128xf32>
    %168 = tpu.matmul %167, %129, %cst_48 {dimension_numbers = #tpu.dot_dimension_numbers<[1], [0], [0], [1], [0, 0, 1, 1], [], []>} : vector<128x1152xbf16>, vector<1152x128xbf16>, vector<128x128xf32> -> vector<128x128xf32>
    %cst_49 = arith.constant 0.000000e+00 : f32
    %169 = vector.broadcast %cst_49 : f32 to vector<128x128xf32>
    %170 = arith.maximumf %168, %169 : vector<128x128xf32>
    %171 = arith.truncf %170 : vector<128x128xf32> to vector<128x128xbf16>
    %c1_50 = arith.constant 1 : index
    %c0_51 = arith.constant 0 : index
    %c0_52 = arith.constant 0 : index
    %172 = vector.load %arg7[%c1_50, %c0_51, %c0_52] : memref<2x128x128xbf16, #tpu.memory_space<vmem>>, vector<1x128x128xbf16>
    %173 = vector.shape_cast %172 : vector<1x128x128xbf16> to vector<128x128xbf16>
    %cst_53 = arith.constant dense<0.000000e+00> : vector<128x128xf32>
    %174 = tpu.matmul %171, %173, %cst_53 {dimension_numbers = #tpu.dot_dimension_numbers<[1], [0], [0], [1], [0, 0, 1, 1], [], []>} : vector<128x128xbf16>, vector<128x128xbf16>, vector<128x128xf32> -> vector<128x128xf32>
    %175 = arith.addf %124, %174 : vector<128x128xf32>
    %cst_54 = arith.constant 0.000000e+00 : f32
    %176 = vector.broadcast %cst_54 : f32 to vector<128x128xf32>
    %177 = arith.maximumf %175, %176 : vector<128x128xf32>
    %178 = arith.truncf %177 : vector<128x128xf32> to vector<128x128xbf16>
    %c0_55 = arith.constant 0 : index
    %c0_56 = arith.constant 0 : index
    %179 = vector.load %arg8[%c0_55, %c0_56] : memref<128x128xbf16, #tpu.memory_space<vmem>>, vector<128x128xbf16>
    %cst_57 = arith.constant dense<0.000000e+00> : vector<128x128xf32>
    %180 = tpu.matmul %178, %179, %cst_57 {dimension_numbers = #tpu.dot_dimension_numbers<[1], [0], [0], [1], [0, 0, 1, 1], [], []>} : vector<128x128xbf16>, vector<128x128xbf16>, vector<128x128xf32> -> vector<128x128xf32>
    %c0_58 = arith.constant 0 : index
    %c0_59 = arith.constant 0 : index
    %181 = vector.load %arg9[%c0_58, %c0_59] : memref<1x128xf32, #tpu.memory_space<vmem>>, vector<1x128xf32>
    %182 = vector.broadcast %181 : vector<1x128xf32> to vector<128x128xf32>
    %183 = arith.addf %180, %182 : vector<128x128xf32>
    %cst_60 = arith.constant 0.000000e+00 : f32
    %184 = vector.broadcast %cst_60 : f32 to vector<128x128xf32>
    %185 = arith.maximumf %183, %184 : vector<128x128xf32>
    %186 = arith.truncf %185 : vector<128x128xf32> to vector<128x128xbf16>
    %c0_61 = arith.constant 0 : index
    %c0_62 = arith.constant 0 : index
    %187 = vector.load %arg10[%c0_61, %c0_62] : memref<128x128xbf16, #tpu.memory_space<vmem>>, vector<128x128xbf16>
    %cst_63 = arith.constant dense<0.000000e+00> : vector<128x128xf32>
    %188 = tpu.matmul %186, %187, %cst_63 {dimension_numbers = #tpu.dot_dimension_numbers<[1], [0], [0], [1], [0, 0, 1, 1], [], []>} : vector<128x128xbf16>, vector<128x128xbf16>, vector<128x128xf32> -> vector<128x128xf32>
    %c0_64 = arith.constant 0 : index
    %c0_65 = arith.constant 0 : index
    %189 = vector.load %arg11[%c0_64, %c0_65] : memref<1x128xf32, #tpu.memory_space<vmem>>, vector<1x128xf32>
    %190 = vector.broadcast %189 : vector<1x128xf32> to vector<128x128xf32>
    %191 = arith.addf %188, %190 : vector<128x128xf32>
    %cst_66 = arith.constant 0.000000e+00 : f32
    %192 = vector.broadcast %cst_66 : f32 to vector<128x128xf32>
    %193 = arith.maximumf %191, %192 : vector<128x128xf32>
    %194 = vector.extract_strided_slice %193 {offsets = [0, 0], sizes = [64, 128], strides = [1, 1]} : vector<128x128xf32> to vector<64x128xf32>
    %195 = tpu.transpose %194, [1, 0] : vector<64x128xf32> -> vector<128x64xf32>
    %196 = vector.extract_strided_slice %195 {offsets = [0, 0], sizes = [1, 64], strides = [1, 1]} : vector<128x64xf32> to vector<1x64xf32>
    %197 = vector.extract_strided_slice %195 {offsets = [1, 0], sizes = [1, 64], strides = [1, 1]} : vector<128x64xf32> to vector<1x64xf32>
    %198 = tpu.concatenate %196, %197 in 1 : vector<1x64xf32>, vector<1x64xf32> -> vector<1x128xf32>
    %199 = vector.extract_strided_slice %193 {offsets = [64, 0], sizes = [64, 128], strides = [1, 1]} : vector<128x128xf32> to vector<64x128xf32>
    %200 = tpu.transpose %199, [1, 0] : vector<64x128xf32> -> vector<128x64xf32>
    %201 = vector.extract_strided_slice %200 {offsets = [0, 0], sizes = [1, 64], strides = [1, 1]} : vector<128x64xf32> to vector<1x64xf32>
    %202 = vector.extract_strided_slice %200 {offsets = [1, 0], sizes = [1, 64], strides = [1, 1]} : vector<128x64xf32> to vector<1x64xf32>
    %203 = tpu.concatenate %201, %202 in 1 : vector<1x64xf32>, vector<1x64xf32> -> vector<1x128xf32>
    %204 = tpu.concatenate %198, %203 in 0 : vector<1x128xf32>, vector<1x128xf32> -> vector<2x128xf32>
    %205 = arith.truncf %204 : vector<2x128xf32> to vector<2x128xbf16>
    %c0_67 = arith.constant 0 : index
    %c0_68 = arith.constant 0 : index
    %206 = vector.load %arg12[%c0_67, %c0_68] : memref<128x128xbf16, #tpu.memory_space<vmem>>, vector<128x128xbf16>
    %cst_69 = arith.constant dense<0.000000e+00> : vector<2x128xf32>
    %207 = tpu.matmul %205, %206, %cst_69 {dimension_numbers = #tpu.dot_dimension_numbers<[1], [0], [0], [1], [0, 0, 1, 1], [], []>} : vector<2x128xbf16>, vector<128x128xbf16>, vector<2x128xf32> -> vector<2x128xf32>
    %c0_70 = arith.constant 0 : index
    %c0_71 = arith.constant 0 : index
    %208 = vector.load %arg13[%c0_70, %c0_71] : memref<1x128xf32, #tpu.memory_space<vmem>>, vector<1x128xf32>
    %209 = vector.broadcast %208 : vector<1x128xf32> to vector<2x128xf32>
    %210 = arith.addf %207, %209 : vector<2x128xf32>
    %c0_72 = arith.constant 0 : index
    %c0_73 = arith.constant 0 : index
    %c0_74 = arith.constant 0 : index
    %211 = vector.load %arg14[%c0_72, %c0_73, %c0_74] : memref<2x1x128xf32, #tpu.memory_space<vmem>>, vector<2x1x128xf32>
    %212 = vector.shape_cast %211 : vector<2x1x128xf32> to vector<2x128xf32>
    %213 = vector.shape_cast %210 : vector<2x128xf32> to vector<2x1x128xf32>
    tpu.vector_store %arg14[%c0_72, %c0_73, %c0_74], %213 {strides = array<i32>} : memref<2x1x128xf32, #tpu.memory_space<vmem>>, vector<2x1x128xf32>,
    return
  }
  func.func @transform_0(%arg0: i32) -> (i32, i32, i32) {
    %c0_i32 = arith.constant 0 : i32
    %c0_i32_0 = arith.constant 0 : i32
    %c0_i32_1 = arith.constant 0 : i32
    return %arg0, %c0_i32, %c0_i32_0 : i32, i32, i32
  }
  func.func @transform_1(%arg0: i32) -> (i32, i32) {
    %c0_i32 = arith.constant 0 : i32
    %c0_i32_0 = arith.constant 0 : i32
    %c0_i32_1 = arith.constant 0 : i32
    return %c0_i32, %c0_i32_0 : i32, i32
  }
  func.func @transform_2(%arg0: i32) -> (i32, i32) {
    %c0_i32 = arith.constant 0 : i32
    %c0_i32_0 = arith.constant 0 : i32
    %c0_i32_1 = arith.constant 0 : i32
    return %c0_i32, %c0_i32_0 : i32, i32
  }
  func.func @transform_3(%arg0: i32) -> (i32, i32) {
    %c0_i32 = arith.constant 0 : i32
    %c0_i32_0 = arith.constant 0 : i32
    %c0_i32_1 = arith.constant 0 : i32
    return %c0_i32, %c0_i32_0 : i32, i32
  }
  func.func @transform_4(%arg0: i32) -> (i32, i32) {
    %c0_i32 = arith.constant 0 : i32
    %c0_i32_0 = arith.constant 0 : i32
    %c0_i32_1 = arith.constant 0 : i32
    return %c0_i32, %c0_i32_0 : i32, i32
  }
  func.func @transform_5(%arg0: i32) -> (i32, i32, i32) {
    %c0_i32 = arith.constant 0 : i32
    %c0_i32_0 = arith.constant 0 : i32
    %c0_i32_1 = arith.constant 0 : i32
    %c0_i32_2 = arith.constant 0 : i32
    return %c0_i32, %c0_i32_0, %c0_i32_1 : i32, i32, i32
  }
  func.func @transform_6(%arg0: i32) -> (i32, i32, i32) {
    %c0_i32 = arith.constant 0 : i32
    %c0_i32_0 = arith.constant 0 : i32
    %c0_i32_1 = arith.constant 0 : i32
    %c0_i32_2 = arith.constant 0 : i32
    return %c0_i32, %c0_i32_0, %c0_i32_1 : i32, i32, i32
  }
  func.func @transform_7(%arg0: i32) -> (i32, i32) {
    %c0_i32 = arith.constant 0 : i32
    %c0_i32_0 = arith.constant 0 : i32
    %c0_i32_1 = arith.constant 0 : i32
    return %c0_i32, %c0_i32_0 : i32, i32
  }
  func.func @transform_8(%arg0: i32) -> (i32, i32) {
    %c0_i32 = arith.constant 0 : i32
    %c0_i32_0 = arith.constant 0 : i32
    %c0_i32_1 = arith.constant 0 : i32
    return %c0_i32, %c0_i32_0 : i32, i32
  }
  func.func @transform_9(%arg0: i32) -> (i32, i32) {
    %c0_i32 = arith.constant 0 : i32
    %c0_i32_0 = arith.constant 0 : i32
    %c0_i32_1 = arith.constant 0 : i32
    return %c0_i32, %c0_i32_0 : i32, i32
  }
  func.func @transform_10(%arg0: i32) -> (i32, i32) {
    %c0_i32 = arith.constant 0 : i32
    %c0_i32_0 = arith.constant 0 : i32
    %c0_i32_1 = arith.constant 0 : i32
    return %c0_i32, %c0_i32_0 : i32, i32
  }
  func.func @transform_11(%arg0: i32) -> (i32, i32) {
    %c0_i32 = arith.constant 0 : i32
    %c0_i32_0 = arith.constant 0 : i32
    %c0_i32_1 = arith.constant 0 : i32
    return %c0_i32, %c0_i32_0 : i32, i32
  }
  func.func @transform_12(%arg0: i32) -> (i32, i32) {
    %c0_i32 = arith.constant 0 : i32
    %c0_i32_0 = arith.constant 0 : i32
    %c0_i32_1 = arith.constant 0 : i32
    return %c0_i32, %c0_i32_0 : i32, i32
  }
  func.func @transform_13(%arg0: i32) -> (i32, i32, i32) {
    %c0_i32 = arith.constant 0 : i32
    %c0_i32_0 = arith.constant 0 : i32
    %c0_i32_1 = arith.constant 0 : i32
    return %arg0, %c0_i32, %c0_i32_0 : i32, i32, i32
  }
}

</mosaic_0001>

<bundles_post_ra>
// kernel: encoder_forward.3
= control target key start
LH: loop header
LB: loop body
LE: loop exit
PB: predicated region body
PF: predicated region fallthrough
CT: control target
= control target key end

     0   :  { %vm272_vm0 = vcmask 392192   ;;  %vm1244_vm1 = vcmask 1040384   ;;  %s2346_s1 = inlined_call_operand.vmem [shape: bf16[48,128], index: 1, kind: input, shape index: {}]   ;;  %s2347_s0 = inlined_call_operand.vmem [shape: bf16[2,256,48], index: 0, kind: input, shape index: {}]   ;;  %s2348_s2 = inlined_call_operand.vmem [shape: f32[1,128], index: 2, kind: input, shape index: {}]   ;;  %s2349_s3 = inlined_call_operand.vmem [shape: bf16[2,256,128], index: 3, kind: output, shape index: {0}]   ;;  %s2350_s4 = inlined_call_operand.vmem [shape: f32[1,2,128], index: 4, kind: output, shape index: {1}]  }
   0x1   :  { %v1753_v0 = vld [vmem:[%s2346_s1] sm:$0xff]   ;;  %v1754_v1 = vld [vmem:[%s2346_s1 + $0x8] sm:$0xff]   ;;  %v1755_v3 = vld [vmem:[%s2346_s1 + $0x10] sm:$0xff]  }
   0x2   :  { %1677 = vmatprep.subr.bf16.mxu0 %v1753_v0  ;;  %1747 = vmatprep.subr.bf16.mxu1 %v1753_v0  ;;  %v1756_v2 = vld [vmem:[%s2347_s0] sm:$0xff]   ;;  %v1757_v4 = vld [vmem:[%s2347_s0 + $0x8] sm:$0xff]   ;;  %v1758_v5 = vld [vmem:[%s2347_s0 + $0x10] sm:$0xff]  }
   0x3   :  { %1678 = vmatpush3.bf16.msra.mxu0 %v1753_v0  ;;  %1750 = vmatpush3.bf16.msra.mxu1 %v1753_v0  ;;  %v1759_v6 = vld [vmem:[%s2347_s0 + $0x18] sm:$0xff]   ;;  %v1760_v7 = vld [vmem:[%s2347_s0 + $0x20] sm:$0xff]   ;;  %v1773_v9 = vld [vmem:[%s2347_s0 + $0x88] sm:$0xff]  }
   0x4   :  { %1679 = vmatprep.subr.bf16.mxu0 %v1754_v1  ;;  %1748 = vmatprep.subr.bf16.mxu1 %v1754_v1  ;;  %v1772_v8 = vld [vmem:[%s2347_s0 + $0x80] sm:$0xff]   ;;  %v1774_v10 = vld [vmem:[%s2347_s0 + $0x90] sm:$0xff]   ;;  %v1761_v11 = vld [vmem:[%s2347_s0 + $0x28] sm:$0xff]  }
   0x5   :  { %1683 = vmatprep.mubr.msk.bf16.mxu0 %vm272_vm0, %v1756_v2  ;;  %1715 = vmatprep.mubr.msk.bf16.mxu1 %vm272_vm0, %v1772_v8  ;;  %v1762_v12 = vld [vmem:[%s2347_s0 + $0x30] sm:$0xff]   ;;  %v1775_v13 = vld [vmem:[%s2347_s0 + $0x98] sm:$0xff]   ;;  %v1776_v14 = vld [vmem:[%s2347_s0 + $0xa0] sm:$0xff]  }
   0x6   :  { %v1763_v15 = vld [vmem:[%s2347_s0 + $0x38] sm:$0xff]   ;;  %v1777_v16 = vld [vmem:[%s2347_s0 + $0xa8] sm:$0xff]   ;;  %v1764_v17 = vld [vmem:[%s2347_s0 + $0x40] sm:$0xff]  }
   0x7   :  { %1680 = vmatpush3.bf16.msra.mxu0 %v1754_v1  ;;  %1751 = vmatpush3.bf16.msra.mxu1 %v1754_v1  ;;  %v1778_v18 = vld [vmem:[%s2347_s0 + $0xb0] sm:$0xff]   ;;  %v1765_v19 = vld [vmem:[%s2347_s0 + $0x48] sm:$0xff]   ;;  %v1779_v20 = vld [vmem:[%s2347_s0 + $0xb8] sm:$0xff]  }
   0x8   :  { %1681 = vmatprep.subr.bf16.mxu0 %v1755_v3  ;;  %1749 = vmatprep.subr.bf16.mxu1 %v1755_v3  ;;  %v1766_v21 = vld [vmem:[%s2347_s0 + $0x50] sm:$0xff]   ;;  %v1780_v22 = vld [vmem:[%s2347_s0 + $0xc0] sm:$0xff]   ;;  %v1767_v23 = vld [vmem:[%s2347_s0 + $0x58] sm:$0xff]  }
   0x9   :  { %v1781_v24 = vld [vmem:[%s2347_s0 + $0xc8] sm:$0xff]   ;;  %v1768_v25 = vld [vmem:[%s2347_s0 + $0x60] sm:$0xff]   ;;  %v1782_v26 = vld [vmem:[%s2347_s0 + $0xd0] sm:$0xff]  }
   0xa   :  { %v1769_v27 = vld [vmem:[%s2347_s0 + $0x68] sm:$0xff]   ;;  %v1783_v28 = vld [vmem:[%s2347_s0 + $0xd8] sm:$0xff]   ;;  %v1770_v29 = vld [vmem:[%s2347_s0 + $0x70] sm:$0xff]  }
   0xb   :  { %1682 = vmatpush3.bf16.msra.mxu0 %v1755_v3  ;;  %1752 = vmatpush3.bf16.msra.mxu1 %v1755_v3  ;;  %v1784_v30 = vld [vmem:[%s2347_s0 + $0xe0] sm:$0xff]   ;;  %v1771_v31 = vld [vmem:[%s2347_s0 + $0x78] sm:$0xff]   ;;  %v1785_v32 = vld [vmem:[%s2347_s0 + $0xe8] sm:$0xff]  }
   0xc   :  { %v1786_v33 = vld [vmem:[%s2347_s0 + $0xf0] sm:$0xff]   ;;  %v1787_v34 = vld [vmem:[%s2347_s0 + $0xf8] sm:$0xff]   ;;  %v1953_v35 = vld [vmem:[%s2348_s2] ss:$0 sm:$0xff] }
   0xe   :  { %1684 = vmatmul.mubr.msk.bf16.vlgmr.msra.gmra.mrb[0].mxu0 %vm272_vm0, %v1757_v4  ;;  %1716 = vmatmul.mubr.msk.bf16.vlgmr.msra.gmra.mrb[0].mxu1 %vm272_vm0, %v1773_v9 }
   0xf   :  { %1687 = vmatprep.mubr.msk.bf16.mxu0 %vm272_vm0, %v1758_v5  ;;  %1719 = vmatprep.mubr.msk.bf16.mxu1 %vm272_vm0, %v1774_v10 }
  0x16   :  { %1688 = vmatmul.mubr.msk.bf16.gmra.mrb[4].mxu0 %vm272_vm0, %v1759_v6  ;;  %1720 = vmatmul.mubr.msk.bf16.gmra.mrb[4].mxu1 %vm272_vm0, %v1775_v13 }
  0x17   :  { %1691 = vmatprep.mubr.msk.bf16.mxu0 %vm272_vm0, %v1760_v7  ;;  %1723 = vmatprep.mubr.msk.bf16.mxu1 %vm272_vm0, %v1776_v14 }
  0x1e   :  { %1692 = vmatmul.mubr.msk.bf16.gmra.mrb[8].mxu0 %vm272_vm0, %v1761_v11  ;;  %1724 = vmatmul.mubr.msk.bf16.gmra.mrb[8].mxu1 %vm272_vm0, %v1777_v16 }
  0x1f   :  { %1695 = vmatprep.mubr.msk.bf16.mxu0 %vm272_vm0, %v1762_v12  ;;  %1727 = vmatprep.mubr.msk.bf16.mxu1 %vm272_vm0, %v1778_v18 }
  0x26   :  { %1696 = vmatmul.mubr.msk.bf16.gmra.mrb[12].mxu0 %vm272_vm0, %v1763_v15  ;;  %1728 = vmatmul.mubr.msk.bf16.gmra.mrb[12].mxu1 %vm272_vm0, %v1779_v20 }
  0x27   :  { %1699 = vmatprep.mubr.msk.bf16.mxu0 %vm272_vm0, %v1764_v17  ;;  %1731 = vmatprep.mubr.msk.bf16.mxu1 %vm272_vm0, %v1780_v22 }
  0x2e   :  { %1700 = vmatmul.mubr.msk.bf16.gmra.mrb[16].mxu0 %vm272_vm0, %v1765_v19  ;;  %1732 = vmatmul.mubr.msk.bf16.gmra.mrb[16].mxu1 %vm272_vm0, %v1781_v24 }
  0x2f   :  { %1703 = vmatprep.mubr.msk.bf16.mxu0 %vm272_vm0, %v1766_v21  ;;  %1735 = vmatprep.mubr.msk.bf16.mxu1 %vm272_vm0, %v1782_v26 }
  0x36   :  { %1704 = vmatmul.mubr.msk.bf16.gmra.mrb[20].mxu0 %vm272_vm0, %v1767_v23  ;;  %1736 = vmatmul.mubr.msk.bf16.gmra.mrb[20].mxu1 %vm272_vm0, %v1783_v28 }
  0x37   :  { %1707 = vmatprep.mubr.msk.bf16.mxu0 %vm272_vm0, %v1768_v25  ;;  %1739 = vmatprep.mubr.msk.bf16.mxu1 %vm272_vm0, %v1784_v30 }
  0x3e   :  { %1708 = vmatmul.mubr.msk.bf16.gmra.mrb[24].mxu0 %vm272_vm0, %v1769_v27  ;;  %1740 = vmatmul.mubr.msk.bf16.gmra.mrb[24].mxu1 %vm272_vm0, %v1785_v32 }
  0x3f   :  { %1711 = vmatprep.mubr.msk.bf16.mxu0 %vm272_vm0, %v1770_v29  ;;  %1743 = vmatprep.mubr.msk.bf16.mxu1 %vm272_vm0, %v1786_v33 }
  0x46   :  { %1712 = vmatmul.mubr.msk.bf16.gmra.mrb[28].mxu0 %vm272_vm0, %v1771_v31  ;;  %1744 = vmatmul.mubr.msk.bf16.gmra.mrb[28].mxu1 %vm272_vm0, %v1787_v34 }
  0xe1   :  { %v1685_v36 = vpop.f32.mrb[0].mxu0  ;;  %v1717_v54 = vpop.f32.mrb[0].mxu1 }
  0xe2   :  { %v412_v37 = vadd.f32 %v1685_v36, %v1953_v35  ;;  %v403_v38 = vpop.f32.mrb[1].mxu0  ;;  %v540_v57 = vadd.f32 %v1717_v54, %v1953_v35  ;;  %v531_v58 = vpop.f32.mrb[1].mxu1 }
  0xe3   :  { %v404_v39 = vadd.f32 %v1953_v35, %v403_v38  ;;  %v1686_v40 = vpop.f32.mrb[2].mxu0  ;;  %v1718_v0 = vpop.f32.mrb[2].mxu1  ;;  %v532_v13 = vadd.f32 %v1953_v35, %v531_v58 }
  0xe4   :  { %v415_v41 = vadd.f32 %v1686_v40, %v1953_v35  ;;  %v406_v42 = vpop.f32.mrb[3].mxu0  ;;  %v660_v45 = vmax.f32 %v412_v37, 0.0  ;;  %v543_v4 = vadd.f32 %v1718_v0, %v1953_v35  ;;  %v534_v5 = vpop.f32.mrb[3].mxu1  ;;  %v1971_v12 = vmax.f32 %v540_v57, 0.0 }
  0xe5   :  { %v658_v43 = vmax.f32 %v404_v39, 0.0  ;;  %v407_v44 = vadd.f32 %v1953_v35, %v406_v42  ;;  %v1980_v28 = vmax.f32 %v532_v13, 0.0  ;;  %v535_v30 = vadd.f32 %v1953_v35, %v534_v5 }
  0xe6   :  { %v661_v46 = vmax.f32 %v415_v41, 0.0  ;;  %v1113_v59 = vmul.f32 %v660_v45, %v660_v45  ;;  %v1974_v19 = vmax.f32 %v543_v4, 0.0 }
  0xe7   :  { %v659_v47 = vmax.f32 %v407_v44, 0.0  ;;  %v1111_v49 = vmul.f32 %v658_v43, %v658_v43  ;;  %v1993_v42 = vmax.f32 %v535_v30, 0.0 }
  0xe8   :  { %v1459_v48 = vpack.c.bf16 %v661_v46, %v660_v45  ;;  %v1114_v1 = vmul.f32 %v661_v46, %v661_v46  ;;  %v1539_v29 = vpack.c.bf16 %v1974_v19, %v1971_v12 }
  0xe9   :  { %v1454_v50 = vpack.c.bf16 %v659_v47, %v658_v43  ;;  %v1042_v51 = vadd.f32 %v659_v47, %v658_v43  ;;  %v1112_v52 = vmul.f32 %v659_v47, %v659_v47  ;;  %v1689_v53 = vpop.f32.mrb[4].mxu0  ;;  %v1721_v25 = vpop.f32.mrb[4].mxu1 }
  0xea   :  { %1611 = vst [vmem:[%s2349_s3 + $0x8] sm:$0xff] %v1459_v48   ;;  %v428_v55 = vadd.f32 %v1689_v53, %v1953_v35  ;;  %v419_v56 = vpop.f32.mrb[5].mxu0  ;;  %v547_v31 = vpop.f32.mrb[5].mxu1  ;;  %1627 = vst [vmem:[%s2349_s3 + $0x88] sm:$0xff] %v1539_v29  }
  0xeb   :  { %1455 = vst [vmem:[%s2349_s3] sm:$0xff] %v1454_v50   ;;  %v1043_v60 = vadd.f32 %v1042_v51, %v660_v45  ;;  %v1175_v61 = vadd.f32 %v1112_v52, %v1111_v49  ;;  %v420_v62 = vadd.f32 %v1953_v35, %v419_v56  ;;  %v1690_v63 = vpop.f32.mrb[6].mxu0  ;;  %v1722_v38 = vpop.f32.mrb[6].mxu1  ;;  %v1534_v50 = vpack.c.bf16 %v1993_v42, %v1980_v28 }
  0xec   :  { %v431_v2 = vadd.f32 %v1690_v63, %v1953_v35  ;;  %v422_v3 = vpop.f32.mrb[7].mxu0  ;;  %v664_v10 = vmax.f32 %v428_v55, 0.0  ;;  %v550_v43 = vpop.f32.mrb[7].mxu1  ;;  %v556_v51 = vadd.f32 %v1721_v25, %v1953_v35 }
  0xed   :  { %v1176_v6 = vadd.f32 %v1175_v61, %v1113_v59  ;;  %v662_v7 = vmax.f32 %v420_v62, 0.0  ;;  %v1044_v8 = vadd.f32 %v1043_v60, %v661_v46  ;;  %v423_v9 = vadd.f32 %v1953_v35, %v422_v3  ;;  %1626 = vst [vmem:[%s2349_s3 + $0x80] sm:$0xff] %v1534_v50  }
  0xee   :  { %v665_v11 = vmax.f32 %v431_v2, 0.0  ;;  %v1117_v32 = vmul.f32 %v664_v10, %v664_v10  ;;  %v548_v2 = vadd.f32 %v1953_v35, %v547_v31  ;;  %v559_v3 = vadd.f32 %v1722_v38, %v1953_v35 }
  0xef   :  { %v1045_v14 = vadd.f32 %v1044_v8, %v662_v7  ;;  %v1115_v15 = vmul.f32 %v662_v7, %v662_v7  ;;  %v1177_v16 = vadd.f32 %v1176_v6, %v1114_v1  ;;  %v663_v17 = vmax.f32 %v423_v9, 0.0 }
  0xf0   :  { %v1469_v18 = vpack.c.bf16 %v665_v11, %v664_v10  ;;  %v1118_v39 = vmul.f32 %v665_v11, %v665_v11  ;;  %v2006_v1 = vmax.f32 %v556_v51, 0.0  ;;  %v2019_v25 = vmax.f32 %v548_v2, 0.0 }
  0xf1   :  { %v1178_v20 = vadd.f32 %v1177_v16, %v1115_v15  ;;  %v1464_v21 = vpack.c.bf16 %v663_v17, %v662_v7  ;;  %v1046_v22 = vadd.f32 %v1045_v14, %v663_v17  ;;  %v1116_v23 = vmul.f32 %v663_v17, %v663_v17  ;;  %v1693_v24 = vpop.f32.mrb[8].mxu0  ;;  %v1725_v62 = vpop.f32.mrb[8].mxu1 }
  0xf2   :  { %1613 = vst [vmem:[%s2349_s3 + $0x18] sm:$0xff] %v1469_v18   ;;  %v444_v26 = vadd.f32 %v1693_v24, %v1953_v35  ;;  %v435_v27 = vpop.f32.mrb[9].mxu0  ;;  %v563_v4 = vpop.f32.mrb[9].mxu1  ;;  %v2015_v15 = vmax.f32 %v559_v3, 0.0  ;;  %v551_v16 = vadd.f32 %v1953_v35, %v550_v43 }
  0xf3   :  { %1612 = vst [vmem:[%s2349_s3 + $0x10] sm:$0xff] %v1464_v21   ;;  %v1047_v33 = vadd.f32 %v1046_v22, %v664_v10  ;;  %v1179_v34 = vadd.f32 %v1178_v20, %v1116_v23  ;;  %v436_v36 = vadd.f32 %v1953_v35, %v435_v27  ;;  %v1694_v37 = vpop.f32.mrb[10].mxu0  ;;  %v1726_v10 = vpop.f32.mrb[10].mxu1 }
  0xf4   :  { %v447_v40 = vadd.f32 %v1694_v37, %v1953_v35  ;;  %v438_v41 = vpop.f32.mrb[11].mxu0  ;;  %v668_v48 = vmax.f32 %v444_v26, 0.0  ;;  %v566_v17 = vpop.f32.mrb[11].mxu1  ;;  %v1549_v26 = vpack.c.bf16 %v2015_v15, %v2006_v1 }
  0xf5   :  { %v1180_v44 = vadd.f32 %v1179_v34, %v1117_v32  ;;  %v666_v45 = vmax.f32 %v436_v36, 0.0  ;;  %v1048_v46 = vadd.f32 %v1047_v33, %v665_v11  ;;  %v439_v47 = vadd.f32 %v1953_v35, %v438_v41 }
  0xf6   :  { %v669_v49 = vmax.f32 %v447_v40, 0.0  ;;  %v1121_v5 = vmul.f32 %v668_v48, %v668_v48  ;;  %1629 = vst [vmem:[%s2349_s3 + $0x98] sm:$0xff] %v1549_v26   ;;  %v2026_v33 = vmax.f32 %v551_v16, 0.0  ;;  %v572_v34 = vadd.f32 %v1725_v62, %v1953_v35 }
  0xf7   :  { %v1049_v52 = vadd.f32 %v1048_v46, %v666_v45  ;;  %v1119_v53 = vmul.f32 %v666_v45, %v666_v45  ;;  %v1181_v54 = vadd.f32 %v1180_v44, %v1118_v39  ;;  %v667_v55 = vmax.f32 %v439_v47, 0.0 }
  0xf8   :  { %v1479_v56 = vpack.c.bf16 %v669_v49, %v668_v48  ;;  %v1122_v11 = vmul.f32 %v669_v49, %v669_v49  ;;  %v1544_v46 = vpack.c.bf16 %v2026_v33, %v2019_v25 }
  0xf9   :  { %v1182_v57 = vadd.f32 %v1181_v54, %v1119_v53  ;;  %v1474_v58 = vpack.c.bf16 %v667_v55, %v666_v45  ;;  %v1050_v59 = vadd.f32 %v1049_v52, %v667_v55  ;;  %v1120_v60 = vmul.f32 %v667_v55, %v667_v55  ;;  %v1697_v61 = vpop.f32.mrb[12].mxu0  ;;  %v2029_v41 = vpop.f32.mrb[12].mxu1 }
  0xfa   :  { %1615 = vst [vmem:[%s2349_s3 + $0x28] sm:$0xff] %v1479_v56   ;;  %v460_v63 = vadd.f32 %v1697_v61, %v1953_v35  ;;  %v451_v0 = vpop.f32.mrb[13].mxu0  ;;  %v579_v47 = vpop.f32.mrb[13].mxu1  ;;  %1628 = vst [vmem:[%s2349_s3 + $0x90] sm:$0xff] %v1544_v46   ;;  %v2047_v56 = vmax.f32 %v572_v34, 0.0 }
  0xfb   :  { %1614 = vst [vmem:[%s2349_s3 + $0x20] sm:$0xff] %v1474_v58   ;;  %v1051_v6 = vadd.f32 %v1050_v59, %v668_v48  ;;  %v1183_v7 = vadd.f32 %v1182_v57, %v1120_v60  ;;  %v452_v8 = vadd.f32 %v1953_v35, %v451_v0  ;;  %v1698_v9 = vpop.f32.mrb[14].mxu0  ;;  %v2041_v53 = vpop.f32.mrb[14].mxu1  ;;  %v564_v57 = vadd.f32 %v1953_v35, %v563_v4 }
  0xfc   :  { %v463_v13 = vadd.f32 %v1698_v9, %v1953_v35  ;;  %v454_v14 = vpop.f32.mrb[15].mxu0  ;;  %v672_v23 = vmax.f32 %v460_v63, 0.0  ;;  %v575_v58 = vadd.f32 %v1726_v10, %v1953_v35  ;;  %v2051_v59 = vpop.f32.mrb[15].mxu1 }
  0xfd   :  { %v1184_v18 = vadd.f32 %v1183_v7, %v1121_v5  ;;  %v670_v20 = vmax.f32 %v452_v8, 0.0  ;;  %v1052_v21 = vadd.f32 %v1051_v6, %v669_v49  ;;  %v455_v22 = vadd.f32 %v1953_v35, %v454_v14 }
  0xfe   :  { %v673_v24 = vmax.f32 %v463_v13, 0.0  ;;  %v1125_v43 = vmul.f32 %v672_v23, %v672_v23  ;;  %v2054_v3 = vmax.f32 %v575_v58, 0.0  ;;  %v567_v5 = vadd.f32 %v1953_v35, %v566_v17 }
  0xff   :  { %v1053_v27 = vadd.f32 %v1052_v21, %v670_v20  ;;  %v1123_v29 = vmul.f32 %v670_v20, %v670_v20  ;;  %v1185_v30 = vadd.f32 %v1184_v18, %v1122_v11  ;;  %v671_v31 = vmax.f32 %v455_v22, 0.0 }
 0x100   :  { %v1489_v32 = vpack.c.bf16 %v673_v24, %v672_v23  ;;  %v1126_v48 = vmul.f32 %v673_v24, %v673_v24  ;;  %v2057_v11 = vmax.f32 %v564_v57, 0.0  ;;  %v1559_v10 = vpack.c.bf16 %v2054_v3, %v2047_v56 }
 0x101   :  { %v1186_v36 = vadd.f32 %v1185_v30, %v1123_v29  ;;  %v1484_v37 = vpack.c.bf16 %v671_v31, %v670_v20  ;;  %v1054_v38 = vadd.f32 %v1053_v27, %v671_v31  ;;  %v1124_v39 = vmul.f32 %v671_v31, %v671_v31  ;;  %v1701_v40 = vpop.f32.mrb[16].mxu0  ;;  %v2061_v21 = vpop.f32.mrb[16].mxu1 }
 0x102   :  { %1617 = vst [vmem:[%s2349_s3 + $0x38] sm:$0xff] %v1489_v32   ;;  %v476_v44 = vadd.f32 %v1701_v40, %v1953_v35  ;;  %v467_v45 = vpop.f32.mrb[17].mxu0  ;;  %1631 = vst [vmem:[%s2349_s3 + $0xa8] sm:$0xff] %v1559_v10  }
 0x103   :  { %1616 = vst [vmem:[%s2349_s3 + $0x30] sm:$0xff] %v1484_v37   ;;  %v1055_v49 = vadd.f32 %v1054_v38, %v672_v23  ;;  %v1187_v50 = vadd.f32 %v1186_v36, %v1124_v39  ;;  %v468_v51 = vadd.f32 %v1953_v35, %v467_v45  ;;  %v1702_v52 = vpop.f32.mrb[18].mxu0  ;;  %v2070_v23 = vmax.f32 %v567_v5, 0.0 }
 0x104   :  { %v479_v54 = vadd.f32 %v1702_v52, %v1953_v35  ;;  %v470_v55 = vpop.f32.mrb[19].mxu0  ;;  %v676_v0 = vmax.f32 %v476_v44, 0.0 }
 0x105   :  { %v1188_v60 = vadd.f32 %v1187_v50, %v1125_v43  ;;  %v674_v61 = vmax.f32 %v468_v51, 0.0  ;;  %v1056_v62 = vadd.f32 %v1055_v49, %v673_v24  ;;  %v471_v63 = vadd.f32 %v1953_v35, %v470_v55  ;;  %v2072_v24 = vpop.f32.mrb[17].mxu1 }
 0x106   :  { %v677_v2 = vmax.f32 %v479_v54, 0.0  ;;  %v1129_v26 = vmul.f32 %v676_v0, %v676_v0  ;;  %v2078_v32 = vpop.f32.mrb[18].mxu1  ;;  %v1554_v39 = vpack.c.bf16 %v2070_v23, %v2057_v11  ;;  %v588_v49 = vadd.f32 %v2029_v41, %v1953_v35 }
 0x107   :  { %v1057_v6 = vadd.f32 %v1056_v62, %v674_v61  ;;  %v1127_v7 = vmul.f32 %v674_v61, %v674_v61  ;;  %v1189_v8 = vadd.f32 %v1188_v60, %v1126_v48  ;;  %v675_v9 = vmax.f32 %v471_v63, 0.0  ;;  %v2083_v40 = vpop.f32.mrb[19].mxu1 }
 0x108   :  { %v1499_v4 = vpack.c.bf16 %v677_v2, %v676_v0  ;;  %v1130_v34 = vmul.f32 %v677_v2, %v677_v2  ;;  %1630 = vst [vmem:[%s2349_s3 + $0xa0] sm:$0xff] %v1554_v39   ;;  %v580_v50 = vadd.f32 %v1953_v35, %v579_v47  ;;  %v2098_v5 = vmax.f32 %v588_v49, 0.0 }
 0x109   :  { %v1190_v13 = vadd.f32 %v1189_v8, %v1127_v7  ;;  %v1494_v14 = vpack.c.bf16 %v675_v9, %v674_v61  ;;  %v1058_v16 = vadd.f32 %v1057_v6, %v675_v9  ;;  %v1128_v18 = vmul.f32 %v675_v9, %v675_v9  ;;  %v1705_v20 = vpop.f32.mrb[20].mxu0 }
 0x10a   :  { %1619 = vst [vmem:[%s2349_s3 + $0x48] sm:$0xff] %v1499_v4   ;;  %v492_v17 = vadd.f32 %v1705_v20, %v1953_v35  ;;  %v483_v22 = vpop.f32.mrb[21].mxu0  ;;  %v591_v6 = vadd.f32 %v2041_v53, %v1953_v35  ;;  %v583_v7 = vadd.f32 %v1953_v35, %v2051_v59 }
 0x10b   :  { %1618 = vst [vmem:[%s2349_s3 + $0x40] sm:$0xff] %v1494_v14   ;;  %v1059_v27 = vadd.f32 %v1058_v16, %v676_v0  ;;  %v1191_v29 = vadd.f32 %v1190_v13, %v1128_v18  ;;  %v484_v30 = vadd.f32 %v1953_v35, %v483_v22  ;;  %v1706_v31 = vpop.f32.mrb[22].mxu0  ;;  %v2110_v14 = vmax.f32 %v580_v50, 0.0 }
 0x10c   :  { %v680_v36 = vmax.f32 %v492_v17, 0.0  ;;  %v495_v37 = vadd.f32 %v1706_v31, %v1953_v35  ;;  %v486_v38 = vpop.f32.mrb[23].mxu0  ;;  %v2115_v59 = vmax.f32 %v591_v6, 0.0  ;;  %v2117_v17 = vmax.f32 %v583_v7, 0.0 }
 0x10d   :  { %v1192_v43 = vadd.f32 %v1191_v29, %v1129_v26  ;;  %v678_v44 = vmax.f32 %v484_v30, 0.0  ;;  %v1060_v45 = vadd.f32 %v1059_v27, %v677_v2  ;;  %v487_v46 = vadd.f32 %v1953_v35, %v486_v38  ;;  %v2092_v2 = vpop.f32.mrb[20].mxu1 }
 0x10e   :  { %v681_v48 = vmax.f32 %v495_v37, 0.0  ;;  %v1133_v57 = vmul.f32 %v680_v36, %v680_v36  ;;  %v2104_v8 = vpop.f32.mrb[21].mxu1 }
 0x10f   :  { %v1061_v51 = vadd.f32 %v1060_v45, %v678_v44  ;;  %v1131_v52 = vmul.f32 %v678_v44, %v678_v44  ;;  %v1193_v54 = vadd.f32 %v1192_v43, %v1130_v34  ;;  %v679_v55 = vmax.f32 %v487_v46, 0.0  ;;  %v2112_v16 = vpop.f32.mrb[22].mxu1 }
 0x110   :  { %v1509_v58 = vpack.c.bf16 %v681_v48, %v680_v36  ;;  %v1134_v18 = vmul.f32 %v681_v48, %v681_v48  ;;  %v2119_v22 = vpop.f32.mrb[23].mxu1  ;;  %v1564_v45 = vpack.c.bf16 %v2117_v17, %v2110_v14  ;;  %v604_v46 = vadd.f32 %v2061_v21, %v1953_v35 }
 0x111   :  { %v1194_v60 = vadd.f32 %v1193_v54, %v1131_v52  ;;  %v1504_v61 = vpack.c.bf16 %v679_v55, %v678_v44  ;;  %v1062_v62 = vadd.f32 %v1061_v51, %v679_v55  ;;  %v1132_v63 = vmul.f32 %v679_v55, %v679_v55  ;;  %v1709_v0 = vpop.f32.mrb[24].mxu0  ;;  %v1741_v54 = vpop.f32.mrb[24].mxu1 }
 0x112   :  { %1621 = vst [vmem:[%s2349_s3 + $0x58] sm:$0xff] %v1509_v58   ;;  %v508_v41 = vadd.f32 %v1709_v0, %v1953_v35  ;;  %v499_v47 = vpop.f32.mrb[25].mxu0  ;;  %1632 = vst [vmem:[%s2349_s3 + $0xb0] sm:$0xff] %v1564_v45   ;;  %v596_v21 = vadd.f32 %v1953_v35, %v2072_v24 }
 0x113   :  { %1620 = vst [vmem:[%s2349_s3 + $0x50] sm:$0xff] %v1504_v61   ;;  %v1063_v9 = vadd.f32 %v1062_v62, %v680_v36  ;;  %v1195_v4 = vadd.f32 %v1194_v60, %v1132_v63  ;;  %v500_v10 = vadd.f32 %v1953_v35, %v499_v47  ;;  %v1710_v13 = vpop.f32.mrb[26].mxu0  ;;  %v1569_v36 = vpack.c.bf16 %v2115_v59, %v2098_v5  ;;  %v627_v61 = vpop.f32.mrb[25].mxu1 }
 0x114   :  { %v511_v53 = vadd.f32 %v1710_v13, %v1953_v35  ;;  %v502_v20 = vpop.f32.mrb[27].mxu0  ;;  %v684_v31 = vmax.f32 %v508_v41, 0.0  ;;  %v607_v60 = vadd.f32 %v2078_v32, %v1953_v35  ;;  %v599_v47 = vadd.f32 %v1953_v35, %v2083_v40  ;;  %v2148_v6 = vpop.f32.mrb[26].mxu1 }
 0x115   :  { %v1196_v26 = vadd.f32 %v1195_v4, %v1133_v57  ;;  %v682_v27 = vmax.f32 %v500_v10, 0.0  ;;  %v1064_v29 = vadd.f32 %v1063_v9, %v681_v48  ;;  %v503_v30 = vadd.f32 %v1953_v35, %v502_v20  ;;  %1633 = vst [vmem:[%s2349_s3 + $0xb8] sm:$0xff] %v1569_v36   ;;  %v630_v10 = vpop.f32.mrb[27].mxu1 }
 0x116   :  { %v685_v34 = vmax.f32 %v511_v53, 0.0  ;;  %v1137_v55 = vmul.f32 %v684_v31, %v684_v31  ;;  %v2151_v4 = vmax.f32 %v604_v46, 0.0  ;;  %v2158_v40 = vmax.f32 %v599_v47, 0.0 }
 0x117   :  { %v1065_v37 = vadd.f32 %v1064_v29, %v682_v27  ;;  %v1135_v38 = vmul.f32 %v682_v27, %v682_v27  ;;  %v1197_v39 = vadd.f32 %v1196_v26, %v1134_v18  ;;  %v683_v43 = vmax.f32 %v503_v30, 0.0 }
 0x118   :  { %v1519_v44 = vpack.c.bf16 %v685_v34, %v684_v31  ;;  %v1138_v7 = vmul.f32 %v685_v34, %v685_v34  ;;  %v2156_v29 = vmax.f32 %v607_v60, 0.0  ;;  %v623_v60 = vadd.f32 %v2112_v16, %v1953_v35 }
 0x119   :  { %v1198_v48 = vadd.f32 %v1197_v39, %v1135_v38  ;;  %v1514_v49 = vpack.c.bf16 %v683_v43, %v682_v27  ;;  %v1066_v50 = vadd.f32 %v1065_v37, %v683_v43  ;;  %v1136_v51 = vmul.f32 %v683_v43, %v683_v43  ;;  %v1713_v52 = vpop.f32.mrb[28].mxu0 }
 0x11a   :  { %1623 = vst [vmem:[%s2349_s3 + $0x68] sm:$0xff] %v1519_v44   ;;  %v524_v57 = vadd.f32 %v1713_v52, %v1953_v35  ;;  %v515_v58 = vpop.f32.mrb[29].mxu0  ;;  %v2154_v27 = vmax.f32 %v596_v21, 0.0  ;;  %v1143_v43 = vmul.f32 %v1980_v28, %v1980_v28  ;;  %v620_v52 = vadd.f32 %v2092_v2, %v1953_v35 }
 0x11b   :  { %1622 = vst [vmem:[%s2349_s3 + $0x60] sm:$0xff] %v1514_v49   ;;  %v1067_v62 = vadd.f32 %v1066_v50, %v684_v31  ;;  %v1199_v63 = vadd.f32 %v1198_v48, %v1136_v51  ;;  %v516_v0 = vadd.f32 %v1953_v35, %v515_v58  ;;  %v1714_v41 = vpop.f32.mrb[30].mxu0  ;;  %v1745_v49 = vpop.f32.mrb[28].mxu1  ;;  %v2192_v16 = vmax.f32 %v623_v60, 0.0 }
 0x11c   :  { %v688_v24 = vmax.f32 %v524_v57, 0.0  ;;  %v527_v9 = vadd.f32 %v1714_v41, %v1953_v35  ;;  %v518_v32 = vpop.f32.mrb[31].mxu0  ;;  %v1574_v51 = vpack.c.bf16 %v2158_v40, %v2154_v27  ;;  %v643_v57 = vpop.f32.mrb[29].mxu1  ;;  %v2186_v2 = vmax.f32 %v620_v52, 0.0 }
 0x11d   :  { %v1200_v13 = vadd.f32 %v1199_v63, %v1137_v55  ;;  %v686_v18 = vmax.f32 %v516_v0, 0.0  ;;  %v1068_v53 = vadd.f32 %v1067_v62, %v685_v34  ;;  %v519_v20 = vadd.f32 %v1953_v35, %v518_v32  ;;  %v1746_v63 = vpop.f32.mrb[30].mxu1 }
 0x11e   :  { %v689_v26 = vmax.f32 %v527_v9, 0.0  ;;  %v1141_v38 = vmul.f32 %v688_v24, %v688_v24  ;;  %v1579_v34 = vpack.c.bf16 %v2156_v29, %v2151_v4  ;;  %v612_v55 = vadd.f32 %v1953_v35, %v2104_v8  ;;  %1634 = vst [vmem:[%s2349_s3 + $0xc0] sm:$0xff] %v1574_v51   ;;  %v646_v47 = vpop.f32.mrb[31].mxu1 }
 0x11f   :  { %v1069_v30 = vadd.f32 %v1068_v53, %v686_v18  ;;  %v1139_v31 = vmul.f32 %v686_v18, %v686_v18  ;;  %v1201_v36 = vadd.f32 %v1200_v13, %v1138_v7  ;;  %v687_v37 = vmax.f32 %v519_v20, 0.0 }
 0x120   :  { %v1529_v39 = vpack.c.bf16 %v689_v26, %v688_v24  ;;  %v1142_v50 = vmul.f32 %v689_v26, %v689_v26  ;;  %1635 = vst [vmem:[%s2349_s3 + $0xc8] sm:$0xff] %v1579_v34   ;;  %v615_v62 = vadd.f32 %v1953_v35, %v2119_v22  ;;  %v2188_v8 = vmax.f32 %v612_v55, 0.0 }
 0x121   :  { %v1202_v44 = vadd.f32 %v1201_v36, %v1139_v31  ;;  %v1524_v45 = vpack.c.bf16 %v687_v37, %v686_v18  ;;  %v1070_v46 = vadd.f32 %v1069_v30, %v687_v37  ;;  %v1140_v48 = vmul.f32 %v687_v37, %v687_v37 }
 0x122   :  { %1625 = vst [vmem:[%s2349_s3 + $0x78] sm:$0xff] %v1529_v39   ;;  %v636_v0 = vadd.f32 %v1741_v54, %v1953_v35  ;;  %v628_v41 = vadd.f32 %v1953_v35, %v627_v61  ;;  %v2194_v9 = vmax.f32 %v615_v62, 0.0  ;;  %v1145_v22 = vmul.f32 %v1971_v12, %v1971_v12 }
 0x123   :  { %1624 = vst [vmem:[%s2349_s3 + $0x70] sm:$0xff] %v1524_v45   ;;  %v1071_v58 = vadd.f32 %v1070_v46, %v688_v24  ;;  %v1203_v21 = vadd.f32 %v1202_v44, %v1140_v48  ;;  %v1146_v18 = vmul.f32 %v1974_v19, %v1974_v19  ;;  %v1589_v54 = vpack.c.bf16 %v2192_v16, %v2186_v2 }
 0x124   :  { %v1144_v61 = vmul.f32 %v1993_v42, %v1993_v42  ;;  %v1584_v53 = vpack.c.bf16 %v2194_v9, %v2188_v8  ;;  %v2207_v20 = vmax.f32 %v636_v0, 0.0  ;;  %v639_v31 = vadd.f32 %v2148_v6, %v1953_v35 }
 0x125   :  { %v1204_v7 = vadd.f32 %v1203_v21, %v1141_v38  ;;  %v1072_v24 = vadd.f32 %v1071_v58, %v689_v26  ;;  %v2209_v26 = vmax.f32 %v628_v41, 0.0  ;;  %1637 = vst [vmem:[%s2349_s3 + $0xd8] sm:$0xff] %v1589_v54   ;;  %v631_v36 = vadd.f32 %v1953_v35, %v630_v10 }
 0x126   :  { %1636 = vst [vmem:[%s2349_s3 + $0xd0] sm:$0xff] %v1584_v53   ;;  %v652_v37 = vadd.f32 %v1745_v49, %v1953_v35  ;;  %v644_v38 = vadd.f32 %v1953_v35, %v643_v57  ;;  %v655_v39 = vadd.f32 %v1746_v63, %v1953_v35  ;;  %v2226_v44 = vmax.f32 %v639_v31, 0.0 }
 0x127   :  { %v1073_v32 = vadd.f32 %v1072_v24, %v1980_v28  ;;  %v1205_v13 = vadd.f32 %v1204_v7, %v1142_v50  ;;  %v2228_v6 = vmax.f32 %v631_v36, 0.0  ;;  %v1149_v60 = vmul.f32 %v2006_v1, %v2006_v1 }
 0x128   :  { %v2230_v10 = vmax.f32 %v652_v37, 0.0  ;;  %v2232_v45 = vmax.f32 %v644_v38, 0.0  ;;  %v2234_v46 = vmax.f32 %v655_v39, 0.0  ;;  %v1150_v0 = vmul.f32 %v2015_v15, %v2015_v15 }
 0x129   :  { %v1206_v30 = vadd.f32 %v1205_v13, %v1143_v43  ;;  %v1074_v28 = vadd.f32 %v1073_v32, %v1993_v42  ;;  %v647_v42 = vadd.f32 %v1953_v35, %v646_v47  ;;  %v1147_v35 = vmul.f32 %v2019_v25, %v2019_v25 }
 0x12a   :  { %v1594_v51 = vpack.c.bf16 %v2228_v6, %v2209_v26  ;;  %v1609_v57 = vpack.c.bf16 %v2234_v46, %v2230_v10  ;;  %v1151_v47 = vmul.f32 %v2057_v11, %v2057_v11  ;;  %v1152_v13 = vmul.f32 %v2070_v23, %v2070_v23 }
 0x12b   :  { %v1075_v43 = vadd.f32 %v1074_v28, %v1971_v12  ;;  %v1207_v34 = vadd.f32 %v1206_v30, %v1144_v61  ;;  %v2236_v48 = vmax.f32 %v647_v42, 0.0  ;;  %v1599_v12 = vpack.c.bf16 %v2226_v44, %v2207_v20 }
 0x12c   :  { %1638 = vst [vmem:[%s2349_s3 + $0xe0] sm:$0xff] %v1594_v51   ;;  %1641 = vst [vmem:[%s2349_s3 + $0xf8] sm:$0xff] %v1609_v57   ;;  %v1156_v36 = vmul.f32 %v2117_v17, %v2117_v17 }
 0x12d   :  { %v1208_v49 = vadd.f32 %v1207_v34, %v1145_v22  ;;  %v1076_v50 = vadd.f32 %v1075_v43, %v1974_v19  ;;  %1639 = vst [vmem:[%s2349_s3 + $0xe8] sm:$0xff] %v1599_v12   ;;  %v1604_v19 = vpack.c.bf16 %v2236_v48, %v2232_v45 }
 0x12f   :  { %v1077_v52 = vadd.f32 %v1076_v50, %v2019_v25  ;;  %v1209_v55 = vadd.f32 %v1208_v49, %v1146_v18  ;;  %v1148_v25 = vmul.f32 %v2026_v33, %v2026_v33  ;;  %1640 = vst [vmem:[%s2349_s3 + $0xf0] sm:$0xff] %v1604_v19   ;;  %v1160_v50 = vmul.f32 %v2158_v40, %v2158_v40 }
 0x131   :  { %v1210_v58 = vadd.f32 %v1209_v55, %v1147_v35  ;;  %v1078_v21 = vadd.f32 %v1077_v52, %v2026_v33 }
 0x133   :  { %v1079_v62 = vadd.f32 %v1078_v21, %v2006_v1  ;;  %v1211_v63 = vadd.f32 %v1210_v58, %v1148_v25  ;;  %v1153_v1 = vmul.f32 %v2047_v56, %v2047_v56  ;;  %v1164_v58 = vmul.f32 %v2194_v9, %v2194_v9 }
 0x135   :  { %v1212_v41 = vadd.f32 %v1211_v63, %v1149_v60  ;;  %v1080_v33 = vadd.f32 %v1079_v62, %v2015_v15  ;;  %v1154_v15 = vmul.f32 %v2054_v3, %v2054_v3 }
 0x137   :  { %v1081_v7 = vadd.f32 %v1080_v33, %v2057_v11  ;;  %v1213_v24 = vadd.f32 %v1212_v41, %v1150_v0  ;;  %v1155_v11 = vmul.f32 %v2110_v14, %v2110_v14  ;;  %v1168_v33 = vmul.f32 %v2228_v6, %v2228_v6 }
 0x139   :  { %v1214_v22 = vadd.f32 %v1213_v24, %v1151_v47  ;;  %v1082_v32 = vadd.f32 %v1081_v7, %v2070_v23 }
 0x13b   :  { %v1083_v18 = vadd.f32 %v1082_v32, %v2047_v56  ;;  %v1215_v54 = vadd.f32 %v1214_v22, %v1152_v13  ;;  %v1157_v56 = vmul.f32 %v2098_v5, %v2098_v5 }
 0x13d   :  { %v1216_v61 = vadd.f32 %v1215_v54, %v1153_v1  ;;  %v1084_v53 = vadd.f32 %v1083_v18, %v2054_v3  ;;  %v1158_v3 = vmul.f32 %v2115_v59, %v2115_v59  ;;  %v1172_v18 = vmul.f32 %v2236_v48, %v2236_v48 }
 0x13f   :  { %v1085_v30 = vadd.f32 %v1084_v53, %v2110_v14  ;;  %v1217_v28 = vadd.f32 %v1216_v61, %v1154_v15  ;;  %v1159_v14 = vmul.f32 %v2154_v27, %v2154_v27 }
 0x141   :  { %v1218_v31 = vadd.f32 %v1217_v28, %v1155_v11  ;;  %v1086_v23 = vadd.f32 %v1085_v30, %v2117_v17 }
 0x143   :  { %v1087_v37 = vadd.f32 %v1086_v23, %v2098_v5  ;;  %v1219_v38 = vadd.f32 %v1218_v31, %v1156_v36  ;;  %v1161_v5 = vmul.f32 %v2151_v4, %v2151_v4 }
 0x145   :  { %v1220_v39 = vadd.f32 %v1219_v38, %v1157_v56  ;;  %v1088_v42 = vadd.f32 %v1087_v37, %v2115_v59  ;;  %v1162_v59 = vmul.f32 %v2156_v29, %v2156_v29 }
 0x147   :  { %v1089_v43 = vadd.f32 %v1088_v42, %v2154_v27  ;;  %v1221_v34 = vadd.f32 %v1220_v39, %v1158_v3  ;;  %v1163_v27 = vmul.f32 %v2188_v8, %v2188_v8 }
 0x149   :  { %v1222_v49 = vadd.f32 %v1221_v34, %v1159_v14  ;;  %v1090_v17 = vadd.f32 %v1089_v43, %v2158_v40 }
 0x14b   :  { %v1091_v35 = vadd.f32 %v1090_v17, %v2151_v4  ;;  %v1223_v12 = vadd.f32 %v1222_v49, %v1160_v50  ;;  %v1165_v4 = vmul.f32 %v2186_v2, %v2186_v2 }
 0x14d   :  { %v1224_v51 = vadd.f32 %v1223_v12, %v1161_v5  ;;  %v1092_v52 = vadd.f32 %v1091_v35, %v2156_v29  ;;  %v1166_v29 = vmul.f32 %v2192_v16, %v2192_v16 }
 0x14f   :  { %v1093_v55 = vadd.f32 %v1092_v52, %v2188_v8  ;;  %v1225_v57 = vadd.f32 %v1224_v51, %v1162_v59  ;;  %v1167_v8 = vmul.f32 %v2209_v26, %v2209_v26 }
 0x151   :  { %v1226_v19 = vadd.f32 %v1225_v57, %v1163_v27  ;;  %v1094_v40 = vadd.f32 %v1093_v55, %v2194_v9 }
 0x153   :  { %v1095_v21 = vadd.f32 %v1094_v40, %v2186_v2  ;;  %v1227_v25 = vadd.f32 %v1226_v19, %v1164_v58  ;;  %v1169_v2 = vmul.f32 %v2207_v20, %v2207_v20 }
 0x155   :  { %v1228_v60 = vadd.f32 %v1227_v25, %v1165_v4  ;;  %v1096_v62 = vadd.f32 %v1095_v21, %v2192_v16  ;;  %v1170_v16 = vmul.f32 %v2226_v44, %v2226_v44 }
 0x157   :  { %v1097_v63 = vadd.f32 %v1096_v62, %v2209_v26  ;;  %v1229_v0 = vadd.f32 %v1228_v60, %v1166_v29  ;;  %v1171_v26 = vmul.f32 %v2232_v45, %v2232_v45 }
 0x159   :  { %v1230_v41 = vadd.f32 %v1229_v0, %v1167_v8  ;;  %v1098_v9 = vadd.f32 %v1097_v63, %v2228_v6 }
 0x15b   :  { %v1099_v47 = vadd.f32 %v1098_v9, %v2207_v20  ;;  %v1231_v7 = vadd.f32 %v1230_v41, %v1168_v33  ;;  %v1173_v20 = vmul.f32 %v2230_v10, %v2230_v10 }
 0x15d   :  { %v1232_v24 = vadd.f32 %v1231_v7, %v1169_v2  ;;  %v1100_v22 = vadd.f32 %v1099_v47, %v2226_v44  ;;  %v1174_v44 = vmul.f32 %v2234_v46, %v2234_v46 }
 0x15f   :  { %v1101_v32 = vadd.f32 %v1100_v22, %v2232_v45  ;;  %v1233_v13 = vadd.f32 %v1232_v24, %v1170_v16 }
 0x161   :  { %v1234_v1 = vadd.f32 %v1233_v13, %v1171_v26  ;;  %v1102_v6 = vadd.f32 %v1101_v32, %v2236_v48 }
 0x163   :  { %v1103_v54 = vadd.f32 %v1102_v6, %v2230_v10  ;;  %v1235_v15 = vadd.f32 %v1234_v1, %v1172_v18 }
 0x165   :  { %v1104_v61 = vadd.f32 %v1103_v54, %v2234_v46  ;;  %v1236_v53 = vadd.f32 %v1235_v15, %v1173_v20 }
 0x167   :  { %v1105_v45 = vrot.slane %v1104_v61, 4  ;;  %v1237_v11 = vadd.f32 %v1236_v53, %v1174_v44 }
 0x169   :  { %v1106_v30 = vadd.f32 %v1105_v45, %v1104_v61  ;;  %v1238_v28 = vrot.slane %v1237_v11, 4 }
 0x16b   :  { %v1107_v31 = vrot.slane %v1106_v30, 2  ;;  %v1239_v23 = vadd.f32 %v1238_v28, %v1237_v11 }
 0x16d   :  { %v1108_v36 = vadd.f32 %v1107_v31, %v1106_v30  ;;  %v1240_v48 = vrot.slane %v1239_v23, 2 }
 0x16f   :  { %v1109_v56 = vrot.slane %v1108_v36, 1  ;;  %v1241_v37 = vadd.f32 %v1240_v48, %v1239_v23 }
 0x171   :  { %v1242_v38 = vrot.slane %v1241_v37, 1  ;;  %v1110_v10 = vadd.f32 %v1109_v56, %v1108_v36 }
 0x173   :  { %v1243_v3 = vadd.f32 %v1242_v38, %v1241_v37 }
 0x175   :  { %v1245_v39 = vsel %vm1244_vm1, %v1110_v10, %v1243_v3 }
 0x176   :  { %1246 = vst [vmem:[%s2350_s4] sm:$0x3] %v1245_v39 }

// kernel: encoder_forward.4
= control target key start
LH: loop header
LB: loop body
LE: loop exit
PB: predicated region body
PF: predicated region fallthrough
CT: control target
= control target key end

     0   :  { %vm499_vm0 = vcmask 1040384   ;;  %s935_s1 = inlined_call_operand.vmem [shape: bf16[256,128], index: 1, kind: input, shape index: {}]   ;;  %s936_s0 = inlined_call_operand.vmem [shape: bf16[2,64,256], index: 0, kind: input, shape index: {}]   ;;  %s937_s2 = inlined_call_operand.vmem [shape: f32[1,128], index: 2, kind: input, shape index: {}]   ;;  %s938_s3 = inlined_call_operand.vmem [shape: bf16[2,64,128], index: 3, kind: output, shape index: {0}]   ;;  %s939_s4 = inlined_call_operand.vmem [shape: f32[1,2,128], index: 4, kind: output, shape index: {1}]  }
   0x1   :  { %v702_v0 = vld [vmem:[%s935_s1 + $0x40] sm:$0xff]   ;;  %v704_v2 = vld [vmem:[%s935_s1 + $0x48] sm:$0xff]   ;;  %v706_v4 = vld [vmem:[%s935_s1 + $0x50] sm:$0xff]  }
   0x2   :  { %v703_v1 = vld [vmem:[%s935_s1] sm:$0xff]   ;;  %622 = vmatprep.subr.bf16.mxu0 %v702_v0  ;;  %686 = vmatprep.subr.bf16.mxu1 %v702_v0  ;;  %v705_v3 = vld [vmem:[%s935_s1 + $0x8] sm:$0xff]   ;;  %v707_v5 = vld [vmem:[%s935_s1 + $0x10] sm:$0xff]  }
   0x3   :  { %623 = vmatpush3.bf16.msra.mxu0 %v703_v1  ;;  %694 = vmatpush3.bf16.msra.mxu1 %v703_v1  ;;  %v708_v6 = vld [vmem:[%s935_s1 + $0x58] sm:$0xff]   ;;  %v710_v8 = vld [vmem:[%s935_s1 + $0x60] sm:$0xff]   ;;  %v712_v10 = vld [vmem:[%s935_s1 + $0x68] sm:$0xff]  }
   0x4   :  { %624 = vmatprep.subr.bf16.mxu0 %v704_v2  ;;  %687 = vmatprep.subr.bf16.mxu1 %v704_v2  ;;  %v709_v7 = vld [vmem:[%s935_s1 + $0x18] sm:$0xff]   ;;  %v711_v9 = vld [vmem:[%s935_s1 + $0x20] sm:$0xff]   ;;  %v713_v12 = vld [vmem:[%s935_s1 + $0x28] sm:$0xff]  }
   0x5   :  { %v720_v11 = vld [vmem:[%s936_s0 + $0x4] ss:$8 sps:$4 sm:$0xff]   ;;  %v714_v14 = vld [vmem:[%s935_s1 + $0x70] sm:$0xff]   ;;  %v716_v16 = vld [vmem:[%s935_s1 + $0x78] sm:$0xff]  }
   0x6   :  { %v726_v13 = vld [vmem:[%s936_s0 + $0x44] ss:$8 sps:$4 sm:$0xff]   ;;  %280 = vmatprep.mubr.bf16.mxu0 %v720_v11  ;;  %v715_v15 = vld [vmem:[%s935_s1 + $0x30] sm:$0xff]   ;;  %v717_v17 = vld [vmem:[%s935_s1 + $0x38] sm:$0xff]  }
   0x7   :  { %625 = vmatpush3.bf16.msra.mxu0 %v705_v3  ;;  %695 = vmatpush3.bf16.msra.mxu1 %v705_v3  ;;  %v718_v18 = vld [vmem:[%s936_s0] ss:$8 sps:$4 sm:$0xff]   ;;  %v721_v20 = vld [vmem:[%s936_s0 + $0x14] ss:$8 sps:$4 sm:$0xff]   ;;  %v723_v22 = vld [vmem:[%s936_s0 + $0x10] ss:$8 sps:$4 sm:$0xff]  }
   0x8   :  { %626 = vmatprep.subr.bf16.mxu0 %v706_v4  ;;  %688 = vmatprep.subr.bf16.mxu1 %v706_v4  ;;  %v724_v19 = vld [vmem:[%s936_s0 + $0x40] ss:$8 sps:$4 sm:$0xff]   ;;  %v730_v21 = vld [vmem:[%s936_s0 + $0x54] ss:$8 sps:$4 sm:$0xff]   ;;  %v732_v23 = vld [vmem:[%s936_s0 + $0x50] ss:$8 sps:$4 sm:$0xff]  }
   0x9   :  { %312 = vmatprep.mubr.bf16.mxu1 %v726_v13  ;;  %v727_v24 = vld [vmem:[%s936_s0 + $0x24] ss:$8 sps:$4 sm:$0xff]   ;;  %v729_v26 = vld [vmem:[%s936_s0 + $0x20] ss:$8 sps:$4 sm:$0xff]   ;;  %v733_v28 = vld [vmem:[%s936_s0 + $0x34] ss:$8 sps:$4 sm:$0xff]  }
   0xa   :  { %v736_v25 = vld [vmem:[%s936_s0 + $0x64] ss:$8 sps:$4 sm:$0xff]   ;;  %v738_v27 = vld [vmem:[%s936_s0 + $0x60] ss:$8 sps:$4 sm:$0xff]   ;;  %v739_v29 = vld [vmem:[%s936_s0 + $0x74] ss:$8 sps:$4 sm:$0xff]  }
   0xb   :  { %627 = vmatpush3.bf16.msra.mxu0 %v707_v5  ;;  %696 = vmatpush3.bf16.msra.mxu1 %v707_v5  ;;  %v735_v30 = vld [vmem:[%s936_s0 + $0x30] ss:$8 sps:$4 sm:$0xff]   ;;  %v866_v34 = vld [vmem:[%s937_s2] ss:$0 sm:$0xff] }
   0xc   :  { %628 = vmatprep.subr.bf16.mxu0 %v708_v6  ;;  %689 = vmatprep.subr.bf16.mxu1 %v708_v6  ;;  %v741_v31 = vld [vmem:[%s936_s0 + $0x70] ss:$8 sps:$4 sm:$0xff]  }
   0xf   :  { %629 = vmatpush3.bf16.msra.mxu0 %v709_v7  ;;  %697 = vmatpush3.bf16.msra.mxu1 %v709_v7 }
  0x10   :  { %630 = vmatprep.subr.bf16.mxu0 %v710_v8  ;;  %690 = vmatprep.subr.bf16.mxu1 %v710_v8 }
  0x13   :  { %631 = vmatpush3.bf16.msra.mxu0 %v711_v9  ;;  %698 = vmatpush3.bf16.msra.mxu1 %v711_v9 }
  0x14   :  { %632 = vmatprep.subr.bf16.mxu0 %v712_v10  ;;  %691 = vmatprep.subr.bf16.mxu1 %v712_v10 }
  0x17   :  { %633 = vmatpush3.bf16.msra.mxu0 %v713_v12  ;;  %699 = vmatpush3.bf16.msra.mxu1 %v713_v12 }
  0x18   :  { %634 = vmatprep.subr.bf16.mxu0 %v714_v14  ;;  %692 = vmatprep.subr.bf16.mxu1 %v714_v14 }
  0x1b   :  { %635 = vmatpush3.bf16.msra.mxu0 %v715_v15  ;;  %700 = vmatpush3.bf16.msra.mxu1 %v715_v15 }
  0x1c   :  { %636 = vmatprep.subr.bf16.mxu0 %v716_v16  ;;  %693 = vmatprep.subr.bf16.mxu1 %v716_v16 }
  0x1f   :  { %637 = vmatpush3.bf16.msra.mxu0 %v717_v17  ;;  %701 = vmatpush3.bf16.msra.mxu1 %v717_v17 }
  0x22   :  { %281 = vmatmul.mubr.bf16.vlgmr.msra.gmra.mrb[0].mxu0 %v718_v18  ;;  %313 = vmatmul.mubr.bf16.vlgmr.msra.gmra.mrb[0].mxu1 %v724_v19 }
  0x23   :  { %288 = vmatprep.mubr.bf16.mxu0 %v721_v20  ;;  %320 = vmatprep.mubr.bf16.mxu1 %v730_v21 }
  0x2a   :  { %289 = vmatmul.mubr.bf16.gmra.mrb[4].mxu0 %v723_v22  ;;  %321 = vmatmul.mubr.bf16.gmra.mrb[4].mxu1 %v732_v23 }
  0x2b   :  { %296 = vmatprep.mubr.bf16.mxu0 %v727_v24  ;;  %328 = vmatprep.mubr.bf16.mxu1 %v736_v25 }
  0x32   :  { %297 = vmatmul.mubr.bf16.gmra.mrb[8].mxu0 %v729_v26  ;;  %329 = vmatmul.mubr.bf16.gmra.mrb[8].mxu1 %v738_v27 }
  0x33   :  { %304 = vmatprep.mubr.bf16.mxu0 %v733_v28  ;;  %336 = vmatprep.mubr.bf16.mxu1 %v739_v29 }
  0x3a   :  { %305 = vmatmul.mubr.bf16.gmra.mrb[12].mxu0 %v735_v30  ;;  %337 = vmatmul.mubr.bf16.gmra.mrb[12].mxu1 %v741_v31 }
  0xf5   :  { %v638_v32 = vpop.f32.mrb[0].mxu0  ;;  %v662_v33 = vpop.f32.mrb[0].mxu1 }
  0xf6   :  { %v639_v35 = vpop.f32.mrb[1].mxu0  ;;  %v663_v36 = vpop.f32.mrb[1].mxu1 }
  0xf7   :  { %v640_v37 = vadd.f32 %v639_v35, %v638_v32  ;;  %v641_v38 = vpop.f32.mrb[2].mxu0  ;;  %v664_v39 = vadd.f32 %v663_v36, %v662_v33  ;;  %v665_v40 = vpop.f32.mrb[2].mxu1 }
  0xf8   :  { %v642_v41 = vpop.f32.mrb[3].mxu0  ;;  %v666_v42 = vpop.f32.mrb[3].mxu1 }
  0xf9   :  { %v283_v43 = vadd.f32 %v640_v37, %v866_v34  ;;  %v643_v44 = vadd.f32 %v642_v41, %v641_v38  ;;  %v315_v45 = vadd.f32 %v664_v39, %v866_v34  ;;  %v667_v46 = vadd.f32 %v666_v42, %v665_v40 }
  0xfb   :  { %v345_v47 = vmax.f32 %v283_v43, 0.0  ;;  %v286_v48 = vadd.f32 %v643_v44, %v866_v34  ;;  %v318_v49 = vadd.f32 %v667_v46, %v866_v34  ;;  %v872_v50 = vmax.f32 %v315_v45, 0.0 }
  0xfd   :  { %v346_v51 = vmax.f32 %v286_v48, 0.0  ;;  %v644_v52 = vpop.f32.mrb[4].mxu0  ;;  %v874_v53 = vmax.f32 %v318_v49, 0.0  ;;  %v668_v54 = vpop.f32.mrb[4].mxu1  ;;  %v462_v55 = vmul.f32 %v345_v47, %v345_v47 }
  0xfe   :  { %v645_v56 = vpop.f32.mrb[5].mxu0  ;;  %v669_v57 = vpop.f32.mrb[5].mxu1 }
  0xff   :  { %v578_v58 = vpack.c.bf16 %v346_v51, %v345_v47  ;;  %v441_v59 = vadd.f32 %v346_v51, %v345_v47  ;;  %v463_v60 = vmul.f32 %v346_v51, %v346_v51  ;;  %v646_v61 = vadd.f32 %v645_v56, %v644_v52  ;;  %v647_v62 = vpop.f32.mrb[6].mxu0  ;;  %v671_v63 = vpop.f32.mrb[6].mxu1 }
 0x100   :  { %v648_v0 = vpop.f32.mrb[7].mxu0  ;;  %v598_v1 = vpack.c.bf16 %v874_v53, %v872_v50  ;;  %v670_v2 = vadd.f32 %v669_v57, %v668_v54  ;;  %v672_v3 = vpop.f32.mrb[7].mxu1 }
 0x101   :  { %579 = vst [vmem:[%s938_s3] sm:$0xff] %v578_v58   ;;  %v478_v4 = vadd.f32 %v463_v60, %v462_v55  ;;  %v291_v5 = vadd.f32 %v646_v61, %v866_v34  ;;  %v649_v6 = vadd.f32 %v648_v0, %v647_v62  ;;  %v673_v7 = vadd.f32 %v672_v3, %v671_v63 }
 0x102   :  { %618 = vst [vmem:[%s938_s3 + $0x20] sm:$0xff] %v598_v1   ;;  %v323_v8 = vadd.f32 %v670_v2, %v866_v34 }
 0x103   :  { %v347_v9 = vmax.f32 %v291_v5, 0.0  ;;  %v294_v10 = vadd.f32 %v649_v6, %v866_v34  ;;  %v326_v11 = vadd.f32 %v673_v7, %v866_v34 }
 0x104   :  { %v888_v12 = vmax.f32 %v323_v8, 0.0 }
 0x105   :  { %v442_v13 = vadd.f32 %v441_v59, %v347_v9  ;;  %v464_v14 = vmul.f32 %v347_v9, %v347_v9  ;;  %v348_v15 = vmax.f32 %v294_v10, 0.0  ;;  %v650_v16 = vpop.f32.mrb[8].mxu0  ;;  %v890_v17 = vmax.f32 %v326_v11, 0.0  ;;  %v674_v18 = vpop.f32.mrb[8].mxu1 }
 0x106   :  { %v651_v19 = vpop.f32.mrb[9].mxu0  ;;  %v675_v20 = vpop.f32.mrb[9].mxu1 }
 0x107   :  { %v479_v21 = vadd.f32 %v478_v4, %v464_v14  ;;  %v583_v22 = vpack.c.bf16 %v348_v15, %v347_v9  ;;  %v443_v23 = vadd.f32 %v442_v13, %v348_v15  ;;  %v465_v24 = vmul.f32 %v348_v15, %v348_v15  ;;  %v653_v25 = vpop.f32.mrb[10].mxu0  ;;  %v677_v26 = vpop.f32.mrb[10].mxu1 }
 0x108   :  { %v652_v27 = vadd.f32 %v651_v19, %v650_v16  ;;  %v654_v28 = vpop.f32.mrb[11].mxu0  ;;  %v603_v29 = vpack.c.bf16 %v890_v17, %v888_v12  ;;  %v676_v30 = vadd.f32 %v675_v20, %v674_v18  ;;  %v678_v31 = vpop.f32.mrb[11].mxu1  ;;  %v470_v19 = vmul.f32 %v872_v50, %v872_v50 }
 0x109   :  { %615 = vst [vmem:[%s938_s3 + $0x8] sm:$0xff] %v583_v22   ;;  %v480_v32 = vadd.f32 %v479_v21, %v465_v24  ;;  %v655_v33 = vadd.f32 %v654_v28, %v653_v25  ;;  %v679_v35 = vadd.f32 %v678_v31, %v677_v26  ;;  %v471_v21 = vmul.f32 %v874_v53, %v874_v53 }
 0x10a   :  { %v299_v36 = vadd.f32 %v652_v27, %v866_v34  ;;  %619 = vst [vmem:[%s938_s3 + $0x28] sm:$0xff] %v603_v29   ;;  %v331_v37 = vadd.f32 %v676_v30, %v866_v34  ;;  %v472_v24 = vmul.f32 %v888_v12, %v888_v12 }
 0x10b   :  { %v302_v38 = vadd.f32 %v655_v33, %v866_v34  ;;  %v334_v39 = vadd.f32 %v679_v35, %v866_v34 }
 0x10c   :  { %v349_v40 = vmax.f32 %v299_v36, 0.0  ;;  %v357_v41 = vmax.f32 %v331_v37, 0.0 }
 0x10d   :  { %v350_v42 = vmax.f32 %v302_v38, 0.0  ;;  %v656_v43 = vpop.f32.mrb[12].mxu0  ;;  %v358_v44 = vmax.f32 %v334_v39, 0.0  ;;  %v680_v45 = vpop.f32.mrb[12].mxu1 }
 0x10e   :  { %v444_v46 = vadd.f32 %v443_v23, %v349_v40  ;;  %v466_v47 = vmul.f32 %v349_v40, %v349_v40  ;;  %v657_v48 = vpop.f32.mrb[13].mxu0  ;;  %v681_v49 = vpop.f32.mrb[13].mxu1  ;;  %v474_v30 = vmul.f32 %v357_v41, %v357_v41 }
 0x10f   :  { %v588_v51 = vpack.c.bf16 %v350_v42, %v349_v40  ;;  %v467_v52 = vmul.f32 %v350_v42, %v350_v42  ;;  %v658_v54 = vadd.f32 %v657_v48, %v656_v43  ;;  %v659_v55 = vpop.f32.mrb[14].mxu0  ;;  %v608_v56 = vpack.c.bf16 %v358_v44, %v357_v41  ;;  %v683_v57 = vpop.f32.mrb[14].mxu1 }
 0x110   :  { %v481_v58 = vadd.f32 %v480_v32, %v466_v47  ;;  %v445_v59 = vadd.f32 %v444_v46, %v350_v42  ;;  %v660_v60 = vpop.f32.mrb[15].mxu0  ;;  %v682_v61 = vadd.f32 %v681_v49, %v680_v45  ;;  %v684_v62 = vpop.f32.mrb[15].mxu1  ;;  %v475_v35 = vmul.f32 %v358_v44, %v358_v44 }
 0x111   :  { %616 = vst [vmem:[%s938_s3 + $0x10] sm:$0xff] %v588_v51   ;;  %v307_v63 = vadd.f32 %v658_v54, %v866_v34  ;;  %v661_v0 = vadd.f32 %v660_v60, %v659_v55  ;;  %620 = vst [vmem:[%s938_s3 + $0x30] sm:$0xff] %v608_v56   ;;  %v685_v1 = vadd.f32 %v684_v62, %v683_v57 }
 0x112   :  { %v482_v2 = vadd.f32 %v481_v58, %v467_v52  ;;  %v339_v3 = vadd.f32 %v682_v61, %v866_v34 }
 0x113   :  { %v351_v4 = vmax.f32 %v307_v63, 0.0  ;;  %v310_v5 = vadd.f32 %v661_v0, %v866_v34  ;;  %v342_v6 = vadd.f32 %v685_v1, %v866_v34 }
 0x114   :  { %v359_v7 = vmax.f32 %v339_v3, 0.0 }
 0x115   :  { %v446_v8 = vadd.f32 %v445_v59, %v351_v4  ;;  %v468_v9 = vmul.f32 %v351_v4, %v351_v4  ;;  %v352_v10 = vmax.f32 %v310_v5, 0.0  ;;  %v360_v11 = vmax.f32 %v342_v6, 0.0 }
 0x117   :  { %v483_v13 = vadd.f32 %v482_v2, %v468_v9  ;;  %v593_v14 = vpack.c.bf16 %v352_v10, %v351_v4  ;;  %v447_v15 = vadd.f32 %v446_v8, %v352_v10  ;;  %v469_v16 = vmul.f32 %v352_v10, %v352_v10 }
 0x118   :  { %v613_v18 = vpack.c.bf16 %v360_v11, %v359_v7  ;;  %v477_v40 = vmul.f32 %v360_v11, %v360_v11 }
 0x119   :  { %617 = vst [vmem:[%s938_s3 + $0x18] sm:$0xff] %v593_v14   ;;  %v448_v20 = vadd.f32 %v447_v15, %v872_v50  ;;  %v484_v34 = vadd.f32 %v483_v13, %v469_v16  ;;  %v473_v50 = vmul.f32 %v890_v17, %v890_v17 }
 0x11a   :  { %621 = vst [vmem:[%s938_s3 + $0x38] sm:$0xff] %v613_v18  }
 0x11b   :  { %v449_v22 = vadd.f32 %v448_v20, %v874_v53  ;;  %v485_v23 = vadd.f32 %v484_v34, %v470_v19  ;;  %v476_v53 = vmul.f32 %v359_v7, %v359_v7 }
 0x11d   :  { %v486_v25 = vadd.f32 %v485_v23, %v471_v21  ;;  %v450_v26 = vadd.f32 %v449_v22, %v888_v12 }
 0x11f   :  { %v451_v27 = vadd.f32 %v450_v26, %v890_v17  ;;  %v487_v28 = vadd.f32 %v486_v25, %v472_v24 }
 0x121   :  { %v452_v29 = vadd.f32 %v451_v27, %v357_v41  ;;  %v488_v31 = vadd.f32 %v487_v28, %v473_v50 }
 0x123   :  { %v489_v32 = vadd.f32 %v488_v31, %v474_v30  ;;  %v453_v33 = vadd.f32 %v452_v29, %v358_v44 }
 0x125   :  { %v490_v36 = vadd.f32 %v489_v32, %v475_v35  ;;  %v454_v37 = vadd.f32 %v453_v33, %v359_v7 }
 0x127   :  { %v491_v38 = vadd.f32 %v490_v36, %v476_v53  ;;  %v455_v39 = vadd.f32 %v454_v37, %v360_v11 }
 0x129   :  { %v456_v42 = vrot.slane %v455_v39, 4  ;;  %v492_v12 = vadd.f32 %v491_v38, %v477_v40 }
 0x12b   :  { %v457_v43 = vadd.f32 %v456_v42, %v455_v39  ;;  %v493_v45 = vrot.slane %v492_v12, 4 }
 0x12d   :  { %v458_v46 = vrot.slane %v457_v43, 2  ;;  %v494_v47 = vadd.f32 %v493_v45, %v492_v12 }
 0x12f   :  { %v459_v17 = vadd.f32 %v458_v46, %v457_v43  ;;  %v495_v48 = vrot.slane %v494_v47, 2 }
 0x131   :  { %v460_v49 = vrot.slane %v459_v17, 1  ;;  %v496_v41 = vadd.f32 %v495_v48, %v494_v47 }
 0x133   :  { %v497_v51 = vrot.slane %v496_v41, 1  ;;  %v461_v52 = vadd.f32 %v460_v49, %v459_v17 }
 0x135   :  { %v498_v44 = vadd.f32 %v497_v51, %v496_v41 }
 0x137   :  { %v500_v54 = vsel %vm499_vm0, %v461_v52, %v498_v44 }
 0x138   :  { %501 = vst [vmem:[%s939_s4] sm:$0x3] %v500_v54 }

// kernel: encoder_forward.5
= control target key start
LH: loop header
LB: loop body
LE: loop exit
PB: predicated region body
PF: predicated region fallthrough
CT: control target
= control target key end

     0   :  { %v48_v8 = vlaneseq  ;;  %v12910_v16 = vmov 0   ;;  %vm583_vm14 = vsmask.f32 7424  ;;  %s12890_s0 = inlined_call_operand.vmem [shape: bf16[2,64,128], index: 0, kind: input, shape index: {}]   ;;  %s12891_s1 = inlined_call_operand.vmem [shape: f32[1,128], index: 1, kind: input, shape index: {}]   ;;  %s12892_s2 = inlined_call_operand.vmem [shape: f32[1,128], index: 2, kind: input, shape index: {}]   ;;  %s12893_s3 = inlined_call_operand.vmem [shape: bf16[1152,128], index: 3, kind: input, shape index: {}]   ;;  %s12894_s4 = inlined_call_operand.vmem [shape: f32[1,128], index: 4, kind: input, shape index: {}]   ;;  %s12895_s5 = inlined_call_operand.vmem [shape: bf16[2,1152,128], index: 5, kind: input, shape index: {}]   ;;  %s12896_s6 = inlined_call_operand.vmem [shape: bf16[2,128,128], index: 6, kind: input, shape index: {}]   ;;  %s12897_s7 = inlined_call_operand.vmem [shape: bf16[128,128], index: 7, kind: input, shape index: {}]   ;;  %s12898_s8 = inlined_call_operand.vmem [shape: f32[1,128], index: 8, kind: input, shape index: {}]   ;;  %s12899_s9 = inlined_call_operand.vmem [shape: bf16[128,128], index: 9, kind: input, shape index: {}]   ;;  %s12900_s10 = inlined_call_operand.vmem [shape: f32[1,128], index: 10, kind: input, shape index: {}]   ;;  %s12901_s11 = inlined_call_operand.vmem [shape: bf16[128,128], index: 11, kind: input, shape index: {}]   ;;  %s12902_s12 = inlined_call_operand.vmem [shape: f32[1,128], index: 12, kind: input, shape index: {}]   ;;  %s12903_s13 = inlined_call_operand.hbm [shape: f32[2,1,128], index: 13, kind: output, shape index: {}]  }
   0x1   :  { %v9354_v0 = vld [vmem:[%s12893_s3 + $0x40] sm:$0xff]   ;;  %v9358_v4 = vld [vmem:[%s12893_s3 + $0x48] sm:$0xff]   ;;  %v9362_v9 = vld [vmem:[%s12893_s3 + $0x50] sm:$0xff]   ;;  %v9760_v17 = vrot.slane %v12910_v16, 1  ;;  %v9766_v19 = vrot.slane %v12910_v16, 4  ;;  %v855_v52 = vrot.slane %v12910_v16, 3 }
   0x2   :  { %v9355_v1 = vld [vmem:[%s12893_s3] sm:$0xff]   ;;  %8192 = vmatprep.subr.bf16.mxu0 %v9354_v0  ;;  %v9359_v5 = vld [vmem:[%s12893_s3 + $0x8] sm:$0xff]   ;;  %v9363_v10 = vld [vmem:[%s12893_s3 + $0x10] sm:$0xff]   ;;  %v9751_v13 = vshrl.u32 %v48_v8, 7 }
   0x3   :  { %v9356_v2 = vld [vmem:[%s12893_s3 + $0xc0] sm:$0xff]   ;;  %8193 = vmatpush3.bf16.msra.mxu0 %v9355_v1  ;;  %v9360_v6 = vld [vmem:[%s12893_s3 + $0xc8] sm:$0xff]   ;;  %v9364_v11 = vld [vmem:[%s12893_s3 + $0xd0] sm:$0xff]   ;;  %13025 = vst [vmem:[#allocation6_spill] sm:$0xff] %v9766_v19 }
   0x4   :  { %v9357_v3 = vld [vmem:[%s12893_s3 + $0x80] sm:$0xff]   ;;  %8256 = vmatprep.subr.bf16.mxu1 %v9356_v2  ;;  %8194 = vmatprep.subr.bf16.mxu0 %v9358_v4  ;;  %v9361_v7 = vld [vmem:[%s12893_s3 + $0x88] sm:$0xff]   ;;  %v9365_v12 = vld [vmem:[%s12893_s3 + $0x90] sm:$0xff]   ;;  %13024 = vst [vmem:[#allocation5_spill] sm:$0xff] %v9751_v13  ;;  %v50_v21 = vadd.s32 8, %v9751_v13  ;;  %v51_v23 = vadd.s32 16, %v9751_v13 }
   0x5   :  { %8257 = vmatpush3.bf16.msra.mxu1 %v9357_v3  ;;  %v9366_v14 = vld [vmem:[%s12893_s3 + $0x58] sm:$0xff]   ;;  %v9370_v22 = vld [vmem:[%s12893_s3 + $0x60] sm:$0xff]   ;;  %v52_v25 = vadd.s32 24, %v9751_v13  ;;  %v61_v27 = vand.u32 7, %v9751_v13  ;;  %v9374_v30 = vld [vmem:[%s12893_s3 + $0x68] sm:$0xff]   ;;  %v53_v36 = vadd.s32 32, %v9751_v13 }
   0x6   :  { %8258 = vmatprep.subr.bf16.mxu1 %v9360_v6  ;;  %v9367_v15 = vld [vmem:[%s12893_s3 + $0x18] sm:$0xff]   ;;  %v9371_v24 = vld [vmem:[%s12893_s3 + $0x20] sm:$0xff]   ;;  %v68_v29 = vand.u32 7, %v50_v21  ;;  %v75_v31 = vand.u32 7, %v51_v23  ;;  %v9375_v32 = vld [vmem:[%s12893_s3 + $0x28] sm:$0xff]   ;;  %v54_v39 = vadd.s32 40, %v9751_v13 }
   0x7   :  { %8195 = vmatpush3.bf16.msra.mxu0 %v9359_v5  ;;  %v9368_v18 = vld [vmem:[%s12893_s3 + $0xd8] sm:$0xff]   ;;  %v9372_v26 = vld [vmem:[%s12893_s3 + $0xe0] sm:$0xff]   ;;  %v82_v33 = vand.u32 7, %v52_v25  ;;  %v9376_v34 = vld [vmem:[%s12893_s3 + $0xe8] sm:$0xff]   ;;  %vm9796_vm0 = vcmp.ge.s32.totalorder %v61_v27, 1  ;;  %vm9826_vm4 = vcmp.lt.s32.totalorder %v61_v27, 7 }
   0x8   :  { %8196 = vmatprep.subr.bf16.mxu0 %v9362_v9  ;;  %v9369_v20 = vld [vmem:[%s12893_s3 + $0x98] sm:$0xff]   ;;  %v9373_v28 = vld [vmem:[%s12893_s3 + $0xa0] sm:$0xff]   ;;  %v9377_v37 = vld [vmem:[%s12893_s3 + $0xa8] sm:$0xff]   ;;  %vm9804_vm1 = vcmp.ge.s32.totalorder %v68_v29, 1  ;;  %vm9812_vm2 = vcmp.ge.s32.totalorder %v75_v31, 1  ;;  %v89_v46 = vand.u32 7, %v53_v36 }
   0x9   :  { %8259 = vmatpush3.bf16.msra.mxu1 %v9361_v7  ;;  %v9378_v40 = vld [vmem:[%s12893_s3 + $0x70] sm:$0xff]   ;;  %vm9819_vm3 = vcmp.ge.s32.totalorder %v82_v33, 1  ;;  %v96_v48 = vand.u32 7, %v54_v39  ;;  %v9382_v49 = vld [vmem:[%s12893_s3 + $0x78] sm:$0xff]   ;;  %vm9836_vm5 = vcmp.lt.s32.totalorder %v68_v29, 7  ;;  %v8154_v55 = vld [vmem:[%s12890_s0] sm:$0xff]  }
   0xa   :  { %8260 = vmatprep.subr.bf16.mxu1 %v9364_v11  ;;  %v9379_v42 = vld [vmem:[%s12893_s3 + $0x30] sm:$0xff]   ;;  %v9383_v51 = vld [vmem:[%s12893_s3 + $0x38] sm:$0xff]   ;;  %vm9847_vm6 = vcmp.ge.s32.totalorder %v89_v46, 1  ;;  %v8185_v56 = vld [vmem:[%s12890_s0 + $0x8] sm:$0xff]   ;;  %vm9866_vm8 = vcmp.lt.s32.totalorder %v75_v31, 7  ;;  %v8155_v60 = vunpack.c.l.bf16 %v8154_v55  ;;  %v8156_v61 = vunpack.c.h.bf16 %v8154_v55 }
   0xb   :  { %8197 = vmatpush3.bf16.msra.mxu0 %v9363_v10  ;;  %v9380_v44 = vld [vmem:[%s12893_s3 + $0xf0] sm:$0xff]   ;;  %v9384_v53 = vld [vmem:[%s12893_s3 + $0xf8] sm:$0xff]   ;;  %v9860_v57 = vld [vmem:[%s12891_s1] ss:$0 sm:$0xff]  ;;  %vm9862_vm7 = vcmp.ge.s32.totalorder %v96_v48, 1  ;;  %v8159_v62 = vunpack.c.l.bf16 %v8185_v56  ;;  %v8160_v63 = vunpack.c.h.bf16 %v8185_v56  ;;  %vm9884_vm10 = vcmp.lt.s32.totalorder %v82_v33, 7 }
   0xc   :  { %8198 = vmatprep.subr.bf16.mxu0 %v9366_v14  ;;  %v9381_v47 = vld [vmem:[%s12893_s3 + $0xb0] sm:$0xff]   ;;  %v9873_v0 = vld [vmem:[%s12892_s2] ss:$0 sm:$0xff]  ;;  %v9385_v1 = vld [vmem:[%s12893_s3 + $0xb8] sm:$0xff]   ;;  %vm9888_vm11 = vcmp.lt.s32.totalorder %v89_v46, 7  ;;  %vm9892_vm12 = vcmp.lt.s32.totalorder %v96_v48, 7  ;;  %v208_v7 = vmul.f32 %v8155_v60, %v9860_v57  ;;  %v209_v8 = vmul.f32 %v8156_v61, %v9860_v57 }
   0xd   :  { %8261 = vmatpush3.bf16.msra.mxu1 %v9365_v12  ;;  %vm415_vm9 = vmpackc.low %vm9796_vm0, %vm9796_vm0  ;;  %v9386_v2 = vld [vmem:[%s12893_s3 + $0x140] sm:$0xff]   ;;  %v9897_v6 = vadd.s32 48, %v9751_v13  ;;  %v210_v9 = vmul.f32 %v8159_v62, %v9860_v57  ;;  %v211_v10 = vmul.f32 %v8160_v63, %v9860_v57  ;;  %v9912_v14 = vor.u32 %v855_v52, %v9766_v19 }
   0xe   :  { %8262 = vmatprep.subr.bf16.mxu1 %v9368_v18  ;;  %vm416_vm13 = vmpackc.low %vm9804_vm1, %vm9804_vm1  ;;  %v423_v11 = vsel %vm415_vm9, 65537, %v12910_v16  ;;  %v232_v18 = vadd.f32 %v9873_v0, %v209_v8  ;;  %vm443_vm1 = vsmask.f32 3328 }
   0xf   :  { %8199 = vmatpush3.bf16.msra.mxu0 %v9367_v15  ;;  %vm417_vm15 = vmpackc.low %vm9812_vm2, %vm9812_vm2  ;;  %v424_v12 = vsel %vm416_vm13, 65537, %v12910_v16  ;;  %v231_v15 = vadd.f32 %v9873_v0, %v208_v7  ;;  %v234_v21 = vadd.f32 %v9873_v0, %v211_v10 }
  0x10   :  { %8200 = vmatprep.subr.bf16.mxu0 %v9370_v22  ;;  %vm418_vm0 = vmpackc.low %vm9819_vm3, %vm9819_vm3  ;;  %v9924_v22 = vld [vmem:[%s12890_s0 + $0x10] sm:$0xff]   ;;  %v425_v23 = vsel %vm417_vm15, 65537, %v12910_v16  ;;  %v9928_v25 = vcombine.low %v423_v11, %v424_v12  ;;  %vm535_vm15 = vsmask.f32 4352 }
  0x11   :  { %8263 = vmatpush3.bf16.msra.mxu1 %v9369_v20  ;;  %v233_v20 = vadd.f32 %v9873_v0, %v210_v9  ;;  %vm507_vm2 = vmpackc.low %vm9826_vm4, %vm9826_vm4  ;;  %v9934_v27 = vpack.c.bf16 %v232_v18, %v231_v15 }
  0x12   :  { %8264 = vmatprep.subr.bf16.mxu1 %v9372_v26  ;;  %v8163_v26 = vunpack.c.l.bf16 %v9924_v22  ;;  %vm508_vm3 = vmpackc.low %vm9836_vm5, %vm9836_vm5  ;;  %v445_v31 = vshrl.u32 %v9928_v25, 16 }
  0x13   :  { %8201 = vmatpush3.bf16.msra.mxu0 %v9371_v24  ;;  %v426_v24 = vsel %vm418_vm0, 65537, %v12910_v16  ;;  %vm419_vm4 = vmpackc.low %vm9847_vm6, %vm9847_vm6  ;;  %v9952_v33 = vsel %vm508_vm3, 65537, %v12910_v16  ;;  %v657_v35 = vshll.u32 %v9934_v27, 16  ;;  %v661_v36 = vshrl.u32 %v9934_v27, 16 }
  0x14   :  { %8202 = vmatprep.subr.bf16.mxu0 %v9374_v30  ;;  %v9938_v29 = vcombine.low %v425_v23, %v426_v24  ;;  %v9944_v30 = vsel %vm507_vm2, 65537, %v12910_v16  ;;  %vm420_vm5 = vmpackc.low %vm9862_vm7, %vm9862_vm7  ;;  %v447_v39 = vrot.slane %v445_v31, 4  ;;  %v9396_v23 = vld [vmem:[%s12893_s3 + $0x1c0] sm:$0xff]   ;;  %vm729_vm3 = vcmask 1046528  }
  0x15   :  { %8265 = vmatpush3.bf16.msra.mxu1 %v9373_v28  ;;  %v9936_v28 = vpack.c.bf16 %v234_v21, %v233_v20  ;;  %vm509_vm6 = vmpackc.low %vm9866_vm8, %vm9866_vm8  ;;  %v659_v43 = vrot.slane %v657_v35, 1  ;;  %v9973_v45 = vrot.slane %v661_v36, 4  ;;  %v9975_v46 = vrot.slane %v657_v35, 5 }
  0x16   :  { %8266 = vmatprep.subr.bf16.mxu1 %v9376_v34  ;;  %v8164_v34 = vunpack.c.h.bf16 %v9924_v22  ;;  %v453_v38 = vshrl.u32 %v9938_v29, 16  ;;  %v456_v41 = vshll.u32 %v9938_v29, 16  ;;  %vm510_vm9 = vmpackc.low %vm9884_vm10, %vm9884_vm10  ;;  %v517_v54 = vsel %vm509_vm6, 65537, %v12910_v16 }
  0x17   :  { %8203 = vmatpush3.bf16.msra.mxu0 %v9375_v32  ;;  %v448_v32 = vshll.u32 %v9928_v25, 16  ;;  %vm511_vm13 = vmpackc.low %vm9888_vm11, %vm9888_vm11  ;;  %v663_v52 = vor.u32 %v661_v36, %v659_v43  ;;  %v518_v62 = vsel %vm510_vm9, 65537, %v12910_v16  ;;  %vm12944_vm8 = vcmask 1043456  }
  0x18   :  { %8204 = vmatprep.subr.bf16.mxu0 %v9378_v40  ;;  %v458_v50 = vrot.slane %v456_v41, 5  ;;  %vm512_vm0 = vmpackc.low %vm9892_vm12, %vm9892_vm12  ;;  %v519_v63 = vsel %vm511_vm13, 65537, %v12910_v16  ;;  %v10026_v10 = vcombine.low %v517_v54, %v518_v62  ;;  %v213_v29 = vmul.f32 %v8164_v34, %v9860_v57 }
  0x19   :  { %8267 = vmatpush3.bf16.msra.mxu1 %v9377_v37  ;;  %v665_v37 = vshll.u32 %v9936_v28, 16  ;;  %v450_v40 = vrot.slane %v448_v32, 5  ;;  %v520_v59 = vsel %vm512_vm0, 65537, %v12910_v16  ;;  %v584_v62 = vrot.slane %v448_v32, 1  ;;  %v9388_v32 = vld [vmem:[%s12893_s3 + $0x148] sm:$0xff]  }
  0x1a   :  { %8268 = vmatprep.subr.bf16.mxu1 %v9380_v44  ;;  %v10034_v21 = vcombine.low %v519_v63, %v520_v59  ;;  %v9387_v63 = vld [vmem:[%s12893_s3 + $0x100] sm:$0xff]  }
  0x1b   :  { %8205 = vmatpush3.bf16.msra.mxu0 %v9379_v42  ;;  %v427_v42 = vsel %vm419_vm4, 65537, %v12910_v16  ;;  %v9971_v44 = vrot.slane %v665_v37, 1  ;;  %v9982_v48 = vor.u32 %v450_v40, %v447_v39  ;;  %v12906_v40 = vshll.u32 %v10026_v10, 16 }
  0x1c   :  { %8206 = vmatprep.subr.bf16.mxu0 %v9382_v49  ;;  %v455_v49 = vrot.slane %v453_v38, 4 }
  0x1d   :  { %8269 = vmatpush3.bf16.msra.mxu1 %v9381_v47  ;;  %v9980_v47 = vrot.slane %v665_v37, 5  ;;  %v668_v58 = vsel %vm583_vm14, %v663_v52, %v9971_v44  ;;  %v12908_v37 = vshrl.u32 %v10026_v10, 16  ;;  %v550_v54 = vrot.slane %v12906_v40, 4 }
  0x1e   :  { %8270 = vmatprep.subr.bf16.mxu1 %v9384_v53  ;;  %v428_v53 = vsel %vm420_vm5, 65537, %v12910_v16  ;;  %v459_v60 = vor.u32 %v458_v50, %v455_v49  ;;  %v876_v4 = vshrl.u32 %v668_v58, 16  ;;  %v879_v5 = vshll.u32 %v668_v58, 16 }
  0x1f   :  { %8207 = vmatpush3.bf16.msra.mxu0 %v9383_v51  ;;  %v660_v51 = vsel %vm583_vm14, %v9760_v17, %v659_v43  ;;  %v10008_v61 = vcombine.low %v427_v42, %v428_v53  ;;  %v12905_v42 = vshrl.u32 %v10034_v21, 16  ;;  %v12904_v43 = vshll.u32 %v10034_v21, 16 }
  0x20   :  { %8320 = vmatprep.subr.bf16.mxu0 %v9386_v2  ;;  %v868_v55 = vshrl.u32 %v660_v51, 16  ;;  %v871_v56 = vshll.u32 %v660_v51, 16  ;;  %v10022_v7 = vsel %vm443_vm1, %v9982_v48, %v459_v60  ;;  %v878_v11 = vrot.slane %v876_v4, 3 }
  0x21   :  { %8271 = vmatpush3.bf16.msra.mxu1 %v9385_v1  ;;  %v462_v8 = vshrl.u32 %v10008_v61, 16  ;;  %v465_v9 = vshll.u32 %v10008_v61, 16  ;;  %v881_v12 = vrot.slane %v879_v5, 4  ;;  %vm479_vm7 = vcmp.ne.s16.totalorder %v10022_v7, 0 }
  0x22   :  { %v870_v1 = vrot.slane %v868_v55, 3  ;;  %v873_v2 = vrot.slane %v871_v56, 4  ;;  %v483_v15 = vsel %vm479_vm7, %v9934_v27, 0  ;;  %8384 = vmatprep.subr.bf16.mxu1 %v9396_v23  ;;  %v547_v52 = vrot.slane %v12908_v37, 3 }
  0x23   :  { %v464_v18 = vrot.slane %v462_v8, 4  ;;  %v467_v20 = vrot.slane %v465_v9, 5  ;;  %v10039_v24 = vor.u32 %v881_v12, %v878_v11  ;;  %v859_v35 = vshrl.u32 %v483_v15, 16  ;;  %v9390_v12 = vld [vmem:[%s12893_s3 + $0x150] sm:$0xff]  }
  0x24   :  { %v874_v3 = vor.u32 %v873_v2, %v870_v1  ;;  %v862_v36 = vshll.u32 %v483_v15, 16  ;;  %v556_v55 = vrot.slane %v12905_v42, 3  ;;  %v559_v56 = vrot.slane %v12904_v43, 4 }
  0x25   :  { %v10042_v39 = vor.u32 %v467_v20, %v464_v18  ;;  %v861_v50 = vrot.slane %v859_v35, 3  ;;  %v551_v59 = vor.u32 %v550_v54, %v547_v52  ;;  %v10073_v2 = vrot.slane %v465_v9, 1 }
  0x26   :  { %v883_v49 = vsel %vm535_vm15, %v874_v3, %v10039_v24  ;;  %v864_v51 = vrot.slane %v862_v36, 4  ;;  %v10071_v1 = vor.u32 %v559_v56, %v556_v55  ;;  %v10077_v4 = vcombine.low %v9944_v30, %v9952_v33  ;;  %v9389_v30 = vld [vmem:[%s12893_s3 + $0x108] sm:$0xff]   ;;  %v9391_v56 = vld [vmem:[%s12893_s3 + $0x110] sm:$0xff]  }
  0x27   :  { %2089 = vmatprep.mubr.bf16.mxu0 %v883_v49  ;;  %v10053_v53 = vsel %vm443_vm1, %v459_v60, %v10042_v39  ;;  %v586_v60 = vrot.slane %v456_v41, 1  ;;  %v585_v5 = vor.u32 %v584_v62, %v445_v31  ;;  %v212_v9 = vmul.f32 %v8163_v26, %v9860_v57 }
  0x28   :  { %v10061_v58 = vor.u32 %v864_v51, %v861_v50  ;;  %vm12909_vm10 = vcmp.ne.s16.totalorder %v10053_v53, 0  ;;  %v10097_v33 = vsel %vm535_vm15, %v551_v59, %v10071_v1  ;;  %v12916_v11 = vshrl.u32 %v10077_v4, 16 }
  0x29   :  { %v588_v3 = vor.u32 %v586_v60, %v453_v38  ;;  %13050 = vst [vmem:[#allocation7_spill] sm:$0xff] %v10097_v33  ;;  %v12912_v25 = vshll.u32 %v10077_v4, 16  ;;  %vm572_vm11 = vcmp.ne.s16.totalorder %v10097_v33, 0  ;;  %v10106_v26 = vsel %vm583_vm14, %v585_v5, %v586_v60 }
  0x2a   :  { %v866_v41 = vsel %vm535_vm15, %v9912_v14, %v10061_v58  ;;  %13051 = vst [vmem:[#allocation8_spill] sm:$0xff] %v10106_v26  ;;  %v235_v38 = vadd.f32 %v9873_v0, %v212_v9  ;;  %vm12932_vm12 = vcmp.ne.s16.totalorder %v10106_v26, 0  ;;  %v539_v22 = vrot.slane %v12916_v11, 3 }
  0x2b   :  { %2090 = vmatmul.mubr.bf16.vlgmr.msra.gmra.mrb[0].mxu0 %v866_v41  ;;  %v10110_v31 = vsel %vm583_vm14, %v588_v3, %v10073_v2  ;;  %v542_v34 = vrot.slane %v12912_v25, 4  ;;  %v599_v15 = vsel %vm12932_vm12, %v9934_v27, 0  ;;  %v10133_v20 = vsel %vm572_vm11, %v9936_v28, 0  ;;  %v9392_v41 = vld [vmem:[%s12893_s3 + $0x158] sm:$0xff]  }
  0x2c   :  { %13052 = vst [vmem:[#allocation9_spill] sm:$0xff] %v10110_v31  ;;  %8321 = vmatpush3.bf16.msra.mxu0 %v9387_v63  ;;  %vm12945_vm2 = vcmp.ne.s16.totalorder %v10110_v31, 0  ;;  %v236_v23 = vadd.f32 %v9873_v0, %v213_v29  ;;  %v757_v35 = vrot.slane %v599_v15, 4  ;;  %v12917_v50 = vrot.slane %v10133_v20, 1  ;;  %v9393_v29 = vld [vmem:[%s12893_s3 + $0x118] sm:$0xff]  }
  0x2d   :  { %8322 = vmatprep.subr.bf16.mxu0 %v9388_v32  ;;  %v10128_v18 = vsel %vm12945_vm2, %v9936_v28, 0  ;;  %v10137_v49 = vor.u32 %v542_v34, %v539_v22  ;;  %v669_v52 = vshrl.u32 %v9936_v28, 16  ;;  %v484_v54 = vsel %vm12909_vm10, %v9936_v28, 0 }
  0x2e   :  { %v759_v36 = vrot.slane %v10128_v18, 4  ;;  %v10140_v51 = vpack.c.bf16 %v236_v23, %v235_v38  ;;  %v10147_v55 = vadd.s32 56, %v9751_v13  ;;  %v758_v62 = vsel %vm12944_vm8, %v9766_v19, %v757_v35 }
  0x2f   :  { %13053 = vst [vmem:[#allocation10_spill] sm:$0xff] %v10137_v49  ;;  %v10159_v63 = vsel %vm535_vm15, %v10137_v49, %v551_v59  ;;  %v996_v32 = vshrl.u32 %v484_v54, 16  ;;  %v902_v5 = vshrl.u32 %v758_v62, 16  ;;  %v905_v3 = vshll.u32 %v758_v62, 16 }
  0x30   :  { %8323 = vmatpush3.bf16.msra.mxu0 %v9389_v30  ;;  %v760_v60 = vsel %vm12944_vm8, %v757_v35, %v759_v36  ;;  %vm571_vm4 = vcmp.ne.s16.totalorder %v10159_v63, 0  ;;  %v671_v38 = vor.u32 %v669_v52, %v9971_v44  ;;  %v12907_v59 = vshll.u32 %v10140_v51, 16 }
  0x31   :  { %8324 = vmatprep.subr.bf16.mxu0 %v9390_v12  ;;  %v910_v9 = vshrl.u32 %v760_v60, 16  ;;  %v913_v30 = vshll.u32 %v760_v60, 16  ;;  %v10170_v22 = vrot.slane %v669_v52, 4  ;;  %v9394_v12 = vld [vmem:[%s12893_s3 + $0x160] sm:$0xff]   ;;  %v904_v34 = vrot.slane %v902_v5, 3 }
  0x32   :  { %v907_v15 = vrot.slane %v905_v3, 4  ;;  %v575_v62 = vsel %vm571_vm4, %v9934_v27, 0  ;;  %v10180_v44 = vrot.slane %v12907_v59, 1  ;;  %v998_v60 = vrot.slane %v996_v32, 3 }
  0x33   :  { %v912_v23 = vrot.slane %v910_v9, 3  ;;  %v915_v35 = vrot.slane %v913_v30, 4  ;;  %v999_v52 = vshll.u32 %v484_v54, 16  ;;  %v731_v40 = vrot.slane %v575_v62, 1 }
  0x34   :  { %8325 = vmatpush3.bf16.msra.mxu0 %v9391_v56  ;;  %v908_v43 = vor.u32 %v907_v15, %v904_v34  ;;  %v103_v5 = vand.u32 7, %v9897_v6  ;;  %v9395_v56 = vld [vmem:[%s12893_s3 + $0x120] sm:$0xff]   ;;  %v676_v3 = vsel %vm583_vm14, %v671_v38, %v10180_v44  ;;  %v110_v30 = vand.u32 7, %v10147_v55  ;;  %v9400_v34 = vld [vmem:[%s12893_s3 + $0x168] sm:$0xff]  }
  0x35   :  { %8326 = vmatprep.subr.bf16.mxu0 %v9392_v41  ;;  %v10182_v42 = vor.u32 %v915_v35, %v912_v23  ;;  %v1001_v9 = vrot.slane %v999_v52, 4  ;;  %v732_v32 = vsel %vm729_vm3, %v9760_v17, %v731_v40  ;;  %v734_v6 = vsel %vm729_vm3, %v731_v40, %v12917_v50  ;;  %v8187_v40 = vld [vmem:[%s12890_s0 + $0x18] sm:$0xff]   ;;  %v10260_v52 = vld [vmem:[%s12890_s0 + $0x28] sm:$0xff]  }
  0x36   :  { %v970_v41 = vshrl.u32 %v676_v3, 16  ;;  %v885_v38 = vshrl.u32 %v732_v32, 16  ;;  %v888_v15 = vshll.u32 %v732_v32, 16  ;;  %v893_v55 = vshrl.u32 %v734_v6, 16  ;;  %v9398_v32 = vld [vmem:[%s12893_s3 + $0x1c8] sm:$0xff]  }
  0x37   :  { %v917_v54 = vsel %vm535_vm15, %v908_v43, %v10182_v42  ;;  %v896_v23 = vshll.u32 %v734_v6, 16  ;;  %v973_v35 = vshll.u32 %v676_v3, 16  ;;  %v10201_v62 = vor.u32 %v1001_v9, %v998_v60  ;;  %v9401_v6 = vld [vmem:[%s12893_s3 + $0x128] sm:$0xff]  }
  0x38   :  { %8327 = vmatpush3.bf16.msra.mxu0 %v9393_v29  ;;  %2186 = vmatprep.mubr.bf16.mxu1 %v917_v54  ;;  %v972_v43 = vrot.slane %v970_v41, 3  ;;  %vm10203_vm5 = vcmp.ge.s32.totalorder %v103_v5, 1  ;;  %v887_v29 = vrot.slane %v885_v38, 3  ;;  %v890_v59 = vrot.slane %v888_v15, 4  ;;  %v9412_v15 = vld [vmem:[%s12893_s3 + $0x178] sm:$0xff]  }
  0x39   :  { %8328 = vmatprep.subr.bf16.mxu0 %v9394_v12  ;;  %v895_v54 = vrot.slane %v893_v55, 3  ;;  %v898_v37 = vrot.slane %v896_v23, 4  ;;  %vm421_vm6 = vmpackc.low %vm10203_vm5, %vm10203_vm5  ;;  %v9397_v12 = vld [vmem:[%s12893_s3 + $0x180] sm:$0xff]   ;;  %v975_v60 = vrot.slane %v973_v35, 4  ;;  %v1003_v3 = vsel %vm535_vm15, %v10061_v58, %v10201_v62 }
  0x3a   :  { %vm160_vm9 = vcmp.ge.s32.totalorder %v110_v30, 1  ;;  %vm10219_vm13 = vcmp.lt.s32.totalorder %v103_v5, 7  ;;  %v891_v41 = vor.u32 %v890_v59, %v887_v29  ;;  %vm10231_vm0 = vcmp.lt.s32.totalorder %v110_v30, 7  ;;  %v10239_v5 = vld [vmem:[%s12890_s0 + $0x20] sm:$0xff]   ;;  %v9406_v30 = vld [vmem:[%s12893_s3 + $0x170] sm:$0xff]  }
  0x3b   :  { %v10229_v38 = vor.u32 %v898_v37, %v895_v54  ;;  %vm422_vm5 = vmpackc.low %vm160_vm9, %vm160_vm9  ;;  %v429_v58 = vsel %vm421_vm6, 65537, %v12910_v16  ;;  %v8167_v37 = vunpack.c.l.bf16 %v8187_v40  ;;  %v8168_v59 = vunpack.c.h.bf16 %v8187_v40  ;;  %v9399_v40 = vld [vmem:[%s12893_s3 + $0x188] sm:$0xff]   ;;  %v9407_v29 = vld [vmem:[%s12893_s3 + $0x130] sm:$0xff]  }
  0x3c   :  { %8329 = vmatpush3.bf16.msra.mxu0 %v9395_v56  ;;  %v10241_v56 = vor.u32 %v975_v60, %v972_v43  ;;  %v430_v55 = vsel %vm422_vm5, 65537, %v12910_v16  ;;  %vm513_vm10 = vmpackc.low %vm10219_vm13, %vm10219_vm13  ;;  %v12911_v43 = vshrl.u32 %v10140_v51, 16  ;;  %v13065_v13 = vrot.slane %v10133_v20, 1 }
  0x3d   :  { %8330 = vmatprep.subr.bf16.mxu0 %v9400_v34  ;;  %v900_v23 = vsel %vm535_vm15, %v891_v41, %v10229_v38  ;;  %v7726_v35 = vcombine.low %v429_v58, %v430_v55  ;;  %vm514_vm6 = vmpackc.low %vm10231_vm0, %vm10231_vm0  ;;  %v521_v34 = vsel %vm513_vm10, 65537, %v12910_v16  ;;  %v214_v9 = vmul.f32 %v8167_v37, %v9860_v57 }
  0x3e   :  { %2187 = vmatmul.mubr.bf16.vlgmr.msra.gmra.mrb[0].mxu1 %v900_v23  ;;  %v10271_v54 = vsel %vm535_vm15, %v10039_v24, %v10241_v56  ;;  %v522_v60 = vsel %vm514_vm6, 65537, %v12910_v16  ;;  %v215_v41 = vmul.f32 %v8168_v59, %v9860_v57  ;;  %v591_v24 = vor.u32 %v10073_v2, %v462_v8 }
  0x3f   :  { %2097 = vmatprep.mubr.bf16.mxu0 %v10271_v54  ;;  %v471_v58 = vshrl.u32 %v7726_v35, 16  ;;  %v474_v55 = vshll.u32 %v7726_v35, 16  ;;  %v10280_v23 = vcombine.low %v521_v34, %v522_v60  ;;  %8385 = vmatpush3.bf16.msra.mxu1 %v9397_v12  ;;  %v237_v37 = vadd.f32 %v9873_v0, %v214_v9  ;;  %v9402_v35 = vld [vmem:[%s12893_s3 + $0x1d0] sm:$0xff]  }
  0x40   :  { %8331 = vmatpush3.bf16.msra.mxu0 %v9401_v6  ;;  %v238_v6 = vadd.f32 %v9873_v0, %v215_v41  ;;  %v679_v59 = vor.u32 %v12911_v43, %v10180_v44  ;;  %v8171_v16 = vunpack.c.l.bf16 %v10239_v5  ;;  %8386 = vmatprep.subr.bf16.mxu1 %v9398_v32  ;;  %v9403_v12 = vld [vmem:[%s12893_s3 + $0x190] sm:$0xff]   ;;  %v9413_v44 = vld [vmem:[%s12893_s3 + $0x138] sm:$0xff]   ;;  %v9418_v41 = vld [vmem:[%s12893_s3 + $0x200] sm:$0xff]  }
  0x41   :  { %2098 = vmatmul.mubr.bf16.gmra.mrb[4].mxu0 %v1003_v3  ;;  %v473_v61 = vrot.slane %v471_v58, 4  ;;  %v476_v34 = vrot.slane %v474_v55, 5  ;;  %v12915_v8 = vshrl.u32 %v10280_v23, 16  ;;  %v12914_v2 = vshll.u32 %v10280_v23, 16  ;;  %8332 = vmatprep.subr.bf16.mxu0 %v9406_v30 }
  0x42   :  { %v592_v3 = vrot.slane %v474_v55, 1  ;;  %v10302_v32 = vpack.c.bf16 %v238_v6, %v237_v37 }
  0x43   :  { %v10309_v43 = vor.u32 %v476_v34, %v473_v61  ;;  %v565_v30 = vrot.slane %v12915_v8, 3  ;;  %v568_v25 = vrot.slane %v12914_v2, 4  ;;  %8387 = vmatpush3.bf16.msra.mxu1 %v9399_v40  ;;  %v10323_v61 = vmul.f32 %v8171_v16, %v9860_v57  ;;  %v9404_v34 = vld [vmem:[%s12893_s3 + $0x1d8] sm:$0xff]  }
  0x44   :  { %8333 = vmatpush3.bf16.msra.mxu0 %v9407_v29  ;;  %v10317_v37 = vsel %vm583_vm14, %v591_v24, %v592_v3  ;;  %v12913_v29 = vshll.u32 %v10302_v32, 16  ;;  %v10320_v6 = vor.u32 %v592_v3, %v471_v58  ;;  %8388 = vmatprep.subr.bf16.mxu1 %v9402_v35  ;;  %v13066_v20 = vshrl.u32 %v10302_v32, 16 }
  0x45   :  { %13060 = vst [vmem:[#allocation11_spill] sm:$0xff] %v10309_v43  ;;  %8334 = vmatprep.subr.bf16.mxu0 %v9412_v15  ;;  %13061 = vst [vmem:[#allocation12_spill] sm:$0xff] %v10317_v37  ;;  %v10331_v40 = vsel %vm443_vm1, %v10042_v39, %v10309_v43  ;;  %v10333_v15 = vor.u32 %v568_v25, %v565_v30  ;;  %vm12943_vm10 = vcmp.ne.s16.totalorder %v10317_v37, 0  ;;  %vm12940_vm0 = vcmp.ne.s16.totalorder %v10309_v43, 0  ;;  %v9405_v30 = vld [vmem:[%s12893_s3 + $0x198] sm:$0xff]  }
  0x46   :  { %13062 = vst [vmem:[#allocation13_spill] sm:$0xff] %v10320_v6  ;;  %vm481_vm9 = vcmp.ne.s16.totalorder %v10331_v40, 0  ;;  %v601_v16 = vsel %vm12943_vm10, %v10140_v51, 0  ;;  %v683_v24 = vrot.slane %v12913_v29, 1  ;;  %vm12942_vm13 = vcmp.ne.s16.totalorder %v10320_v6, 0  ;;  %v9408_v29 = vld [vmem:[%s12893_s3 + $0x1e0] sm:$0xff]  }
  0x47   :  { %13063 = vst [vmem:[#allocation14_spill] sm:$0xff] %v10333_v15  ;;  %v761_v39 = vrot.slane %v601_v16, 4  ;;  %v10348_v25 = vsel %vm535_vm15, %v10071_v1, %v10333_v15  ;;  %v485_v35 = vsel %vm481_vm9, %v10140_v51, 0  ;;  %v602_v3 = vsel %vm12942_vm13, %v10302_v32, 0  ;;  %8389 = vmatpush3.bf16.msra.mxu1 %v9403_v12 }
  0x48   :  { %8335 = vmatpush3.bf16.msra.mxu0 %v9413_v44  ;;  %13064 = vst [vmem:[#allocation15_spill] sm:$0xff] %v10348_v25  ;;  %vm573_vm5 = vcmp.ne.s16.totalorder %v10348_v25, 0  ;;  %v684_v44 = vsel %vm583_vm14, %v679_v59, %v683_v24  ;;  %v1068_v1 = vshrl.u32 %v485_v35, 16  ;;  %v1071_v16 = vshll.u32 %v485_v35, 16  ;;  %8390 = vmatprep.subr.bf16.mxu1 %v9404_v34  ;;  %v9409_v59 = vld [vmem:[%s12893_s3 + $0x1a0] sm:$0xff]  }
  0x49   :  { %9081 = vmatprep.subr.bf16.mxu0 %v9418_v41  ;;  %v762_v12 = vsel %vm12944_vm8, %v759_v36, %v761_v39  ;;  %v577_v2 = vsel %vm573_vm5, %v10140_v51, 0  ;;  %v1050_v41 = vshrl.u32 %v684_v44, 16  ;;  %v1053_v8 = vshll.u32 %v684_v44, 16 }
  0x4a   :  { %v1014_v35 = vshrl.u32 %v762_v12, 16  ;;  %v1017_v34 = vshll.u32 %v762_v12, 16  ;;  %v735_v11 = vrot.slane %v577_v2, 1  ;;  %v1070_v55 = vrot.slane %v1068_v1, 3  ;;  %v9410_v2 = vld [vmem:[%s12893_s3 + $0x1e8] sm:$0xff]  }
  0x4b   :  { %v1052_v9 = vrot.slane %v1050_v41, 3  ;;  %v1055_v60 = vrot.slane %v1053_v8, 4  ;;  %v1073_v58 = vrot.slane %v1071_v16, 4  ;;  %v10373_v18 = vrot.slane %v602_v3, 4  ;;  %8391 = vmatpush3.bf16.msra.mxu1 %v9405_v30  ;;  %v9411_v41 = vld [vmem:[%s12893_s3 + $0x1a8] sm:$0xff]  }
  0x4c   :  { %v1016_v36 = vrot.slane %v1014_v35, 3  ;;  %v1019_v50 = vrot.slane %v1017_v34, 4  ;;  %v736_v44 = vsel %vm729_vm3, %v13065_v13, %v735_v11  ;;  %vm12941_vm6 = vcmp.ne.s16.totalorder %v10333_v15, 0  ;;  %8392 = vmatprep.subr.bf16.mxu1 %v9408_v29  ;;  %v9414_v34 = vld [vmem:[%s12893_s3 + $0x1f0] sm:$0xff]  }
  0x4d   :  { %v1005_v1 = vshrl.u32 %v736_v44, 16  ;;  %v1008_v12 = vshll.u32 %v736_v44, 16  ;;  %v10382_v8 = vor.u32 %v1055_v60, %v1052_v9  ;;  %v10384_v3 = vor.u32 %v1073_v58, %v1070_v55 }
  0x4e   :  { %v1020_v30 = vor.u32 %v1019_v50, %v1016_v36  ;;  %v764_v16 = vsel %vm12944_vm8, %v761_v39, %v10373_v18  ;;  %v578_v13 = vsel %vm12941_vm6, %v10302_v32, 0  ;;  %v10393_v29 = vor.u32 %v13066_v20, %v683_v24 }
  0x4f   :  { %v1007_v60 = vrot.slane %v1005_v1, 3  ;;  %v1010_v9 = vrot.slane %v1008_v12, 4  ;;  %v10401_v50 = vsel %vm535_vm15, %v10241_v56, %v10382_v8  ;;  %v1075_v55 = vsel %vm535_vm15, %v10201_v62, %v10384_v3  ;;  %8393 = vmatpush3.bf16.msra.mxu1 %v9409_v59 }
  0x50   :  { %13067 = vst [vmem:[#allocation16_spill] sm:$0xff] %v10393_v29  ;;  %v1021_v58 = vsel %vm535_vm15, %v10182_v42, %v1020_v30  ;;  %2105 = vmatprep.mubr.bf16.mxu0 %v10401_v50  ;;  %v1086_v24 = vshrl.u32 %v764_v16, 16  ;;  %v1089_v39 = vshll.u32 %v764_v16, 16  ;;  %v737_v35 = vrot.slane %v578_v13, 1  ;;  %8394 = vmatprep.subr.bf16.mxu1 %v9410_v2 }
  0x51   :  { %2194 = vmatprep.mubr.bf16.mxu1 %v1021_v58  ;;  %v1011_v56 = vor.u32 %v1010_v9, %v1007_v60  ;;  %2106 = vmatmul.mubr.bf16.gmra.mrb[8].mxu0 %v1075_v55  ;;  %v1149_v36 = vshrl.u32 %v10393_v29, 16  ;;  %v1152_v62 = vshll.u32 %v10393_v29, 16  ;;  %v486_v42 = vsel %vm12940_vm0, %v10302_v32, 0  ;;  %v9415_v60 = vld [vmem:[%s12893_s3 + $0x1b0] sm:$0xff]  }
  0x52   :  { %v1088_v59 = vrot.slane %v1086_v24, 3  ;;  %v1091_v44 = vrot.slane %v1089_v39, 4  ;;  %v738_v1 = vsel %vm729_vm3, %v735_v11, %v737_v35  ;;  %v1140_v2 = vshrl.u32 %v486_v42, 16  ;;  %v9416_v11 = vld [vmem:[%s12893_s3 + $0x1f8] sm:$0xff]  }
  0x53   :  { %v1012_v12 = vsel %vm535_vm15, %v10229_v38, %v1011_v56  ;;  %v1077_v16 = vshrl.u32 %v738_v1, 16  ;;  %v1080_v13 = vshll.u32 %v738_v1, 16  ;;  %v1151_v20 = vrot.slane %v1149_v36, 3  ;;  %8395 = vmatpush3.bf16.msra.mxu1 %v9411_v41 }
  0x54   :  { %2195 = vmatmul.mubr.bf16.gmra.mrb[4].mxu1 %v1012_v12  ;;  %v1092_v9 = vor.u32 %v1091_v44, %v1088_v59  ;;  %v1154_v55 = vrot.slane %v1152_v62, 4  ;;  %v1142_v58 = vrot.slane %v1140_v2, 3  ;;  %v1143_v24 = vshll.u32 %v486_v42, 16  ;;  %8396 = vmatprep.subr.bf16.mxu1 %v9414_v34  ;;  %v9417_v44 = vld [vmem:[%s12893_s3 + $0x1b8] sm:$0xff]  }
  0x55   :  { %v1079_v39 = vrot.slane %v1077_v16, 3  ;;  %v1082_v38 = vrot.slane %v1080_v13, 4  ;;  %v1167_v1 = vshrl.u32 %v10373_v18, 16  ;;  %v1170_v41 = vshll.u32 %v10373_v18, 16 }
  0x56   :  { %v1093_v36 = vsel %vm535_vm15, %v1020_v30, %v1092_v9  ;;  %v1155_v49 = vor.u32 %v1154_v55, %v1151_v20  ;;  %v1145_v29 = vrot.slane %v1143_v24, 4  ;;  %v1158_v12 = vshrl.u32 %v737_v35, 16  ;;  %v10440_v20 = vld [vmem:[%s12890_s0 + $0x30] sm:$0xff]  }
  0x57   :  { %2202 = vmatprep.mubr.bf16.mxu1 %v1093_v36  ;;  %v1083_v62 = vor.u32 %v1082_v38, %v1079_v39  ;;  %v1169_v59 = vrot.slane %v1167_v1, 3  ;;  %v1172_v42 = vrot.slane %v1170_v41, 4  ;;  %v1161_v34 = vshll.u32 %v737_v35, 16  ;;  %8397 = vmatpush3.bf16.msra.mxu1 %v9415_v60 }
  0x58   :  { %v1156_v2 = vsel %vm535_vm15, %v10382_v8, %v1155_v49  ;;  %v1146_v16 = vor.u32 %v1145_v29, %v1142_v58  ;;  %v1160_v18 = vrot.slane %v1158_v12, 3  ;;  %v13068_v30 = vunpack.c.h.bf16 %v10239_v5  ;;  %8398 = vmatprep.subr.bf16.mxu1 %v9416_v11  ;;  %v10449_v5 = vld [vmem:[%s12890_s0 + $0x38] sm:$0xff]  }
  0x59   :  { %v1084_v35 = vsel %vm535_vm15, %v1011_v56, %v1083_v62  ;;  %2113 = vmatprep.mubr.bf16.mxu0 %v1156_v2  ;;  %v1173_v60 = vor.u32 %v1172_v42, %v1169_v59  ;;  %v1163_v55 = vrot.slane %v1161_v34, 4  ;;  %v13069_v49 = vunpack.c.l.bf16 %v10260_v52 }
  0x5a   :  { %v217_v13 = vmul.f32 %v13068_v30, %v9860_v57  ;;  %v1147_v58 = vsel %vm535_vm15, %v10384_v3, %v1146_v16  ;;  %v13070_v24 = vunpack.c.h.bf16 %v10260_v52  ;;  %v239_v56 = vadd.f32 %v9873_v0, %v10323_v61  ;;  %v10465_v52 = vld [vmem:[%s12892_s2] ss:$0 sm:$0xff] }
  0x5b   :  { %v218_v29 = vmul.f32 %v13069_v49, %v9860_v57  ;;  %2114 = vmatmul.mubr.bf16.gmra.mrb[12].mxu0 %v1147_v58  ;;  %v1174_v38 = vsel %vm535_vm15, %v1092_v9, %v1173_v60  ;;  %v1164_v1 = vor.u32 %v1163_v55, %v1160_v18  ;;  %v8179_v36 = vunpack.c.l.bf16 %v10440_v20  ;;  %8399 = vmatpush3.bf16.msra.mxu1 %v9417_v44 }
  0x5c   :  { %v219_v11 = vmul.f32 %v13070_v24, %v9860_v57  ;;  %v240_v39 = vadd.f32 %v9873_v0, %v217_v13  ;;  %2203 = vmatmul.mubr.bf16.gmra.mrb[8].mxu1 %v1084_v35  ;;  %v8180_v3 = vunpack.c.h.bf16 %v10440_v20 }
  0x5d   :  { %v241_v41 = vadd.f32 %v9873_v0, %v218_v29  ;;  %2210 = vmatprep.mubr.bf16.mxu1 %v1174_v38  ;;  %v1165_v9 = vsel %vm535_vm15, %v1083_v62, %v1164_v1  ;;  %v10475_v0 = vld [vmem:[%s12891_s1] ss:$0 sm:$0xff] }
  0x5e   :  { %v242_v57 = vadd.f32 %v10465_v52, %v219_v11  ;;  %v10468_v61 = vpack.c.bf16 %v240_v39, %v239_v56  ;;  %v220_v12 = vmul.f32 %v10475_v0, %v8179_v36 }
  0x60   :  { %v10480_v34 = vpack.c.bf16 %v242_v57, %v241_v41  ;;  %v12922_v44 = vshll.u32 %v10468_v61, 16  ;;  %v12924_v2 = vshrl.u32 %v10468_v61, 16  ;;  %v487_v62 = vsel %vm479_vm7, %v10468_v61, 0 }
  0x61   :  { %v1213_v16 = vshrl.u32 %v487_v62, 16  ;;  %v1216_v18 = vshll.u32 %v487_v62, 16  ;;  %v603_v30 = vsel %vm12932_vm12, %v10468_v61, 0  ;;  %v579_v13 = vsel %vm571_vm4, %v10468_v61, 0 }
  0x62   :  { %v691_v20 = vrot.slane %v12922_v44, 1  ;;  %v12923_v35 = vshll.u32 %v10480_v34, 16  ;;  %v10499_v60 = vsel %vm12945_vm2, %v10480_v34, 0  ;;  %v765_v55 = vrot.slane %v603_v30, 4 }
  0x63   :  { %v1215_v49 = vrot.slane %v1213_v16, 3  ;;  %v1218_v29 = vrot.slane %v1216_v18, 4  ;;  %v12927_v58 = vrot.slane %v10499_v60, 4  ;;  %v10505_v24 = vsel %vm572_vm11, %v10480_v34, 0 }
  0x64   :  { %v692_v11 = vsel %vm583_vm14, %v9760_v17, %v691_v20  ;;  %v695_v56 = vor.u32 %v12924_v2, %v691_v20  ;;  %v699_v39 = vrot.slane %v12923_v35, 1  ;;  %v766_v38 = vsel %vm12944_vm8, %v9766_v19, %v765_v55  ;;  %2211 = vmatmul.mubr.bf16.gmra.mrb[12].mxu1 %v1165_v9 }
  0x65   :  { %v1222_v1 = vshrl.u32 %v692_v11, 16  ;;  %v1225_v41 = vshll.u32 %v692_v11, 16  ;;  %v10515_v36 = vor.u32 %v1218_v29, %v1215_v49  ;;  %v768_v57 = vsel %vm12944_vm8, %v765_v55, %v12927_v58 }
  0x66   :  { %v700_v62 = vsel %vm583_vm14, %v695_v56, %v699_v39  ;;  %v1256_v16 = vshrl.u32 %v766_v38, 16  ;;  %v1259_v18 = vshll.u32 %v766_v38, 16  ;;  %v1264_v30 = vshrl.u32 %v768_v57, 16 }
  0x67   :  { %v1224_v20 = vrot.slane %v1222_v1, 3  ;;  %v1227_v44 = vrot.slane %v1225_v41, 4  ;;  %v1230_v35 = vshrl.u32 %v700_v62, 16  ;;  %v1233_v2 = vshll.u32 %v700_v62, 16 }
  0x68   :  { %v1220_v11 = vsel %vm535_vm15, %v9912_v14, %v10515_v36  ;;  %v1258_v49 = vrot.slane %v1256_v16, 3  ;;  %v1261_v29 = vrot.slane %v1259_v18, 4  ;;  %v1266_v42 = vrot.slane %v1264_v30, 3 }
  0x69   :  { %v1228_v59 = vor.u32 %v1227_v44, %v1224_v20  ;;  %v1232_v19 = vrot.slane %v1230_v35, 3  ;;  %v1235_v55 = vrot.slane %v1233_v2, 4  ;;  %v1267_v9 = vshll.u32 %v768_v57, 16 }
  0x6a   :  { %v1262_v58 = vor.u32 %v1261_v29, %v1258_v49  ;;  %v739_v56 = vrot.slane %v579_v13, 1  ;;  %v741_v38 = vrot.slane %v10505_v24, 1  ;;  %v221_v1 = vmul.f32 %v10475_v0, %v8180_v3 }
  0x6b   :  { %v10526_v41 = vor.u32 %v1235_v55, %v1232_v19  ;;  %v1269_v62 = vrot.slane %v1267_v9, 4  ;;  %v243_v26 = vadd.f32 %v10465_v52, %v220_v12  ;;  %v12937_v31 = vshrl.u32 %v10480_v34, 16 }
  0x6c   :  { %v740_v16 = vsel %vm729_vm3, %v9760_v17, %v739_v56  ;;  %v742_v44 = vsel %vm729_vm3, %v739_v56, %v741_v38  ;;  %v244_v2 = vadd.f32 %v10465_v52, %v221_v1  ;;  %vm13071_vm12 = vcmp.ne.s16.totalorder %v10053_v53, 0 }
  0x6d   :  { %v488_v13 = vsel %vm13071_vm12, %v10480_v34, 0  ;;  %v1237_v19 = vsel %vm535_vm15, %v1228_v59, %v10526_v41  ;;  %v1270_v3 = vor.u32 %v1269_v62, %v1266_v42  ;;  %v1239_v35 = vshrl.u32 %v740_v16, 16 }
  0x6e   :  { %v1242_v24 = vshll.u32 %v740_v16, 16  ;;  %2121 = vmatprep.mubr.bf16.mxu0 %v1237_v19  ;;  %v1247_v12 = vshrl.u32 %v742_v44, 16  ;;  %v1250_v57 = vshll.u32 %v742_v44, 16  ;;  %v10539_v18 = vpack.c.bf16 %v244_v2, %v243_v26 }
  0x6f   :  { %v703_v30 = vor.u32 %v12937_v31, %v699_v39  ;;  %2122 = vmatmul.mubr.bf16.gmra.mrb[16].mxu0 %v1220_v11  ;;  %v1271_v20 = vsel %vm535_vm15, %v1262_v58, %v1270_v3  ;;  %v1241_v49 = vrot.slane %v1239_v35, 3  ;;  %v1350_v55 = vshrl.u32 %v488_v13, 16 }
  0x70   :  { %v1244_v29 = vrot.slane %v1242_v24, 4  ;;  %2218 = vmatprep.mubr.bf16.mxu1 %v1271_v20  ;;  %v1249_v9 = vrot.slane %v1247_v12, 3  ;;  %v1252_v59 = vrot.slane %v1250_v57, 4  ;;  %v12934_v42 = vshll.u32 %v10539_v18, 16 }
  0x71   :  { %v1353_v56 = vshll.u32 %v488_v13, 16  ;;  %v1352_v62 = vrot.slane %v1350_v55, 3  ;;  %v605_v26 = vsel %vm12943_vm10, %v10539_v18, 0  ;;  %v10551_v39 = vsel %vm573_vm5, %v10539_v18, 0 }
  0x72   :  { %v1245_v1 = vor.u32 %v1244_v29, %v1241_v49  ;;  %v1253_v58 = vor.u32 %v1252_v59, %v1249_v9  ;;  %v707_v11 = vrot.slane %v12934_v42, 1  ;;  %v769_v44 = vrot.slane %v605_v26, 4 }
  0x73   :  { %v1355_v16 = vrot.slane %v1353_v56, 4  ;;  %v743_v2 = vrot.slane %v10551_v39, 1  ;;  %v13072_v13 = vunpack.c.l.bf16 %v10449_v5  ;;  %v13073_v35 = vunpack.c.h.bf16 %v10449_v5 }
  0x74   :  { %v12935_v12 = vshrl.u32 %v10539_v18, 16  ;;  %v1254_v57 = vsel %vm535_vm15, %v1245_v1, %v1253_v58  ;;  %v708_v20 = vsel %vm583_vm14, %v703_v30, %v707_v11  ;;  %v13074_v29 = vrot.slane %v10499_v60, 4 }
  0x75   :  { %v222_v19 = vmul.f32 %v10475_v0, %v13072_v13  ;;  %v223_v24 = vmul.f32 %v10475_v0, %v13073_v35  ;;  %v1356_v49 = vor.u32 %v1355_v16, %v1352_v62  ;;  %2219 = vmatmul.mubr.bf16.gmra.mrb[16].mxu1 %v1254_v57  ;;  %v1324_v9 = vshrl.u32 %v708_v20, 16 }
  0x76   :  { %v770_v55 = vsel %vm12944_vm8, %v13074_v29, %v769_v44  ;;  %v1327_v59 = vshll.u32 %v708_v20, 16  ;;  %v744_v0 = vsel %vm729_vm3, %v741_v38, %v743_v2  ;;  %v711_v20 = vor.u32 %v12935_v12, %v707_v11 }
  0x77   :  { %v1368_v56 = vshrl.u32 %v770_v55, 16  ;;  %v1371_v26 = vshll.u32 %v770_v55, 16  ;;  %v1357_v5 = vsel %vm535_vm15, %v10515_v36, %v1356_v49  ;;  %v245_v39 = vadd.f32 %v10465_v52, %v222_v19 }
  0x78   :  { %v246_v1 = vadd.f32 %v10465_v52, %v223_v24  ;;  %v1326_v30 = vrot.slane %v1324_v9, 3  ;;  %v1329_v62 = vrot.slane %v1327_v59, 4  ;;  %v1359_v13 = vshrl.u32 %v744_v0, 16 }
  0x79   :  { %v1370_v16 = vrot.slane %v1368_v56, 3  ;;  %v1373_v60 = vrot.slane %v1371_v26, 4  ;;  %v1362_v35 = vshll.u32 %v744_v0, 16  ;;  %v489_v36 = vsel %vm481_vm9, %v10539_v18, 0 }
  0x7a   :  { %v10573_v57 = vpack.c.bf16 %v246_v1, %v245_v39  ;;  %v1330_v29 = vor.u32 %v1329_v62, %v1326_v30  ;;  %v13075_v38 = vshrl.u32 %v10077_v4, 16  ;;  %v1361_v19 = vrot.slane %v1359_v13, 3 }
  0x7b   :  { %v1374_v55 = vor.u32 %v1373_v60, %v1370_v16  ;;  %v1364_v24 = vrot.slane %v1362_v35, 4  ;;  %v1422_v59 = vshrl.u32 %v489_v36, 16  ;;  %v1425_v26 = vshll.u32 %v489_v36, 16 }
  0x7c   :  { %v10582_v52 = vrot.slane %v13075_v38, 7  ;;  %v12933_v9 = vshll.u32 %v10573_v57, 16  ;;  %v10587_v56 = vsel %vm535_vm15, %v10526_v41, %v1330_v29  ;;  %v606_v0 = vsel %vm12942_vm13, %v10573_v57, 0 }
  0x7d   :  { %v1375_v11 = vsel %vm535_vm15, %v1270_v3, %v1374_v55  ;;  %2129 = vmatprep.mubr.bf16.mxu0 %v10587_v56  ;;  %v1365_v39 = vor.u32 %v1364_v24, %v1361_v19  ;;  %v1424_v30 = vrot.slane %v1422_v59, 3  ;;  %v771_v62 = vrot.slane %v606_v0, 4 }
  0x7e   :  { %2226 = vmatprep.mubr.bf16.mxu1 %v1375_v11  ;;  %v715_v1 = vrot.slane %v12933_v9, 1  ;;  %2130 = vmatmul.mubr.bf16.gmra.mrb[20].mxu0 %v1357_v5  ;;  %v1427_v16 = vrot.slane %v1425_v26, 4  ;;  %v582_v41 = vsel %vm12941_vm6, %v10573_v57, 0  ;;  %v12936_v3 = vshrl.u32 %v10573_v57, 16 }
  0x7f   :  { %v490_v60 = vsel %vm12940_vm0, %v10573_v57, 0  ;;  %v1366_v13 = vsel %vm535_vm15, %v1253_v58, %v1365_v39  ;;  %v772_v36 = vsel %vm12944_vm8, %v769_v44, %v771_v62  ;;  %v745_v38 = vrot.slane %v582_v41, 1 }
  0x80   :  { %v716_v35 = vsel %vm583_vm14, %v711_v20, %v715_v1  ;;  %2227 = vmatmul.mubr.bf16.gmra.mrb[20].mxu1 %v1366_v13  ;;  %v1428_v24 = vor.u32 %v1427_v16, %v1424_v30  ;;  %v1440_v59 = vshrl.u32 %v772_v36, 16  ;;  %v1443_v11 = vshll.u32 %v772_v36, 16 }
  0x81   :  { %v1404_v5 = vshrl.u32 %v716_v35, 16  ;;  %v1407_v19 = vshll.u32 %v716_v35, 16  ;;  %v746_v26 = vsel %vm729_vm3, %v743_v2, %v745_v38  ;;  %v10609_v0 = vor.u32 %v12936_v3, %v715_v1 }
  0x82   :  { %v1494_v9 = vshrl.u32 %v490_v60, 16  ;;  %v1429_v20 = vsel %vm535_vm15, %v1356_v49, %v1428_v24  ;;  %v1442_v12 = vrot.slane %v1440_v59, 3  ;;  %v1445_v44 = vrot.slane %v1443_v11, 4 }
  0x83   :  { %v1406_v42 = vrot.slane %v1404_v5, 3  ;;  %v1409_v58 = vrot.slane %v1407_v19, 4  ;;  %v1431_v41 = vshrl.u32 %v746_v26, 16  ;;  %v1434_v13 = vshll.u32 %v746_v26, 16 }
  0x84   :  { %v1503_v35 = vshrl.u32 %v10609_v0, 16  ;;  %vm607_vm12 = vsmask.f32 256  ;;  %v1506_v2 = vshll.u32 %v10609_v0, 16  ;;  %v1496_v16 = vrot.slane %v1494_v9, 3 }
  0x85   :  { %v10613_v30 = vor.u32 %v1409_v58, %v1406_v42  ;;  %v1497_v36 = vshll.u32 %v490_v60, 16  ;;  %v1446_v1 = vor.u32 %v1445_v44, %v1442_v12  ;;  %v1433_v3 = vrot.slane %v1431_v41, 3 }
  0x86   :  { %v1436_v31 = vrot.slane %v1434_v13, 4  ;;  %v1505_v5 = vrot.slane %v1503_v35, 3  ;;  %v1508_v19 = vrot.slane %v1506_v2, 4  ;;  %v1521_v11 = vshrl.u32 %v771_v62, 16 }
  0x87   :  { %v10618_v49 = vsel %vm535_vm15, %v1330_v29, %v10613_v30  ;;  %v1499_v59 = vrot.slane %v1497_v36, 4  ;;  %v1447_v42 = vsel %vm535_vm15, %v1374_v55, %v1446_v1  ;;  %v1524_v58 = vshll.u32 %v771_v62, 16 }
  0x88   :  { %2137 = vmatprep.mubr.bf16.mxu0 %v10618_v49  ;;  %v1437_v26 = vor.u32 %v1436_v31, %v1433_v3  ;;  %v1512_v43 = vshrl.u32 %v745_v38, 16  ;;  %2234 = vmatprep.mubr.bf16.mxu1 %v1447_v42  ;;  %v1509_v12 = vor.u32 %v1508_v19, %v1505_v5  ;;  %v1523_v60 = vrot.slane %v1521_v11, 3 }
  0x89   :  { %2138 = vmatmul.mubr.bf16.gmra.mrb[24].mxu0 %v1429_v20  ;;  %v1500_v9 = vor.u32 %v1499_v59, %v1496_v16  ;;  %v1515_v44 = vshll.u32 %v745_v38, 16  ;;  %v1526_v29 = vrot.slane %v1524_v58, 4  ;;  %v13076_v35 = vshll.u32 %v10077_v4, 16 }
  0x8a   :  { %v1438_v41 = vsel %vm535_vm15, %v1365_v39, %v1437_v26  ;;  %v1514_v13 = vrot.slane %v1512_v43, 3  ;;  %v1510_v31 = vsel %vm535_vm15, %v10613_v30, %v1509_v12  ;;  %v13077_v3 = vshrl.u32 %v10026_v10, 16 }
  0x8b   :  { %v10626_v2 = vor.u32 %v10582_v52, %v13076_v35  ;;  %2235 = vmatmul.mubr.bf16.gmra.mrb[24].mxu1 %v1438_v41  ;;  %v1501_v55 = vsel %vm535_vm15, %v1428_v24, %v1500_v9  ;;  %v1517_v62 = vrot.slane %v1515_v44, 4  ;;  %2145 = vmatprep.mubr.bf16.mxu0 %v1510_v31  ;;  %v1527_v39 = vor.u32 %v1526_v29, %v1523_v60 }
  0x8c   :  { %v10633_v20 = vrot.slane %v13077_v3, 7  ;;  %vm811_vm6 = vcmask 1042432   ;;  %v775_v4 = vor.u32 %v9975_v46, %v9973_v45  ;;  %v13078_v38 = vshll.u32 %v10026_v10, 16 }
  0x8d   :  { %vm619_vm0 = vcmp.ne.s16.totalorder %v10626_v2, 0  ;;  %v1518_v43 = vor.u32 %v1517_v62, %v1514_v13  ;;  %v10646_v36 = vor.u32 %v9980_v47, %v10170_v22  ;;  %v1528_v5 = vsel %vm535_vm15, %v1446_v1, %v1527_v39 }
  0x8e   :  { %v611_v16 = vor.u32 %v10633_v20, %v13078_v38  ;;  %v623_v24 = vsel %vm619_vm0, %v9934_v27, 0  ;;  %v919_v59 = vshrl.u32 %v775_v4, 16  ;;  %v922_v11 = vshll.u32 %v775_v4, 16  ;;  %2242 = vmatprep.mubr.bf16.mxu1 %v1528_v5 }
  0x8f   :  { %v812_v19 = vrot.slane %v623_v24, 5  ;;  %v1519_v45 = vsel %vm535_vm15, %v1437_v26, %v1518_v43  ;;  %v779_v10 = vsel %vm443_vm1, %v775_v4, %v10646_v36  ;;  %vm631_vm13 = vcmp.ne.s16.totalorder %v9982_v48, 0 }
  0x90   :  { %v10652_v46 = vsel %vm607_vm12, %v10582_v52, %v611_v16  ;;  %v921_v1 = vrot.slane %v919_v59, 3  ;;  %v924_v26 = vrot.slane %v922_v11, 4  ;;  %v927_v58 = vshrl.u32 %v779_v10, 16 }
  0x91   :  { %vm620_vm10 = vcmp.ne.s16.totalorder %v10652_v46, 0  ;;  %v936_v47 = vshrl.u32 %v812_v19, 16  ;;  %v939_v22 = vshll.u32 %v812_v19, 16  ;;  %2146 = vmatmul.mubr.bf16.gmra.mrb[28].mxu0 %v1501_v55  ;;  %v930_v52 = vshll.u32 %v779_v10, 16 }
  0x92   :  { %v10661_v42 = vsel %vm620_vm10, %v9936_v28, 0  ;;  %v632_v44 = vsel %vm631_vm13, %v9934_v27, 0  ;;  %v925_v41 = vor.u32 %v924_v26, %v921_v1  ;;  %v929_v29 = vrot.slane %v927_v58, 3 }
  0x93   :  { %v813_v12 = vrot.slane %v10661_v42, 5  ;;  %v938_v9 = vrot.slane %v936_v47, 3  ;;  %v941_v60 = vrot.slane %v939_v22, 4  ;;  %2243 = vmatmul.mubr.bf16.gmra.mrb[28].mxu1 %v1519_v45  ;;  %v932_v13 = vrot.slane %v930_v52, 4 }
  0x94   :  { %v633_v35 = vsel %vm479_vm7, %v9936_v28, 0  ;;  %2380 = vmatprep.mubr.bf16.mxu1 %v10271_v54  ;;  %v953_v62 = vshrl.u32 %v632_v44, 16  ;;  %v956_v3 = vshll.u32 %v632_v44, 16  ;;  %v13079_v59 = vshrl.u32 %v10034_v21, 16 }
  0x95   :  { %v814_v31 = vsel %vm811_vm6, %v812_v19, %v813_v12  ;;  %v942_v55 = vor.u32 %v941_v60, %v938_v9  ;;  %v10674_v43 = vor.u32 %v932_v13, %v929_v29  ;;  %v961_v38 = vshrl.u32 %v633_v35, 16 }
  0x96   :  { %v944_v39 = vshrl.u32 %v814_v31, 16  ;;  %v947_v4 = vshll.u32 %v814_v31, 16  ;;  %v955_v16 = vrot.slane %v953_v62, 3  ;;  %v958_v24 = vrot.slane %v956_v3, 4 }
  0x97   :  { %v964_v5 = vshll.u32 %v633_v35, 16  ;;  %v613_v11 = vrot.slane %v13079_v59, 7  ;;  %v934_v19 = vsel %vm535_vm15, %v925_v41, %v10674_v43  ;;  %v963_v47 = vrot.slane %v961_v38, 3 }
  0x98   :  { %v946_v45 = vrot.slane %v944_v39, 3  ;;  %v949_v10 = vrot.slane %v947_v4, 4  ;;  %v959_v54 = vor.u32 %v958_v24, %v955_v16  ;;  %v13080_v1 = vshll.u32 %v10034_v21, 16  ;;  %v9419_v4 = vld [vmem:[%s12893_s3 + $0x208] sm:$0xff]  }
  0x99   :  { %v966_v22 = vrot.slane %v964_v5, 4  ;;  %v13081_v58 = vshrl.u32 %v10140_v51, 16  ;;  %v13082_v60 = vshll.u32 %v10140_v51, 16  ;;  %vm13083_vm8 = vcmp.ne.s16.totalorder %v10053_v53, 0 }
  0x9a   :  { %v614_v26 = vor.u32 %v613_v11, %v13080_v1  ;;  %v10684_v9 = vor.u32 %v949_v10, %v946_v45  ;;  %v634_v29 = vsel %vm13083_vm8, %v10140_v51, 0  ;;  %v13084_v41 = vshrl.u32 %v10280_v23, 16 }
  0x9b   :  { %v780_v52 = vrot.slane %v13081_v58, 4  ;;  %v781_v44 = vrot.slane %v13082_v60, 5  ;;  %v967_v35 = vor.u32 %v966_v22, %v963_v47  ;;  %v1041_v31 = vshrl.u32 %v634_v29, 16 }
  0x9c   :  { %v616_v13 = vrot.slane %v13084_v41, 7  ;;  %v10695_v21 = vsel %vm607_vm12, %v10633_v20, %v614_v26  ;;  %v1044_v62 = vshll.u32 %v634_v29, 16  ;;  %v951_v3 = vsel %vm535_vm15, %v942_v55, %v10684_v9 }
  0x9d   :  { %vm12970_vm2 = vcmp.ne.s16.totalorder %v10695_v21, 0  ;;  %v782_v39 = vor.u32 %v781_v44, %v780_v52  ;;  %v13085_v38 = vshll.u32 %v10280_v23, 16  ;;  %2283 = vmatprep.mubr.bf16.mxu0 %v951_v3  ;;  %v968_v24 = vsel %vm535_vm15, %v959_v54, %v967_v35  ;;  %v9612_v54 = vld [vmem:[%s12893_s3 + $0x200] sm:$0xff]  }
  0x9e   :  { %v625_v20 = vsel %vm12970_vm2, %v10140_v51, 0  ;;  %v1043_v5 = vrot.slane %v1041_v31, 3  ;;  %v1046_v59 = vrot.slane %v1044_v62, 4  ;;  %2284 = vmatmul.mubr.bf16.vlgmr.msra.gmra.mrb[32].mxu0 %v934_v19  ;;  %2381 = vmatmul.mubr.bf16.vlgmr.msra.gmra.mrb[32].mxu1 %v968_v24  ;;  %v13086_v23 = vshrl.u32 %v10302_v32, 16  ;;  %v13088_v52 = vld [vmem:[#allocation16_spill] sm:$0xff] }
  0x9f   :  { %v617_v16 = vor.u32 %v616_v13, %v13085_v38  ;;  %v815_v55 = vrot.slane %v625_v20, 5  ;;  %v783_v45 = vsel %vm443_vm1, %v10646_v36, %v782_v39  ;;  %9082 = vmatpush3.bf16.msra.mxu0 %v9612_v54  ;;  %2388 = vmatprep.mubr.bf16.mxu1 %v10401_v50  ;;  %v9420_v36 = vld [vmem:[%s12893_s3 + $0x210] sm:$0xff]   ;;  %v13087_v58 = vshll.u32 %v10302_v32, 16  ;;  %v9421_v20 = vld [vmem:[%s12893_s3 + $0x218] sm:$0xff]  }
  0xa0   :  { %v784_v47 = vrot.slane %v13086_v23, 4  ;;  %v1023_v22 = vshrl.u32 %v783_v45, 16  ;;  %v1026_v1 = vshll.u32 %v783_v45, 16  ;;  %v10720_v19 = vor.u32 %v1046_v59, %v1043_v5  ;;  %9083 = vmatprep.subr.bf16.mxu0 %v9419_v4 }
  0xa1   :  { %v10712_v10 = vsel %vm607_vm12, %v613_v11, %v617_v16  ;;  %v816_v11 = vsel %vm811_vm6, %v813_v12, %v815_v55  ;;  %v785_v50 = vrot.slane %v13087_v58, 5  ;;  %v829_v60 = vsel %vm583_vm14, %v13088_v52, %v9760_v17 }
  0xa2   :  { %vm12947_vm8 = vcmp.ne.s16.totalorder %v10712_v10, 0  ;;  %v1032_v44 = vshrl.u32 %v816_v11, 16  ;;  %v1035_v29 = vshll.u32 %v816_v11, 16  ;;  %v1025_v41 = vrot.slane %v1023_v22, 3 }
  0xa3   :  { %v626_v26 = vsel %vm12947_vm8, %v10302_v32, 0  ;;  %v1028_v13 = vrot.slane %v1026_v1, 4  ;;  %v1048_v42 = vsel %vm535_vm15, %v967_v35, %v10720_v19  ;;  %v786_v31 = vor.u32 %v785_v50, %v784_v47  ;;  %9084 = vmatpush3.bf16.msra.mxu0 %v9419_v4 }
  0xa4   :  { %v817_v12 = vrot.slane %v626_v26, 5  ;;  %v1122_v62 = vshrl.u32 %v829_v60, 16  ;;  %v1034_v3 = vrot.slane %v1032_v44, 3  ;;  %v1037_v38 = vrot.slane %v1035_v29, 4  ;;  %9085 = vmatprep.subr.bf16.mxu0 %v9420_v36 }
  0xa5   :  { %v1029_v16 = vor.u32 %v1028_v13, %v1025_v41  ;;  %v1125_v24 = vshll.u32 %v829_v60, 16  ;;  %v787_v59 = vsel %vm443_vm1, %v782_v39, %v786_v31  ;;  %v635_v35 = vsel %vm481_vm9, %v10302_v32, 0 }
  0xa6   :  { %v818_v5 = vsel %vm811_vm6, %v815_v55, %v817_v12  ;;  %v1124_v45 = vrot.slane %v1122_v62, 3  ;;  %v1038_v23 = vor.u32 %v1037_v38, %v1034_v3  ;;  %2389 = vmatmul.mubr.bf16.gmra.mrb[36].mxu1 %v1048_v42  ;;  %v1095_v22 = vshrl.u32 %v787_v59, 16 }
  0xa7   :  { %v1030_v47 = vsel %vm535_vm15, %v10674_v43, %v1029_v16  ;;  %v1104_v4 = vshrl.u32 %v818_v5, 16  ;;  %v1107_v54 = vshll.u32 %v818_v5, 16  ;;  %v1098_v1 = vshll.u32 %v787_v59, 16  ;;  %9086 = vmatpush3.bf16.msra.mxu0 %v9420_v36  ;;  %v9422_v43 = vld [vmem:[%s12893_s3 + $0x220] sm:$0xff]  }
  0xa8   :  { %v1127_v11 = vrot.slane %v1125_v24, 4  ;;  %v1113_v26 = vshrl.u32 %v635_v35, 16  ;;  %v1039_v39 = vsel %vm535_vm15, %v10684_v9, %v1038_v23  ;;  %v1116_v50 = vshll.u32 %v635_v35, 16  ;;  %9087 = vmatprep.subr.bf16.mxu0 %v9421_v20 }
  0xa9   :  { %v1106_v55 = vrot.slane %v1104_v4, 3  ;;  %v1109_v58 = vrot.slane %v1107_v54, 4  ;;  %2291 = vmatprep.mubr.bf16.mxu0 %v1039_v39  ;;  %v1097_v52 = vrot.slane %v1095_v22, 3  ;;  %v1100_v60 = vrot.slane %v1098_v1, 4  ;;  %v9424_v39 = vld [vmem:[%s12893_s3 + $0x230] sm:$0xff]  }
  0xaa   :  { %v1128_v44 = vor.u32 %v1127_v11, %v1124_v45  ;;  %v1115_v29 = vrot.slane %v1113_v26, 3  ;;  %2292 = vmatmul.mubr.bf16.gmra.mrb[36].mxu0 %v1030_v47  ;;  %v1118_v13 = vrot.slane %v1116_v50, 4  ;;  %v13089_v42 = vmov 0  }
  0xab   :  { %v1110_v41 = vor.u32 %v1109_v58, %v1106_v55  ;;  %v10755_v62 = vrot.slane %v13089_v42, 5  ;;  %v1176_v9 = vshrl.u32 %v786_v31, 16  ;;  %v1101_v3 = vor.u32 %v1100_v60, %v1097_v52  ;;  %9088 = vmatpush3.bf16.msra.mxu0 %v9421_v20 }
  0xac   :  { %v1129_v36 = vsel %vm535_vm15, %v10382_v8, %v1128_v44  ;;  %v1179_v38 = vshll.u32 %v786_v31, 16  ;;  %v1195_v24 = vshrl.u32 %v9760_v17, 16  ;;  %v1119_v59 = vor.u32 %v1118_v13, %v1115_v29  ;;  %9089 = vmatprep.subr.bf16.mxu0 %v9422_v43  ;;  %v9423_v8 = vld [vmem:[%s12893_s3 + $0x228] sm:$0xff]  }
  0xad   :  { %v1111_v5 = vsel %vm535_vm15, %v1038_v23, %v1110_v41  ;;  %2396 = vmatprep.mubr.bf16.mxu1 %v1129_v36  ;;  %v820_v45 = vsel %vm811_vm6, %v817_v12, %v10755_v62  ;;  %v1178_v35 = vrot.slane %v1176_v9, 3  ;;  %v1102_v47 = vsel %vm535_vm15, %v1029_v16, %v1101_v3 }
  0xae   :  { %2299 = vmatprep.mubr.bf16.mxu0 %v1111_v5  ;;  %v1185_v4 = vshrl.u32 %v820_v45, 16  ;;  %v1188_v54 = vshll.u32 %v820_v45, 16  ;;  %v1181_v22 = vrot.slane %v1179_v38, 4  ;;  %v1120_v31 = vsel %vm535_vm15, %v10720_v19, %v1119_v59 }
  0xaf   :  { %v1197_v23 = vrot.slane %v1195_v24, 3  ;;  %v1198_v1 = vshll.u32 %v9760_v17, 16  ;;  %v1193_v12 = vsel %vm535_vm15, %v1119_v59, %v9912_v14  ;;  %2397 = vmatmul.mubr.bf16.gmra.mrb[40].mxu1 %v1120_v31  ;;  %v627_v26 = vsel %vm619_vm0, %v10468_v61, 0  ;;  %9090 = vmatpush3.bf16.msra.mxu0 %v9422_v43 }
  0xb0   :  { %v1187_v20 = vrot.slane %v1185_v4, 3  ;;  %v1190_v16 = vrot.slane %v1188_v54, 4  ;;  %v1182_v11 = vor.u32 %v1181_v22, %v1178_v35  ;;  %v10781_v19 = vsel %vm620_vm10, %v10480_v34, 0  ;;  %9091 = vmatprep.subr.bf16.mxu0 %v9423_v8 }
  0xb1   :  { %v1200_v55 = vrot.slane %v1198_v1, 4  ;;  %v821_v58 = vrot.slane %v627_v26, 5  ;;  %v13090_v50 = vshrl.u32 %v10468_v61, 16  ;;  %v822_v13 = vrot.slane %v10781_v19, 5 }
  0xb2   :  { %v1191_v60 = vor.u32 %v1190_v16, %v1187_v20  ;;  %v1183_v29 = vsel %vm535_vm15, %v1101_v3, %v1182_v11  ;;  %v13091_v42 = vshll.u32 %v10468_v61, 16  ;;  %2300 = vmatmul.mubr.bf16.gmra.mrb[40].mxu0 %v1102_v47  ;;  %v13092_v5 = vshrl.u32 %v10480_v34, 16  ;;  %v9425_v16 = vld [vmem:[%s12893_s3 + $0x238] sm:$0xff]  }
  0xb3   :  { %v788_v52 = vrot.slane %v13090_v50, 4  ;;  %v10789_v36 = vor.u32 %v1200_v55, %v1197_v23  ;;  %v1290_v38 = vshrl.u32 %v821_v58, 16  ;;  %v1293_v24 = vshll.u32 %v821_v58, 16  ;;  %9092 = vmatpush3.bf16.msra.mxu0 %v9423_v8 }
  0xb4   :  { %v789_v9 = vrot.slane %v13091_v42, 5  ;;  %v791_v59 = vrot.slane %v13092_v5, 4  ;;  %v1192_v45 = vsel %vm535_vm15, %v1110_v41, %v1191_v60  ;;  %v823_v43 = vsel %vm811_vm6, %v821_v58, %v822_v13  ;;  %9093 = vmatprep.subr.bf16.mxu0 %v9424_v39 }
  0xb5   :  { %v13093_v35 = vshll.u32 %v10480_v34, 16  ;;  %2307 = vmatprep.mubr.bf16.mxu0 %v1192_v45  ;;  %v1202_v47 = vsel %vm535_vm15, %v1128_v44, %v10789_v36  ;;  %v1292_v54 = vrot.slane %v1290_v38, 3  ;;  %v1295_v22 = vrot.slane %v1293_v24, 4 }
  0xb6   :  { %v790_v3 = vor.u32 %v789_v9, %v788_v52  ;;  %v1298_v31 = vshrl.u32 %v823_v43, 16  ;;  %2404 = vmatprep.mubr.bf16.mxu1 %v1202_v47  ;;  %v1301_v23 = vshll.u32 %v823_v43, 16  ;;  %v636_v44 = vsel %vm631_vm13, %v10468_v61, 0 }
  0xb7   :  { %v792_v4 = vrot.slane %v13093_v35, 5  ;;  %v1296_v11 = vor.u32 %v1295_v22, %v1292_v54  ;;  %v637_v8 = vsel %vm479_vm7, %v10480_v34, 0  ;;  %2405 = vmatmul.mubr.bf16.gmra.mrb[44].mxu1 %v1193_v12  ;;  %v1307_v9 = vshrl.u32 %v636_v44, 16  ;;  %9094 = vmatpush3.bf16.msra.mxu0 %v9424_v39 }
  0xb8   :  { %v1273_v41 = vshrl.u32 %v790_v3, 16  ;;  %v1276_v20 = vshll.u32 %v790_v3, 16  ;;  %v1300_v26 = vrot.slane %v1298_v31, 3  ;;  %v1303_v55 = vrot.slane %v1301_v23, 4  ;;  %2412 = vmatprep.mubr.bf16.mxu1 %v10587_v56  ;;  %9095 = vmatprep.subr.bf16.mxu0 %v9425_v16 }
  0xb9   :  { %v793_v1 = vor.u32 %v792_v4, %v791_v59  ;;  %v1310_v38 = vshll.u32 %v636_v44, 16  ;;  %v1315_v59 = vshrl.u32 %v637_v8, 16  ;;  %v1318_v45 = vshll.u32 %v637_v8, 16 }
  0xba   :  { %v1275_v50 = vrot.slane %v1273_v41, 3  ;;  %v1278_v52 = vrot.slane %v1276_v20, 4  ;;  %v1304_v24 = vor.u32 %v1303_v55, %v1300_v26  ;;  %2308 = vmatmul.mubr.bf16.gmra.mrb[44].mxu0 %v1183_v29  ;;  %v1309_v35 = vrot.slane %v1307_v9, 3 }
  0xbb   :  { %v794_v58 = vsel %vm443_vm1, %v790_v3, %v793_v1  ;;  %v1312_v4 = vrot.slane %v1310_v38, 4  ;;  %v1317_v47 = vrot.slane %v1315_v59, 3  ;;  %v1320_v54 = vrot.slane %v1318_v45, 4  ;;  %9096 = vmatpush3.bf16.msra.mxu0 %v9425_v16 }
  0xbc   :  { %v1281_v60 = vshrl.u32 %v794_v58, 16  ;;  %v1284_v42 = vshll.u32 %v794_v58, 16  ;;  %v1279_v5 = vor.u32 %v1278_v52, %v1275_v50  ;;  %v1305_v3 = vsel %vm535_vm15, %v1296_v11, %v1304_v24 }
  0xbd   :  { %v629_v56 = vsel %vm12970_vm2, %v10539_v18, 0  ;;  %2315 = vmatprep.mubr.bf16.mxu0 %v1305_v3  ;;  %v1313_v22 = vor.u32 %v1312_v4, %v1309_v35  ;;  %v13094_v23 = vshrl.u32 %v10539_v18, 16  ;;  %v1321_v29 = vor.u32 %v1320_v54, %v1317_v47 }
  0xbe   :  { %v1283_v43 = vrot.slane %v1281_v60, 3  ;;  %v1286_v12 = vrot.slane %v1284_v42, 4  ;;  %v824_v31 = vrot.slane %v629_v56, 5  ;;  %v13095_v20 = vshll.u32 %v10539_v18, 16 }
  0xbf   :  { %v795_v41 = vrot.slane %v13094_v23, 4  ;;  %vm13096_vm12 = vcmp.ne.s16.totalorder %v10053_v53, 0  ;;  %v630_v44 = vsel %vm12947_vm8, %v10573_v57, 0  ;;  %v1322_v50 = vsel %vm535_vm15, %v1313_v22, %v1321_v29 }
  0xc0   :  { %v1287_v39 = vor.u32 %v1286_v12, %v1283_v43  ;;  %v796_v26 = vrot.slane %v13095_v20, 5  ;;  %v638_v11 = vsel %vm13096_vm12, %v10539_v18, 0  ;;  %v825_v55 = vsel %vm811_vm6, %v822_v13, %v824_v31  ;;  %2413 = vmatmul.mubr.bf16.gmra.mrb[48].mxu1 %v1322_v50 }
  0xc1   :  { %v1395_v58 = vshrl.u32 %v638_v11, 16  ;;  %v1398_v16 = vshll.u32 %v638_v11, 16  ;;  %v1386_v52 = vshrl.u32 %v825_v55, 16  ;;  %v1389_v60 = vshll.u32 %v825_v55, 16  ;;  %2420 = vmatprep.mubr.bf16.mxu1 %v10618_v49 }
  0xc2   :  { %v1288_v8 = vsel %vm535_vm15, %v1279_v5, %v1287_v39  ;;  %v797_v42 = vor.u32 %v796_v26, %v795_v41  ;;  %v826_v59 = vrot.slane %v630_v44, 5  ;;  %v13097_v45 = vshrl.u32 %v10573_v57, 16 }
  0xc3   :  { %v1397_v9 = vrot.slane %v1395_v58, 3  ;;  %v1400_v38 = vrot.slane %v1398_v16, 4  ;;  %v1388_v12 = vrot.slane %v1386_v52, 3  ;;  %v1391_v5 = vrot.slane %v1389_v60, 4  ;;  %2316 = vmatmul.mubr.bf16.gmra.mrb[48].mxu0 %v1288_v8 }
  0xc4   :  { %v799_v43 = vrot.slane %v13097_v45, 4  ;;  %v798_v19 = vsel %vm443_vm1, %v793_v1, %v797_v42  ;;  %v13098_v13 = vshll.u32 %v10573_v57, 16  ;;  %v827_v54 = vsel %vm811_vm6, %v824_v31, %v826_v59 }
  0xc5   :  { %v1377_v4 = vshrl.u32 %v798_v19, 16  ;;  %v1380_v3 = vshll.u32 %v798_v19, 16  ;;  %v1401_v47 = vor.u32 %v1400_v38, %v1397_v9  ;;  %v1392_v56 = vor.u32 %v1391_v5, %v1388_v12 }
  0xc6   :  { %v800_v35 = vrot.slane %v13098_v13, 5  ;;  %v1458_v22 = vshrl.u32 %v827_v54, 16  ;;  %v1461_v23 = vshll.u32 %v827_v54, 16  ;;  %v830_v49 = vsel %vm583_vm14, %v10609_v0, %v9760_v17 }
  0xc7   :  { %v1379_v20 = vrot.slane %v1377_v4, 3  ;;  %v1382_v26 = vrot.slane %v1380_v3, 4  ;;  %v1402_v11 = vsel %vm535_vm15, %v1321_v29, %v1401_v47  ;;  %v1393_v1 = vsel %vm535_vm15, %v1304_v24, %v1392_v56 }
  0xc8   :  { %v801_v41 = vor.u32 %v800_v35, %v799_v43  ;;  %v1460_v44 = vrot.slane %v1458_v22, 3  ;;  %v1463_v8 = vrot.slane %v1461_v23, 4  ;;  %2323 = vmatprep.mubr.bf16.mxu0 %v1393_v1  ;;  %v1476_v50 = vshrl.u32 %v830_v49, 16  ;;  %2421 = vmatmul.mubr.bf16.gmra.mrb[52].mxu1 %v1402_v11 }
  0xc9   :  { %v1383_v31 = vor.u32 %v1382_v26, %v1379_v20  ;;  %v1479_v60 = vshll.u32 %v830_v49, 16  ;;  %v639_v29 = vsel %vm481_vm9, %v10573_v57, 0  ;;  %v828_v0 = vsel %vm811_vm6, %v826_v59, %v10755_v62 }
  0xca   :  { %v802_v55 = vsel %vm443_vm1, %v797_v42, %v801_v41  ;;  %v1464_v52 = vor.u32 %v1463_v8, %v1460_v44  ;;  %v1478_v42 = vrot.slane %v1476_v50, 3  ;;  %v1467_v12 = vshrl.u32 %v639_v29, 16  ;;  %v13099_v8 = vld [vmem:[#allocation10_spill] sm:$0xff] }
  0xcb   :  { %v1449_v58 = vshrl.u32 %v802_v55, 16  ;;  %v1452_v16 = vshll.u32 %v802_v55, 16  ;;  %v1384_v24 = vsel %vm535_vm15, %v1287_v39, %v1383_v31  ;;  %v1481_v43 = vrot.slane %v1479_v60, 4 }
  0xcc   :  { %v1465_v45 = vsel %vm535_vm15, %v1392_v56, %v1464_v52  ;;  %v1470_v5 = vshll.u32 %v639_v29, 16  ;;  %2324 = vmatmul.mubr.bf16.gmra.mrb[52].mxu0 %v1384_v24  ;;  %v1539_v13 = vshrl.u32 %v828_v0, 16  ;;  %v1542_v35 = vshll.u32 %v828_v0, 16 }
  0xcd   :  { %v1451_v9 = vrot.slane %v1449_v58, 3  ;;  %v1454_v38 = vrot.slane %v1452_v16, 4  ;;  %v1530_v4 = vshrl.u32 %v801_v41, 16  ;;  %2331 = vmatprep.mubr.bf16.mxu0 %v1465_v45  ;;  %v1482_v3 = vor.u32 %v1481_v43, %v1478_v42 }
  0xce   :  { %v1469_v54 = vrot.slane %v1467_v12, 3  ;;  %v1472_v59 = vrot.slane %v1470_v5, 4  ;;  %v1533_v22 = vshll.u32 %v801_v41, 16  ;;  %v1541_v23 = vrot.slane %v1539_v13, 3 }
  0xcf   :  { %v1455_v19 = vor.u32 %v1454_v38, %v1451_v9  ;;  %v1544_v20 = vrot.slane %v1542_v35, 4  ;;  %v1532_v26 = vrot.slane %v1530_v4, 3  ;;  %v1483_v56 = vsel %vm535_vm15, %v10613_v30, %v1482_v3 }
  0xd0   :  { %v1473_v11 = vor.u32 %v1472_v59, %v1469_v54  ;;  %v1535_v49 = vrot.slane %v1533_v22, 4  ;;  %v1548_v1 = vsel %vm535_vm15, %v1482_v3, %v10789_v36  ;;  %2428 = vmatprep.mubr.bf16.mxu1 %v1483_v56  ;;  %vm12946_vm12 = vcmp.ne.s16.totalorder %v13099_v8, 0 }
  0xd1   :  { %v1456_v39 = vsel %vm535_vm15, %v1383_v31, %v1455_v19  ;;  %v1545_v44 = vor.u32 %v1544_v20, %v1541_v23  ;;  %v642_v41 = vsel %vm571_vm4, %v9936_v28, 0  ;;  %v643_v55 = vsel %vm572_vm11, %v10140_v51, 0 }
  0xd2   :  { %v1474_v31 = vsel %vm535_vm15, %v1401_v47, %v1473_v11  ;;  %v1536_v30 = vor.u32 %v1535_v49, %v1532_v26  ;;  %v1547_v58 = vsel %vm535_vm15, %v1473_v11, %v9912_v14  ;;  %v641_v16 = vsel %vm12946_vm12, %v9934_v27, 0 }
  0xd3   :  { %2429 = vmatmul.mubr.bf16.gmra.mrb[56].mxu1 %v1474_v31  ;;  %v1546_v50 = vsel %vm535_vm15, %v1464_v52, %v1545_v44  ;;  %v839_v60 = vrot.slane %v641_v16, 1  ;;  %v840_v29 = vrot.slane %v642_v41, 1  ;;  %v842_v28 = vrot.slane %v643_v55, 1 }
  0xd4   :  { %v1537_v0 = vsel %vm535_vm15, %v1455_v19, %v1536_v30  ;;  %2436 = vmatprep.mubr.bf16.mxu1 %v1548_v1  ;;  %v644_v51 = vsel %vm573_vm5, %v10302_v32, 0  ;;  %v645_v47 = vsel %vm12946_vm12, %v10468_v61, 0  ;;  %v646_v27 = vsel %vm571_vm4, %v10480_v34, 0  ;;  %2332 = vmatmul.mubr.bf16.gmra.mrb[56].mxu0 %v1456_v39 }
  0xd5   :  { %v841_v52 = vsel %vm729_vm3, %v839_v60, %v840_v29  ;;  %v843_v24 = vsel %vm729_vm3, %v840_v29, %v842_v28  ;;  %v844_v9 = vrot.slane %v644_v51, 1  ;;  %v647_v38 = vsel %vm572_vm11, %v10539_v18, 0  ;;  %2339 = vmatprep.mubr.bf16.mxu0 %v1546_v50 }
  0xd6   :  { %v979_v32 = vshrl.u32 %v841_v52, 16  ;;  %v982_v42 = vshll.u32 %v841_v52, 16  ;;  %v987_v45 = vshrl.u32 %v843_v24, 16  ;;  %v990_v43 = vshll.u32 %v843_v24, 16 }
  0xd7   :  { %v845_v61 = vsel %vm729_vm3, %v842_v28, %v844_v9  ;;  %v846_v34 = vsel %vm729_vm3, %v844_v9, %v9760_v17  ;;  %v847_v12 = vrot.slane %v645_v47, 1  ;;  %v848_v5 = vrot.slane %v646_v27, 1 }
  0xd8   :  { %v981_v19 = vrot.slane %v979_v32, 3  ;;  %v984_v13 = vrot.slane %v982_v42, 4  ;;  %v989_v35 = vrot.slane %v987_v45, 3  ;;  %v992_v4 = vrot.slane %v990_v43, 4 }
  0xd9   :  { %v1059_v3 = vshrl.u32 %v845_v61, 16  ;;  %v1062_v54 = vshll.u32 %v845_v61, 16  ;;  %v1131_v59 = vshrl.u32 %v846_v34, 16  ;;  %v1134_v18 = vshll.u32 %v846_v34, 16 }
  0xda   :  { %v985_v22 = vor.u32 %v984_v13, %v981_v19  ;;  %v993_v39 = vor.u32 %v992_v4, %v989_v35  ;;  %v849_v23 = vsel %vm729_vm3, %v847_v12, %v848_v5  ;;  %v850_v20 = vrot.slane %v647_v38, 1 }
  0xdb   :  { %2437 = vmatmul.mubr.bf16.gmra.mrb[60].mxu1 %v1547_v58  ;;  %v1061_v26 = vrot.slane %v1059_v3, 3  ;;  %v1064_v56 = vrot.slane %v1062_v54, 4  ;;  %v1133_v11 = vrot.slane %v1131_v59, 3  ;;  %v1136_v49 = vrot.slane %v1134_v18, 4 }
  0xdc   :  { %v994_v1 = vsel %vm535_vm15, %v985_v22, %v993_v39  ;;  %v851_v44 = vsel %vm729_vm3, %v848_v5, %v850_v20  ;;  %v1333_v41 = vshrl.u32 %v849_v23, 16  ;;  %v1336_v55 = vshll.u32 %v849_v23, 16  ;;  %2340 = vmatmul.mubr.bf16.gmra.mrb[60].mxu0 %v1537_v0 }
  0xdd   :  { %v1341_v31 = vshrl.u32 %v851_v44, 16  ;;  %v1344_v30 = vshll.u32 %v851_v44, 16  ;;  %9097 = vmatprep.mubr.bf16.mxu0 %v994_v1  ;;  %v1065_v16 = vor.u32 %v1064_v56, %v1061_v26  ;;  %v1137_v50 = vor.u32 %v1136_v49, %v1133_v11  ;;  %v9426_v26 = vld [vmem:[%s12895_s5 + $0x40] sm:$0xff]  }
  0xde   :  { %v1335_v60 = vrot.slane %v1333_v41, 3  ;;  %v648_v58 = vsel %vm573_vm5, %v10573_v57, 0  ;;  %v1338_v29 = vrot.slane %v1336_v55, 4  ;;  %v9427_v56 = vld [vmem:[%s12895_s5] sm:$0xff]   ;;  %8464 = vmatprep.subr.bf16.mxu1 %v9426_v26 }
  0xdf   :  { %v1343_v28 = vrot.slane %v1341_v31, 3  ;;  %v1346_v51 = vrot.slane %v1344_v30, 4  ;;  %v852_v47 = vrot.slane %v648_v58, 1  ;;  %v1066_v27 = vsel %vm535_vm15, %v993_v39, %v1065_v16  ;;  %v10915_v11 = vld [vmem:[%s12894_s4] ss:$0 sm:$0xff]  ;;  %8465 = vmatpush3.bf16.msra.mxu1 %v9427_v56 }
  0xe0   :  { %v1138_v52 = vsel %vm535_vm15, %v1065_v16, %v1137_v50  ;;  %v1339_v34 = vor.u32 %v1338_v29, %v1335_v60  ;;  %v1211_v5 = vsel %vm535_vm15, %v1137_v50, %v10789_v36  ;;  %v9428_v16 = vld [vmem:[%s12895_s5 + $0x48] sm:$0xff]  }
  0xe1   :  { %v853_v0 = vsel %vm729_vm3, %v850_v20, %v852_v47  ;;  %v854_v24 = vsel %vm729_vm3, %v852_v47, %v9760_v17  ;;  %v1347_v12 = vor.u32 %v1346_v51, %v1343_v28  ;;  %v9429_v50 = vld [vmem:[%s12895_s5 + $0x8] sm:$0xff]  }
  0xe2   :  { %v1413_v9 = vshrl.u32 %v853_v0, 16  ;;  %v1416_v38 = vshll.u32 %v853_v0, 16  ;;  %v1485_v32 = vshrl.u32 %v854_v24, 16  ;;  %v1488_v42 = vshll.u32 %v854_v24, 16 }
  0xe3   :  { %v1348_v19 = vsel %vm535_vm15, %v1339_v34, %v1347_v12 }
  0xe4   :  { %9098 = vmatmul.mubr.bf16.vlgmr.msra.gmra.mrb[64].mxu0 %v1066_v27  ;;  %v1415_v45 = vrot.slane %v1413_v9, 3  ;;  %v1418_v57 = vrot.slane %v1416_v38, 4  ;;  %v1487_v43 = vrot.slane %v1485_v32, 3  ;;  %v1490_v61 = vrot.slane %v1488_v42, 4 }
  0xe5   :  { %9101 = vmatprep.mubr.bf16.mxu0 %v1138_v52 }
  0xe6   :  { %v1419_v13 = vor.u32 %v1418_v57, %v1415_v45  ;;  %v1491_v35 = vor.u32 %v1490_v61, %v1487_v43 }
  0xe8   :  { %v1420_v4 = vsel %vm535_vm15, %v1347_v12, %v1419_v13  ;;  %v1492_v3 = vsel %vm535_vm15, %v1419_v13, %v1491_v35  ;;  %v1549_v54 = vsel %vm535_vm15, %v1491_v35, %v10789_v36 }
  0xec   :  { %9102 = vmatmul.mubr.bf16.gmra.mrb[68].mxu0 %v1211_v5 }
  0xed   :  { %9105 = vmatprep.mubr.bf16.mxu0 %v1348_v19 }
  0xf4   :  { %9106 = vmatmul.mubr.bf16.gmra.mrb[72].mxu0 %v1420_v4 }
  0xf5   :  { %9109 = vmatprep.mubr.bf16.mxu0 %v1492_v3 }
  0xfc   :  { %9110 = vmatmul.mubr.bf16.gmra.mrb[76].mxu0 %v1549_v54 }
  0xfe   :  { %v8208_v59 = vpop.f32.mrb[0].mxu0 }
  0xff   :  { %v8209_v18 = vpop.f32.mrb[1].mxu0 }
 0x100   :  { %v8210_v22 = vadd.f32 %v8209_v18, %v8208_v59  ;;  %v8211_v39 = vpop.f32.mrb[2].mxu0 }
 0x101   :  { %v8212_v23 = vpop.f32.mrb[3].mxu0 }
 0x102   :  { %v8213_v20 = vadd.f32 %v8212_v23, %v8211_v39  ;;  %v2092_v49 = vadd.f32 %v8210_v22, %v10915_v11 }
 0x104   :  { %v2095_v41 = vadd.f32 %v8213_v20, %v10915_v11 }
 0x111   :  { %v8272_v1 = vpop.f32.mrb[0].mxu1 }
 0x112   :  { %v8273_v44 = vpop.f32.mrb[1].mxu1 }
 0x113   :  { %v8274_v55 = vadd.f32 %v8273_v44, %v8272_v1  ;;  %v8275_v31 = vpop.f32.mrb[2].mxu1 }
 0x114   :  { %v8214_v30 = vpop.f32.mrb[4].mxu0 }
 0x115   :  { %18 = vsyncpa [#allocation3], 0  ;;  %v8276_v60 = vpop.f32.mrb[3].mxu1  ;;  %v8215_v58 = vpop.f32.mrb[5].mxu0  ;;  %v10925_v29 = vadd.f32 %v8274_v55, %v2092_v49  ;;  %8466 = vmatprep.subr.bf16.mxu1 %v9428_v16  ;;  %v9430_v24 = vld [vmem:[%s12895_s5 + $0x50] sm:$0xff]   ;;  %v9432_v38 = vld [vmem:[%s12895_s5 + $0x58] sm:$0xff]  }
 0x116   :  { %v8277_v28 = vadd.f32 %v8276_v60, %v8275_v31  ;;  %v8216_v51 = vadd.f32 %v8215_v58, %v8214_v30  ;;  %v8217_v47 = vpop.f32.mrb[6].mxu0  ;;  %8467 = vmatpush3.bf16.msra.mxu1 %v9429_v50  ;;  %v9431_v9 = vld [vmem:[%s12895_s5 + $0x10] sm:$0xff]   ;;  %v9433_v32 = vld [vmem:[%s12895_s5 + $0x18] sm:$0xff]   ;;  %v9434_v42 = vld [vmem:[%s12895_s5 + $0xc0] sm:$0xff]   ;;  %s9640_s29 = smov 64   ;;  %s9642_s30 = smov [#allocation2]  }
 0x117   :  { %v8218_v27 = vpop.f32.mrb[7].mxu0  ;;  %8468 = vmatprep.subr.bf16.mxu1 %v9430_v24  ;;  %v9435_v57 = vld [vmem:[%s12895_s5 + $0x80] sm:$0xff]   ;;  %8528 = vmatprep.subr.bf16.mxu0 %v9434_v42  ;;  %v9438_v13 = vld [vmem:[%s12895_s5 + $0xc8] sm:$0xff]   ;;  %v9440_v56 = vld [vmem:[%s12895_s5 + $0xd0] sm:$0xff]   ;;  %s7710_s14 = sshll.u32 %s9642_s30, 4  ;;  %s7711_s14 = int_to_ptr.vmem [resolvable:$true] %s7710_s14 }
 0x118   :  { %v10927_v52 = vadd.f32 %v8277_v28, %v2095_v41  ;;  %v8219_v0 = vadd.f32 %v8218_v27, %v8217_v47  ;;  %8529 = vmatpush3.bf16.msra.mxu0 %v9435_v57  ;;  %v2100_v12 = vadd.f32 %v8216_v51, %v10915_v11  ;;  %v9439_v3 = vld [vmem:[%s12895_s5 + $0x88] sm:$0xff]   ;;  %v9436_v20 = vld [vmem:[%s12895_s5 + $0x60] sm:$0xff]   ;;  %v9441_v49 = vld [vmem:[%s12895_s5 + $0x90] sm:$0xff]   ;;  %s9613_s15 = scalar_lea.vmem %s7711_s14, 32  ;;  %p9618_p1 = scmp.lt.s32.totalorder %s7711_s14, %s7711_s14 }
 0x119   :  { %8530 = vmatprep.subr.bf16.mxu0 %v9438_v13  ;;  %v9437_v26 = vld [vmem:[%s12895_s5 + $0x20] sm:$0xff]   ;;  %v9444_v30 = vld [vmem:[%s12895_s5 + $0xd8] sm:$0xff]   ;;  %v9575_v48 = vld [vmem:[%s12895_s5 + $0x468] sm:$0xff]   ;;  %p9614_p0 = scmp.ne.s32.totalorder %s7711_s14, %s9613_s15  ;;  %p9619_p2 = scmp.lt.s32.totalorder %s9613_s15, %s9613_s15 }
 0x11a   :  { %8469 = vmatpush3.bf16.msra.mxu1 %v9431_v9  ;;  %v2103_v54 = vadd.f32 %v8219_v0, %v10915_v11  ;;  %v9445_v58 = vld [vmem:[%s12895_s5 + $0x98] sm:$0xff]   ;;  %v9446_v42 = vld [vmem:[%s12895_s5 + $0xe0] sm:$0xff]  }
 0x11b   :  { %8470 = vmatprep.subr.bf16.mxu1 %v9432_v38  ;;  %p9620_p3 = por %p9619_p2, %p9618_p1 }
 0x11c   :  { %8531 = vmatpush3.bf16.msra.mxu0 %v9439_v3 }
 0x11d   :  { %8532 = vmatprep.subr.bf16.mxu0 %v9440_v56  ;;  %v9456_v56 = vld [vmem:[%s12895_s5 + $0xf8] sm:$0xff]   ;;  %p9621_p4 = pnand %p9620_p3, %p9614_p0 }
 0x11e   :  { %8471 = vmatpush3.bf16.msra.mxu1 %v9433_v32  ;;  %v9442_v32 = vld [vmem:[%s12895_s5 + $0x68] sm:$0xff]  }
 0x11f   :  { %8472 = vmatprep.subr.bf16.mxu1 %v9436_v20 }
 0x120   :  { %8533 = vmatpush3.bf16.msra.mxu0 %v9441_v49 }
 0x121   :  { %8534 = vmatprep.subr.bf16.mxu0 %v9444_v30  ;;  %v9454_v30 = vld [vmem:[%s12895_s5 + $0x78] sm:$0xff]  }
 0x122   :  { %8473 = vmatpush3.bf16.msra.mxu1 %v9437_v26  ;;  %v9449_v26 = vld [vmem:[%s12895_s5 + $0x30] sm:$0xff]  }
 0x123   :  { %8474 = vmatprep.subr.bf16.mxu1 %v9442_v32 }
 0x124   :  { %v8220_v45 = vpop.f32.mrb[8].mxu0  ;;  %8535 = vmatpush3.bf16.msra.mxu0 %v9445_v58 }
 0x125   :  { %v8221_v43 = vpop.f32.mrb[9].mxu0  ;;  %8536 = vmatprep.subr.bf16.mxu0 %v9446_v42 }
 0x126   :  { %v8222_v61 = vadd.f32 %v8221_v43, %v8220_v45  ;;  %v8223_v34 = vpop.f32.mrb[10].mxu0  ;;  %v9447_v45 = vld [vmem:[%s12895_s5 + $0xa0] sm:$0xff]   ;;  %v9443_v43 = vld [vmem:[%s12895_s5 + $0x28] sm:$0xff]  }
 0x127   :  { %v8278_v5 = vpop.f32.mrb[4].mxu1  ;;  %v8224_v19 = vpop.f32.mrb[11].mxu0  ;;  %8475 = vmatpush3.bf16.msra.mxu1 %v9443_v43 }
 0x128   :  { %v8279_v35 = vpop.f32.mrb[5].mxu1  ;;  %v8225_v4 = vadd.f32 %v8224_v19, %v8223_v34  ;;  %v2108_v41 = vadd.f32 %v8222_v61, %v10915_v11  ;;  %8537 = vmatpush3.bf16.msra.mxu0 %v9447_v45  ;;  %v9451_v19 = vld [vmem:[%s12895_s5 + $0xa8] sm:$0xff]  }
 0x129   :  { %v8280_v59 = vadd.f32 %v8279_v35, %v8278_v5  ;;  %v8281_v18 = vpop.f32.mrb[6].mxu1 }
 0x12a   :  { %v8282_v22 = vpop.f32.mrb[7].mxu1  ;;  %v2111_v28 = vadd.f32 %v8225_v4, %v10915_v11 }
 0x12b   :  { %v10955_v39 = vadd.f32 %v8280_v59, %v2100_v12  ;;  %v8283_v23 = vadd.f32 %v8282_v22, %v8281_v18  ;;  %v9450_v12 = vld [vmem:[%s12895_s5 + $0xe8] sm:$0xff]   ;;  %v9448_v18 = vld [vmem:[%s12895_s5 + $0x70] sm:$0xff]  }
 0x12c   :  { %8538 = vmatprep.subr.bf16.mxu0 %v9450_v12  ;;  %v9452_v22 = vld [vmem:[%s12895_s5 + $0xf0] sm:$0xff]   ;;  %8476 = vmatprep.subr.bf16.mxu1 %v9448_v18  ;;  %v9458_v18 = vld [vmem:[%s12895_s5 + $0x140] sm:$0xff]  }
 0x12d   :  { %v10969_v1 = vadd.f32 %v8283_v23, %v2103_v54  ;;  %8539 = vmatpush3.bf16.msra.mxu0 %v9451_v19  ;;  %v9453_v23 = vld [vmem:[%s12895_s5 + $0xb0] sm:$0xff]   ;;  %8477 = vmatpush3.bf16.msra.mxu1 %v9449_v26 }
 0x12e   :  { %v8226_v44 = vpop.f32.mrb[12].mxu0  ;;  %8540 = vmatprep.subr.bf16.mxu0 %v9452_v22  ;;  %8478 = vmatprep.subr.bf16.mxu1 %v9454_v30 }
 0x12f   :  { %v8284_v55 = vpop.f32.mrb[8].mxu1  ;;  %v8227_v31 = vpop.f32.mrb[13].mxu0 }
 0x130   :  { %v8285_v16 = vpop.f32.mrb[9].mxu1  ;;  %v8228_v50 = vadd.f32 %v8227_v31, %v8226_v44  ;;  %v8229_v60 = vpop.f32.mrb[14].mxu0  ;;  %v9457_v44 = vld [vmem:[%s12895_s5 + $0xb8] sm:$0xff]  }
 0x131   :  { %v8286_v51 = vadd.f32 %v8285_v16, %v8284_v55  ;;  %v8287_v47 = vpop.f32.mrb[10].mxu1  ;;  %v8230_v27 = vpop.f32.mrb[15].mxu0  ;;  %8541 = vmatpush3.bf16.msra.mxu0 %v9453_v23 }
 0x132   :  { %v8288_v0 = vpop.f32.mrb[11].mxu1  ;;  %v8231_v24 = vadd.f32 %v8230_v27, %v8229_v60  ;;  %v2116_v61 = vadd.f32 %v8228_v50, %v10915_v11  ;;  %8542 = vmatprep.subr.bf16.mxu0 %v9456_v56  ;;  %v9455_v50 = vld [vmem:[%s12895_s5 + $0x38] sm:$0xff]  }
 0x133   :  { %v10979_v9 = vadd.f32 %v8286_v51, %v2108_v41  ;;  %v8289_v38 = vadd.f32 %v8288_v0, %v8287_v47  ;;  %8479 = vmatpush3.bf16.msra.mxu1 %v9455_v50 }
 0x134   :  { %v2119_v13 = vadd.f32 %v8231_v24, %v10915_v11  ;;  %8592 = vmatprep.subr.bf16.mxu1 %v9458_v18 }
 0x135   :  { %v10990_v57 = vadd.f32 %v8289_v38, %v2111_v28  ;;  %8543 = vmatpush3.bf16.msra.mxu0 %v9457_v44 }
 0x137   :  { %v8290_v34 = vpop.f32.mrb[12].mxu1 }
 0x138   :  { %v8291_v5 = vpop.f32.mrb[13].mxu1 }
 0x139   :  { %v8292_v35 = vadd.f32 %v8291_v5, %v8290_v34  ;;  %v8293_v4 = vpop.f32.mrb[14].mxu1 }
 0x13a   :  { %v8294_v3 = vpop.f32.mrb[15].mxu1 }
 0x13b   :  { %v11003_v54 = vadd.f32 %v8292_v35, %v2116_v61  ;;  %v8295_v59 = vadd.f32 %v8294_v3, %v8293_v4 }
 0x13d   :  { %v11014_v20 = vadd.f32 %v8295_v59, %v2119_v13 }
 0x142   :  { %v8232_v49 = vpop.f32.mrb[16].mxu0 }
 0x143   :  { %v8233_v41 = vpop.f32.mrb[17].mxu0 }
 0x144   :  { %v8234_v55 = vadd.f32 %v8233_v41, %v8232_v49  ;;  %v8235_v31 = vpop.f32.mrb[18].mxu0 }
 0x145   :  { %v8236_v16 = vpop.f32.mrb[19].mxu0 }
 0x146   :  { %v8237_v60 = vadd.f32 %v8236_v16, %v8235_v31  ;;  %v2124_v58 = vadd.f32 %v8234_v55, %v10915_v11 }
 0x148   :  { %v8296_v28 = vpop.f32.mrb[16].mxu1  ;;  %v2127_v47 = vadd.f32 %v8237_v60, %v10915_v11 }
 0x149   :  { %v8297_v51 = vpop.f32.mrb[17].mxu1 }
 0x14a   :  { %v8298_v27 = vadd.f32 %v8297_v51, %v8296_v28  ;;  %v8299_v0 = vpop.f32.mrb[18].mxu1 }
 0x14b   :  { %v8300_v24 = vpop.f32.mrb[19].mxu1 }
 0x14c   :  { %v11033_v38 = vadd.f32 %v8298_v27, %v2124_v58  ;;  %v8301_v32 = vadd.f32 %v8300_v24, %v8299_v0 }
 0x14e   :  { %v11035_v42 = vadd.f32 %v8301_v32, %v2127_v47 }
 0x151   :  { %v8238_v45 = vpop.f32.mrb[20].mxu0 }
 0x152   :  { %v8239_v43 = vpop.f32.mrb[21].mxu0 }
 0x153   :  { %v8240_v61 = vadd.f32 %v8239_v43, %v8238_v45  ;;  %v8241_v34 = vpop.f32.mrb[22].mxu0  ;;  %v8302_v12 = vpop.f32.mrb[20].mxu1 }
 0x154   :  { %v8242_v5 = vpop.f32.mrb[23].mxu0  ;;  %v8303_v19 = vpop.f32.mrb[21].mxu1 }
 0x155   :  { %v2132_v13 = vadd.f32 %v8240_v61, %v10915_v11  ;;  %v8243_v35 = vadd.f32 %v8242_v5, %v8241_v34  ;;  %v8304_v4 = vadd.f32 %v8303_v19, %v8302_v12  ;;  %v8305_v3 = vpop.f32.mrb[22].mxu1 }
 0x156   :  { %v8306_v59 = vpop.f32.mrb[23].mxu1 }
 0x157   :  { %v2135_v22 = vadd.f32 %v8243_v35, %v10915_v11  ;;  %v11042_v23 = vadd.f32 %v8304_v4, %v2132_v13  ;;  %v8307_v26 = vadd.f32 %v8306_v59, %v8305_v3 }
 0x159   :  { %v11044_v56 = vadd.f32 %v8307_v26, %v2135_v22 }
 0x15c   :  { %v8244_v49 = vpop.f32.mrb[24].mxu0 }
 0x15d   :  { %v8245_v44 = vpop.f32.mrb[25].mxu0 }
 0x15e   :  { %v8246_v41 = vadd.f32 %v8245_v44, %v8244_v49  ;;  %v8247_v55 = vpop.f32.mrb[26].mxu0  ;;  %v8308_v31 = vpop.f32.mrb[24].mxu1 }
 0x15f   :  { %v8248_v30 = vpop.f32.mrb[27].mxu0  ;;  %v8309_v16 = vpop.f32.mrb[25].mxu1 }
 0x160   :  { %v2140_v50 = vadd.f32 %v8246_v41, %v10915_v11  ;;  %v8249_v60 = vadd.f32 %v8248_v30, %v8247_v55  ;;  %v8310_v58 = vadd.f32 %v8309_v16, %v8308_v31  ;;  %v8311_v28 = vpop.f32.mrb[26].mxu1 }
 0x161   :  { %v8312_v51 = vpop.f32.mrb[27].mxu1 }
 0x162   :  { %v2143_v47 = vadd.f32 %v8249_v60, %v10915_v11  ;;  %v11048_v27 = vadd.f32 %v8310_v58, %v2140_v50  ;;  %v8313_v0 = vadd.f32 %v8312_v51, %v8311_v28 }
 0x164   :  { %v11050_v24 = vadd.f32 %v8313_v0, %v2143_v47  ;;  %v8250_v32 = vpop.f32.mrb[28].mxu0 }
 0x165   :  { %v8251_v45 = vpop.f32.mrb[29].mxu0 }
 0x166   :  { %v8252_v43 = vadd.f32 %v8251_v45, %v8250_v32  ;;  %v8253_v61 = vpop.f32.mrb[30].mxu0  ;;  %v8314_v34 = vpop.f32.mrb[28].mxu1 }
 0x167   :  { %v8254_v12 = vpop.f32.mrb[31].mxu0  ;;  %v8315_v5 = vpop.f32.mrb[29].mxu1 }
 0x168   :  { %v2148_v19 = vadd.f32 %v8252_v43, %v10915_v11  ;;  %v8255_v13 = vadd.f32 %v8254_v12, %v8253_v61  ;;  %v8316_v35 = vadd.f32 %v8315_v5, %v8314_v34  ;;  %v8317_v4 = vpop.f32.mrb[30].mxu1 }
 0x169   :  { %v8318_v3 = vpop.f32.mrb[31].mxu1 }
 0x16a   :  { %v2151_v59 = vadd.f32 %v8255_v13, %v10915_v11  ;;  %v11054_v18 = vadd.f32 %v8316_v35, %v2148_v19  ;;  %v8319_v22 = vadd.f32 %v8318_v3, %v8317_v4 }
 0x16c   :  { %v11056_v26 = vadd.f32 %v8319_v22, %v2151_v59 }
 0x171   :  { %v8336_v49 = vpop.f32.mrb[32].mxu0  ;;  %v8400_v44 = vpop.f32.mrb[32].mxu1 }
 0x172   :  { %v8337_v41 = vpop.f32.mrb[33].mxu0  ;;  %v8401_v55 = vpop.f32.mrb[33].mxu1 }
 0x173   :  { %v8338_v31 = vadd.f32 %v8337_v41, %v8336_v49  ;;  %v8339_v30 = vpop.f32.mrb[34].mxu0  ;;  %v8402_v16 = vadd.f32 %v8401_v55, %v8400_v44  ;;  %v8403_v50 = vpop.f32.mrb[34].mxu1 }
 0x174   :  { %v8340_v60 = vpop.f32.mrb[35].mxu0  ;;  %v8404_v58 = vpop.f32.mrb[35].mxu1 }
 0x175   :  { %v2286_v28 = vadd.f32 %v8338_v31, %v10925_v29  ;;  %v8341_v51 = vadd.f32 %v8340_v60, %v8339_v30  ;;  %v8405_v47 = vadd.f32 %v8404_v58, %v8403_v50  ;;  %v9466_v29 = vld [vmem:[%s12895_s5 + $0x1c0] sm:$0xff]  }
 0x176   :  { %8656 = vmatprep.subr.bf16.mxu0 %v9466_v29 }
 0x177   :  { %v2289_v11 = vadd.f32 %v8341_v51, %v10927_v52  ;;  %v11060_v0 = vadd.f32 %v8402_v16, %v2286_v28 }
 0x179   :  { %v8406_v32 = vpop.f32.mrb[36].mxu1  ;;  %v11062_v45 = vadd.f32 %v8405_v47, %v2289_v11 }
 0x17a   :  { %v8407_v43 = vpop.f32.mrb[37].mxu1 }
 0x17b   :  { %v8408_v61 = vadd.f32 %v8407_v43, %v8406_v32  ;;  %v8409_v34 = vpop.f32.mrb[38].mxu1 }
 0x17c   :  { %v8410_v5 = vpop.f32.mrb[39].mxu1 }
 0x17d   :  { %v8342_v12 = vpop.f32.mrb[36].mxu0  ;;  %v8411_v13 = vadd.f32 %v8410_v5, %v8409_v34 }
 0x17e   :  { %v8343_v19 = vpop.f32.mrb[37].mxu0 }
 0x17f   :  { %v8344_v35 = vadd.f32 %v8343_v19, %v8342_v12  ;;  %v8345_v4 = vpop.f32.mrb[38].mxu0 }
 0x180   :  { %v8346_v3 = vpop.f32.mrb[39].mxu0 }
 0x181   :  { %v2294_v52 = vadd.f32 %v8344_v35, %v10955_v39  ;;  %v8347_v59 = vadd.f32 %v8346_v3, %v8345_v4 }
 0x182   :  { %v8412_v22 = vpop.f32.mrb[40].mxu1 }
 0x183   :  { %v2297_v49 = vadd.f32 %v8347_v59, %v10969_v1  ;;  %v8413_v44 = vpop.f32.mrb[41].mxu1  ;;  %v11069_v41 = vadd.f32 %v8408_v61, %v2294_v52 }
 0x184   :  { %v8414_v55 = vadd.f32 %v8413_v44, %v8412_v22  ;;  %v8415_v31 = vpop.f32.mrb[42].mxu1 }
 0x185   :  { %v8348_v30 = vpop.f32.mrb[40].mxu0  ;;  %v8416_v16 = vpop.f32.mrb[43].mxu1  ;;  %v11071_v50 = vadd.f32 %v8411_v13, %v2297_v49 }
 0x186   :  { %v8349_v60 = vpop.f32.mrb[41].mxu0  ;;  %v8417_v58 = vadd.f32 %v8416_v16, %v8415_v31 }
 0x187   :  { %v8350_v28 = vadd.f32 %v8349_v60, %v8348_v30  ;;  %v8351_v51 = vpop.f32.mrb[42].mxu0 }
 0x188   :  { %v8352_v47 = vpop.f32.mrb[43].mxu0 }
 0x189   :  { %v2302_v39 = vadd.f32 %v8350_v28, %v10979_v9  ;;  %v8353_v11 = vadd.f32 %v8352_v47, %v8351_v51 }
 0x18a   :  { %v8418_v32 = vpop.f32.mrb[44].mxu1 }
 0x18b   :  { %v2305_v1 = vadd.f32 %v8353_v11, %v10990_v57  ;;  %v8419_v43 = vpop.f32.mrb[45].mxu1  ;;  %v11075_v61 = vadd.f32 %v8414_v55, %v2302_v39 }
 0x18c   :  { %v8420_v34 = vadd.f32 %v8419_v43, %v8418_v32  ;;  %v8421_v12 = vpop.f32.mrb[46].mxu1 }
 0x18d   :  { %v8354_v5 = vpop.f32.mrb[44].mxu0  ;;  %v8422_v19 = vpop.f32.mrb[47].mxu1  ;;  %v11077_v13 = vadd.f32 %v8417_v58, %v2305_v1 }
 0x18e   :  { %v8355_v35 = vpop.f32.mrb[45].mxu0  ;;  %v8423_v4 = vadd.f32 %v8422_v19, %v8421_v12 }
 0x18f   :  { %v8356_v3 = vadd.f32 %v8355_v35, %v8354_v5  ;;  %v8357_v29 = vpop.f32.mrb[46].mxu0 }
 0x190   :  { %v8358_v52 = vpop.f32.mrb[47].mxu0 }
 0x191   :  { %v2310_v9 = vadd.f32 %v8356_v3, %v11003_v54  ;;  %v8359_v59 = vadd.f32 %v8358_v52, %v8357_v29 }
 0x193   :  { %v2313_v22 = vadd.f32 %v8359_v59, %v11014_v20  ;;  %v8424_v57 = vpop.f32.mrb[48].mxu1  ;;  %v11081_v49 = vadd.f32 %v8420_v34, %v2310_v9 }
 0x194   :  { %v8425_v44 = vpop.f32.mrb[49].mxu1 }
 0x195   :  { %v8426_v31 = vadd.f32 %v8425_v44, %v8424_v57  ;;  %v8427_v30 = vpop.f32.mrb[50].mxu1  ;;  %v11083_v16 = vadd.f32 %v8423_v4, %v2313_v22 }
 0x196   :  { %v8360_v55 = vpop.f32.mrb[48].mxu0  ;;  %v8428_v58 = vpop.f32.mrb[51].mxu1 }
 0x197   :  { %v8361_v60 = vpop.f32.mrb[49].mxu0  ;;  %v8429_v47 = vadd.f32 %v8428_v58, %v8427_v30 }
 0x198   :  { %v8362_v28 = vadd.f32 %v8361_v60, %v8360_v55  ;;  %v8363_v51 = vpop.f32.mrb[50].mxu0 }
 0x199   :  { %v8364_v39 = vpop.f32.mrb[51].mxu0 }
 0x19a   :  { %v2318_v54 = vadd.f32 %v8362_v28, %v11033_v38  ;;  %v8365_v11 = vadd.f32 %v8364_v39, %v8363_v51 }
 0x19b   :  { %v8430_v32 = vpop.f32.mrb[52].mxu1 }
 0x19c   :  { %v2321_v20 = vadd.f32 %v8365_v11, %v11035_v42  ;;  %v11087_v1 = vadd.f32 %v8426_v31, %v2318_v54  ;;  %v8431_v43 = vpop.f32.mrb[53].mxu1 }
 0x19d   :  { %v8432_v12 = vadd.f32 %v8431_v43, %v8430_v32  ;;  %v8433_v5 = vpop.f32.mrb[54].mxu1 }
 0x19e   :  { %v11089_v19 = vadd.f32 %v8429_v47, %v2321_v20  ;;  %v8434_v4 = vpop.f32.mrb[55].mxu1 }
 0x19f   :  { %v8366_v34 = vpop.f32.mrb[52].mxu0  ;;  %v8435_v52 = vadd.f32 %v8434_v4, %v8433_v5 }
 0x1a0   :  { %v8367_v35 = vpop.f32.mrb[53].mxu0 }
 0x1a1   :  { %v8368_v3 = vadd.f32 %v8367_v35, %v8366_v34  ;;  %v8369_v29 = vpop.f32.mrb[54].mxu0 }
 0x1a2   :  { %v8370_v9 = vpop.f32.mrb[55].mxu0 }
 0x1a3   :  { %v2326_v38 = vadd.f32 %v8368_v3, %v11042_v23  ;;  %v8371_v59 = vadd.f32 %v8370_v9, %v8369_v29 }
 0x1a5   :  { %v2329_v42 = vadd.f32 %v8371_v59, %v11044_v56  ;;  %v11093_v57 = vadd.f32 %v8432_v12, %v2326_v38 }
 0x1a6   :  { %v8436_v22 = vpop.f32.mrb[56].mxu1 }
 0x1a7   :  { %v8437_v44 = vpop.f32.mrb[57].mxu1  ;;  %v8372_v55 = vpop.f32.mrb[56].mxu0  ;;  %v11095_v60 = vadd.f32 %v8435_v52, %v2329_v42 }
 0x1a8   :  { %v8438_v31 = vadd.f32 %v8437_v44, %v8436_v22  ;;  %v8439_v30 = vpop.f32.mrb[58].mxu1  ;;  %v8373_v58 = vpop.f32.mrb[57].mxu0 }
 0x1a9   :  { %v8440_v28 = vpop.f32.mrb[59].mxu1  ;;  %v8374_v51 = vadd.f32 %v8373_v58, %v8372_v55  ;;  %v8375_v47 = vpop.f32.mrb[58].mxu0 }
 0x1aa   :  { %v8441_v39 = vadd.f32 %v8440_v28, %v8439_v30  ;;  %v8376_v54 = vpop.f32.mrb[59].mxu0 }
 0x1ab   :  { %v2334_v23 = vadd.f32 %v8374_v51, %v11048_v27  ;;  %v8377_v11 = vadd.f32 %v8376_v54, %v8375_v47 }
 0x1ad   :  { %v2337_v56 = vadd.f32 %v8377_v11, %v11050_v24  ;;  %v11099_v32 = vadd.f32 %v8438_v31, %v2334_v23 }
 0x1ae   :  { %v8442_v20 = vpop.f32.mrb[60].mxu1 }
 0x1af   :  { %v8443_v43 = vpop.f32.mrb[61].mxu1  ;;  %v8378_v34 = vpop.f32.mrb[60].mxu0  ;;  %v11101_v35 = vadd.f32 %v8441_v39, %v2337_v56 }
 0x1b0   :  { %v8444_v12 = vadd.f32 %v8443_v43, %v8442_v20  ;;  %v8445_v5 = vpop.f32.mrb[62].mxu1  ;;  %v8379_v4 = vpop.f32.mrb[61].mxu0 }
 0x1b1   :  { %v8446_v3 = vpop.f32.mrb[63].mxu1  ;;  %v8380_v29 = vadd.f32 %v8379_v4, %v8378_v34  ;;  %v8381_v52 = vpop.f32.mrb[62].mxu0 }
 0x1b2   :  { %v8447_v9 = vadd.f32 %v8446_v3, %v8445_v5  ;;  %v8382_v38 = vpop.f32.mrb[63].mxu0 }
 0x1b3   :  { %v2342_v27 = vadd.f32 %v8380_v29, %v11054_v18  ;;  %v8383_v59 = vadd.f32 %v8382_v38, %v8381_v52 }
 0x1b5   :  { %v2345_v24 = vadd.f32 %v8383_v59, %v11056_v26  ;;  %v11105_v42 = vadd.f32 %v8444_v12, %v2342_v27 }
 0x1b7   :  { %v9099_v22 = vpop.f32.mrb[64].mxu0  ;;  %v11107_v44 = vadd.f32 %v8447_v9, %v2345_v24 }
 0x1b8   :  { %v11110_v55 = vadd.f32 %v9099_v22, %v11069_v41  ;;  %v2479_v31 = vpop.f32.mrb[65].mxu0 }
 0x1b9   :  { %v11113_v30 = vadd.f32 %v2479_v31, %v11060_v0  ;;  %v9100_v58 = vpop.f32.mrb[66].mxu0 }
 0x1ba   :  { %13100 = vst [vmem:[#allocation16_spill] sm:$0xff] %v11110_v55  ;;  %v11116_v28 = vadd.f32 %v9100_v58, %v11071_v50  ;;  %v2482_v18 = vpop.f32.mrb[67].mxu0  ;;  %v2544_v26 = vmax.f32 %v11110_v55, 0.0  ;;  %v13112_v58 = vld [vmem:[#allocation6_spill] sm:$0xff] }
 0x1bb   :  { %13101 = vst [vmem:[#allocation10_spill] sm:$0xff] %v11113_v30  ;;  %v11119_v51 = vadd.f32 %v2482_v18, %v11062_v45  ;;  %v2542_v39 = vmax.f32 %v11113_v30, 0.0  ;;  %v13105_v45 = vld [vmem:[#allocation9_spill] sm:$0xff] }
 0x1bc   :  { %13102 = vst [vmem:[#allocation17_spill] sm:$0xff] %v11116_v28  ;;  %v2545_v47 = vmax.f32 %v11116_v28, 0.0  ;;  %vm13106_vm12 = vcmp.ne.s16.totalorder %v13105_v45, 0 }
 0x1bd   :  { %13103 = vst [vmem:[#allocation18_spill] sm:$0xff] %v11119_v51  ;;  %v2543_v41 = vmax.f32 %v11119_v51, 0.0 }
 0x1be   :  { %v11125_v54 = vpack.c.bf16 %v2545_v47, %v2544_v26 }
 0x1bf   :  { %v11127_v0 = vpack.c.bf16 %v2543_v41, %v2542_v39  ;;  %v9103_v23 = vpop.f32.mrb[68].mxu0 }
 0x1c0   :  { %v11130_v50 = vadd.f32 %v9103_v23, %v11081_v49  ;;  %v2495_v11 = vpop.f32.mrb[69].mxu0  ;;  %v11135_v56 = vsel %vm13106_vm12, %v11125_v54, 0  ;;  %v11140_v20 = vsel %vm572_vm11, %v11125_v54, 0  ;;  %v13108_v49 = vld [vmem:[#allocation8_spill] sm:$0xff] }
 0x1c1   :  { %v11144_v34 = vadd.f32 %v2495_v11, %v11075_v61  ;;  %v9104_v12 = vpop.f32.mrb[70].mxu0  ;;  %vm13109_vm8 = vcmp.ne.s16.totalorder %v13108_v49, 0  ;;  %v12948_v4 = vrot.slane %v11135_v56, 4  ;;  %v2718_v3 = vsel %vm571_vm4, %v11127_v0, 0 }
 0x1c2   :  { %13104 = vst [vmem:[#allocation19_spill] sm:$0xff] %v11130_v50  ;;  %v2726_v5 = vsel %vm13109_vm8, %v11127_v0, 0  ;;  %v2548_v29 = vmax.f32 %v11130_v50, 0.0  ;;  %v11155_v52 = vadd.f32 %v9104_v12, %v11083_v16  ;;  %v2498_v9 = vpop.f32.mrb[71].mxu0  ;;  %v2830_v61 = vrot.slane %v2718_v3, 1 }
 0x1c3   :  { %13107 = vst [vmem:[#allocation20_spill] sm:$0xff] %v11144_v34  ;;  %v2854_v38 = vrot.slane %v2726_v5, 4  ;;  %v2546_v27 = vmax.f32 %v11144_v34, 0.0  ;;  %v11159_v59 = vadd.f32 %v2498_v9, %v11077_v13  ;;  %v12953_v24 = vrot.slane %v11140_v20, 1 }
 0x1c4   :  { %13110 = vst [vmem:[#allocation21_spill] sm:$0xff] %v11155_v52  ;;  %v2759_v22 = vshll.u32 %v11127_v0, 16  ;;  %v2549_v31 = vmax.f32 %v11155_v52, 0.0  ;;  %vm13113_vm8 = vcmask 1043456   ;;  %v2831_v26 = vsel %vm729_vm3, %v9760_v17, %v2830_v61 }
 0x1c5   :  { %13111 = vst [vmem:[#allocation22_spill] sm:$0xff] %v11159_v59  ;;  %v2855_v18 = vsel %vm13113_vm8, %v13112_v58, %v2854_v38  ;;  %vm13114_vm12 = vmmov %vm13113_vm8  ;;  %v2547_v47 = vmax.f32 %v11159_v59, 0.0  ;;  %v2833_v12 = vsel %vm729_vm3, %v2830_v61, %v12953_v24  ;;  %v2977_v5 = vshrl.u32 %v2831_v26, 16 }
 0x1c6   :  { %v2857_v16 = vsel %vm13114_vm12, %v2854_v38, %v12948_v4  ;;  %v2994_v13 = vshrl.u32 %v2855_v18, 16  ;;  %v2997_v39 = vshll.u32 %v2855_v18, 16  ;;  %v11172_v23 = vpack.c.bf16 %v2549_v31, %v2548_v29 }
 0x1c7   :  { %v3002_v41 = vshrl.u32 %v2857_v16, 16  ;;  %v3005_v11 = vshll.u32 %v2857_v16, 16  ;;  %v11177_v3 = vpack.c.bf16 %v2547_v47, %v2546_v27  ;;  %v9107_v9 = vpop.f32.mrb[72].mxu0  ;;  %v2979_v34 = vrot.slane %v2977_v5, 3 }
 0x1c8   :  { %v2996_v38 = vrot.slane %v2994_v13, 3  ;;  %v2999_v4 = vrot.slane %v2997_v39, 4  ;;  %v11180_v52 = vadd.f32 %v9107_v9, %v11093_v57  ;;  %v2511_v59 = vpop.f32.mrb[73].mxu0  ;;  %v2980_v29 = vshll.u32 %v2831_v26, 16 }
 0x1c9   :  { %v3004_v43 = vrot.slane %v3002_v41, 3  ;;  %v3007_v18 = vrot.slane %v3005_v11, 4  ;;  %v11183_v31 = vadd.f32 %v2511_v59, %v11087_v1  ;;  %v9108_v16 = vpop.f32.mrb[74].mxu0  ;;  %v2985_v61 = vshrl.u32 %v2833_v12, 16 }
 0x1ca   :  { %13115 = vst [vmem:[#allocation23_spill] sm:$0xff] %v11180_v52  ;;  %v3000_v50 = vor.u32 %v2999_v4, %v2996_v38  ;;  %v2988_v24 = vshll.u32 %v2833_v12, 16  ;;  %v2552_v27 = vmax.f32 %v11180_v52, 0.0  ;;  %v11187_v47 = vadd.f32 %v9108_v16, %v11095_v60  ;;  %v2514_v13 = vpop.f32.mrb[75].mxu0 }
 0x1cb   :  { %13116 = vst [vmem:[#allocation24_spill] sm:$0xff] %v11183_v31  ;;  %v11189_v39 = vor.u32 %v3007_v18, %v3004_v43  ;;  %v2982_v57 = vrot.slane %v2980_v29, 4  ;;  %v2550_v41 = vmax.f32 %v11183_v31, 0.0  ;;  %v11193_v26 = vadd.f32 %v2514_v13, %v11089_v19 }
 0x1cc   :  { %13117 = vst [vmem:[#allocation25_spill] sm:$0xff] %v11187_v47  ;;  %v2987_v1 = vrot.slane %v2985_v61, 3  ;;  %v2990_v59 = vrot.slane %v2988_v24, 4  ;;  %v2553_v4 = vmax.f32 %v11187_v47, 0.0  ;;  %v2761_v5 = vrot.slane %v2759_v22, 1  ;;  %v9467_v24 = vld [vmem:[%s12895_s5 + $0x180] sm:$0xff]  }
 0x1cd   :  { %13118 = vst [vmem:[#allocation26_spill] sm:$0xff] %v11193_v26  ;;  %v3009_v11 = vsel %vm535_vm15, %v3000_v50, %v11189_v39  ;;  %v2983_v12 = vor.u32 %v2982_v57, %v2979_v34  ;;  %v2551_v60 = vmax.f32 %v11193_v26, 0.0  ;;  %v2763_v9 = vshrl.u32 %v11127_v0, 16  ;;  %v9470_v61 = vld [vmem:[%s12895_s5 + $0x1c8] sm:$0xff]  }
 0x1ce   :  { %4255 = vmatprep.mubr.bf16.mxu0 %v3009_v11  ;;  %v11199_v43 = vor.u32 %v2990_v59, %v2987_v1  ;;  %v13119_v38 = vshll.u32 %v11125_v54, 16  ;;  %v11207_v18 = vpack.c.bf16 %v2553_v4, %v2552_v27  ;;  %v2762_v50 = vsel %vm583_vm14, %v9760_v17, %v2761_v5 }
 0x1cf   :  { %v11211_v34 = vrot.slane %v2759_v22, 5  ;;  %v11220_v13 = vpack.c.bf16 %v2551_v60, %v2550_v41  ;;  %v9111_v27 = vpop.f32.mrb[76].mxu0  ;;  %v2765_v1 = vor.u32 %v2763_v9, %v2761_v5  ;;  %v11224_v59 = vrot.slane %v2763_v9, 4 }
 0x1d0   :  { %v2769_v19 = vrot.slane %v13119_v38, 1  ;;  %v13120_v29 = vmov %v13119_v38  ;;  %v2992_v57 = vsel %vm535_vm15, %v2983_v12, %v11199_v43  ;;  %v11227_v22 = vadd.f32 %v9111_v27, %v11105_v42  ;;  %v2527_v38 = vpop.f32.mrb[77].mxu0  ;;  %v9471_v42 = vld [vmem:[%s12895_s5 + $0x188] sm:$0xff]  }
 0x1d1   :  { %v11215_v16 = vrot.slane %v13120_v29, 5  ;;  %4256 = vmatmul.mubr.bf16.vlgmr.msra.gmra.mrb[80].mxu0 %v2992_v57  ;;  %v2960_v4 = vshrl.u32 %v2762_v50, 16  ;;  %v2963_v11 = vshll.u32 %v2762_v50, 16  ;;  %v2710_v29 = vsel %vm479_vm7, %v11127_v0, 0  ;;  %v9112_v9 = vpop.f32.mrb[78].mxu0 }
 0x1d2   :  { %13121 = vst [vmem:[#allocation27_spill] sm:$0xff] %v11227_v22  ;;  %v2770_v41 = vsel %vm583_vm14, %v2765_v1, %v2769_v19  ;;  %v11234_v60 = vadd.f32 %v2527_v38, %v11099_v32  ;;  %v2951_v12 = vshrl.u32 %v2710_v29, 16  ;;  %v2954_v5 = vshll.u32 %v2710_v29, 16  ;;  %8657 = vmatpush3.bf16.msra.mxu0 %v9467_v24  ;;  %v2530_v47 = vpop.f32.mrb[79].mxu0  ;;  %v9472_v32 = vld [vmem:[%s12895_s5 + $0x1d0] sm:$0xff]  }
 0x1d3   :  { %v2556_v50 = vmax.f32 %v11227_v22, 0.0  ;;  %v2962_v57 = vrot.slane %v2960_v4, 3  ;;  %v2965_v27 = vrot.slane %v2963_v11, 4  ;;  %v2968_v26 = vshrl.u32 %v2770_v41, 16  ;;  %8658 = vmatprep.subr.bf16.mxu0 %v9470_v61 }
 0x1d4   :  { %13122 = vst [vmem:[#allocation28_spill] sm:$0xff] %v11234_v60  ;;  %v2971_v1 = vshll.u32 %v2770_v41, 16  ;;  %v2554_v38 = vmax.f32 %v11234_v60, 0.0  ;;  %v2953_v29 = vrot.slane %v2951_v12, 3  ;;  %v2956_v24 = vrot.slane %v2954_v5, 4  ;;  %v9476_v5 = vld [vmem:[%s12895_s5 + $0x1d8] sm:$0xff]  }
 0x1d5   :  { %v2966_v31 = vor.u32 %v2965_v27, %v2962_v57  ;;  %v2970_v52 = vrot.slane %v2968_v26, 3  ;;  %v11245_v51 = vadd.f32 %v9112_v9, %v11107_v44  ;;  %v11248_v4 = vadd.f32 %v2530_v47, %v11101_v35  ;;  %v9473_v26 = vld [vmem:[%s12895_s5 + $0x190] sm:$0xff]  }
 0x1d6   :  { %v2973_v11 = vrot.slane %v2971_v1, 4  ;;  %v11250_v22 = vor.u32 %v2956_v24, %v2953_v29  ;;  %vm13125_vm8 = vcmp.ne.s16.totalorder %v10317_v37, 0  ;;  %v2771_v41 = vshrl.u32 %v11125_v54, 16  ;;  %8659 = vmatpush3.bf16.msra.mxu0 %v9471_v42  ;;  %v9459_v29 = vld [vmem:[%s12895_s5 + $0x100] sm:$0xff]  }
 0x1d7   :  { %13123 = vst [vmem:[#allocation29_spill] sm:$0xff] %v11245_v51  ;;  %13124 = vst [vmem:[#allocation30_spill] sm:$0xff] %v11248_v4  ;;  %v2728_v61 = vsel %vm13125_vm8, %v11177_v3, 0  ;;  %v2557_v44 = vmax.f32 %v11245_v51, 0.0  ;;  %v2555_v12 = vmax.f32 %v11248_v4, 0.0  ;;  %v12960_v47 = vshll.u32 %v11177_v3, 16  ;;  %8660 = vmatprep.subr.bf16.mxu0 %v9472_v32 }
 0x1d8   :  { %v2858_v35 = vrot.slane %v2728_v61, 4  ;;  %v2974_v9 = vor.u32 %v2973_v11, %v2970_v52  ;;  %v2958_v42 = vsel %vm535_vm15, %v9912_v14, %v11250_v22  ;;  %v2773_v57 = vor.u32 %v2771_v41, %v2769_v19 }
 0x1d9   :  { %v11268_v27 = vrot.slane %v2771_v41, 4  ;;  %v11270_v1 = vpack.c.bf16 %v2557_v44, %v2556_v50  ;;  %v11275_v24 = vpack.c.bf16 %v2555_v12, %v2554_v38  ;;  %v13126_v32 = vrot.slane %v11135_v56, 4  ;;  %v9460_v38 = vld [vmem:[%s12895_s5 + $0x148] sm:$0xff]   ;;  %v9477_v56 = vld [vmem:[%s12895_s5 + $0x198] sm:$0xff]  }
 0x1da   :  { %v11282_v52 = vrot.slane %v12960_v47, 1  ;;  %v2975_v19 = vsel %vm535_vm15, %v2966_v31, %v2974_v9  ;;  %v11288_v50 = vsel %vm573_vm5, %v11177_v3, 0  ;;  %8661 = vmatpush3.bf16.msra.mxu0 %v9473_v26  ;;  %vm13127_vm8 = vcmp.ne.s16.totalorder %v10320_v6, 0  ;;  %v9478_v26 = vld [vmem:[%s12895_s5 + $0x1e0] sm:$0xff]  }
 0x1db   :  { %v2859_v61 = vsel %vm13114_vm12, %v13126_v32, %v2858_v35  ;;  %4158 = vmatprep.mubr.bf16.mxu1 %v2975_v19  ;;  %v12967_v44 = vrot.slane %v11288_v50, 1  ;;  %v2729_v12 = vsel %vm13127_vm8, %v11172_v23, 0  ;;  %vm13128_vm12 = vcmp.ne.s16.totalorder %v10053_v53, 0  ;;  %8662 = vmatprep.subr.bf16.mxu0 %v9476_v5  ;;  %v9461_v5 = vld [vmem:[%s12895_s5 + $0x108] sm:$0xff]  }
 0x1dc   :  { %v3106_v11 = vshrl.u32 %v2859_v61, 16  ;;  %v3109_v41 = vshll.u32 %v2859_v61, 16  ;;  %v2778_v31 = vsel %vm583_vm14, %v2773_v57, %v11282_v52  ;;  %v2711_v32 = vsel %vm13128_vm12, %v11125_v54, 0  ;;  %4159 = vmatmul.mubr.bf16.vlgmr.msra.gmra.mrb[64].mxu1 %v2958_v42 }
 0x1dd   :  { %v3062_v47 = vshrl.u32 %v2778_v31, 16  ;;  %v3065_v57 = vshll.u32 %v2778_v31, 16  ;;  %8593 = vmatpush3.bf16.msra.mxu1 %v9459_v29  ;;  %v13129_v4 = vrot.slane %v11140_v20, 1  ;;  %v2860_v60 = vrot.slane %v2729_v12, 4  ;;  %v9462_v29 = vld [vmem:[%s12895_s5 + $0x150] sm:$0xff]   ;;  %v9479_v20 = vld [vmem:[%s12895_s5 + $0x1a0] sm:$0xff]  }
 0x1de   :  { %v3108_v61 = vrot.slane %v3106_v11, 3  ;;  %v3111_v19 = vrot.slane %v3109_v41, 4  ;;  %v3088_v28 = vshrl.u32 %v2711_v32, 16  ;;  %v3091_v30 = vshll.u32 %v2711_v32, 16  ;;  %8594 = vmatprep.subr.bf16.mxu1 %v9460_v38  ;;  %8663 = vmatpush3.bf16.msra.mxu0 %v9477_v56 }
 0x1df   :  { %v2835_v51 = vsel %vm729_vm3, %v13129_v4, %v12967_v44  ;;  %v3064_v42 = vrot.slane %v3062_v47, 3  ;;  %v3067_v11 = vrot.slane %v3065_v57, 4  ;;  %vm13130_vm8 = vcmask 1043456   ;;  %8664 = vmatprep.subr.bf16.mxu0 %v9478_v26  ;;  %v9482_v47 = vld [vmem:[%s12895_s5 + $0x1e8] sm:$0xff]  }
 0x1e0   :  { %v3112_v55 = vor.u32 %v3111_v19, %v3108_v61  ;;  %v3097_v41 = vshrl.u32 %v2835_v51, 16  ;;  %v3100_v4 = vshll.u32 %v2835_v51, 16  ;;  %v2861_v31 = vsel %vm13130_vm8, %v2858_v35, %v2860_v60 }
 0x1e1   :  { %v3090_v12 = vrot.slane %v3088_v28, 3  ;;  %v3093_v32 = vrot.slane %v3091_v30, 4  ;;  %v11328_v61 = vor.u32 %v3067_v11, %v3064_v42  ;;  %v3178_v19 = vshrl.u32 %v2861_v31, 16  ;;  %8595 = vmatpush3.bf16.msra.mxu1 %v9461_v5  ;;  %v9463_v30 = vld [vmem:[%s12895_s5 + $0x110] sm:$0xff]   ;;  %v9464_v5 = vld [vmem:[%s12895_s5 + $0x158] sm:$0xff]  }
 0x1e2   :  { %v3113_v38 = vsel %vm535_vm15, %v11189_v39, %v3112_v55  ;;  %v3099_v56 = vrot.slane %v3097_v41, 3  ;;  %v3102_v57 = vrot.slane %v3100_v4, 4  ;;  %v3181_v44 = vshll.u32 %v2861_v31, 16  ;;  %8596 = vmatprep.subr.bf16.mxu1 %v9462_v29  ;;  %8665 = vmatpush3.bf16.msra.mxu0 %v9479_v20  ;;  %v9483_v29 = vld [vmem:[%s12895_s5 + $0x1a8] sm:$0xff]  }
 0x1e3   :  { %4263 = vmatprep.mubr.bf16.mxu0 %v3113_v38  ;;  %v11330_v51 = vor.u32 %v3093_v32, %v3090_v12  ;;  %v12969_v28 = vshrl.u32 %v11177_v3, 16  ;;  %v11338_v35 = vsel %vm535_vm15, %v2974_v9, %v11328_v61  ;;  %v3180_v39 = vrot.slane %v3178_v19, 3  ;;  %8666 = vmatprep.subr.bf16.mxu0 %v9482_v47 }
 0x1e4   :  { %v12968_v26 = vshll.u32 %v11172_v23, 16  ;;  %vm13131_vm12 = vcmp.ne.s16.totalorder %v10333_v15, 0  ;;  %4166 = vmatprep.mubr.bf16.mxu1 %v11338_v35  ;;  %v11348_v11 = vor.u32 %v3102_v57, %v3099_v56  ;;  %v3183_v41 = vrot.slane %v3181_v44, 4 }
 0x1e5   :  { %v2721_v42 = vsel %vm13131_vm12, %v11172_v23, 0  ;;  %v3095_v9 = vsel %vm535_vm15, %v11250_v22, %v11330_v51  ;;  %v2781_v4 = vor.u32 %v12969_v28, %v11282_v52  ;;  %v3259_v44 = vshrl.u32 %v2860_v60, 16  ;;  %v9484_v22 = vld [vmem:[%s12895_s5 + $0x1f0] sm:$0xff]   ;;  %8597 = vmatpush3.bf16.msra.mxu1 %v9463_v30 }
 0x1e6   :  { %4167 = vmatmul.mubr.bf16.gmra.mrb[68].mxu1 %v3095_v9  ;;  %v2785_v20 = vrot.slane %v12968_v26, 1  ;;  %v11361_v31 = vrot.slane %v2721_v42, 1  ;;  %v3262_v12 = vshll.u32 %v2860_v60, 16  ;;  %v3104_v52 = vsel %vm535_vm15, %v11199_v43, %v11348_v11  ;;  %v9465_v60 = vld [vmem:[%s12895_s5 + $0x118] sm:$0xff]   ;;  %8598 = vmatprep.subr.bf16.mxu1 %v9464_v5  ;;  %v9468_v42 = vld [vmem:[%s12895_s5 + $0x160] sm:$0xff]  }
 0x1e7   :  { %v3184_v32 = vor.u32 %v3183_v41, %v3180_v39  ;;  %v2712_v47 = vsel %vm481_vm9, %v11177_v3, 0  ;;  %v12971_v38 = vshrl.u32 %v11172_v23, 16  ;;  %4264 = vmatmul.mubr.bf16.gmra.mrb[84].mxu0 %v3104_v52  ;;  %v13132_v19 = vrot.slane %v11288_v50, 1  ;;  %v9488_v5 = vld [vmem:[%s12895_s5 + $0x1f8] sm:$0xff]  }
 0x1e8   :  { %v2786_v56 = vsel %vm583_vm14, %v2781_v4, %v2785_v20  ;;  %v3261_v57 = vrot.slane %v3259_v44, 3  ;;  %v3264_v39 = vrot.slane %v3262_v12, 4  ;;  %8667 = vmatpush3.bf16.msra.mxu0 %v9483_v29  ;;  %v9485_v4 = vld [vmem:[%s12895_s5 + $0x1b0] sm:$0xff]   ;;  %v3160_v44 = vshrl.u32 %v2712_v47, 16 }
 0x1e9   :  { %v2837_v43 = vsel %vm729_vm3, %v13132_v19, %v11361_v31  ;;  %v3185_v30 = vsel %vm535_vm15, %v3112_v55, %v3184_v32  ;;  %v3142_v41 = vshrl.u32 %v2786_v56, 16  ;;  %v3145_v9 = vshll.u32 %v2786_v56, 16  ;;  %8668 = vmatprep.subr.bf16.mxu0 %v9484_v22  ;;  %8599 = vmatpush3.bf16.msra.mxu1 %v9465_v60  ;;  %v9469_v56 = vld [vmem:[%s12895_s5 + $0x120] sm:$0xff]  }
 0x1ea   :  { %v3169_v26 = vshrl.u32 %v2837_v43, 16  ;;  %4271 = vmatprep.mubr.bf16.mxu0 %v3185_v30  ;;  %v3172_v50 = vshll.u32 %v2837_v43, 16  ;;  %v3265_v52 = vor.u32 %v3264_v39, %v3261_v57  ;;  %v3163_v12 = vshll.u32 %v2712_v47, 16  ;;  %8600 = vmatprep.subr.bf16.mxu1 %v9468_v42  ;;  %v9474_v39 = vld [vmem:[%s12895_s5 + $0x168] sm:$0xff]  }
 0x1eb   :  { %v3144_v19 = vrot.slane %v3142_v41, 3  ;;  %v3147_v55 = vrot.slane %v3145_v9, 4  ;;  %v11393_v29 = vor.u32 %v12971_v38, %v2785_v20  ;;  %v3162_v22 = vrot.slane %v3160_v44, 3 }
 0x1ec   :  { %v3171_v28 = vrot.slane %v3169_v26, 3  ;;  %v3174_v43 = vrot.slane %v3172_v50, 4  ;;  %v3266_v47 = vsel %vm535_vm15, %v3184_v32, %v3265_v52  ;;  %v3165_v57 = vrot.slane %v3163_v12, 4  ;;  %8669 = vmatpush3.bf16.msra.mxu0 %v9485_v4  ;;  %v9489_v50 = vld [vmem:[%s12895_s5 + $0x1b8] sm:$0xff]  }
 0x1ed   :  { %v11402_v26 = vor.u32 %v3147_v55, %v3144_v19  ;;  %v3241_v20 = vshrl.u32 %v11393_v29, 16  ;;  %v3244_v60 = vshll.u32 %v11393_v29, 16  ;;  %v3250_v30 = vshrl.u32 %v11361_v31, 16  ;;  %8670 = vmatprep.subr.bf16.mxu0 %v9488_v5  ;;  %8601 = vmatpush3.bf16.msra.mxu1 %v9469_v56  ;;  %v9480_v55 = vld [vmem:[%s12895_s5 + $0x170] sm:$0xff]  }
 0x1ee   :  { %v3175_v41 = vor.u32 %v3174_v43, %v3171_v28  ;;  %v11407_v9 = vor.u32 %v3165_v57, %v3162_v22  ;;  %v3253_v32 = vshll.u32 %v11361_v31, 16  ;;  %vm13133_vm8 = vcmp.ne.s16.totalorder %v13108_v49, 0  ;;  %v9475_v31 = vld [vmem:[%s12895_s5 + $0x128] sm:$0xff]   ;;  %8602 = vmatprep.subr.bf16.mxu1 %v9474_v39  ;;  %v13135_v22 = vld [vmem:[#allocation11_spill] sm:$0xff] }
 0x1ef   :  { %v2730_v42 = vsel %vm13133_vm8, %v11220_v13, 0  ;;  %v11419_v52 = vsel %vm535_vm15, %v11328_v61, %v11402_v26  ;;  %v3243_v4 = vrot.slane %v3241_v20, 3  ;;  %v3246_v28 = vrot.slane %v3244_v60, 4 }
 0x1f0   :  { %v3252_v44 = vrot.slane %v3250_v30, 3  ;;  %4174 = vmatprep.mubr.bf16.mxu1 %v11419_v52  ;;  %v3176_v12 = vsel %vm535_vm15, %v11348_v11, %v3175_v41  ;;  %v3167_v5 = vsel %vm535_vm15, %v11330_v51, %v11407_v9  ;;  %v3255_v19 = vrot.slane %v3253_v32, 4  ;;  %8671 = vmatpush3.bf16.msra.mxu0 %v9489_v50 }
 0x1f1   :  { %vm13134_vm12 = vcmp.ne.s16.totalorder %v13105_v45, 0  ;;  %4272 = vmatmul.mubr.bf16.gmra.mrb[88].mxu0 %v3176_v12  ;;  %4175 = vmatmul.mubr.bf16.gmra.mrb[72].mxu1 %v3167_v5  ;;  %v3247_v56 = vor.u32 %v3246_v28, %v3243_v4  ;;  %v2862_v43 = vrot.slane %v2730_v42, 4  ;;  %vm13136_vm8 = vcmp.ne.s16.totalorder %v13135_v22, 0  ;;  %v9486_v5 = vld [vmem:[%s12895_s5 + $0x178] sm:$0xff]  }
 0x1f2   :  { %v11433_v61 = vsel %vm13134_vm12, %v11207_v18, 0  ;;  %v2713_v51 = vsel %vm13136_vm8, %v11172_v23, 0  ;;  %4279 = vmatprep.mubr.bf16.mxu0 %v3266_v47  ;;  %v3256_v57 = vor.u32 %v3255_v19, %v3252_v44  ;;  %v12974_v39 = vshll.u32 %v11220_v13, 16  ;;  %8603 = vmatpush3.bf16.msra.mxu1 %v9475_v31  ;;  %v9481_v47 = vld [vmem:[%s12895_s5 + $0x130] sm:$0xff]  }
 0x1f3   :  { %v12972_v11 = vrot.slane %v11433_v61, 4  ;;  %v3232_v20 = vshrl.u32 %v2713_v51, 16  ;;  %v3235_v60 = vshll.u32 %v2713_v51, 16  ;;  %v3248_v30 = vsel %vm535_vm15, %v11402_v26, %v3247_v56  ;;  %8604 = vmatprep.subr.bf16.mxu1 %v9480_v55 }
 0x1f4   :  { %vm13137_vm12 = vcmask 1043456   ;;  %v12975_v4 = vshrl.u32 %v11220_v13, 16  ;;  %4182 = vmatprep.mubr.bf16.mxu1 %v3248_v30  ;;  %v3257_v50 = vsel %vm535_vm15, %v3175_v41, %v3256_v57  ;;  %v2793_v31 = vrot.slane %v12974_v39, 1 }
 0x1f5   :  { %v2863_v32 = vsel %vm13137_vm12, %v13112_v58, %v2862_v43  ;;  %vm13138_vm2 = vmmov %vm13137_vm12  ;;  %v3234_v56 = vrot.slane %v3232_v20, 3  ;;  %v12973_v30 = vshll.u32 %v11207_v18, 16  ;;  %v9487_v20 = vld [vmem:[%s12895_s5 + $0x138] sm:$0xff]   ;;  %v13140_v49 = vrot.slane %v11433_v61, 4 }
 0x1f6   :  { %v2865_v42 = vsel %vm13138_vm2, %v2862_v43, %v12972_v11  ;;  %v3332_v28 = vshrl.u32 %v2863_v32, 16  ;;  %v3335_v44 = vshll.u32 %v2863_v32, 16  ;;  %v3237_v43 = vrot.slane %v3235_v60, 4  ;;  %8605 = vmatpush3.bf16.msra.mxu1 %v9481_v47  ;;  %vm13141_vm8 = vmmov %vm13137_vm12 }
 0x1f7   :  { %v3340_v12 = vshrl.u32 %v2865_v42, 16  ;;  %v3343_v19 = vshll.u32 %v2865_v42, 16  ;;  %v2794_v55 = vsel %vm583_vm14, %v9760_v17, %v2793_v31  ;;  %v2797_v32 = vor.u32 %v12975_v4, %v2793_v31  ;;  %8606 = vmatprep.subr.bf16.mxu1 %v9486_v5 }
 0x1f8   :  { %v3334_v51 = vrot.slane %v3332_v28, 3  ;;  %v3337_v38 = vrot.slane %v3335_v44, 4  ;;  %v3238_v57 = vor.u32 %v3237_v43, %v3234_v56  ;;  %v2801_v42 = vrot.slane %v12973_v30, 1 }
 0x1f9   :  { %v3342_v11 = vrot.slane %v3340_v12, 3  ;;  %v3345_v41 = vrot.slane %v3343_v19, 4  ;;  %v3298_v28 = vshrl.u32 %v2794_v55, 16  ;;  %v3301_v44 = vshll.u32 %v2794_v55, 16  ;;  %v11473_v12 = vld [vmem:[%s12895_s5 + $0x200] sm:$0xff]   ;;  %4280 = vmatmul.mubr.bf16.gmra.mrb[92].mxu0 %v3257_v50 }
 0x1fa   :  { %v3338_v60 = vor.u32 %v3337_v38, %v3334_v51  ;;  %v3239_v47 = vsel %vm535_vm15, %v11407_v9, %v3238_v57  ;;  %v2722_v38 = vsel %vm571_vm4, %v11220_v13, 0  ;;  %v2723_v56 = vsel %vm572_vm11, %v11207_v18, 0  ;;  %8607 = vmatpush3.bf16.msra.mxu1 %v9487_v20 }
 0x1fb   :  { %v11475_v19 = vor.u32 %v3345_v41, %v3342_v11  ;;  %4183 = vmatmul.mubr.bf16.gmra.mrb[76].mxu1 %v3239_v47  ;;  %v2802_v5 = vsel %vm583_vm14, %v2797_v32, %v2801_v42  ;;  %v3300_v43 = vrot.slane %v3298_v28, 3  ;;  %v3303_v31 = vrot.slane %v3301_v44, 4  ;;  %9113 = vmatprep.subr.bf16.mxu1 %v11473_v12 }
 0x1fc   :  { %v2838_v51 = vrot.slane %v2722_v38, 1  ;;  %v3306_v50 = vshrl.u32 %v2802_v5, 16  ;;  %v3309_v41 = vshll.u32 %v2802_v5, 16  ;;  %v2840_v9 = vrot.slane %v2723_v56, 1 }
 0x1fd   :  { %v3347_v11 = vsel %vm535_vm15, %v3338_v60, %v11475_v19  ;;  %v3304_v57 = vor.u32 %v3303_v31, %v3300_v43  ;;  %vm13139_vm2 = vcmp.ne.s16.totalorder %v10317_v37, 0  ;;  %v2714_v32 = vsel %vm479_vm7, %v11220_v13, 0 }
 0x1fe   :  { %4287 = vmatprep.mubr.bf16.mxu0 %v3347_v11  ;;  %v2839_v55 = vsel %vm729_vm3, %v9760_v17, %v2838_v51  ;;  %v2732_v47 = vsel %vm13139_vm2, %v11275_v24, 0  ;;  %v3308_v60 = vrot.slane %v3306_v50, 3  ;;  %v3311_v28 = vrot.slane %v3309_v41, 4 }
 0x1ff   :  { %v2841_v44 = vsel %vm729_vm3, %v2838_v51, %v2840_v9  ;;  %v3315_v20 = vshrl.u32 %v2839_v55, 16  ;;  %v3318_v38 = vshll.u32 %v2839_v55, 16  ;;  %v2866_v43 = vrot.slane %v2732_v47, 4 }
 0x200   :  { %v3323_v56 = vshrl.u32 %v2841_v44, 16  ;;  %v3326_v5 = vshll.u32 %v2841_v44, 16  ;;  %v11498_v31 = vor.u32 %v3311_v28, %v3308_v60  ;;  %v3289_v30 = vshrl.u32 %v2714_v32, 16 }
 0x201   :  { %v3317_v11 = vrot.slane %v3315_v20, 3  ;;  %v3292_v39 = vshll.u32 %v2714_v32, 16  ;;  %v3320_v4 = vrot.slane %v3318_v38, 4  ;;  %v2867_v50 = vsel %vm13141_vm8, %v13140_v49, %v2866_v43 }
 0x202   :  { %v3325_v37 = vrot.slane %v3323_v56, 3  ;;  %v3328_v58 = vrot.slane %v3326_v5, 4  ;;  %v3313_v51 = vsel %vm535_vm15, %v3304_v57, %v11498_v31  ;;  %v3444_v41 = vshrl.u32 %v2867_v50, 16 }
 0x203   :  { %v3447_v55 = vshll.u32 %v2867_v50, 16  ;;  %v3291_v45 = vrot.slane %v3289_v30, 3  ;;  %4190 = vmatprep.mubr.bf16.mxu1 %v3313_v51  ;;  %v3321_v47 = vor.u32 %v3320_v4, %v3317_v11  ;;  %v3294_v28 = vrot.slane %v3292_v39, 4 }
 0x204   :  { %v3329_v60 = vor.u32 %v3328_v58, %v3325_v37  ;;  %v12982_v44 = vshrl.u32 %v11207_v18, 16  ;;  %v3446_v32 = vrot.slane %v3444_v41, 3  ;;  %v12981_v38 = vshll.u32 %v11275_v24, 16 }
 0x205   :  { %v3449_v20 = vrot.slane %v3447_v55, 4  ;;  %v2724_v49 = vsel %vm573_vm5, %v11275_v24, 0  ;;  %v3295_v57 = vor.u32 %v3294_v28, %v3291_v45  ;;  %vm13142_vm12 = vcmp.ne.s16.totalorder %v10320_v6, 0 }
 0x206   :  { %v3330_v61 = vsel %vm535_vm15, %v3321_v47, %v3329_v60  ;;  %v2805_v30 = vor.u32 %v12982_v44, %v2801_v42  ;;  %v2842_v56 = vrot.slane %v2724_v49, 1  ;;  %v2809_v58 = vrot.slane %v12981_v38, 1 }
 0x207   :  { %4288 = vmatmul.mubr.bf16.gmra.mrb[96].mxu0 %v3330_v61  ;;  %v3450_v37 = vor.u32 %v3449_v20, %v3446_v32  ;;  %v2733_v39 = vsel %vm13142_vm12, %v11270_v1, 0  ;;  %vm13143_vm2 = vcmp.ne.s16.totalorder %v10053_v53, 0  ;;  %v3296_v45 = vsel %vm535_vm15, %v9912_v14, %v3295_v57 }
 0x208   :  { %v2715_v4 = vsel %vm13143_vm2, %v11207_v18, 0  ;;  %v2843_v5 = vsel %vm729_vm3, %v2840_v9, %v2842_v56  ;;  %v2868_v42 = vrot.slane %v2733_v39, 4  ;;  %4191 = vmatmul.mubr.bf16.gmra.mrb[80].mxu1 %v3296_v45  ;;  %v2810_v51 = vsel %vm583_vm14, %v2805_v30, %v2809_v58 }
 0x209   :  { %v3426_v11 = vshrl.u32 %v2715_v4, 16  ;;  %v3451_v50 = vsel %vm535_vm15, %v11475_v19, %v3450_v37  ;;  %v3435_v41 = vshrl.u32 %v2843_v5, 16  ;;  %v3438_v55 = vshll.u32 %v2843_v5, 16 }
 0x20a   :  { %4295 = vmatprep.mubr.bf16.mxu0 %v3451_v50  ;;  %v3400_v47 = vshrl.u32 %v2810_v51, 16  ;;  %v3403_v28 = vshll.u32 %v2810_v51, 16  ;;  %v2869_v32 = vsel %vm13141_vm8, %v2866_v43, %v2868_v42  ;;  %v3429_v6 = vshll.u32 %v2715_v4, 16 }
 0x20b   :  { %v3428_v20 = vrot.slane %v3426_v11, 3  ;;  %v3437_v49 = vrot.slane %v3435_v41, 3  ;;  %v3440_v61 = vrot.slane %v3438_v55, 4  ;;  %v3516_v38 = vshrl.u32 %v2869_v32, 16 }
 0x20c   :  { %v3519_v9 = vshll.u32 %v2869_v32, 16  ;;  %v3402_v39 = vrot.slane %v3400_v47, 3  ;;  %v3405_v44 = vrot.slane %v3403_v28, 4  ;;  %v12990_v19 = vshrl.u32 %v11275_v24, 16 }
 0x20d   :  { %v3441_v45 = vor.u32 %v3440_v61, %v3437_v49  ;;  %v3518_v25 = vrot.slane %v3516_v38, 3  ;;  %v12989_v5 = vshll.u32 %v11270_v1, 16  ;;  %v3431_v33 = vrot.slane %v3429_v6, 4 }
 0x20e   :  { %v3521_v30 = vrot.slane %v3519_v9, 4  ;;  %v3406_v50 = vor.u32 %v3405_v44, %v3402_v39  ;;  %v2813_v43 = vor.u32 %v12990_v19, %v2809_v58  ;;  %vm13144_vm12 = vcmp.ne.s16.totalorder %v10333_v15, 0 }
 0x20f   :  { %v2725_v11 = vsel %vm13144_vm12, %v11270_v1, 0  ;;  %v3442_v51 = vsel %vm535_vm15, %v3329_v60, %v3441_v45  ;;  %v2817_v4 = vrot.slane %v12989_v5, 1  ;;  %v3432_v6 = vor.u32 %v3431_v33, %v3428_v20 }
 0x210   :  { %v3522_v41 = vor.u32 %v3521_v30, %v3518_v25  ;;  %v2844_v55 = vrot.slane %v2725_v11, 1  ;;  %v11540_v38 = vsel %vm535_vm15, %v11498_v31, %v3406_v50  ;;  %4296 = vmatmul.mubr.bf16.gmra.mrb[100].mxu0 %v3442_v51  ;;  %v3597_v44 = vshrl.u32 %v2868_v42, 16 }
 0x211   :  { %v3600_v47 = vshll.u32 %v2868_v42, 16  ;;  %4198 = vmatprep.mubr.bf16.mxu1 %v11540_v38  ;;  %v2818_v28 = vsel %vm583_vm14, %v2813_v43, %v2817_v4  ;;  %v2716_v60 = vsel %vm481_vm9, %v11275_v24, 0  ;;  %v3433_v31 = vsel %vm535_vm15, %v3295_v57, %v3432_v6 }
 0x212   :  { %v3523_v58 = vsel %vm535_vm15, %v3450_v37, %v3522_v41  ;;  %v2845_v25 = vsel %vm729_vm3, %v2842_v56, %v2844_v55  ;;  %v3480_v32 = vshrl.u32 %v2818_v28, 16  ;;  %v3483_v49 = vshll.u32 %v2818_v28, 16  ;;  %4199 = vmatmul.mubr.bf16.gmra.mrb[84].mxu1 %v3433_v31 }
 0x213   :  { %4303 = vmatprep.mubr.bf16.mxu0 %v3523_v58  ;;  %v3507_v33 = vshrl.u32 %v2845_v25, 16  ;;  %v3510_v42 = vshll.u32 %v2845_v25, 16  ;;  %v3599_v20 = vrot.slane %v3597_v44, 3  ;;  %v3602_v61 = vrot.slane %v3600_v47, 4 }
 0x214   :  { %v3498_v9 = vshrl.u32 %v2716_v60, 16  ;;  %v3482_v37 = vrot.slane %v3480_v32, 3  ;;  %v3485_v39 = vrot.slane %v3483_v49, 4  ;;  %v3501_v43 = vshll.u32 %v2716_v60, 16 }
 0x215   :  { %v3509_v30 = vrot.slane %v3507_v33, 3  ;;  %v3512_v56 = vrot.slane %v3510_v42, 4  ;;  %v3603_v11 = vor.u32 %v3602_v61, %v3599_v20  ;;  %v2819_v5 = vshrl.u32 %v11270_v1, 16 }
 0x216   :  { %v3500_v51 = vrot.slane %v3498_v9, 3  ;;  %v11551_v58 = vor.u32 %v3485_v39, %v3482_v37  ;;  %v3503_v57 = vrot.slane %v3501_v43, 4  ;;  %v3588_v19 = vshrl.u32 %v2844_v55, 16 }
 0x217   :  { %v3591_v28 = vshll.u32 %v2844_v55, 16  ;;  %v3513_v15 = vor.u32 %v3512_v56, %v3509_v30  ;;  %v3604_v25 = vsel %vm535_vm15, %v3522_v41, %v3603_v11  ;;  %v11556_v44 = vor.u32 %v2819_v5, %v2817_v4 }
 0x218   :  { %vm13145_vm2 = vcmp.ne.s16.totalorder %v13135_v22, 0  ;;  %v11563_v60 = vsel %vm535_vm15, %v3406_v50, %v11551_v58  ;;  %v3504_v31 = vor.u32 %v3503_v57, %v3500_v51  ;;  %v3590_v32 = vrot.slane %v3588_v19, 3 }
 0x219   :  { %v2717_v47 = vsel %vm13145_vm2, %v11270_v1, 0  ;;  %v3593_v49 = vrot.slane %v3591_v28, 4  ;;  %4206 = vmatprep.mubr.bf16.mxu1 %v11563_v60  ;;  %v3514_v55 = vsel %vm535_vm15, %v3441_v45, %v3513_v15  ;;  %v3579_v41 = vshrl.u32 %v11556_v44, 16 }
 0x21a   :  { %v3582_v4 = vshll.u32 %v11556_v44, 16  ;;  %v3570_v33 = vshrl.u32 %v2717_v47, 16  ;;  %4304 = vmatmul.mubr.bf16.gmra.mrb[104].mxu0 %v3514_v55  ;;  %v3505_v42 = vsel %vm535_vm15, %v3432_v6, %v3504_v31  ;;  %v3573_v61 = vshll.u32 %v2717_v47, 16 }
 0x21b   :  { %v3594_v20 = vor.u32 %v3593_v49, %v3590_v32  ;;  %v2734_v50 = vsel %vm619_vm0, %v11127_v0, 0  ;;  %4311 = vmatprep.mubr.bf16.mxu0 %v3604_v25  ;;  %4207 = vmatmul.mubr.bf16.gmra.mrb[88].mxu1 %v3505_v42  ;;  %v3581_v19 = vrot.slane %v3579_v41, 3  ;;  %v2735_v45 = vsel %vm620_vm10, %v11125_v54, 0 }
 0x21c   :  { %v3584_v9 = vrot.slane %v3582_v4, 4  ;;  %v3572_v37 = vrot.slane %v3570_v33, 3  ;;  %v3575_v30 = vrot.slane %v3573_v61, 4  ;;  %v2908_v43 = vrot.slane %v2734_v50, 5 }
 0x21d   :  { %v3595_v39 = vsel %vm535_vm15, %v3513_v15, %v3594_v20  ;;  %v2909_v6 = vrot.slane %v2735_v45, 5  ;;  %v2742_v11 = vsel %vm631_vm13, %v11127_v0, 0  ;;  %v2743_v51 = vsel %vm479_vm7, %v11125_v54, 0 }
 0x21e   :  { %v3585_v56 = vor.u32 %v3584_v9, %v3581_v19  ;;  %v2872_v57 = vor.u32 %v11211_v34, %v11224_v59  ;;  %v3576_v28 = vor.u32 %v3575_v30, %v3572_v37  ;;  %v3028_v47 = vshrl.u32 %v2908_v43, 16 }
 0x21f   :  { %v2910_v25 = vsel %vm811_vm6, %v2908_v43, %v2909_v6  ;;  %v3031_v15 = vshll.u32 %v2908_v43, 16  ;;  %v3045_v41 = vshrl.u32 %v2742_v11, 16  ;;  %v3048_v20 = vshll.u32 %v2742_v11, 16 }
 0x220   :  { %v3586_v32 = vsel %vm535_vm15, %v11551_v58, %v3585_v56  ;;  %v3036_v49 = vshrl.u32 %v2910_v25, 16  ;;  %v3039_v55 = vshll.u32 %v2910_v25, 16  ;;  %v3577_v4 = vsel %vm535_vm15, %v3504_v31, %v3576_v28 }
 0x221   :  { %4214 = vmatprep.mubr.bf16.mxu1 %v3586_v32  ;;  %v3030_v33 = vrot.slane %v3028_v47, 3  ;;  %v3033_v42 = vrot.slane %v3031_v15, 4  ;;  %v3047_v34 = vrot.slane %v3045_v41, 3  ;;  %v3053_v59 = vshrl.u32 %v2743_v51, 16 }
 0x222   :  { %v3038_v61 = vrot.slane %v3036_v49, 3  ;;  %v3041_v50 = vrot.slane %v3039_v55, 4  ;;  %4312 = vmatmul.mubr.bf16.gmra.mrb[108].mxu0 %v3595_v39  ;;  %v3050_v9 = vrot.slane %v3048_v20, 4  ;;  %v3056_v37 = vshll.u32 %v2743_v51, 16 }
 0x223   :  { %v3034_v19 = vor.u32 %v3033_v42, %v3030_v33  ;;  %v2875_v45 = vor.u32 %v11215_v16, %v11268_v27  ;;  %4449 = vmatprep.mubr.bf16.mxu0 %v11338_v35  ;;  %4215 = vmatmul.mubr.bf16.gmra.mrb[92].mxu1 %v3577_v4  ;;  %v3055_v43 = vrot.slane %v3053_v59, 3  ;;  %v3011_v31 = vshrl.u32 %v2872_v57, 16 }
 0x224   :  { %v3042_v30 = vor.u32 %v3041_v50, %v3038_v61  ;;  %v3014_v56 = vshll.u32 %v2872_v57, 16  ;;  %v3051_v28 = vor.u32 %v3050_v9, %v3047_v34  ;;  %v3058_v11 = vrot.slane %v3056_v37, 4 }
 0x225   :  { %v2876_v25 = vsel %vm443_vm1, %v2872_v57, %v2875_v45  ;;  %vm13146_vm8 = vcmp.ne.s16.totalorder %v10695_v21, 0  ;;  %v3013_v47 = vrot.slane %v3011_v31, 3  ;;  %vm13147_vm12 = vcmp.ne.s16.totalorder %v10053_v53, 0 }
 0x226   :  { %v2736_v39 = vsel %vm13146_vm8, %v11177_v3, 0  ;;  %v3043_v51 = vsel %vm535_vm15, %v3034_v19, %v3042_v30  ;;  %v3016_v15 = vrot.slane %v3014_v56, 4  ;;  %v3019_v16 = vshrl.u32 %v2876_v25, 16 }
 0x227   :  { %4352 = vmatprep.mubr.bf16.mxu1 %v3043_v51  ;;  %v3059_v27 = vor.u32 %v3058_v11, %v3055_v43  ;;  %v3022_v35 = vshll.u32 %v2876_v25, 16  ;;  %v2911_v32 = vrot.slane %v2736_v39, 5  ;;  %v2744_v49 = vsel %vm13147_vm12, %v11177_v3, 0  ;;  %v9491_v39 = vld [vmem:[%s12895_s5 + $0x208] sm:$0xff]  }
 0x228   :  { %v3017_v55 = vor.u32 %v3016_v15, %v3013_v47  ;;  %v3021_v41 = vrot.slane %v3019_v16, 3  ;;  %v3133_v57 = vshrl.u32 %v2744_v49, 16  ;;  %v3136_v4 = vshll.u32 %v2744_v49, 16 }
 0x229   :  { %v3060_v33 = vsel %vm535_vm15, %v3051_v28, %v3059_v27  ;;  %v3024_v42 = vrot.slane %v3022_v35, 4  ;;  %v2912_v20 = vsel %vm811_vm6, %v2909_v6, %v2911_v32  ;;  %v2924_v61 = vsel %vm583_vm14, %v11393_v29, %v9760_v17 }
 0x22a   :  { %v3124_v50 = vshrl.u32 %v2912_v20, 16  ;;  %v3127_v34 = vshll.u32 %v2912_v20, 16  ;;  %v3135_v59 = vrot.slane %v3133_v57, 3  ;;  %v3138_v19 = vrot.slane %v3136_v4, 4  ;;  %4450 = vmatmul.mubr.bf16.vlgmr.msra.gmra.mrb[112].mxu0 %v3060_v33 }
 0x22b   :  { %v3025_v9 = vor.u32 %v3024_v42, %v3021_v41  ;;  %v3214_v37 = vshrl.u32 %v2924_v61, 16  ;;  %v3217_v43 = vshll.u32 %v2924_v61, 16  ;;  %v13148_v31 = vshrl.u32 %v11177_v3, 16  ;;  %4457 = vmatprep.mubr.bf16.mxu0 %v11419_v52 }
 0x22c   :  { %v3126_v28 = vrot.slane %v3124_v50, 3  ;;  %v3129_v11 = vrot.slane %v3127_v34, 4  ;;  %v11608_v6 = vor.u32 %v3138_v19, %v3135_v59  ;;  %v13149_v25 = vshll.u32 %v11177_v3, 16 }
 0x22d   :  { %v2877_v56 = vrot.slane %v13148_v31, 4  ;;  %v3026_v51 = vsel %vm535_vm15, %v3017_v55, %v3025_v9  ;;  %v3216_v47 = vrot.slane %v3214_v37, 3  ;;  %v3219_v15 = vrot.slane %v3217_v43, 4 }
 0x22e   :  { %v2878_v29 = vrot.slane %v13149_v25, 5  ;;  %vm13150_vm2 = vcmp.ne.s16.totalorder %v10712_v10, 0  ;;  %4353 = vmatmul.mubr.bf16.vlgmr.msra.gmra.mrb[96].mxu1 %v3026_v51  ;;  %v3130_v52 = vor.u32 %v3129_v11, %v3126_v28  ;;  %v2745_v57 = vsel %vm481_vm9, %v11172_v23, 0 }
 0x22f   :  { %v2737_v16 = vsel %vm13150_vm2, %v11172_v23, 0  ;;  %9114 = vmatpush3.bf16.msra.mxu1 %v11473_v12  ;;  %v3220_v41 = vor.u32 %v3219_v15, %v3216_v47  ;;  %v13151_v4 = vshrl.u32 %v11172_v23, 16  ;;  %v13152_v33 = vshll.u32 %v11172_v23, 16  ;;  %v9492_v12 = vld [vmem:[%s12895_s5 + $0x210] sm:$0xff]  }
 0x230   :  { %v2879_v35 = vor.u32 %v2878_v29, %v2877_v56  ;;  %v2913_v49 = vrot.slane %v2737_v16, 5  ;;  %v3131_v20 = vsel %vm535_vm15, %v3042_v30, %v3130_v52  ;;  %9115 = vmatprep.subr.bf16.mxu1 %v9491_v39  ;;  %v3205_v34 = vshrl.u32 %v2745_v57, 16 }
 0x231   :  { %v2881_v55 = vrot.slane %v13151_v4, 4  ;;  %v2882_v42 = vrot.slane %v13152_v33, 5  ;;  %4360 = vmatprep.mubr.bf16.mxu1 %v3131_v20  ;;  %v3140_v59 = vsel %vm535_vm15, %v3059_v27, %v11608_v6  ;;  %v3221_v30 = vsel %vm535_vm15, %v11402_v26, %v3220_v41  ;;  %v9493_v26 = vld [vmem:[%s12895_s5 + $0x218] sm:$0xff]  }
 0x232   :  { %v2880_v61 = vsel %vm443_vm1, %v2875_v45, %v2879_v35  ;;  %v2914_v50 = vsel %vm811_vm6, %v2911_v32, %v2913_v49  ;;  %v3207_v45 = vrot.slane %v3205_v34, 3  ;;  %v3208_v56 = vshll.u32 %v2745_v57, 16  ;;  %4458 = vmatmul.mubr.bf16.gmra.mrb[116].mxu0 %v3140_v59 }
 0x233   :  { %v3115_v19 = vshrl.u32 %v2880_v61, 16  ;;  %v3118_v37 = vshll.u32 %v2880_v61, 16  ;;  %v3196_v43 = vshrl.u32 %v2914_v50, 16  ;;  %v3199_v31 = vshll.u32 %v2914_v50, 16  ;;  %9116 = vmatpush3.bf16.msra.mxu1 %v9491_v39  ;;  %4465 = vmatprep.mubr.bf16.mxu0 %v3221_v30 }
 0x234   :  { %v2883_v25 = vor.u32 %v2882_v42, %v2881_v55  ;;  %v3210_v51 = vrot.slane %v3208_v56, 4  ;;  %9117 = vmatprep.subr.bf16.mxu1 %v9492_v12  ;;  %v2915_v27 = vsel %vm811_vm6, %v2913_v49, %v10755_v62  ;;  %v2738_v47 = vsel %vm619_vm0, %v11220_v13, 0 }
 0x235   :  { %v3117_v32 = vrot.slane %v3115_v19, 3  ;;  %v3120_v28 = vrot.slane %v3118_v37, 4  ;;  %v3198_v11 = vrot.slane %v3196_v43, 3  ;;  %v3201_v29 = vrot.slane %v3199_v31, 4  ;;  %v9494_v37 = vld [vmem:[%s12895_s5 + $0x220] sm:$0xff]  }
 0x236   :  { %v2884_v16 = vsel %vm443_vm1, %v2879_v35, %v2883_v25  ;;  %v3277_v39 = vshrl.u32 %v2915_v27, 16  ;;  %v3280_v57 = vshll.u32 %v2915_v27, 16  ;;  %v3211_v55 = vor.u32 %v3210_v51, %v3207_v45  ;;  %v9495_v27 = vld [vmem:[%s12895_s5 + $0x228] sm:$0xff]  }
 0x237   :  { %v3121_v15 = vor.u32 %v3120_v28, %v3117_v32  ;;  %v3202_v4 = vor.u32 %v3201_v29, %v3198_v11  ;;  %v3187_v33 = vshrl.u32 %v2884_v16, 16  ;;  %v3190_v42 = vshll.u32 %v2884_v16, 16  ;;  %9118 = vmatpush3.bf16.msra.mxu1 %v9492_v12 }
 0x238   :  { %v3279_v49 = vrot.slane %v3277_v39, 3  ;;  %v3282_v61 = vrot.slane %v3280_v57, 4  ;;  %v3268_v50 = vshrl.u32 %v2883_v25, 16  ;;  %v3286_v59 = vsel %vm535_vm15, %v3220_v41, %v10789_v36  ;;  %9119 = vmatprep.subr.bf16.mxu1 %v9493_v26 }
 0x239   :  { %v3122_v20 = vsel %vm535_vm15, %v3025_v9, %v3121_v15  ;;  %v3203_v34 = vsel %vm535_vm15, %v3130_v52, %v3202_v4  ;;  %v3189_v19 = vrot.slane %v3187_v33, 3  ;;  %v3192_v35 = vrot.slane %v3190_v42, 4 }
 0x23a   :  { %4361 = vmatmul.mubr.bf16.gmra.mrb[100].mxu1 %v3122_v20  ;;  %v3212_v9 = vsel %vm535_vm15, %v11608_v6, %v3211_v55  ;;  %v3283_v43 = vor.u32 %v3282_v61, %v3279_v49  ;;  %v3270_v12 = vrot.slane %v3268_v50, 3  ;;  %v3271_v30 = vshll.u32 %v2883_v25, 16 }
 0x23b   :  { %4368 = vmatprep.mubr.bf16.mxu1 %v3203_v34  ;;  %v3285_v52 = vsel %vm535_vm15, %v3211_v55, %v9912_v14  ;;  %v2739_v41 = vsel %vm620_vm10, %v11207_v18, 0  ;;  %v2916_v31 = vrot.slane %v2738_v47, 5  ;;  %v2746_v45 = vsel %vm631_vm13, %v11220_v13, 0  ;;  %4466 = vmatmul.mubr.bf16.gmra.mrb[120].mxu0 %v3212_v9 }
 0x23c   :  { %v3193_v56 = vor.u32 %v3192_v35, %v3189_v19  ;;  %v3273_v32 = vrot.slane %v3271_v30, 4  ;;  %v2917_v28 = vrot.slane %v2739_v41, 5  ;;  %9120 = vmatpush3.bf16.msra.mxu1 %v9493_v26  ;;  %v2747_v6 = vsel %vm479_vm7, %v11207_v18, 0  ;;  %4473 = vmatprep.mubr.bf16.mxu0 %v3286_v59  ;;  %v9496_v35 = vld [vmem:[%s12895_s5 + $0x230] sm:$0xff]  }
 0x23d   :  { %v3284_v11 = vsel %vm535_vm15, %v3202_v4, %v3283_v43  ;;  %v3366_v25 = vshrl.u32 %v2916_v31, 16  ;;  %v3369_v29 = vshll.u32 %v2916_v31, 16  ;;  %v3383_v51 = vshrl.u32 %v2746_v45, 16  ;;  %9121 = vmatprep.subr.bf16.mxu1 %v9494_v37 }
 0x23e   :  { %v3274_v47 = vor.u32 %v3273_v32, %v3270_v12  ;;  %v2918_v16 = vsel %vm811_vm6, %v2916_v31, %v2917_v28  ;;  %v3386_v39 = vshll.u32 %v2746_v45, 16  ;;  %v3391_v26 = vshrl.u32 %v2747_v6, 16 }
 0x23f   :  { %v3368_v57 = vrot.slane %v3366_v25, 3  ;;  %v3371_v55 = vrot.slane %v3369_v29, 4  ;;  %v3374_v33 = vshrl.u32 %v2918_v16, 16  ;;  %v3377_v42 = vshll.u32 %v2918_v16, 16 }
 0x240   :  { %v3194_v20 = vsel %vm535_vm15, %v3121_v15, %v3193_v56  ;;  %v3275_v4 = vsel %vm535_vm15, %v3193_v56, %v3274_v47  ;;  %v3385_v49 = vrot.slane %v3383_v51, 3  ;;  %v3388_v61 = vrot.slane %v3386_v39, 4  ;;  %9122 = vmatpush3.bf16.msra.mxu1 %v9494_v37 }
 0x241   :  { %v3372_v50 = vor.u32 %v3371_v55, %v3368_v57  ;;  %v3376_v34 = vrot.slane %v3374_v33, 3  ;;  %v3379_v59 = vrot.slane %v3377_v42, 4  ;;  %v3394_v19 = vshll.u32 %v2747_v6, 16  ;;  %9123 = vmatprep.subr.bf16.mxu1 %v9495_v27 }
 0x242   :  { %4369 = vmatmul.mubr.bf16.gmra.mrb[104].mxu1 %v3194_v20  ;;  %v3393_v9 = vrot.slane %v3391_v26, 3  ;;  %v13153_v43 = vshrl.u32 %v11220_v13, 16  ;;  %v13154_v12 = vshll.u32 %v11220_v13, 16  ;;  %v13155_v37 = vshrl.u32 %v11207_v18, 16 }
 0x243   :  { %4376 = vmatprep.mubr.bf16.mxu1 %v3284_v11  ;;  %v11682_v31 = vor.u32 %v3379_v59, %v3376_v34  ;;  %v3396_v45 = vrot.slane %v3394_v19, 4  ;;  %v13156_v56 = vshll.u32 %v11207_v18, 16  ;;  %v2740_v6 = vsel %vm13146_vm8, %v11275_v24, 0  ;;  %4474 = vmatmul.mubr.bf16.gmra.mrb[124].mxu0 %v3285_v52  ;;  %v9497_v52 = vld [vmem:[%s12895_s5 + $0x238] sm:$0xff]  }
 0x244   :  { %v2885_v15 = vrot.slane %v13153_v43, 4  ;;  %v2886_v30 = vrot.slane %v13154_v12, 5  ;;  %v2888_v41 = vrot.slane %v13155_v37, 4  ;;  %v3389_v11 = vor.u32 %v3388_v61, %v3385_v49  ;;  %9124 = vmatpush3.bf16.msra.mxu1 %v9495_v27  ;;  %4481 = vmatprep.mubr.bf16.mxu0 %v11540_v38 }
 0x245   :  { %v2889_v32 = vrot.slane %v13156_v56, 5  ;;  %v2919_v29 = vrot.slane %v2740_v6, 5  ;;  %v2748_v51 = vsel %vm13147_vm12, %v11275_v24, 0  ;;  %v3381_v47 = vsel %vm535_vm15, %v3372_v50, %v11682_v31  ;;  %9125 = vmatprep.subr.bf16.mxu1 %v9496_v35 }
 0x246   :  { %v2887_v25 = vor.u32 %v2886_v30, %v2885_v15  ;;  %v3471_v39 = vshrl.u32 %v2748_v51, 16  ;;  %v2925_v26 = vsel %vm583_vm14, %v11556_v44, %v9760_v17  ;;  %v3474_v33 = vshll.u32 %v2748_v51, 16 }
 0x247   :  { %v2890_v16 = vor.u32 %v2889_v32, %v2888_v41  ;;  %v2920_v27 = vsel %vm811_vm6, %v2917_v28, %v2919_v29  ;;  %v3397_v38 = vor.u32 %v3396_v45, %v3393_v9  ;;  %v3552_v9 = vshrl.u32 %v2925_v26, 16 }
 0x248   :  { %v3349_v57 = vshrl.u32 %v2887_v25, 16  ;;  %v3352_v55 = vshll.u32 %v2887_v25, 16  ;;  %v3462_v20 = vshrl.u32 %v2920_v27, 16  ;;  %v3465_v49 = vshll.u32 %v2920_v27, 16  ;;  %9126 = vmatpush3.bf16.msra.mxu1 %v9496_v35 }
 0x249   :  { %v2891_v42 = vsel %vm443_vm1, %v2887_v25, %v2890_v16  ;;  %v3473_v43 = vrot.slane %v3471_v39, 3  ;;  %v3476_v15 = vrot.slane %v3474_v33, 4  ;;  %9127 = vmatprep.subr.bf16.mxu1 %v9497_v52  ;;  %v3398_v37 = vsel %vm535_vm15, %v3389_v11, %v3397_v38 }
 0x24a   :  { %v3351_v61 = vrot.slane %v3349_v57, 3  ;;  %v3354_v50 = vrot.slane %v3352_v55, 4  ;;  %v3357_v34 = vshrl.u32 %v2891_v42, 16  ;;  %v3360_v59 = vshll.u32 %v2891_v42, 16  ;;  %4377 = vmatmul.mubr.bf16.gmra.mrb[108].mxu1 %v3275_v4 }
 0x24b   :  { %v3464_v44 = vrot.slane %v3462_v20, 3  ;;  %v3467_v19 = vrot.slane %v3465_v49, 4  ;;  %4384 = vmatprep.mubr.bf16.mxu1 %v3381_v47  ;;  %v3555_v41 = vshll.u32 %v2925_v26, 16  ;;  %v13157_v45 = vshrl.u32 %v11275_v24, 16  ;;  %4482 = vmatmul.mubr.bf16.gmra.mrb[128].mxu0 %v3398_v37 }
 0x24c   :  { %v3355_v12 = vor.u32 %v3354_v50, %v3351_v61  ;;  %v3359_v28 = vrot.slane %v3357_v34, 3  ;;  %v3362_v30 = vrot.slane %v3360_v59, 4  ;;  %v3554_v35 = vrot.slane %v3552_v9, 3  ;;  %9128 = vmatpush3.bf16.msra.mxu1 %v9497_v52  ;;  %4489 = vmatprep.mubr.bf16.mxu0 %v11563_v60 }
 0x24d   :  { %v2892_v56 = vrot.slane %v13157_v45, 4  ;;  %v13158_v4 = vshll.u32 %v11275_v24, 16  ;;  %v2741_v25 = vsel %vm13150_vm2, %v11270_v1, 0  ;;  %v3468_v51 = vor.u32 %v3467_v19, %v3464_v44 }
 0x24e   :  { %v3363_v32 = vor.u32 %v3362_v30, %v3359_v28  ;;  %v3477_v47 = vor.u32 %v3476_v15, %v3473_v43  ;;  %v3557_v11 = vrot.slane %v3555_v41, 4  ;;  %v2921_v39 = vrot.slane %v2741_v25, 5 }
 0x24f   :  { %v2893_v6 = vrot.slane %v13158_v4, 5  ;;  %v2749_v55 = vsel %vm481_vm9, %v11270_v1, 0  ;;  %v2896_v27 = vrot.slane %v2819_v5, 4  ;;  %v13159_v50 = vshll.u32 %v11270_v1, 16 }
 0x250   :  { %v3364_v26 = vsel %vm535_vm15, %v3355_v12, %v3363_v32  ;;  %v3558_v33 = vor.u32 %v3557_v11, %v3554_v35  ;;  %v2922_v42 = vsel %vm811_vm6, %v2919_v29, %v2921_v39  ;;  %v3543_v52 = vshrl.u32 %v2749_v55, 16 }
 0x251   :  { %v2894_v57 = vor.u32 %v2893_v6, %v2892_v56  ;;  %v3546_v20 = vshll.u32 %v2749_v55, 16  ;;  %v3534_v49 = vshrl.u32 %v2922_v42, 16  ;;  %v3537_v61 = vshll.u32 %v2922_v42, 16 }
 0x252   :  { %v2897_v34 = vrot.slane %v13159_v50, 5  ;;  %4385 = vmatmul.mubr.bf16.gmra.mrb[112].mxu1 %v3364_v26  ;;  %v3469_v59 = vsel %vm535_vm15, %v11682_v31, %v3468_v51  ;;  %v3478_v44 = vsel %vm535_vm15, %v3397_v38, %v3477_v47  ;;  %v3545_v15 = vrot.slane %v3543_v52, 3 }
 0x253   :  { %v2895_v60 = vsel %vm443_vm1, %v2890_v16, %v2894_v57  ;;  %4392 = vmatprep.mubr.bf16.mxu1 %v3469_v59  ;;  %v3536_v43 = vrot.slane %v3534_v49, 3  ;;  %v3539_v29 = vrot.slane %v3537_v61, 4  ;;  %v3548_v12 = vrot.slane %v3546_v20, 4  ;;  %4490 = vmatmul.mubr.bf16.gmra.mrb[132].mxu0 %v3478_v44 }
 0x254   :  { %v3453_v19 = vshrl.u32 %v2895_v60, 16  ;;  %v3456_v5 = vshll.u32 %v2895_v60, 16  ;;  %v2898_v30 = vor.u32 %v2897_v34, %v2896_v27  ;;  %v2923_v9 = vsel %vm811_vm6, %v2921_v39, %v10755_v62 }
 0x255   :  { %v3559_v37 = vsel %vm535_vm15, %v11551_v58, %v3558_v33  ;;  %v3540_v31 = vor.u32 %v3539_v29, %v3536_v43  ;;  %v3615_v41 = vshrl.u32 %v2923_v9, 16  ;;  %v3618_v56 = vshll.u32 %v2923_v9, 16 }
 0x256   :  { %v3455_v28 = vrot.slane %v3453_v19, 3  ;;  %v3458_v16 = vrot.slane %v3456_v5, 4  ;;  %4497 = vmatprep.mubr.bf16.mxu0 %v3559_v37  ;;  %v2899_v45 = vsel %vm443_vm1, %v2894_v57, %v2898_v30  ;;  %v3549_v25 = vor.u32 %v3548_v12, %v3545_v15 }
 0x257   :  { %v3525_v35 = vshrl.u32 %v2899_v45, 16  ;;  %v3528_v4 = vshll.u32 %v2899_v45, 16  ;;  %v3541_v6 = vsel %vm535_vm15, %v3468_v51, %v3540_v31  ;;  %v3617_v55 = vrot.slane %v3615_v41, 3 }
 0x258   :  { %v3459_v38 = vor.u32 %v3458_v16, %v3455_v28  ;;  %v3620_v27 = vrot.slane %v3618_v56, 4  ;;  %vm13160_vm8 = vcmp.ne.s16.totalorder %v13099_v8, 0  ;;  %v2751_v57 = vsel %vm571_vm4, %v11125_v54, 0 }
 0x259   :  { %v3527_v26 = vrot.slane %v3525_v35, 3  ;;  %v3530_v39 = vrot.slane %v3528_v4, 4  ;;  %v2750_v58 = vsel %vm13160_vm8, %v11127_v0, 0  ;;  %v2752_v51 = vsel %vm572_vm11, %v11177_v3, 0  ;;  %vm13163_vm12 = vmmov %vm13160_vm8 }
 0x25a   :  { %v3460_v11 = vsel %vm535_vm15, %v3363_v32, %v3459_v38  ;;  %v2934_v52 = vrot.slane %v2750_v58, 1  ;;  %v2935_v32 = vrot.slane %v2751_v57, 1  ;;  %v3550_v20 = vsel %vm535_vm15, %v3477_v47, %v3549_v25 }
 0x25b   :  { %4393 = vmatmul.mubr.bf16.gmra.mrb[116].mxu1 %v3460_v11  ;;  %v3624_v60 = vsel %vm535_vm15, %v3558_v33, %v10789_v36  ;;  %v2937_v49 = vrot.slane %v2752_v51, 1  ;;  %v2753_v0 = vsel %vm573_vm5, %v11172_v23, 0  ;;  %4498 = vmatmul.mubr.bf16.gmra.mrb[136].mxu0 %v3550_v20  ;;  %v3531_v50 = vor.u32 %v3530_v39, %v3527_v26 }
 0x25c   :  { %4400 = vmatprep.mubr.bf16.mxu1 %v3541_v6  ;;  %v3606_v54 = vshrl.u32 %v2898_v30, 16  ;;  %v3609_v34 = vshll.u32 %v2898_v30, 16  ;;  %v2936_v59 = vsel %vm729_vm3, %v2934_v52, %v2935_v32  ;;  %4505 = vmatprep.mubr.bf16.mxu0 %v3624_v60  ;;  %v3621_v3 = vor.u32 %v3620_v27, %v3617_v55 }
 0x25d   :  { %v2938_v44 = vsel %vm729_vm3, %v2935_v32, %v2937_v49  ;;  %v2939_v19 = vrot.slane %v2753_v0, 1  ;;  %v3071_v43 = vshrl.u32 %v2936_v59, 16  ;;  %v3074_v33 = vshll.u32 %v2936_v59, 16 }
 0x25e   :  { %v3079_v47 = vshrl.u32 %v2938_v44, 16  ;;  %v3082_v5 = vshll.u32 %v2938_v44, 16  ;;  %v3532_v29 = vsel %vm535_vm15, %v3459_v38, %v3531_v50  ;;  %v3608_v15 = vrot.slane %v3606_v54, 3 }
 0x25f   :  { %v3611_v12 = vrot.slane %v3609_v34, 4  ;;  %v3622_v23 = vsel %vm535_vm15, %v3540_v31, %v3621_v3  ;;  %v2940_v30 = vsel %vm729_vm3, %v2937_v49, %v2939_v19  ;;  %v2941_v9 = vsel %vm729_vm3, %v2939_v19, %v9760_v17 }
 0x260   :  { %v3081_v28 = vrot.slane %v3079_v47, 3  ;;  %v3084_v16 = vrot.slane %v3082_v5, 4  ;;  %v3623_v37 = vsel %vm535_vm15, %v3549_v25, %v9912_v14  ;;  %v3073_v41 = vrot.slane %v3071_v43, 3 }
 0x261   :  { %v3076_v45 = vrot.slane %v3074_v33, 4  ;;  %v2756_v38 = vsel %vm572_vm11, %v11275_v24, 0  ;;  %v3612_v56 = vor.u32 %v3611_v12, %v3608_v15  ;;  %v3151_v31 = vshrl.u32 %v2940_v30, 16 }
 0x262   :  { %v3154_v35 = vshll.u32 %v2940_v30, 16  ;;  %v2754_v4 = vsel %vm13163_vm12, %v11220_v13, 0  ;;  %v3085_v6 = vor.u32 %v3084_v16, %v3081_v28  ;;  %v3223_v11 = vshrl.u32 %v2941_v9, 16 }
 0x263   :  { %4401 = vmatmul.mubr.bf16.gmra.mrb[120].mxu1 %v3532_v29  ;;  %4506 = vmatmul.mubr.bf16.gmra.mrb[140].mxu0 %v3623_v37  ;;  %v3226_v26 = vshll.u32 %v2941_v9, 16  ;;  %v2755_v25 = vsel %vm571_vm4, %v11207_v18, 0  ;;  %v2945_v39 = vrot.slane %v2756_v38, 1  ;;  %v3613_v55 = vsel %vm535_vm15, %v3531_v50, %v3612_v56 }
 0x264   :  { %4408 = vmatprep.mubr.bf16.mxu1 %v3622_v23  ;;  %v3077_v27 = vor.u32 %v3076_v45, %v3073_v41  ;;  %v3153_v24 = vrot.slane %v3151_v31, 3  ;;  %v3156_v58 = vrot.slane %v3154_v35, 4  ;;  %v2942_v57 = vrot.slane %v2754_v4, 1 }
 0x265   :  { %v2943_v51 = vrot.slane %v2755_v25, 1  ;;  %v3225_v32 = vrot.slane %v3223_v11, 3  ;;  %v3228_v13 = vrot.slane %v3226_v26, 4  ;;  %v2757_v18 = vsel %vm573_vm5, %v11270_v1, 0  ;;  %v9498_v26 = vld [vmem:[%s12896_s6] sm:$0xff]   ;;  %v9499_v25 = vld [vmem:[%s12896_s6 + $0x8] sm:$0xff]  }
 0x266   :  { %v3086_v52 = vsel %vm535_vm15, %v3077_v27, %v3085_v6  ;;  %v3157_v60 = vor.u32 %v3156_v58, %v3153_v24  ;;  %v2947_v34 = vrot.slane %v2757_v18, 1  ;;  %9145 = vmatprep.subr.bf16.mxu0 %v9498_v26  ;;  %v9501_v27 = vld [vmem:[%s12896_s6 + $0x18] sm:$0xff]   ;;  %vm13185_vm12 = vcmask 1043456  }
 0x267   :  { %v2946_v20 = vsel %vm729_vm3, %v2943_v51, %v2945_v39  ;;  %v2944_v49 = vsel %vm729_vm3, %v2942_v57, %v2943_v51  ;;  %v3229_v0 = vor.u32 %v3228_v13, %v3225_v32  ;;  %9146 = vmatpush3.bf16.msra.mxu0 %v9498_v26  ;;  %v9502_v32 = vld [vmem:[%s12896_s6 + $0x20] sm:$0xff]  }
 0x268   :  { %v3417_v50 = vshrl.u32 %v2946_v20, 16  ;;  %v3420_v54 = vshll.u32 %v2946_v20, 16  ;;  %v3409_v59 = vshrl.u32 %v2944_v49, 16  ;;  %v3412_v3 = vshll.u32 %v2944_v49, 16  ;;  %9147 = vmatprep.subr.bf16.mxu0 %v9499_v25 }
 0x269   :  { %v3158_v44 = vsel %vm535_vm15, %v3085_v6, %v3157_v60  ;;  %v3230_v19 = vsel %vm535_vm15, %v3157_v60, %v3229_v0  ;;  %v2948_v43 = vsel %vm729_vm3, %v2945_v39, %v2947_v34  ;;  %v2949_v1 = vsel %vm729_vm3, %v2947_v34, %v9760_v17  ;;  %v9500_v39 = vld [vmem:[%s12896_s6 + $0x10] sm:$0xff]  }
 0x26a   :  { %v3419_v47 = vrot.slane %v3417_v50, 3  ;;  %v3422_v5 = vrot.slane %v3420_v54, 4  ;;  %v3411_v33 = vrot.slane %v3409_v59, 3  ;;  %v3414_v29 = vrot.slane %v3412_v3, 4  ;;  %v9503_v54 = vld [vmem:[%s12896_s6 + $0x28] sm:$0xff]  }
 0x26b   :  { %4409 = vmatmul.mubr.bf16.gmra.mrb[124].mxu1 %v3613_v55  ;;  %v3489_v15 = vshrl.u32 %v2948_v43, 16  ;;  %v3492_v12 = vshll.u32 %v2948_v43, 16  ;;  %v3561_v28 = vshrl.u32 %v2949_v1, 16  ;;  %v3564_v16 = vshll.u32 %v2949_v1, 16  ;;  %9148 = vmatpush3.bf16.msra.mxu0 %v9499_v25  ;;  %v9505_v25 = vld [vmem:[%s12896_s6 + $0x38] sm:$0xff]  }
 0x26c   :  { %9129 = vmatprep.mubr.bf16.mxu1 %v3086_v52  ;;  %v3423_v23 = vor.u32 %v3422_v5, %v3419_v47  ;;  %v3415_v30 = vor.u32 %v3414_v29, %v3411_v33  ;;  %v3287_v9 = vsel %vm535_vm15, %v3229_v0, %v10789_v36  ;;  %9149 = vmatprep.subr.bf16.mxu0 %v9500_v39 }
 0x26d   :  { %v3491_v37 = vrot.slane %v3489_v15, 3  ;;  %v3494_v41 = vrot.slane %v3492_v12, 4  ;;  %v3563_v38 = vrot.slane %v3561_v28, 3  ;;  %v3566_v56 = vrot.slane %v3564_v16, 4  ;;  %v9504_v12 = vld [vmem:[%s12896_s6 + $0x30] sm:$0xff]  }
 0x26e   :  { %v3424_v45 = vsel %vm535_vm15, %v3415_v30, %v3423_v23 }
 0x26f   :  { %v3495_v31 = vor.u32 %v3494_v41, %v3491_v37  ;;  %v3567_v35 = vor.u32 %v3566_v56, %v3563_v38  ;;  %9150 = vmatpush3.bf16.msra.mxu0 %v9500_v39 }
 0x270   :  { %9151 = vmatprep.subr.bf16.mxu0 %v9501_v27 }
 0x271   :  { %v3496_v4 = vsel %vm535_vm15, %v3423_v23, %v3495_v31  ;;  %v3568_v6 = vsel %vm535_vm15, %v3495_v31, %v3567_v35  ;;  %v3625_v11 = vsel %vm535_vm15, %v3567_v35, %v10789_v36 }
 0x273   :  { %9130 = vmatmul.mubr.bf16.vlgmr.msra.gmra.mrb[128].mxu1 %v3158_v44  ;;  %9152 = vmatpush3.bf16.msra.mxu0 %v9501_v27 }
 0x274   :  { %9133 = vmatprep.mubr.bf16.mxu1 %v3230_v19  ;;  %9153 = vmatprep.subr.bf16.mxu0 %v9502_v32 }
 0x277   :  { %9154 = vmatpush3.bf16.msra.mxu0 %v9502_v32 }
 0x278   :  { %9155 = vmatprep.subr.bf16.mxu0 %v9503_v54 }
 0x27b   :  { %9134 = vmatmul.mubr.bf16.gmra.mrb[132].mxu1 %v3287_v9  ;;  %9156 = vmatpush3.bf16.msra.mxu0 %v9503_v54 }
 0x27c   :  { %9137 = vmatprep.mubr.bf16.mxu1 %v3424_v45  ;;  %9157 = vmatprep.subr.bf16.mxu0 %v9504_v12 }
 0x27f   :  { %9158 = vmatpush3.bf16.msra.mxu0 %v9504_v12 }
 0x280   :  { %9159 = vmatprep.subr.bf16.mxu0 %v9505_v25 }
 0x283   :  { %9138 = vmatmul.mubr.bf16.gmra.mrb[136].mxu1 %v3496_v4  ;;  %9160 = vmatpush3.bf16.msra.mxu0 %v9505_v25 }
 0x284   :  { %9141 = vmatprep.mubr.bf16.mxu1 %v3568_v6 }
 0x28b   :  { %9142 = vmatmul.mubr.bf16.gmra.mrb[140].mxu1 %v3625_v11 }
 0x2a4   :  { %v8544_v55 = vpop.f32.mrb[80].mxu0 }
 0x2a5   :  { %v8545_v24 = vpop.f32.mrb[81].mxu0 }
 0x2a6   :  { %v8546_v58 = vadd.f32 %v8545_v24, %v8544_v55  ;;  %v8547_v57 = vpop.f32.mrb[82].mxu0 }
 0x2a7   :  { %v8548_v51 = vpop.f32.mrb[83].mxu0 }
 0x2a8   :  { %v8549_v52 = vadd.f32 %v8548_v51, %v8547_v57 }
 0x2af   :  { %v8480_v13 = vpop.f32.mrb[64].mxu1 }
 0x2b0   :  { %v8481_v20 = vpop.f32.mrb[65].mxu1 }
 0x2b1   :  { %v8482_v18 = vadd.f32 %v8481_v20, %v8480_v13  ;;  %v8483_v60 = vpop.f32.mrb[66].mxu1 }
 0x2b2   :  { %v8484_v49 = vpop.f32.mrb[67].mxu1 }
 0x2b3   :  { %v11799_v0 = vadd.f32 %v8546_v58, %v8482_v18  ;;  %v8485_v50 = vadd.f32 %v8484_v49, %v8483_v60 }
 0x2b5   :  { %v11804_v34 = vadd.f32 %v8549_v52, %v8485_v50 }
 0x2b9   :  { %v8486_v59 = vpop.f32.mrb[68].mxu1 }
 0x2ba   :  { %v8487_v3 = vpop.f32.mrb[69].mxu1  ;;  %v8550_v44 = vpop.f32.mrb[84].mxu0 }
 0x2bb   :  { %v8488_v19 = vadd.f32 %v8487_v3, %v8486_v59  ;;  %v8489_v47 = vpop.f32.mrb[70].mxu1  ;;  %v8551_v5 = vpop.f32.mrb[85].mxu0 }
 0x2bc   :  { %v8490_v43 = vpop.f32.mrb[71].mxu1  ;;  %v8552_v1 = vadd.f32 %v8551_v5, %v8550_v44  ;;  %v8553_v33 = vpop.f32.mrb[86].mxu0 }
 0x2bd   :  { %v8491_v29 = vadd.f32 %v8490_v43, %v8489_v47  ;;  %v8554_v15 = vpop.f32.mrb[87].mxu0 }
 0x2be   :  { %v8555_v23 = vadd.f32 %v8554_v15, %v8553_v33  ;;  %v11809_v28 = vadd.f32 %v8552_v1, %v8488_v19 }
 0x2c0   :  { %v11811_v16 = vadd.f32 %v8555_v23, %v8491_v29 }
 0x2c4   :  { %v8556_v30 = vpop.f32.mrb[88].mxu0  ;;  %v8492_v9 = vpop.f32.mrb[72].mxu1 }
 0x2c5   :  { %v8557_v37 = vpop.f32.mrb[89].mxu0  ;;  %v8493_v41 = vpop.f32.mrb[73].mxu1 }
 0x2c6   :  { %v8558_v45 = vadd.f32 %v8557_v37, %v8556_v30  ;;  %v8559_v38 = vpop.f32.mrb[90].mxu0  ;;  %v8494_v56 = vadd.f32 %v8493_v41, %v8492_v9  ;;  %v8495_v31 = vpop.f32.mrb[74].mxu1 }
 0x2c7   :  { %v8560_v35 = vpop.f32.mrb[91].mxu0  ;;  %v8496_v4 = vpop.f32.mrb[75].mxu1 }
 0x2c8   :  { %v8561_v6 = vadd.f32 %v8560_v35, %v8559_v38  ;;  %v11813_v11 = vadd.f32 %v8558_v45, %v8494_v56  ;;  %v8497_v26 = vadd.f32 %v8496_v4, %v8495_v31  ;;  %v9506_v45 = vld [vmem:[%s12895_s5 + $0x300] sm:$0xff]  }
 0x2c9   :  { %v9508_v38 = vld [vmem:[%s12895_s5 + $0x280] sm:$0xff]   ;;  %8816 = vmatprep.subr.bf16.mxu0 %v9506_v45 }
 0x2ca   :  { %v11818_v39 = vadd.f32 %v8561_v6, %v8497_v26  ;;  %v9509_v35 = vld [vmem:[%s12895_s5 + $0x240] sm:$0xff]   ;;  %8752 = vmatprep.subr.bf16.mxu1 %v9508_v38  ;;  %v9512_v26 = vld [vmem:[%s12895_s5 + $0x288] sm:$0xff]  }
 0x2cb   :  { %8753 = vmatpush3.bf16.msra.mxu1 %v9509_v35 }
 0x2cc   :  { %v8562_v55 = vpop.f32.mrb[92].mxu0  ;;  %8754 = vmatprep.subr.bf16.mxu1 %v9512_v26 }
 0x2cd   :  { %v8563_v27 = vpop.f32.mrb[93].mxu0 }
 0x2ce   :  { %v8498_v24 = vpop.f32.mrb[76].mxu1  ;;  %v8564_v58 = vadd.f32 %v8563_v27, %v8562_v55  ;;  %v8565_v57 = vpop.f32.mrb[94].mxu0  ;;  %v9513_v27 = vld [vmem:[%s12895_s5 + $0x248] sm:$0xff]  }
 0x2cf   :  { %v8499_v51 = vpop.f32.mrb[77].mxu1  ;;  %v8566_v52 = vpop.f32.mrb[95].mxu0  ;;  %8755 = vmatpush3.bf16.msra.mxu1 %v9513_v27 }
 0x2d0   :  { %v8500_v32 = vadd.f32 %v8499_v51, %v8498_v24  ;;  %v8501_v13 = vpop.f32.mrb[78].mxu1  ;;  %v8567_v20 = vadd.f32 %v8566_v52, %v8565_v57 }
 0x2d1   :  { %v8502_v18 = vpop.f32.mrb[79].mxu1 }
 0x2d2   :  { %v11820_v60 = vadd.f32 %v8564_v58, %v8500_v32  ;;  %v8503_v49 = vadd.f32 %v8502_v18, %v8501_v13 }
 0x2d4   :  { %v11822_v50 = vadd.f32 %v8567_v20, %v8503_v49 }
 0x2da   :  { %v8568_v54 = vpop.f32.mrb[96].mxu0 }
 0x2db   :  { %v8569_v59 = vpop.f32.mrb[97].mxu0  ;;  %v8504_v19 = vpop.f32.mrb[80].mxu1 }
 0x2dc   :  { %v8570_v3 = vadd.f32 %v8569_v59, %v8568_v54  ;;  %v8571_v44 = vpop.f32.mrb[98].mxu0  ;;  %v8505_v5 = vpop.f32.mrb[81].mxu1 }
 0x2dd   :  { %v8572_v47 = vpop.f32.mrb[99].mxu0  ;;  %v8506_v1 = vadd.f32 %v8505_v5, %v8504_v19  ;;  %v8507_v33 = vpop.f32.mrb[82].mxu1 }
 0x2de   :  { %v8573_v43 = vadd.f32 %v8572_v47, %v8571_v44  ;;  %v8508_v29 = vpop.f32.mrb[83].mxu1 }
 0x2df   :  { %v11824_v15 = vadd.f32 %v8570_v3, %v8506_v1  ;;  %v8509_v12 = vadd.f32 %v8508_v29, %v8507_v33 }
 0x2e1   :  { %v11826_v23 = vadd.f32 %v8573_v43, %v8509_v12 }
 0x2e3   :  { %v8574_v30 = vpop.f32.mrb[100].mxu0 }
 0x2e4   :  { %v8575_v9 = vpop.f32.mrb[101].mxu0 }
 0x2e5   :  { %v8576_v37 = vadd.f32 %v8575_v9, %v8574_v30  ;;  %v8577_v41 = vpop.f32.mrb[102].mxu0  ;;  %v8510_v56 = vpop.f32.mrb[84].mxu1 }
 0x2e6   :  { %v8578_v31 = vpop.f32.mrb[103].mxu0  ;;  %v8511_v6 = vpop.f32.mrb[85].mxu1 }
 0x2e7   :  { %v8579_v4 = vadd.f32 %v8578_v31, %v8577_v41  ;;  %v8512_v25 = vadd.f32 %v8511_v6, %v8510_v56  ;;  %v8513_v55 = vpop.f32.mrb[86].mxu1 }
 0x2e8   :  { %v8514_v24 = vpop.f32.mrb[87].mxu1 }
 0x2e9   :  { %v11843_v58 = vadd.f32 %v8576_v37, %v8512_v25  ;;  %v8515_v57 = vadd.f32 %v8514_v24, %v8513_v55 }
 0x2eb   :  { %v11845_v51 = vadd.f32 %v8579_v4, %v8515_v57 }
 0x2ed   :  { %v8580_v52 = vpop.f32.mrb[104].mxu0 }
 0x2ee   :  { %v8581_v32 = vpop.f32.mrb[105].mxu0  ;;  %v8516_v13 = vpop.f32.mrb[88].mxu1 }
 0x2ef   :  { %v8582_v20 = vadd.f32 %v8581_v32, %v8580_v52  ;;  %v8583_v18 = vpop.f32.mrb[106].mxu0  ;;  %v8517_v49 = vpop.f32.mrb[89].mxu1 }
 0x2f0   :  { %v8584_v54 = vpop.f32.mrb[107].mxu0  ;;  %v8518_v59 = vadd.f32 %v8517_v49, %v8516_v13  ;;  %v8519_v3 = vpop.f32.mrb[90].mxu1 }
 0x2f1   :  { %v8585_v44 = vadd.f32 %v8584_v54, %v8583_v18  ;;  %v8520_v19 = vpop.f32.mrb[91].mxu1 }
 0x2f2   :  { %v11847_v47 = vadd.f32 %v8582_v20, %v8518_v59  ;;  %v8521_v5 = vadd.f32 %v8520_v19, %v8519_v3 }
 0x2f4   :  { %v11849_v43 = vadd.f32 %v8585_v44, %v8521_v5 }
 0x2f5   :  { %v8586_v1 = vpop.f32.mrb[108].mxu0 }
 0x2f6   :  { %v8587_v33 = vpop.f32.mrb[109].mxu0  ;;  %v8522_v29 = vpop.f32.mrb[92].mxu1 }
 0x2f7   :  { %v8588_v12 = vadd.f32 %v8587_v33, %v8586_v1  ;;  %v8589_v30 = vpop.f32.mrb[110].mxu0  ;;  %v8523_v9 = vpop.f32.mrb[93].mxu1 }
 0x2f8   :  { %v8590_v37 = vpop.f32.mrb[111].mxu0  ;;  %v8524_v41 = vadd.f32 %v8523_v9, %v8522_v29  ;;  %v8525_v45 = vpop.f32.mrb[94].mxu1 }
 0x2f9   :  { %v8591_v38 = vadd.f32 %v8590_v37, %v8589_v30  ;;  %v8526_v56 = vpop.f32.mrb[95].mxu1 }
 0x2fa   :  { %v11851_v31 = vadd.f32 %v8588_v12, %v8524_v41  ;;  %v8527_v35 = vadd.f32 %v8526_v56, %v8525_v45 }
 0x2fc   :  { %v11853_v4 = vadd.f32 %v8591_v38, %v8527_v35 }
 0x2fd   :  { %v8672_v6 = vpop.f32.mrb[112].mxu0 }
 0x2fe   :  { %v8673_v26 = vpop.f32.mrb[113].mxu0 }
 0x2ff   :  { %v8674_v25 = vadd.f32 %v8673_v26, %v8672_v6  ;;  %v8675_v55 = vpop.f32.mrb[114].mxu0 }
 0x300   :  { %v8676_v24 = vpop.f32.mrb[115].mxu0 }
 0x301   :  { %v8608_v27 = vpop.f32.mrb[96].mxu1  ;;  %v8677_v57 = vadd.f32 %v8676_v24, %v8675_v55 }
 0x302   :  { %v8609_v52 = vpop.f32.mrb[97].mxu1 }
 0x303   :  { %v8610_v32 = vadd.f32 %v8609_v52, %v8608_v27  ;;  %v8611_v13 = vpop.f32.mrb[98].mxu1 }
 0x304   :  { %v8612_v20 = vpop.f32.mrb[99].mxu1 }
 0x305   :  { %v4355_v18 = vadd.f32 %v8610_v32, %v11799_v0  ;;  %v8613_v49 = vadd.f32 %v8612_v20, %v8611_v13  ;;  %v8678_v54 = vpop.f32.mrb[116].mxu0 }
 0x306   :  { %v8679_v3 = vpop.f32.mrb[117].mxu0 }
 0x307   :  { %v4358_v59 = vadd.f32 %v8613_v49, %v11804_v34  ;;  %v11857_v44 = vadd.f32 %v8674_v25, %v4355_v18  ;;  %v8680_v19 = vadd.f32 %v8679_v3, %v8678_v54  ;;  %v8681_v5 = vpop.f32.mrb[118].mxu0 }
 0x308   :  { %v8682_v1 = vpop.f32.mrb[119].mxu0 }
 0x309   :  { %v11859_v33 = vadd.f32 %v8677_v57, %v4358_v59  ;;  %v8683_v29 = vadd.f32 %v8682_v1, %v8681_v5 }
 0x30d   :  { %v8614_v12 = vpop.f32.mrb[100].mxu1 }
 0x30e   :  { %v8615_v30 = vpop.f32.mrb[101].mxu1  ;;  %v8684_v45 = vpop.f32.mrb[120].mxu0 }
 0x30f   :  { %v8616_v9 = vadd.f32 %v8615_v30, %v8614_v12  ;;  %v8617_v37 = vpop.f32.mrb[102].mxu1  ;;  %v8685_v56 = vpop.f32.mrb[121].mxu0 }
 0x310   :  { %v8618_v41 = vpop.f32.mrb[103].mxu1  ;;  %v8686_v34 = vadd.f32 %v8685_v56, %v8684_v45  ;;  %v8687_v35 = vpop.f32.mrb[122].mxu0 }
 0x311   :  { %v4363_v0 = vadd.f32 %v8616_v9, %v11809_v28  ;;  %v8619_v38 = vadd.f32 %v8618_v41, %v8617_v37  ;;  %v8688_v26 = vpop.f32.mrb[123].mxu0 }
 0x312   :  { %v8689_v55 = vadd.f32 %v8688_v26, %v8687_v35 }
 0x313   :  { %v4366_v6 = vadd.f32 %v8619_v38, %v11811_v16  ;;  %v11863_v25 = vadd.f32 %v8680_v19, %v4363_v0 }
 0x315   :  { %v8620_v27 = vpop.f32.mrb[104].mxu1  ;;  %v11865_v24 = vadd.f32 %v8683_v29, %v4366_v6 }
 0x316   :  { %v8621_v57 = vpop.f32.mrb[105].mxu1  ;;  %v8690_v20 = vpop.f32.mrb[124].mxu0 }
 0x317   :  { %v8622_v52 = vadd.f32 %v8621_v57, %v8620_v27  ;;  %v8623_v32 = vpop.f32.mrb[106].mxu1  ;;  %v8691_v49 = vpop.f32.mrb[125].mxu0 }
 0x318   :  { %v8624_v13 = vpop.f32.mrb[107].mxu1  ;;  %v8692_v54 = vadd.f32 %v8691_v49, %v8690_v20  ;;  %v8693_v59 = vpop.f32.mrb[126].mxu0 }
 0x319   :  { %v4371_v28 = vadd.f32 %v8622_v52, %v11813_v11  ;;  %v8625_v18 = vadd.f32 %v8624_v13, %v8623_v32  ;;  %v8694_v3 = vpop.f32.mrb[127].mxu0 }
 0x31a   :  { %v8695_v5 = vadd.f32 %v8694_v3, %v8693_v59 }
 0x31b   :  { %v4374_v16 = vadd.f32 %v8625_v18, %v11818_v39  ;;  %v11869_v19 = vadd.f32 %v8686_v34, %v4371_v28 }
 0x31d   :  { %v8626_v1 = vpop.f32.mrb[108].mxu1  ;;  %v11871_v29 = vadd.f32 %v8689_v55, %v4374_v16 }
 0x31e   :  { %v8627_v12 = vpop.f32.mrb[109].mxu1  ;;  %v8696_v41 = vpop.f32.mrb[128].mxu0 }
 0x31f   :  { %v8628_v30 = vadd.f32 %v8627_v12, %v8626_v1  ;;  %v8629_v9 = vpop.f32.mrb[110].mxu1  ;;  %v8697_v0 = vpop.f32.mrb[129].mxu0 }
 0x320   :  { %v8630_v37 = vpop.f32.mrb[111].mxu1  ;;  %v8698_v38 = vadd.f32 %v8697_v0, %v8696_v41  ;;  %v8699_v56 = vpop.f32.mrb[130].mxu0 }
 0x321   :  { %v4379_v11 = vadd.f32 %v8628_v30, %v11820_v60  ;;  %v8631_v45 = vadd.f32 %v8630_v37, %v8629_v9  ;;  %v8700_v35 = vpop.f32.mrb[131].mxu0 }
 0x322   :  { %v8701_v6 = vadd.f32 %v8700_v35, %v8699_v56 }
 0x323   :  { %v4382_v39 = vadd.f32 %v8631_v45, %v11822_v50  ;;  %v11875_v34 = vadd.f32 %v8692_v54, %v4379_v11 }
 0x325   :  { %v8632_v26 = vpop.f32.mrb[112].mxu1  ;;  %v11877_v55 = vadd.f32 %v8695_v5, %v4382_v39 }
 0x326   :  { %v8633_v27 = vpop.f32.mrb[113].mxu1  ;;  %v8702_v13 = vpop.f32.mrb[132].mxu0 }
 0x327   :  { %v8634_v57 = vadd.f32 %v8633_v27, %v8632_v26  ;;  %v8635_v52 = vpop.f32.mrb[114].mxu1  ;;  %v8703_v28 = vpop.f32.mrb[133].mxu0 }
 0x328   :  { %v8636_v32 = vpop.f32.mrb[115].mxu1  ;;  %v8704_v18 = vadd.f32 %v8703_v28, %v8702_v13  ;;  %v8705_v49 = vpop.f32.mrb[134].mxu0 }
 0x329   :  { %v4387_v60 = vadd.f32 %v8634_v57, %v11824_v15  ;;  %v8637_v20 = vadd.f32 %v8636_v32, %v8635_v52  ;;  %v8706_v59 = vpop.f32.mrb[135].mxu0 }
 0x32a   :  { %v8707_v16 = vadd.f32 %v8706_v59, %v8705_v49 }
 0x32b   :  { %v4390_v50 = vadd.f32 %v8637_v20, %v11826_v23  ;;  %v11881_v54 = vadd.f32 %v8698_v38, %v4387_v60 }
 0x32d   :  { %v11883_v5 = vadd.f32 %v8701_v6, %v4390_v50 }
 0x32e   :  { %v8638_v3 = vpop.f32.mrb[116].mxu1  ;;  %v8708_v37 = vpop.f32.mrb[136].mxu0 }
 0x32f   :  { %v8639_v1 = vpop.f32.mrb[117].mxu1  ;;  %v8709_v11 = vpop.f32.mrb[137].mxu0 }
 0x330   :  { %v8640_v12 = vadd.f32 %v8639_v1, %v8638_v3  ;;  %v8641_v30 = vpop.f32.mrb[118].mxu1  ;;  %v8710_v45 = vadd.f32 %v8709_v11, %v8708_v37  ;;  %v8711_v0 = vpop.f32.mrb[138].mxu0 }
 0x331   :  { %v8642_v9 = vpop.f32.mrb[119].mxu1  ;;  %v8712_v56 = vpop.f32.mrb[139].mxu0 }
 0x332   :  { %v4395_v15 = vadd.f32 %v8640_v12, %v11843_v58  ;;  %v8643_v41 = vadd.f32 %v8642_v9, %v8641_v30  ;;  %v8713_v39 = vadd.f32 %v8712_v56, %v8711_v0 }
 0x334   :  { %v4398_v23 = vadd.f32 %v8643_v41, %v11845_v51  ;;  %v11887_v38 = vadd.f32 %v8704_v18, %v4395_v15 }
 0x336   :  { %v8644_v35 = vpop.f32.mrb[120].mxu1  ;;  %v11889_v6 = vadd.f32 %v8707_v16, %v4398_v23  ;;  %v8714_v32 = vpop.f32.mrb[140].mxu0 }
 0x337   :  { %v8645_v26 = vpop.f32.mrb[121].mxu1  ;;  %v8715_v60 = vpop.f32.mrb[141].mxu0 }
 0x338   :  { %v8646_v27 = vadd.f32 %v8645_v26, %v8644_v35  ;;  %v8647_v57 = vpop.f32.mrb[122].mxu1  ;;  %v8716_v20 = vadd.f32 %v8715_v60, %v8714_v32  ;;  %v8717_v28 = vpop.f32.mrb[142].mxu0 }
 0x339   :  { %v8648_v52 = vpop.f32.mrb[123].mxu1  ;;  %v8718_v49 = vpop.f32.mrb[143].mxu0 }
 0x33a   :  { %v4403_v58 = vadd.f32 %v8646_v27, %v11847_v47  ;;  %v8649_v13 = vadd.f32 %v8648_v52, %v8647_v57  ;;  %v8719_v50 = vadd.f32 %v8718_v49, %v8717_v28 }
 0x33c   :  { %v4406_v51 = vadd.f32 %v8649_v13, %v11849_v43  ;;  %v11893_v18 = vadd.f32 %v8710_v45, %v4403_v58 }
 0x33e   :  { %v8650_v59 = vpop.f32.mrb[124].mxu1  ;;  %v11895_v16 = vadd.f32 %v8713_v39, %v4406_v51 }
 0x33f   :  { %v8651_v3 = vpop.f32.mrb[125].mxu1 }
 0x340   :  { %v8652_v1 = vadd.f32 %v8651_v3, %v8650_v59  ;;  %v8653_v12 = vpop.f32.mrb[126].mxu1 }
 0x341   :  { %v8654_v30 = vpop.f32.mrb[127].mxu1 }
 0x342   :  { %v4411_v9 = vadd.f32 %v8652_v1, %v11851_v31  ;;  %v8655_v47 = vadd.f32 %v8654_v30, %v8653_v12 }
 0x344   :  { %v4414_v37 = vadd.f32 %v8655_v47, %v11853_v4  ;;  %v4508_v15 = vadd.f32 %v8716_v20, %v4411_v9 }
 0x346   :  { %v9131_v41 = vpop.f32.mrb[128].mxu1  ;;  %v4511_v11 = vadd.f32 %v8719_v50, %v4414_v37 }
 0x347   :  { %v4557_v43 = vadd.f32 %v9131_v41, %v11863_v25  ;;  %v4548_v45 = vpop.f32.mrb[129].mxu1  ;;  %v9507_v25 = vld [vmem:[%s12895_s5 + $0x2c0] sm:$0xff]  }
 0x348   :  { %v4549_v0 = vadd.f32 %v4548_v45, %v11857_v44  ;;  %v9132_v23 = vpop.f32.mrb[130].mxu1 }
 0x349   :  { %v4560_v56 = vadd.f32 %v9132_v23, %v11865_v24  ;;  %v4551_v39 = vpop.f32.mrb[131].mxu1  ;;  %v4613_v26 = vmax.f32 %v4557_v43, 0.0  ;;  %v9510_v24 = vld [vmem:[%s12895_s5 + $0x308] sm:$0xff]  }
 0x34a   :  { %v4552_v35 = vadd.f32 %v4551_v39, %v11859_v33  ;;  %v4611_v31 = vmax.f32 %v4549_v0, 0.0 }
 0x34b   :  { %v4614_v27 = vmax.f32 %v4560_v56, 0.0 }
 0x34c   :  { %v4612_v57 = vmax.f32 %v4552_v35, 0.0 }
 0x34d   :  { %v4628_v52 = vpack.c.bf16 %v4614_v27, %v4613_v26 }
 0x34e   :  { %v4627_v4 = vpack.c.bf16 %v4612_v57, %v4611_v31  ;;  %v9135_v32 = vpop.f32.mrb[132].mxu1 }
 0x34f   :  { %v4573_v58 = vadd.f32 %v9135_v32, %v11875_v34  ;;  %v4564_v44 = vpop.f32.mrb[133].mxu1  ;;  %v9511_v34 = vld [vmem:[%s12895_s5 + $0x2c8] sm:$0xff]  }
 0x350   :  { %v4565_v33 = vadd.f32 %v4564_v44, %v11869_v19  ;;  %v9136_v13 = vpop.f32.mrb[134].mxu1  ;;  %9161 = vmatprep.mubr.bf16.mxu0 %v4627_v4  ;;  %v9514_v19 = vld [vmem:[%s12895_s5 + $0x310] sm:$0xff]  }
 0x351   :  { %v4576_v60 = vadd.f32 %v9136_v13, %v11877_v55  ;;  %v4567_v20 = vpop.f32.mrb[135].mxu1  ;;  %9162 = vmatmul.mubr.bf16.vlgmr.msra.gmra.mrb[144].mxu0 %v4628_v52  ;;  %v4617_v51 = vmax.f32 %v4573_v58, 0.0  ;;  %v9522_v13 = vld [vmem:[%s12895_s5 + $0x320] sm:$0xff]  }
 0x352   :  { %v4568_v28 = vadd.f32 %v4567_v20, %v11871_v29  ;;  %8817 = vmatpush3.bf16.msra.mxu0 %v9507_v25  ;;  %v4615_v50 = vmax.f32 %v4565_v33, 0.0  ;;  %v9515_v29 = vld [vmem:[%s12895_s5 + $0x2d0] sm:$0xff]   ;;  %v9521_v33 = vld [vmem:[%s12895_s5 + $0x258] sm:$0xff]   ;;  %v9524_v20 = vld [vmem:[%s12895_s5 + $0x2a0] sm:$0xff]  }
 0x353   :  { %v4618_v49 = vmax.f32 %v4576_v60, 0.0  ;;  %8818 = vmatprep.subr.bf16.mxu0 %v9510_v24  ;;  %v9520_v24 = vld [vmem:[%s12895_s5 + $0x298] sm:$0xff]   ;;  %v9523_v60 = vld [vmem:[%s12895_s5 + $0x2e0] sm:$0xff]  }
 0x354   :  { %v4616_v59 = vmax.f32 %v4568_v28, 0.0  ;;  %v9525_v28 = vld [vmem:[%s12895_s5 + $0x260] sm:$0xff]  }
 0x355   :  { %v4630_v3 = vpack.c.bf16 %v4618_v49, %v4617_v51  ;;  %v9527_v51 = vld [vmem:[%s12895_s5 + $0x2e8] sm:$0xff]  }
 0x356   :  { %v4629_v55 = vpack.c.bf16 %v4616_v59, %v4615_v50  ;;  %v9139_v1 = vpop.f32.mrb[136].mxu1  ;;  %8819 = vmatpush3.bf16.msra.mxu0 %v9511_v34  ;;  %v9526_v34 = vld [vmem:[%s12895_s5 + $0x328] sm:$0xff]   ;;  %v9530_v50 = vld [vmem:[%s12895_s5 + $0x330] sm:$0xff]  }
 0x357   :  { %v4589_v12 = vadd.f32 %v9139_v1, %v11887_v38  ;;  %v4580_v30 = vpop.f32.mrb[137].mxu1  ;;  %8820 = vmatprep.subr.bf16.mxu0 %v9514_v19  ;;  %v9528_v49 = vld [vmem:[%s12895_s5 + $0x2a8] sm:$0xff]   ;;  %v9531_v59 = vld [vmem:[%s12895_s5 + $0x2f0] sm:$0xff]   ;;  %v9534_v1 = vld [vmem:[%s12895_s5 + $0x338] sm:$0xff]  }
 0x358   :  { %v4581_v9 = vadd.f32 %v4580_v30, %v11881_v54  ;;  %v9140_v47 = vpop.f32.mrb[138].mxu1  ;;  %9165 = vmatprep.mubr.bf16.mxu0 %v4629_v55  ;;  %v9529_v19 = vld [vmem:[%s12895_s5 + $0x268] sm:$0xff]   ;;  %v9533_v55 = vld [vmem:[%s12895_s5 + $0x270] sm:$0xff]   ;;  %v9537_v30 = vld [vmem:[%s12895_s5 + $0x278] sm:$0xff]  }
 0x359   :  { %v4592_v37 = vadd.f32 %v9140_v47, %v11889_v6  ;;  %v4583_v41 = vpop.f32.mrb[139].mxu1  ;;  %9166 = vmatmul.mubr.bf16.gmra.mrb[148].mxu0 %v4630_v3  ;;  %v4621_v45 = vmax.f32 %v4589_v12, 0.0  ;;  %v9532_v3 = vld [vmem:[%s12895_s5 + $0x2b0] sm:$0xff]   ;;  %v9536_v12 = vld [vmem:[%s12895_s5 + $0x2b8] sm:$0xff]   ;;  %v9546_v47 = vld [vmem:[%s12895_s5 + $0x400] sm:$0xff]  }
 0x35a   :  { %v4584_v43 = vadd.f32 %v4583_v41, %v11883_v5  ;;  %8821 = vmatpush3.bf16.msra.mxu0 %v9515_v29  ;;  %v4619_v23 = vmax.f32 %v4581_v9, 0.0  ;;  %v9535_v29 = vld [vmem:[%s12895_s5 + $0x2f8] sm:$0xff]   ;;  %v9538_v9 = vld [vmem:[%s12895_s5 + $0x380] sm:$0xff]  }
 0x35b   :  { %v4622_v0 = vmax.f32 %v4592_v37, 0.0  ;;  %v13164_v41 = vld [vmem:[#allocation16_spill] sm:$0xff] }
 0x35c   :  { %v4620_v56 = vmax.f32 %v4584_v43, 0.0 }
 0x35d   :  { %v4632_v39 = vpack.c.bf16 %v4622_v0, %v4621_v45  ;;  %v13166_v0 = vld [vmem:[#allocation10_spill] sm:$0xff] }
 0x35e   :  { %v4631_v35 = vpack.c.bf16 %v4620_v56, %v4619_v23  ;;  %v9143_v38 = vpop.f32.mrb[140].mxu1 }
 0x35f   :  { %v4605_v26 = vadd.f32 %v9143_v38, %v4508_v15  ;;  %v4596_v27 = vpop.f32.mrb[141].mxu1  ;;  %v9516_v15 = vld [vmem:[%s12895_s5 + $0x290] sm:$0xff]  }
 0x360   :  { %v4597_v54 = vadd.f32 %v4596_v27, %v11893_v18  ;;  %v9144_v31 = vpop.f32.mrb[142].mxu1  ;;  %9169 = vmatprep.mubr.bf16.mxu0 %v4631_v35  ;;  %8756 = vmatprep.subr.bf16.mxu1 %v9516_v15  ;;  %v9517_v18 = vld [vmem:[%s12895_s5 + $0x250] sm:$0xff]  }
 0x361   :  { %v4608_v57 = vadd.f32 %v9144_v31, %v4511_v11  ;;  %v4599_v6 = vpop.f32.mrb[143].mxu1  ;;  %9170 = vmatmul.mubr.bf16.gmra.mrb[152].mxu0 %v4632_v39  ;;  %v4625_v5 = vmax.f32 %v4605_v26, 0.0  ;;  %v9519_v11 = vld [vmem:[%s12895_s5 + $0x2d8] sm:$0xff]   ;;  %8757 = vmatpush3.bf16.msra.mxu1 %v9517_v18  ;;  %v13168_v39 = vld [vmem:[#allocation17_spill] sm:$0xff]  ;;  %v13170_v26 = vld [vmem:[#allocation18_spill] sm:$0xff] }
 0x362   :  { %v4600_v52 = vadd.f32 %v4599_v6, %v11895_v16  ;;  %v4623_v32 = vmax.f32 %v4597_v54, 0.0  ;;  %v9518_v16 = vld [vmem:[%s12895_s5 + $0x318] sm:$0xff]   ;;  %8758 = vmatprep.subr.bf16.mxu1 %v9520_v24 }
 0x363   :  { %v4626_v4 = vmax.f32 %v4608_v57, 0.0  ;;  %8822 = vmatprep.subr.bf16.mxu0 %v9518_v16 }
 0x364   :  { %v4624_v25 = vmax.f32 %v4600_v52, 0.0  ;;  %8823 = vmatpush3.bf16.msra.mxu0 %v9519_v11  ;;  %v13176_v11 = vld [vmem:[#allocation20_spill] sm:$0xff] }
 0x365   :  { %v4634_v58 = vpack.c.bf16 %v4626_v4, %v4625_v5  ;;  %8824 = vmatprep.subr.bf16.mxu0 %v9522_v13  ;;  %8759 = vmatpush3.bf16.msra.mxu1 %v9521_v33  ;;  %v13178_v13 = vld [vmem:[#allocation8_spill] sm:$0xff] }
 0x366   :  { %v4633_v44 = vpack.c.bf16 %v4624_v25, %v4623_v32  ;;  %8760 = vmatprep.subr.bf16.mxu1 %v9524_v20  ;;  %v13172_v32 = vld [vmem:[#allocation19_spill] sm:$0xff]  ;;  %vm13179_vm8 = vcmp.ne.s16.totalorder %v13178_v13, 0 }
 0x368   :  { %9173 = vmatprep.mubr.bf16.mxu0 %v4633_v44  ;;  %8825 = vmatpush3.bf16.msra.mxu0 %v9523_v60  ;;  %v13174_v44 = vld [vmem:[#allocation9_spill] sm:$0xff] }
 0x369   :  { %9174 = vmatmul.mubr.bf16.gmra.mrb[156].mxu0 %v4634_v58  ;;  %8761 = vmatpush3.bf16.msra.mxu1 %v9525_v28  ;;  %vm13175_vm2 = vcmp.ne.s16.totalorder %v13174_v44, 0 }
 0x36a   :  { %8826 = vmatprep.subr.bf16.mxu0 %v9526_v34  ;;  %8762 = vmatprep.subr.bf16.mxu1 %v9528_v49 }
 0x36c   :  { %8827 = vmatpush3.bf16.msra.mxu0 %v9527_v51  ;;  %v13180_v51 = vld [vmem:[#allocation21_spill] sm:$0xff] }
 0x36d   :  { %8828 = vmatprep.subr.bf16.mxu0 %v9530_v50  ;;  %8763 = vmatpush3.bf16.msra.mxu1 %v9529_v19 }
 0x36e   :  { %8764 = vmatprep.subr.bf16.mxu1 %v9532_v3 }
 0x370   :  { %8829 = vmatpush3.bf16.msra.mxu0 %v9531_v59 }
 0x371   :  { %8765 = vmatpush3.bf16.msra.mxu1 %v9533_v55  ;;  %8830 = vmatprep.subr.bf16.mxu0 %v9534_v1  ;;  %v13182_v55 = vld [vmem:[#allocation22_spill] sm:$0xff] }
 0x372   :  { %8766 = vmatprep.subr.bf16.mxu1 %v9536_v12 }
 0x374   :  { %8831 = vmatpush3.bf16.msra.mxu0 %v9535_v29 }
 0x375   :  { %8767 = vmatpush3.bf16.msra.mxu1 %v9537_v30  ;;  %8944 = vmatprep.subr.bf16.mxu0 %v9546_v47 }
 0x376   :  { %8880 = vmatprep.subr.bf16.mxu1 %v9538_v9  ;;  %v13184_v9 = vld [vmem:[#allocation6_spill] sm:$0xff] }
 0x424   :  { %v9163_v37 = vpop.f32.mrb[144].mxu0 }
 0x425   :  { %v12001_v43 = vadd.f32 %v9163_v37, %v13164_v41  ;;  %v4733_v45 = vpop.f32.mrb[145].mxu0 }
 0x426   :  { %v12004_v23 = vadd.f32 %v4733_v45, %v13166_v0  ;;  %v9164_v56 = vpop.f32.mrb[146].mxu0 }
 0x427   :  { %13165 = vst [vmem:[#allocation11_spill] sm:$0xff] %v12001_v43  ;;  %v12007_v35 = vadd.f32 %v9164_v56, %v13168_v39  ;;  %v4736_v38 = vpop.f32.mrb[147].mxu0  ;;  %v4814_v54 = vmax.f32 %v12001_v43, 0.0 }
 0x428   :  { %13167 = vst [vmem:[#allocation16_spill] sm:$0xff] %v12004_v23  ;;  %v12010_v27 = vadd.f32 %v4736_v38, %v13170_v26  ;;  %v4812_v57 = vmax.f32 %v12004_v23, 0.0 }
 0x429   :  { %13169 = vst [vmem:[#allocation10_spill] sm:$0xff] %v12007_v35  ;;  %v4815_v31 = vmax.f32 %v12007_v35, 0.0 }
 0x42a   :  { %13171 = vst [vmem:[#allocation17_spill] sm:$0xff] %v12010_v27  ;;  %v4813_v6 = vmax.f32 %v12010_v27, 0.0 }
 0x42b   :  { %v12016_v52 = vpack.c.bf16 %v4815_v31, %v4814_v54 }
 0x42c   :  { %v12018_v5 = vpack.c.bf16 %v4813_v6, %v4812_v57  ;;  %v9167_v4 = vpop.f32.mrb[148].mxu0 }
 0x42d   :  { %v12021_v25 = vadd.f32 %v9167_v4, %v13172_v32  ;;  %v4749_v58 = vpop.f32.mrb[149].mxu0  ;;  %v12026_v15 = vsel %vm13175_vm2, %v12016_v52, 0  ;;  %v12031_v18 = vsel %vm572_vm11, %v12016_v52, 0  ;;  %v5038_v16 = vshll.u32 %v12016_v52, 16  ;;  %vm13186_vm2 = vmmov %vm13185_vm12 }
 0x42e   :  { %v12035_v24 = vadd.f32 %v4749_v58, %v13176_v11  ;;  %v9168_v33 = vpop.f32.mrb[150].mxu0  ;;  %v4997_v60 = vsel %vm13179_vm8, %v12018_v5, 0  ;;  %v12994_v20 = vrot.slane %v12026_v15, 4  ;;  %v4989_v28 = vsel %vm571_vm4, %v12018_v5, 0  ;;  %v13187_v11 = vld [vmem:[#allocation23_spill] sm:$0xff] }
 0x42f   :  { %13173 = vst [vmem:[#allocation18_spill] sm:$0xff] %v12021_v25  ;;  %v4818_v34 = vmax.f32 %v12021_v25, 0.0  ;;  %v12046_v49 = vadd.f32 %v9168_v33, %v13180_v51  ;;  %v4752_v19 = vpop.f32.mrb[151].mxu0  ;;  %v5125_v50 = vrot.slane %v4997_v60, 4  ;;  %v5101_v59 = vrot.slane %v4989_v28, 1 }
 0x430   :  { %13177 = vst [vmem:[#allocation19_spill] sm:$0xff] %v12035_v24  ;;  %v4816_v3 = vmax.f32 %v12035_v24, 0.0  ;;  %v12050_v1 = vadd.f32 %v4752_v19, %v13182_v55  ;;  %v12993_v29 = vrot.slane %v12031_v18, 1  ;;  %v5030_v12 = vshll.u32 %v12018_v5, 16  ;;  %v13189_v19 = vld [vmem:[#allocation24_spill] sm:$0xff] }
 0x431   :  { %13181 = vst [vmem:[#allocation9_spill] sm:$0xff] %v12046_v49  ;;  %v4819_v30 = vmax.f32 %v12046_v49, 0.0  ;;  %v5126_v47 = vsel %vm13185_vm12, %v13184_v9, %v5125_v50  ;;  %v5128_v37 = vsel %vm13186_vm2, %v5125_v50, %v12994_v20  ;;  %v5102_v41 = vsel %vm729_vm3, %v9760_v17, %v5101_v59  ;;  %vm13206_vm12 = vmmov %vm13186_vm2 }
 0x432   :  { %13183 = vst [vmem:[#allocation20_spill] sm:$0xff] %v12050_v1  ;;  %v4817_v45 = vmax.f32 %v12050_v1, 0.0  ;;  %v5265_v0 = vshrl.u32 %v5126_v47, 16  ;;  %v5268_v56 = vshll.u32 %v5126_v47, 16  ;;  %v5273_v39 = vshrl.u32 %v5128_v37, 16  ;;  %v13199_v1 = vld [vmem:[#allocation29_spill] sm:$0xff] }
 0x433   :  { %v12063_v38 = vpack.c.bf16 %v4819_v30, %v4818_v34  ;;  %v5276_v26 = vshll.u32 %v5128_v37, 16  ;;  %v5104_v54 = vsel %vm729_vm3, %v5101_v59, %v12993_v29  ;;  %v5248_v31 = vshrl.u32 %v5102_v41, 16  ;;  %v13191_v37 = vld [vmem:[#allocation25_spill] sm:$0xff] }
 0x434   :  { %v12068_v57 = vpack.c.bf16 %v4817_v45, %v4816_v3  ;;  %v9171_v6 = vpop.f32.mrb[152].mxu0  ;;  %v5267_v4 = vrot.slane %v5265_v0, 3  ;;  %v5270_v32 = vrot.slane %v5268_v56, 4  ;;  %v5275_v58 = vrot.slane %v5273_v39, 3 }
 0x435   :  { %v12071_v33 = vadd.f32 %v9171_v6, %v13187_v11  ;;  %v4765_v60 = vpop.f32.mrb[153].mxu0  ;;  %v5278_v28 = vrot.slane %v5276_v26, 4  ;;  %v5250_v51 = vrot.slane %v5248_v31, 3  ;;  %v5251_v34 = vshll.u32 %v5102_v41, 16  ;;  %v13193_v31 = vld [vmem:[#allocation26_spill] sm:$0xff] }
 0x436   :  { %v12074_v50 = vadd.f32 %v4765_v60, %v13189_v19  ;;  %v9172_v55 = vpop.f32.mrb[154].mxu0  ;;  %v5271_v30 = vor.u32 %v5270_v32, %v5267_v4  ;;  %v5256_v59 = vshrl.u32 %v5104_v54, 16  ;;  %v5259_v47 = vshll.u32 %v5104_v54, 16 }
 0x437   :  { %13188 = vst [vmem:[#allocation8_spill] sm:$0xff] %v12071_v33  ;;  %v4822_v3 = vmax.f32 %v12071_v33, 0.0  ;;  %v12078_v45 = vadd.f32 %v9172_v55, %v13191_v37  ;;  %v4768_v0 = vpop.f32.mrb[155].mxu0  ;;  %v12080_v56 = vor.u32 %v5278_v28, %v5275_v58  ;;  %v5253_v39 = vrot.slane %v5251_v34, 4  ;;  %v9547_v55 = vld [vmem:[%s12895_s5 + $0x3c0] sm:$0xff]   ;;  %v9550_v37 = vld [vmem:[%s12895_s5 + $0x408] sm:$0xff]  }
 0x438   :  { %13190 = vst [vmem:[#allocation21_spill] sm:$0xff] %v12074_v50  ;;  %v4820_v26 = vmax.f32 %v12074_v50, 0.0  ;;  %v12084_v41 = vadd.f32 %v4768_v0, %v13193_v31  ;;  %v5258_v6 = vrot.slane %v5256_v59, 3  ;;  %v5261_v11 = vrot.slane %v5259_v47, 4 }
 0x439   :  { %13192 = vst [vmem:[#allocation22_spill] sm:$0xff] %v12078_v45  ;;  %v4823_v4 = vmax.f32 %v12078_v45, 0.0  ;;  %v5280_v54 = vsel %vm535_vm15, %v5271_v30, %v12080_v56  ;;  %v5254_v32 = vor.u32 %v5253_v39, %v5250_v51  ;;  %v5032_v60 = vrot.slane %v5030_v12, 1 }
 0x43a   :  { %13194 = vst [vmem:[#allocation6_spill] sm:$0xff] %v12084_v41  ;;  %v4821_v19 = vmax.f32 %v12084_v41, 0.0  ;;  %6526 = vmatprep.mubr.bf16.mxu0 %v5280_v54  ;;  %v12090_v58 = vor.u32 %v5261_v11, %v5258_v6  ;;  %v5034_v28 = vshrl.u32 %v12018_v5, 16  ;;  %v5040_v34 = vrot.slane %v5038_v16, 1 }
 0x43b   :  { %v12098_v59 = vpack.c.bf16 %v4823_v4, %v4822_v3  ;;  %v5033_v51 = vsel %vm583_vm14, %v9760_v17, %v5032_v60  ;;  %v12102_v30 = vrot.slane %v5030_v12, 5  ;;  %v12106_v47 = vrot.slane %v5038_v16, 5  ;;  %v13195_v12 = vld [vmem:[#allocation27_spill] sm:$0xff] }
 0x43c   :  { %v12111_v0 = vpack.c.bf16 %v4821_v19, %v4820_v26  ;;  %v5263_v39 = vsel %vm535_vm15, %v5254_v32, %v12090_v58  ;;  %v9175_v3 = vpop.f32.mrb[156].mxu0  ;;  %v5036_v31 = vor.u32 %v5034_v28, %v5032_v60  ;;  %v12115_v6 = vrot.slane %v5034_v28, 4  ;;  %v13197_v19 = vld [vmem:[#allocation28_spill] sm:$0xff] }
 0x43d   :  { %6527 = vmatmul.mubr.bf16.vlgmr.msra.gmra.mrb[160].mxu0 %v5263_v39  ;;  %v12118_v11 = vadd.f32 %v9175_v3, %v13195_v12  ;;  %v5231_v4 = vshrl.u32 %v5033_v51, 16  ;;  %v5234_v16 = vshll.u32 %v5033_v51, 16  ;;  %v4781_v54 = vpop.f32.mrb[157].mxu0  ;;  %v4981_v29 = vsel %vm479_vm7, %v12018_v5, 0  ;;  %v9551_v39 = vld [vmem:[%s12895_s5 + $0x3c8] sm:$0xff]  }
 0x43e   :  { %v5041_v26 = vsel %vm583_vm14, %v5036_v31, %v5040_v34  ;;  %v12125_v20 = vadd.f32 %v4781_v54, %v13197_v19  ;;  %v5222_v32 = vshrl.u32 %v4981_v29, 16  ;;  %v5225_v60 = vshll.u32 %v4981_v29, 16  ;;  %v9176_v28 = vpop.f32.mrb[158].mxu0  ;;  %8945 = vmatpush3.bf16.msra.mxu0 %v9547_v55  ;;  %v9552_v31 = vld [vmem:[%s12895_s5 + $0x410] sm:$0xff]  }
 0x43f   :  { %13196 = vst [vmem:[#allocation23_spill] sm:$0xff] %v12118_v11  ;;  %v4826_v51 = vmax.f32 %v12118_v11, 0.0  ;;  %v5233_v3 = vrot.slane %v5231_v4, 3  ;;  %v5236_v12 = vrot.slane %v5234_v16, 4  ;;  %v5239_v41 = vshrl.u32 %v5041_v26, 16  ;;  %v4784_v45 = vpop.f32.mrb[159].mxu0  ;;  %8946 = vmatprep.subr.bf16.mxu0 %v9550_v37 }
 0x440   :  { %13198 = vst [vmem:[#allocation24_spill] sm:$0xff] %v12125_v20  ;;  %v5242_v54 = vshll.u32 %v5041_v26, 16  ;;  %v4824_v29 = vmax.f32 %v12125_v20, 0.0  ;;  %v5224_v19 = vrot.slane %v5222_v32, 3  ;;  %v5227_v55 = vrot.slane %v5225_v60, 4  ;;  %v13201_v11 = vld [vmem:[#allocation30_spill] sm:$0xff] }
 0x441   :  { %v5237_v50 = vor.u32 %v5236_v12, %v5233_v3  ;;  %v5241_v33 = vrot.slane %v5239_v41, 3  ;;  %v12136_v49 = vadd.f32 %v9176_v28, %v13199_v1  ;;  %v12139_v4 = vadd.f32 %v4784_v45, %v13201_v11  ;;  %v13203_v37 = vld [vmem:[#allocation12_spill] sm:$0xff]  ;;  %v9553_v41 = vld [vmem:[%s12895_s5 + $0x3d0] sm:$0xff]  }
 0x442   :  { %v5244_v16 = vrot.slane %v5242_v54, 4  ;;  %v12141_v24 = vor.u32 %v5227_v55, %v5224_v19  ;;  %vm13204_vm8 = vcmp.ne.s16.totalorder %v13203_v37, 0  ;;  %v5042_v26 = vshrl.u32 %v12016_v52, 16  ;;  %8947 = vmatpush3.bf16.msra.mxu0 %v9551_v39  ;;  %v9556_v60 = vld [vmem:[%s12895_s5 + $0x418] sm:$0xff]  }
 0x443   :  { %13200 = vst [vmem:[#allocation25_spill] sm:$0xff] %v12136_v49  ;;  %13202 = vst [vmem:[#allocation26_spill] sm:$0xff] %v12139_v4  ;;  %v4999_v25 = vsel %vm13204_vm8, %v12068_v57, 0  ;;  %v4827_v1 = vmax.f32 %v12136_v49, 0.0  ;;  %v4825_v32 = vmax.f32 %v12139_v4, 0.0  ;;  %v13004_v11 = vshll.u32 %v12068_v57, 16  ;;  %8948 = vmatprep.subr.bf16.mxu0 %v9552_v31 }
 0x444   :  { %v5129_v45 = vrot.slane %v4999_v25, 4  ;;  %v5245_v28 = vor.u32 %v5244_v16, %v5241_v33  ;;  %v5229_v39 = vsel %vm535_vm15, %v9912_v14, %v12141_v24  ;;  %v5044_v3 = vor.u32 %v5042_v26, %v5040_v34  ;;  %v9539_v25 = vld [vmem:[%s12895_s5 + $0x340] sm:$0xff]  }
 0x445   :  { %v12159_v12 = vrot.slane %v5042_v26, 4  ;;  %v12161_v54 = vpack.c.bf16 %v4827_v1, %v4826_v51  ;;  %v12166_v19 = vpack.c.bf16 %v4825_v32, %v4824_v29  ;;  %v13205_v31 = vrot.slane %v12026_v15, 4  ;;  %v9540_v29 = vld [vmem:[%s12895_s5 + $0x388] sm:$0xff]   ;;  %v9557_v15 = vld [vmem:[%s12895_s5 + $0x3d8] sm:$0xff]  }
 0x446   :  { %v12173_v33 = vrot.slane %v13004_v11, 1  ;;  %v5246_v34 = vsel %vm535_vm15, %v5237_v50, %v5245_v28  ;;  %v12179_v51 = vsel %vm573_vm5, %v12068_v57, 0  ;;  %8949 = vmatpush3.bf16.msra.mxu0 %v9553_v41  ;;  %v13207_v32 = vld [vmem:[#allocation13_spill] sm:$0xff]  ;;  %vm13209_vm8 = vcmp.ne.s16.totalorder %v10053_v53, 0 }
 0x447   :  { %v5130_v55 = vsel %vm13206_vm12, %v13205_v31, %v5129_v45  ;;  %6429 = vmatprep.mubr.bf16.mxu1 %v5246_v34  ;;  %v13012_v1 = vrot.slane %v12179_v51, 1  ;;  %vm13208_vm2 = vcmp.ne.s16.totalorder %v13207_v32, 0  ;;  %8950 = vmatprep.subr.bf16.mxu0 %v9556_v60  ;;  %v9558_v41 = vld [vmem:[%s12895_s5 + $0x420] sm:$0xff]   ;;  %v13210_v49 = vrot.slane %v12031_v18, 1  ;;  %v9541_v60 = vld [vmem:[%s12895_s5 + $0x348] sm:$0xff]  }
 0x448   :  { %v5377_v16 = vshrl.u32 %v5130_v55, 16  ;;  %v5380_v26 = vshll.u32 %v5130_v55, 16  ;;  %v5049_v50 = vsel %vm583_vm14, %v5044_v3, %v12173_v33  ;;  %v5000_v31 = vsel %vm13208_vm2, %v12063_v38, 0  ;;  %6430 = vmatmul.mubr.bf16.vlgmr.msra.gmra.mrb[144].mxu1 %v5229_v39  ;;  %v9559_v18 = vld [vmem:[%s12895_s5 + $0x3e0] sm:$0xff]  }
 0x449   :  { %v4982_v55 = vsel %vm13209_vm8, %v12016_v52, 0  ;;  %v5333_v4 = vshrl.u32 %v5049_v50, 16  ;;  %v5336_v3 = vshll.u32 %v5049_v50, 16  ;;  %8881 = vmatpush3.bf16.msra.mxu1 %v9539_v25  ;;  %v5106_v20 = vsel %vm729_vm3, %v13210_v49, %v13012_v1  ;;  %v9542_v25 = vld [vmem:[%s12895_s5 + $0x390] sm:$0xff]  }
 0x44a   :  { %v5379_v34 = vrot.slane %v5377_v16, 3  ;;  %v5382_v11 = vrot.slane %v5380_v26, 4  ;;  %v5131_v27 = vrot.slane %v5000_v31, 4  ;;  %v5359_v35 = vshrl.u32 %v4982_v55, 16  ;;  %8882 = vmatprep.subr.bf16.mxu1 %v9540_v29  ;;  %8951 = vmatpush3.bf16.msra.mxu0 %v9557_v15 }
 0x44b   :  { %v5362_v23 = vshll.u32 %v4982_v55, 16  ;;  %v5335_v39 = vrot.slane %v5333_v4, 3  ;;  %v5338_v16 = vrot.slane %v5336_v3, 4  ;;  %v5368_v26 = vshrl.u32 %v5106_v20, 16  ;;  %8952 = vmatprep.subr.bf16.mxu0 %v9558_v41  ;;  %v9562_v4 = vld [vmem:[%s12895_s5 + $0x428] sm:$0xff]  }
 0x44c   :  { %v5383_v43 = vor.u32 %v5382_v11, %v5379_v34  ;;  %v5371_v49 = vshll.u32 %v5106_v20, 16  ;;  %v5132_v50 = vsel %vm13206_vm12, %v5129_v45, %v5131_v27  ;;  %v5361_v31 = vrot.slane %v5359_v35, 3 }
 0x44d   :  { %v5364_v55 = vrot.slane %v5362_v23, 4  ;;  %v12219_v29 = vor.u32 %v5338_v16, %v5335_v39  ;;  %v5370_v15 = vrot.slane %v5368_v26, 3  ;;  %v5449_v34 = vshrl.u32 %v5132_v50, 16  ;;  %8883 = vmatpush3.bf16.msra.mxu1 %v9541_v60  ;;  %v9543_v23 = vld [vmem:[%s12895_s5 + $0x350] sm:$0xff]   ;;  %v9544_v60 = vld [vmem:[%s12895_s5 + $0x398] sm:$0xff]  }
 0x44e   :  { %v5384_v11 = vsel %vm535_vm15, %v12080_v56, %v5383_v43  ;;  %v5373_v3 = vrot.slane %v5371_v49, 4  ;;  %v5452_v1 = vshll.u32 %v5132_v50, 16  ;;  %v13014_v35 = vshrl.u32 %v12068_v57, 16  ;;  %v13211_v39 = vld [vmem:[#allocation14_spill] sm:$0xff]  ;;  %8884 = vmatprep.subr.bf16.mxu1 %v9542_v25  ;;  %8953 = vmatpush3.bf16.msra.mxu0 %v9559_v18 }
 0x44f   :  { %6534 = vmatprep.mubr.bf16.mxu0 %v5384_v11  ;;  %v12221_v20 = vor.u32 %v5364_v55, %v5361_v31  ;;  %v12229_v45 = vsel %vm535_vm15, %v5245_v28, %v12219_v29  ;;  %v5451_v56 = vrot.slane %v5449_v34, 3  ;;  %v13013_v41 = vshll.u32 %v12063_v38, 16  ;;  %8954 = vmatprep.subr.bf16.mxu0 %v9562_v4  ;;  %v9563_v25 = vld [vmem:[%s12895_s5 + $0x3e8] sm:$0xff]  }
 0x450   :  { %vm13212_vm2 = vcmp.ne.s16.totalorder %v13211_v39, 0  ;;  %6437 = vmatprep.mubr.bf16.mxu1 %v12229_v45  ;;  %v12239_v26 = vor.u32 %v5373_v3, %v5370_v15  ;;  %v5454_v49 = vrot.slane %v5452_v1, 4  ;;  %v5052_v50 = vor.u32 %v13014_v35, %v12173_v33 }
 0x451   :  { %v4992_v16 = vsel %vm13212_vm2, %v12063_v38, 0  ;;  %v5366_v28 = vsel %vm535_vm15, %v12141_v24, %v12221_v20  ;;  %v5056_v18 = vrot.slane %v13013_v41, 1  ;;  %v5530_v1 = vshrl.u32 %v5131_v27, 16  ;;  %v9564_v24 = vld [vmem:[%s12895_s5 + $0x430] sm:$0xff]   ;;  %8885 = vmatpush3.bf16.msra.mxu1 %v9543_v23 }
 0x452   :  { %6438 = vmatmul.mubr.bf16.gmra.mrb[148].mxu1 %v5366_v28  ;;  %v12252_v31 = vrot.slane %v4992_v16, 1  ;;  %v5533_v55 = vshll.u32 %v5131_v27, 16  ;;  %v5375_v33 = vsel %vm535_vm15, %v12090_v58, %v12239_v26  ;;  %v5455_v4 = vor.u32 %v5454_v49, %v5451_v56  ;;  %v9545_v27 = vld [vmem:[%s12895_s5 + $0x358] sm:$0xff]   ;;  %8886 = vmatprep.subr.bf16.mxu1 %v9544_v60  ;;  %v9548_v49 = vld [vmem:[%s12895_s5 + $0x3a0] sm:$0xff]  }
 0x453   :  { %v4983_v11 = vsel %vm481_vm9, %v12068_v57, 0  ;;  %6535 = vmatmul.mubr.bf16.gmra.mrb[164].mxu0 %v5375_v33  ;;  %v5057_v34 = vsel %vm583_vm14, %v5052_v50, %v5056_v18  ;;  %v13213_v3 = vrot.slane %v12179_v51, 1  ;;  %v5532_v56 = vrot.slane %v5530_v1, 3  ;;  %v9565_v50 = vld [vmem:[%s12895_s5 + $0x3f0] sm:$0xff]   ;;  %v9568_v60 = vld [vmem:[%s12895_s5 + $0x438] sm:$0xff]  }
 0x454   :  { %v5535_v16 = vrot.slane %v5533_v55, 4  ;;  %v5456_v23 = vsel %vm535_vm15, %v5383_v43, %v5455_v4  ;;  %v5413_v28 = vshrl.u32 %v5057_v34, 16  ;;  %v5416_v41 = vshll.u32 %v5057_v34, 16  ;;  %8955 = vmatpush3.bf16.msra.mxu0 %v9563_v25 }
 0x455   :  { %v5108_v58 = vsel %vm729_vm3, %v13213_v3, %v12252_v31  ;;  %6542 = vmatprep.mubr.bf16.mxu0 %v5456_v23  ;;  %v5431_v1 = vshrl.u32 %v4983_v11, 16  ;;  %v5434_v55 = vshll.u32 %v4983_v11, 16  ;;  %8956 = vmatprep.subr.bf16.mxu0 %v9564_v24  ;;  %v13214_v34 = vshrl.u32 %v12063_v38, 16 }
 0x456   :  { %v5440_v35 = vshrl.u32 %v5108_v58, 16  ;;  %v5443_v51 = vshll.u32 %v5108_v58, 16  ;;  %v5536_v33 = vor.u32 %v5535_v16, %v5532_v56  ;;  %v5415_v3 = vrot.slane %v5413_v28, 3  ;;  %8887 = vmatpush3.bf16.msra.mxu1 %v9545_v27  ;;  %v9549_v58 = vld [vmem:[%s12895_s5 + $0x360] sm:$0xff]  }
 0x457   :  { %v5418_v43 = vrot.slane %v5416_v41, 4  ;;  %v12284_v25 = vor.u32 %v13214_v34, %v5056_v18  ;;  %v5433_v24 = vrot.slane %v5431_v1, 3  ;;  %v5436_v16 = vrot.slane %v5434_v55, 4  ;;  %8888 = vmatprep.subr.bf16.mxu1 %v9548_v49  ;;  %v9554_v41 = vld [vmem:[%s12895_s5 + $0x3a8] sm:$0xff]  }
 0x458   :  { %v5442_v15 = vrot.slane %v5440_v35, 3  ;;  %v5445_v56 = vrot.slane %v5443_v51, 4  ;;  %v5537_v11 = vsel %vm535_vm15, %v5455_v4, %v5536_v33  ;;  %v5521_v23 = vshrl.u32 %v12252_v31, 16  ;;  %8957 = vmatpush3.bf16.msra.mxu0 %v9565_v50  ;;  %v9569_v33 = vld [vmem:[%s12895_s5 + $0x3f8] sm:$0xff]  }
 0x459   :  { %v12293_v35 = vor.u32 %v5418_v43, %v5415_v3  ;;  %v5512_v18 = vshrl.u32 %v12284_v25, 16  ;;  %v5515_v27 = vshll.u32 %v12284_v25, 16  ;;  %v12298_v51 = vor.u32 %v5436_v16, %v5433_v24  ;;  %8958 = vmatprep.subr.bf16.mxu0 %v9568_v60  ;;  %v9560_v43 = vld [vmem:[%s12895_s5 + $0x3b0] sm:$0xff]  }
 0x45a   :  { %v5446_v28 = vor.u32 %v5445_v56, %v5442_v15  ;;  %v5524_v4 = vshll.u32 %v12252_v31, 16  ;;  %vm13215_vm8 = vcmp.ne.s16.totalorder %v13178_v13, 0  ;;  %v5523_v55 = vrot.slane %v5521_v23, 3  ;;  %8889 = vmatpush3.bf16.msra.mxu1 %v9549_v58  ;;  %v9555_v31 = vld [vmem:[%s12895_s5 + $0x368] sm:$0xff]  }
 0x45b   :  { %v5001_v49 = vsel %vm13215_vm8, %v12111_v0, 0  ;;  %v12310_v1 = vsel %vm535_vm15, %v12219_v29, %v12293_v35  ;;  %v5514_v50 = vrot.slane %v5512_v18, 3  ;;  %v5517_v15 = vrot.slane %v5515_v27, 4  ;;  %8890 = vmatprep.subr.bf16.mxu1 %v9554_v41 }
 0x45c   :  { %6445 = vmatprep.mubr.bf16.mxu1 %v12310_v1  ;;  %v5447_v13 = vsel %vm535_vm15, %v12239_v26, %v5446_v28  ;;  %v5438_v60 = vsel %vm535_vm15, %v12221_v20, %v12298_v51  ;;  %v5526_v3 = vrot.slane %v5524_v4, 4  ;;  %vm13216_vm12 = vcmp.ne.s16.totalorder %v13174_v44, 0  ;;  %8959 = vmatpush3.bf16.msra.mxu0 %v9569_v33 }
 0x45d   :  { %v12324_v29 = vsel %vm13216_vm12, %v12098_v59, 0  ;;  %6543 = vmatmul.mubr.bf16.gmra.mrb[168].mxu0 %v5447_v13  ;;  %6446 = vmatmul.mubr.bf16.gmra.mrb[152].mxu1 %v5438_v60  ;;  %v5518_v34 = vor.u32 %v5517_v15, %v5514_v50  ;;  %v5133_v58 = vrot.slane %v5001_v49, 4  ;;  %vm13217_vm2 = vcmp.ne.s16.totalorder %v13135_v22, 0 }
 0x45e   :  { %v5135_v26 = vrot.slane %v12324_v29, 4  ;;  %v4984_v20 = vsel %vm13217_vm2, %v12063_v38, 0  ;;  %6550 = vmatprep.mubr.bf16.mxu0 %v5537_v11  ;;  %v5527_v56 = vor.u32 %v5526_v3, %v5523_v55  ;;  %v13016_v16 = vshll.u32 %v12111_v0, 16  ;;  %8891 = vmatpush3.bf16.msra.mxu1 %v9555_v31  ;;  %v9561_v11 = vld [vmem:[%s12895_s5 + $0x370] sm:$0xff]  }
 0x45f   :  { %v5503_v44 = vshrl.u32 %v4984_v20, 16  ;;  %v5506_v24 = vshll.u32 %v4984_v20, 16  ;;  %v5519_v41 = vsel %vm535_vm15, %v12293_v35, %v5518_v34  ;;  %vm13218_vm8 = vcmask 1043456   ;;  %8892 = vmatprep.subr.bf16.mxu1 %v9560_v43 }
 0x460   :  { %v5134_v18 = vsel %vm13218_vm8, %v13184_v9, %v5133_v58  ;;  %vm13219_vm12 = vmmov %vm13218_vm8  ;;  %v13017_v23 = vshrl.u32 %v12111_v0, 16  ;;  %6453 = vmatprep.mubr.bf16.mxu1 %v5519_v41  ;;  %v5528_v4 = vsel %vm535_vm15, %v5446_v28, %v5527_v56  ;;  %v9566_v9 = vld [vmem:[%s12895_s5 + $0x3b8] sm:$0xff]   ;;  %v5064_v31 = vrot.slane %v13016_v16, 1 }
 0x461   :  { %v5136_v27 = vsel %vm13219_vm12, %v5133_v58, %v5135_v26  ;;  %v5603_v49 = vshrl.u32 %v5134_v18, 16  ;;  %v5606_v33 = vshll.u32 %v5134_v18, 16  ;;  %v5505_v55 = vrot.slane %v5503_v44, 3  ;;  %v9567_v44 = vld [vmem:[%s12895_s5 + $0x378] sm:$0xff]  }
 0x462   :  { %v5611_v50 = vshrl.u32 %v5136_v27, 16  ;;  %v5614_v15 = vshll.u32 %v5136_v27, 16  ;;  %v5508_v13 = vrot.slane %v5506_v24, 4  ;;  %v13015_v58 = vshll.u32 %v12098_v59, 16  ;;  %8893 = vmatpush3.bf16.msra.mxu1 %v9561_v11 }
 0x463   :  { %v5605_v60 = vrot.slane %v5603_v49, 3  ;;  %v5608_v3 = vrot.slane %v5606_v33, 4  ;;  %v5065_v43 = vsel %vm583_vm14, %v9760_v17, %v5064_v31  ;;  %v5068_v56 = vor.u32 %v13017_v23, %v5064_v31  ;;  %8894 = vmatprep.subr.bf16.mxu1 %v9566_v9  ;;  %v12364_v49 = vld [vmem:[%s12895_s5 + $0x440] sm:$0xff]  }
 0x464   :  { %v5613_v34 = vrot.slane %v5611_v50, 3  ;;  %v5616_v28 = vrot.slane %v5614_v15, 4  ;;  %v5509_v20 = vor.u32 %v5508_v13, %v5505_v55  ;;  %v5072_v41 = vrot.slane %v13015_v58, 1 }
 0x465   :  { %v5609_v24 = vor.u32 %v5608_v3, %v5605_v60  ;;  %v5569_v18 = vshrl.u32 %v5065_v43, 16  ;;  %v5572_v27 = vshll.u32 %v5065_v43, 16  ;;  %6551 = vmatmul.mubr.bf16.gmra.mrb[172].mxu0 %v5528_v4  ;;  %v4993_v50 = vsel %vm571_vm4, %v12111_v0, 0 }
 0x466   :  { %v12366_v33 = vor.u32 %v5616_v28, %v5613_v34  ;;  %v5510_v11 = vsel %vm535_vm15, %v12298_v51, %v5509_v20  ;;  %v4994_v15 = vsel %vm572_vm11, %v12098_v59, 0  ;;  %v5073_v9 = vsel %vm583_vm14, %v5068_v56, %v5072_v41  ;;  %8895 = vmatpush3.bf16.msra.mxu1 %v9567_v44 }
 0x467   :  { %6454 = vmatmul.mubr.bf16.gmra.mrb[156].mxu1 %v5510_v11  ;;  %v5571_v55 = vrot.slane %v5569_v18, 3  ;;  %v5574_v13 = vrot.slane %v5572_v27, 4  ;;  %v5109_v31 = vrot.slane %v4993_v50, 1  ;;  %v5577_v60 = vshrl.u32 %v5073_v9, 16  ;;  %9177 = vmatprep.subr.bf16.mxu1 %v12364_v49 }
 0x468   :  { %v5618_v4 = vsel %vm535_vm15, %v5609_v24, %v12366_v33  ;;  %v5580_v3 = vshll.u32 %v5073_v9, 16  ;;  %v5111_v51 = vrot.slane %v4994_v15, 1  ;;  %vm13220_vm2 = vcmp.ne.s16.totalorder %v13203_v37, 0 }
 0x469   :  { %6558 = vmatprep.mubr.bf16.mxu0 %v5618_v4  ;;  %v5575_v34 = vor.u32 %v5574_v13, %v5571_v55  ;;  %v5110_v28 = vsel %vm729_vm3, %v9760_v17, %v5109_v31  ;;  %v5003_v20 = vsel %vm13220_vm2, %v12166_v19, 0  ;;  %v4985_v43 = vsel %vm479_vm7, %v12111_v0, 0 }
 0x46a   :  { %v5579_v56 = vrot.slane %v5577_v60, 3  ;;  %v5582_v24 = vrot.slane %v5580_v3, 4  ;;  %v5112_v18 = vsel %vm729_vm3, %v5109_v31, %v5111_v51  ;;  %v5586_v44 = vshrl.u32 %v5110_v28, 16 }
 0x46b   :  { %v5589_v27 = vshll.u32 %v5110_v28, 16  ;;  %v5594_v11 = vshrl.u32 %v5112_v18, 16  ;;  %v5597_v50 = vshll.u32 %v5112_v18, 16  ;;  %v5137_v15 = vrot.slane %v5003_v20, 4 }
 0x46c   :  { %v12389_v9 = vor.u32 %v5582_v24, %v5579_v56  ;;  %v5588_v55 = vrot.slane %v5586_v44, 3  ;;  %v5560_v37 = vshrl.u32 %v4985_v43, 16  ;;  %v5563_v13 = vshll.u32 %v4985_v43, 16 }
 0x46d   :  { %v5591_v4 = vrot.slane %v5589_v27, 4  ;;  %v5596_v58 = vrot.slane %v5594_v11, 3  ;;  %v5599_v16 = vrot.slane %v5597_v50, 4  ;;  %v5138_v60 = vsel %vm13218_vm8, %v5135_v26, %v5137_v15 }
 0x46e   :  { %v5584_v31 = vsel %vm535_vm15, %v5575_v34, %v12389_v9  ;;  %v5715_v3 = vshrl.u32 %v5138_v60, 16  ;;  %v5718_v28 = vshll.u32 %v5138_v60, 16  ;;  %v5562_v23 = vrot.slane %v5560_v37, 3 }
 0x46f   :  { %6461 = vmatprep.mubr.bf16.mxu1 %v5584_v31  ;;  %v5592_v20 = vor.u32 %v5591_v4, %v5588_v55  ;;  %v5600_v56 = vor.u32 %v5599_v16, %v5596_v58  ;;  %v5565_v24 = vrot.slane %v5563_v13, 4  ;;  %v13019_v18 = vshrl.u32 %v12098_v59, 16 }
 0x470   :  { %v5717_v43 = vrot.slane %v5715_v3, 3  ;;  %v5720_v44 = vrot.slane %v5718_v28, 4  ;;  %v13018_v27 = vshll.u32 %v12166_v19, 16  ;;  %v4995_v29 = vsel %vm573_vm5, %v12166_v19, 0 }
 0x471   :  { %v5601_v26 = vsel %vm535_vm15, %v5592_v20, %v5600_v56  ;;  %v5566_v34 = vor.u32 %v5565_v24, %v5562_v23  ;;  %v5076_v11 = vor.u32 %v13019_v18, %v5072_v41  ;;  %v5113_v50 = vrot.slane %v4995_v29, 1 }
 0x472   :  { %6559 = vmatmul.mubr.bf16.gmra.mrb[176].mxu0 %v5601_v26  ;;  %v5721_v16 = vor.u32 %v5720_v44, %v5717_v43  ;;  %v5080_v58 = vrot.slane %v13018_v27, 1  ;;  %vm13221_vm12 = vcmp.ne.s16.totalorder %v13207_v32, 0  ;;  %vm13222_vm2 = vcmp.ne.s16.totalorder %v10053_v53, 0 }
 0x473   :  { %v5004_v55 = vsel %vm13221_vm12, %v12161_v54, 0  ;;  %v4986_v37 = vsel %vm13222_vm2, %v12098_v59, 0  ;;  %v5567_v23 = vsel %vm535_vm15, %v9912_v14, %v5566_v34  ;;  %v5114_v13 = vsel %vm729_vm3, %v5111_v51, %v5113_v50 }
 0x474   :  { %v5139_v41 = vrot.slane %v5004_v55, 4  ;;  %v5697_v4 = vshrl.u32 %v4986_v37, 16  ;;  %v5722_v60 = vsel %vm535_vm15, %v12366_v33, %v5721_v16  ;;  %6462 = vmatmul.mubr.bf16.gmra.mrb[160].mxu1 %v5567_v23  ;;  %v5081_v31 = vsel %vm583_vm14, %v5076_v11, %v5080_v58 }
 0x475   :  { %v5706_v3 = vshrl.u32 %v5114_v13, 16  ;;  %v5709_v32 = vshll.u32 %v5114_v13, 16  ;;  %6566 = vmatprep.mubr.bf16.mxu0 %v5722_v60  ;;  %v5671_v28 = vshrl.u32 %v5081_v31, 16  ;;  %v5674_v20 = vshll.u32 %v5081_v31, 16 }
 0x476   :  { %v5140_v24 = vsel %vm13218_vm8, %v5137_v15, %v5139_v41  ;;  %v5699_v43 = vrot.slane %v5697_v4, 3  ;;  %v5700_v18 = vshll.u32 %v4986_v37, 16  ;;  %v13023_v33 = vshrl.u32 %v12166_v19, 16 }
 0x477   :  { %v5708_v44 = vrot.slane %v5706_v3, 3  ;;  %v5711_v29 = vrot.slane %v5709_v32, 4  ;;  %v5787_v26 = vshrl.u32 %v5140_v24, 16  ;;  %v5790_v51 = vshll.u32 %v5140_v24, 16 }
 0x478   :  { %v5673_v55 = vrot.slane %v5671_v28, 3  ;;  %v5676_v27 = vrot.slane %v5674_v20, 4  ;;  %v13022_v13 = vshll.u32 %v12161_v54, 16  ;;  %v5702_v42 = vrot.slane %v5700_v18, 4 }
 0x479   :  { %v5712_v23 = vor.u32 %v5711_v29, %v5708_v44  ;;  %v5789_v61 = vrot.slane %v5787_v26, 3  ;;  %v5792_v11 = vrot.slane %v5790_v51, 4  ;;  %v5084_v15 = vor.u32 %v13023_v33, %v5080_v58 }
 0x47a   :  { %v5677_v60 = vor.u32 %v5676_v27, %v5673_v55  ;;  %vm13223_vm12 = vcmp.ne.s16.totalorder %v13211_v39, 0  ;;  %v5088_v37 = vrot.slane %v13022_v13, 1  ;;  %v5703_v18 = vor.u32 %v5702_v42, %v5699_v43 }
 0x47b   :  { %v4996_v4 = vsel %vm13223_vm12, %v12161_v54, 0  ;;  %v5713_v31 = vsel %vm535_vm15, %v5600_v56, %v5712_v23  ;;  %v5793_v3 = vor.u32 %v5792_v11, %v5789_v61  ;;  %v5868_v27 = vshrl.u32 %v5139_v41, 16 }
 0x47c   :  { %v5115_v32 = vrot.slane %v4996_v4, 1  ;;  %v12431_v28 = vsel %vm535_vm15, %v12389_v9, %v5677_v60  ;;  %6567 = vmatmul.mubr.bf16.gmra.mrb[180].mxu0 %v5713_v31  ;;  %v5871_v20 = vshll.u32 %v5139_v41, 16  ;;  %v5089_v58 = vsel %vm583_vm14, %v5084_v15, %v5088_v37 }
 0x47d   :  { %6469 = vmatprep.mubr.bf16.mxu1 %v12431_v28  ;;  %v5794_v39 = vsel %vm535_vm15, %v5721_v16, %v5793_v3  ;;  %v4987_v56 = vsel %vm481_vm9, %v12166_v19, 0  ;;  %v5704_v9 = vsel %vm535_vm15, %v5566_v34, %v5703_v18  ;;  %v5751_v24 = vshrl.u32 %v5089_v58, 16 }
 0x47e   :  { %v5116_v61 = vsel %vm729_vm3, %v5113_v50, %v5115_v32  ;;  %6574 = vmatprep.mubr.bf16.mxu0 %v5794_v39  ;;  %v5754_v44 = vshll.u32 %v5089_v58, 16  ;;  %6470 = vmatmul.mubr.bf16.gmra.mrb[164].mxu1 %v5704_v9  ;;  %v5870_v43 = vrot.slane %v5868_v27, 3  ;;  %v5873_v29 = vrot.slane %v5871_v20, 4 }
 0x47f   :  { %v5778_v42 = vshrl.u32 %v5116_v61, 16  ;;  %v5781_v41 = vshll.u32 %v5116_v61, 16  ;;  %v5769_v26 = vshrl.u32 %v4987_v56, 16  ;;  %v5753_v16 = vrot.slane %v5751_v24, 3 }
 0x480   :  { %v5756_v51 = vrot.slane %v5754_v44, 4  ;;  %v5772_v11 = vshll.u32 %v4987_v56, 16  ;;  %v5874_v15 = vor.u32 %v5873_v29, %v5870_v43  ;;  %v5090_v31 = vshrl.u32 %v12161_v54, 16 }
 0x481   :  { %v5780_v55 = vrot.slane %v5778_v42, 3  ;;  %v5783_v50 = vrot.slane %v5781_v41, 4  ;;  %v5771_v4 = vrot.slane %v5769_v26, 3  ;;  %v5859_v13 = vshrl.u32 %v5115_v32, 16 }
 0x482   :  { %v12442_v39 = vor.u32 %v5756_v51, %v5753_v16  ;;  %v5774_v34 = vrot.slane %v5772_v11, 4  ;;  %v5862_v58 = vshll.u32 %v5115_v32, 16  ;;  %v5875_v61 = vsel %vm535_vm15, %v5793_v3, %v5874_v15 }
 0x483   :  { %v5784_v33 = vor.u32 %v5783_v50, %v5780_v55  ;;  %v12447_v27 = vor.u32 %v5090_v31, %v5088_v37  ;;  %vm13224_vm2 = vcmp.ne.s16.totalorder %v13135_v22, 0  ;;  %v5861_v24 = vrot.slane %v5859_v13, 3 }
 0x484   :  { %v4988_v20 = vsel %vm13224_vm2, %v12161_v54, 0  ;;  %v12454_v56 = vsel %vm535_vm15, %v5677_v60, %v12442_v39  ;;  %v5775_v9 = vor.u32 %v5774_v34, %v5771_v4  ;;  %v5864_v44 = vrot.slane %v5862_v58, 4 }
 0x485   :  { %6477 = vmatprep.mubr.bf16.mxu1 %v12454_v56  ;;  %v5785_v32 = vsel %vm535_vm15, %v5712_v23, %v5784_v33  ;;  %v5850_v3 = vshrl.u32 %v12447_v27, 16  ;;  %v5853_v37 = vshll.u32 %v12447_v27, 16  ;;  %v5841_v42 = vshrl.u32 %v4988_v20, 16 }
 0x486   :  { %6575 = vmatmul.mubr.bf16.gmra.mrb[184].mxu0 %v5785_v32  ;;  %v5776_v22 = vsel %vm535_vm15, %v5703_v18, %v5775_v9  ;;  %v5865_v41 = vor.u32 %v5864_v44, %v5861_v24  ;;  %v5844_v43 = vshll.u32 %v4988_v20, 16  ;;  %v5005_v60 = vsel %vm619_vm0, %v12018_v5, 0 }
 0x487   :  { %6582 = vmatprep.mubr.bf16.mxu0 %v5875_v61  ;;  %6478 = vmatmul.mubr.bf16.gmra.mrb[168].mxu1 %v5776_v22  ;;  %v5852_v13 = vrot.slane %v5850_v3, 3  ;;  %v5855_v29 = vrot.slane %v5853_v37, 4  ;;  %v5843_v26 = vrot.slane %v5841_v42, 3  ;;  %v5006_v23 = vsel %vm620_vm10, %v12016_v52, 0 }
 0x488   :  { %v5866_v16 = vsel %vm535_vm15, %v5784_v33, %v5865_v41  ;;  %v5846_v51 = vrot.slane %v5844_v43, 4  ;;  %v5179_v55 = vrot.slane %v5005_v60, 5  ;;  %v5180_v18 = vrot.slane %v5006_v23, 5 }
 0x489   :  { %v5856_v11 = vor.u32 %v5855_v29, %v5852_v13  ;;  %v5013_v50 = vsel %vm631_vm13, %v12018_v5, 0  ;;  %v5014_v15 = vsel %vm479_vm7, %v12016_v52, 0  ;;  %v5143_v4 = vor.u32 %v12102_v30, %v12115_v6 }
 0x48a   :  { %v5847_v34 = vor.u32 %v5846_v51, %v5843_v26  ;;  %v5181_v58 = vsel %vm811_vm6, %v5179_v55, %v5180_v18  ;;  %v5299_v61 = vshrl.u32 %v5179_v55, 16  ;;  %v5302_v33 = vshll.u32 %v5179_v55, 16 }
 0x48b   :  { %v5857_v20 = vsel %vm535_vm15, %v12442_v39, %v5856_v11  ;;  %v5307_v24 = vshrl.u32 %v5181_v58, 16  ;;  %v5310_v44 = vshll.u32 %v5181_v58, 16  ;;  %v5316_v32 = vshrl.u32 %v5013_v50, 16 }
 0x48c   :  { %6485 = vmatprep.mubr.bf16.mxu1 %v5857_v20  ;;  %v5848_v3 = vsel %vm535_vm15, %v5775_v9, %v5847_v34  ;;  %v5301_v37 = vrot.slane %v5299_v61, 3  ;;  %v5304_v42 = vrot.slane %v5302_v33, 4  ;;  %v5319_v22 = vshll.u32 %v5013_v50, 16 }
 0x48d   :  { %v5309_v41 = vrot.slane %v5307_v24, 3  ;;  %v5312_v43 = vrot.slane %v5310_v44, 4  ;;  %v5318_v30 = vrot.slane %v5316_v32, 3  ;;  %v5324_v6 = vshrl.u32 %v5014_v15, 16 }
 0x48e   :  { %6583 = vmatmul.mubr.bf16.gmra.mrb[188].mxu0 %v5866_v16  ;;  %v5305_v60 = vor.u32 %v5304_v42, %v5301_v37  ;;  %v5321_v13 = vrot.slane %v5319_v22, 4  ;;  %v5327_v29 = vshll.u32 %v5014_v15, 16  ;;  %v5146_v26 = vor.u32 %v12106_v47, %v12159_v12 }
 0x48f   :  { %6720 = vmatprep.mubr.bf16.mxu0 %v12229_v45  ;;  %6486 = vmatmul.mubr.bf16.gmra.mrb[172].mxu1 %v5848_v3  ;;  %v5313_v23 = vor.u32 %v5312_v43, %v5309_v41  ;;  %v5326_v51 = vrot.slane %v5324_v6, 3  ;;  %v5282_v9 = vshrl.u32 %v5143_v4, 16  ;;  %v5285_v55 = vshll.u32 %v5143_v4, 16 }
 0x490   :  { %v5322_v11 = vor.u32 %v5321_v13, %v5318_v30  ;;  %v5329_v50 = vrot.slane %v5327_v29, 4  ;;  %v5147_v34 = vsel %vm443_vm1, %v5143_v4, %v5146_v26  ;;  %vm13225_vm8 = vcmp.ne.s16.totalorder %v10695_v21, 0 }
 0x491   :  { %v5007_v16 = vsel %vm13225_vm8, %v12068_v57, 0  ;;  %v5314_v15 = vsel %vm535_vm15, %v5305_v60, %v5313_v23  ;;  %v5284_v58 = vrot.slane %v5282_v9, 3  ;;  %v5287_v61 = vrot.slane %v5285_v55, 4 }
 0x492   :  { %v5290_v47 = vshrl.u32 %v5147_v34, 16  ;;  %6623 = vmatprep.mubr.bf16.mxu1 %v5314_v15  ;;  %v5330_v12 = vor.u32 %v5329_v50, %v5326_v51  ;;  %v5293_v45 = vshll.u32 %v5147_v34, 16  ;;  %v5182_v33 = vrot.slane %v5007_v16, 5  ;;  %v9571_v34 = vld [vmem:[%s12895_s5 + $0x448] sm:$0xff]  }
 0x493   :  { %vm13226_vm12 = vcmp.ne.s16.totalorder %v10053_v53, 0  ;;  %v5288_v24 = vor.u32 %v5287_v61, %v5284_v58  ;;  %v5195_v22 = vsel %vm583_vm14, %v12284_v25, %v9760_v17  ;;  %v13227_v51 = vshrl.u32 %v12068_v57, 16 }
 0x494   :  { %v5015_v20 = vsel %vm13226_vm12, %v12068_v57, 0  ;;  %v5292_v44 = vrot.slane %v5290_v47, 3  ;;  %v5331_v3 = vsel %vm535_vm15, %v5322_v11, %v5330_v12  ;;  %v5295_v37 = vrot.slane %v5293_v45, 4 }
 0x495   :  { %v5404_v4 = vshrl.u32 %v5015_v20, 16  ;;  %v5407_v32 = vshll.u32 %v5015_v20, 16  ;;  %v5183_v42 = vsel %vm811_vm6, %v5180_v18, %v5182_v33  ;;  %v5485_v13 = vshrl.u32 %v5195_v22, 16 }
 0x496   :  { %v5395_v41 = vshrl.u32 %v5183_v42, 16  ;;  %v5398_v43 = vshll.u32 %v5183_v42, 16  ;;  %6721 = vmatmul.mubr.bf16.vlgmr.msra.gmra.mrb[192].mxu0 %v5331_v3  ;;  %v5296_v60 = vor.u32 %v5295_v37, %v5292_v44  ;;  %v5488_v29 = vshll.u32 %v5195_v22, 16 }
 0x497   :  { %v5406_v30 = vrot.slane %v5404_v4, 3  ;;  %v5409_v6 = vrot.slane %v5407_v32, 4  ;;  %v5148_v9 = vrot.slane %v13227_v51, 4  ;;  %6728 = vmatprep.mubr.bf16.mxu0 %v12310_v1  ;;  %v13228_v50 = vshll.u32 %v12068_v57, 16 }
 0x498   :  { %v5397_v55 = vrot.slane %v5395_v41, 3  ;;  %v5400_v11 = vrot.slane %v5398_v43, 4  ;;  %v5297_v16 = vsel %vm535_vm15, %v5288_v24, %v5296_v60  ;;  %v5487_v15 = vrot.slane %v5485_v13, 3 }
 0x499   :  { %v12499_v18 = vor.u32 %v5409_v6, %v5406_v30  ;;  %v5149_v25 = vrot.slane %v13228_v50, 5  ;;  %v5490_v58 = vrot.slane %v5488_v29, 4  ;;  %vm13229_vm2 = vcmp.ne.s16.totalorder %v10712_v10, 0  ;;  %6624 = vmatmul.mubr.bf16.vlgmr.msra.gmra.mrb[176].mxu1 %v5297_v16 }
 0x49a   :  { %v5008_v61 = vsel %vm13229_vm2, %v12063_v38, 0  ;;  %v5401_v1 = vor.u32 %v5400_v11, %v5397_v55  ;;  %9178 = vmatpush3.bf16.msra.mxu1 %v12364_v49  ;;  %v5016_v44 = vsel %vm481_vm9, %v12063_v38, 0  ;;  %v13230_v4 = vshrl.u32 %v12063_v38, 16  ;;  %v9572_v49 = vld [vmem:[%s12895_s5 + $0x450] sm:$0xff]  }
 0x49b   :  { %v5150_v47 = vor.u32 %v5149_v25, %v5148_v9  ;;  %v5184_v45 = vrot.slane %v5008_v61, 5  ;;  %v5491_v20 = vor.u32 %v5490_v58, %v5487_v15  ;;  %v13231_v32 = vshll.u32 %v12063_v38, 16  ;;  %9179 = vmatprep.subr.bf16.mxu1 %v9571_v34 }
 0x49c   :  { %v5152_v24 = vrot.slane %v13230_v4, 4  ;;  %v5402_v37 = vsel %vm535_vm15, %v5313_v23, %v5401_v1  ;;  %v5476_v41 = vshrl.u32 %v5016_v44, 16  ;;  %v5411_v43 = vsel %vm535_vm15, %v5330_v12, %v12499_v18 }
 0x49d   :  { %v5153_v3 = vrot.slane %v13231_v32, 5  ;;  %v5151_v42 = vsel %vm443_vm1, %v5146_v26, %v5150_v47  ;;  %v5185_v22 = vsel %vm811_vm6, %v5182_v33, %v5184_v45  ;;  %6631 = vmatprep.mubr.bf16.mxu1 %v5402_v37  ;;  %v5492_v23 = vsel %vm535_vm15, %v12293_v35, %v5491_v20  ;;  %v9573_v35 = vld [vmem:[%s12895_s5 + $0x458] sm:$0xff]  }
 0x49e   :  { %v5386_v30 = vshrl.u32 %v5151_v42, 16  ;;  %v5389_v6 = vshll.u32 %v5151_v42, 16  ;;  %v5467_v13 = vshrl.u32 %v5185_v22, 16  ;;  %v5470_v29 = vshll.u32 %v5185_v22, 16  ;;  %6729 = vmatmul.mubr.bf16.gmra.mrb[196].mxu0 %v5411_v43  ;;  %9180 = vmatpush3.bf16.msra.mxu1 %v9571_v34  ;;  %v9574_v43 = vld [vmem:[%s12895_s5 + $0x460] sm:$0xff]  }
 0x49f   :  { %v5478_v26 = vrot.slane %v5476_v41, 3  ;;  %v5479_v51 = vshll.u32 %v5016_v44, 16  ;;  %v5154_v11 = vor.u32 %v5153_v3, %v5152_v24  ;;  %6736 = vmatprep.mubr.bf16.mxu0 %v5492_v23  ;;  %9181 = vmatprep.subr.bf16.mxu1 %v9572_v49  ;;  %v5186_v12 = vsel %vm811_vm6, %v5184_v45, %v10755_v62 }
 0x4a0   :  { %v5388_v33 = vrot.slane %v5386_v30, 3  ;;  %v5391_v9 = vrot.slane %v5389_v6, 4  ;;  %v5469_v55 = vrot.slane %v5467_v13, 3  ;;  %v5472_v50 = vrot.slane %v5470_v29, 4 }
 0x4a1   :  { %v5481_v25 = vrot.slane %v5479_v51, 4  ;;  %v5009_v16 = vsel %vm619_vm0, %v12111_v0, 0  ;;  %v5155_v58 = vsel %vm443_vm1, %v5150_v47, %v5154_v11  ;;  %v5548_v34 = vshrl.u32 %v5186_v12, 16 }
 0x4a2   :  { %v5392_v15 = vor.u32 %v5391_v9, %v5388_v33  ;;  %v5551_v61 = vshll.u32 %v5186_v12, 16  ;;  %v5473_v44 = vor.u32 %v5472_v50, %v5469_v55  ;;  %v5458_v24 = vshrl.u32 %v5155_v58, 16  ;;  %9182 = vmatpush3.bf16.msra.mxu1 %v9572_v49 }
 0x4a3   :  { %v5482_v4 = vor.u32 %v5481_v25, %v5478_v26  ;;  %v5461_v32 = vshll.u32 %v5155_v58, 16  ;;  %v5550_v45 = vrot.slane %v5548_v34, 3  ;;  %v5539_v42 = vshrl.u32 %v5154_v11, 16  ;;  %9183 = vmatprep.subr.bf16.mxu1 %v9573_v35 }
 0x4a4   :  { %v5393_v3 = vsel %vm535_vm15, %v5296_v60, %v5392_v15  ;;  %v5553_v37 = vrot.slane %v5551_v61, 4  ;;  %v5474_v22 = vsel %vm535_vm15, %v5401_v1, %v5473_v44  ;;  %v5557_v2 = vsel %vm535_vm15, %v5491_v20, %v10789_v36 }
 0x4a5   :  { %6632 = vmatmul.mubr.bf16.gmra.mrb[180].mxu1 %v5393_v3  ;;  %v5460_v41 = vrot.slane %v5458_v24, 3  ;;  %v5463_v47 = vrot.slane %v5461_v32, 4  ;;  %v5483_v60 = vsel %vm535_vm15, %v12499_v18, %v5482_v4  ;;  %v5541_v49 = vrot.slane %v5539_v42, 3 }
 0x4a6   :  { %6639 = vmatprep.mubr.bf16.mxu1 %v5474_v22  ;;  %v5554_v30 = vor.u32 %v5553_v37, %v5550_v45  ;;  %v5542_v6 = vshll.u32 %v5154_v11, 16  ;;  %v5556_v1 = vsel %vm535_vm15, %v5482_v4, %v9912_v14  ;;  %v5010_v20 = vsel %vm620_vm10, %v12098_v59, 0  ;;  %6737 = vmatmul.mubr.bf16.gmra.mrb[200].mxu0 %v5483_v60  ;;  %v9576_v37 = vld [vmem:[%s12895_s5 + $0x470] sm:$0xff]   ;;  %vm13237_vm10 = vmmov %vm13226_vm12 }
 0x4a7   :  { %v5187_v13 = vrot.slane %v5009_v16, 5  ;;  %v5017_v23 = vsel %vm631_vm13, %v12111_v0, 0  ;;  %v5464_v29 = vor.u32 %v5463_v47, %v5460_v41  ;;  %v5188_v51 = vrot.slane %v5010_v20, 5  ;;  %9184 = vmatpush3.bf16.msra.mxu1 %v9573_v35  ;;  %6744 = vmatprep.mubr.bf16.mxu0 %v5557_v2 }
 0x4a8   :  { %v5544_v26 = vrot.slane %v5542_v6, 4  ;;  %v5018_v18 = vsel %vm479_vm7, %v12098_v59, 0  ;;  %v5555_v33 = vsel %vm535_vm15, %v5473_v44, %v5554_v30  ;;  %v5654_v55 = vshrl.u32 %v5017_v23, 16  ;;  %9185 = vmatprep.subr.bf16.mxu1 %v9574_v43  ;;  %vm13236_vm7 = vmmov %vm13225_vm8 }
 0x4a9   :  { %v5637_v9 = vshrl.u32 %v5187_v13, 16  ;;  %v5640_v46 = vshll.u32 %v5187_v13, 16  ;;  %v5189_v50 = vsel %vm811_vm6, %v5187_v13, %v5188_v51  ;;  %v5657_v25 = vshll.u32 %v5017_v23, 16 }
 0x4aa   :  { %v5545_v11 = vor.u32 %v5544_v26, %v5541_v49  ;;  %v5662_v12 = vshrl.u32 %v5018_v18, 16  ;;  %v5645_v7 = vshrl.u32 %v5189_v50, 16  ;;  %v5648_v58 = vshll.u32 %v5189_v50, 16 }
 0x4ab   :  { %v5639_v35 = vrot.slane %v5637_v9, 3  ;;  %v5642_v16 = vrot.slane %v5640_v46, 4  ;;  %v5465_v34 = vsel %vm535_vm15, %v5392_v15, %v5464_v29  ;;  %v5656_v44 = vrot.slane %v5654_v55, 3  ;;  %9186 = vmatpush3.bf16.msra.mxu1 %v9574_v43 }
 0x4ac   :  { %v5546_v61 = vsel %vm535_vm15, %v5464_v29, %v5545_v11  ;;  %v5659_v4 = vrot.slane %v5657_v25, 4  ;;  %v5647_v32 = vrot.slane %v5645_v7, 3  ;;  %v5650_v3 = vrot.slane %v5648_v58, 4  ;;  %9187 = vmatprep.subr.bf16.mxu1 %v9575_v48 }
 0x4ad   :  { %6640 = vmatmul.mubr.bf16.gmra.mrb[184].mxu1 %v5465_v34  ;;  %v5643_v24 = vor.u32 %v5642_v16, %v5639_v35  ;;  %v5665_v45 = vshll.u32 %v5018_v18, 16  ;;  %v5664_v42 = vrot.slane %v5662_v12, 3  ;;  %v13232_v22 = vshrl.u32 %v12111_v0, 16 }
 0x4ae   :  { %6647 = vmatprep.mubr.bf16.mxu1 %v5555_v33  ;;  %v13233_v2 = vshll.u32 %v12111_v0, 16  ;;  %v13234_v47 = vshrl.u32 %v12098_v59, 16  ;;  %v12573_v60 = vor.u32 %v5650_v3, %v5647_v32  ;;  %v13235_v49 = vshll.u32 %v12098_v59, 16  ;;  %6745 = vmatmul.mubr.bf16.gmra.mrb[204].mxu0 %v5556_v1  ;;  %v9577_v1 = vld [vmem:[%s12895_s5 + $0x478] sm:$0xff]  }
 0x4af   :  { %v5156_v15 = vrot.slane %v13232_v22, 4  ;;  %v5667_v30 = vrot.slane %v5665_v45, 4  ;;  %v5011_v20 = vsel %vm13236_vm7, %v12166_v19, 0  ;;  %v5660_v13 = vor.u32 %v5659_v4, %v5656_v44  ;;  %9188 = vmatpush3.bf16.msra.mxu1 %v9575_v48  ;;  %6752 = vmatprep.mubr.bf16.mxu0 %v12431_v28 }
 0x4b0   :  { %v5157_v41 = vrot.slane %v13233_v2, 5  ;;  %v5159_v43 = vrot.slane %v13234_v47, 4  ;;  %v5160_v6 = vrot.slane %v13235_v49, 5  ;;  %v5190_v29 = vrot.slane %v5011_v20, 5  ;;  %9189 = vmatprep.subr.bf16.mxu1 %v9576_v37 }
 0x4b1   :  { %v5019_v26 = vsel %vm13237_vm10, %v12166_v19, 0  ;;  %v5652_v18 = vsel %vm535_vm15, %v5643_v24, %v12573_v60  ;;  %v5196_v21 = vsel %vm583_vm14, %v12447_v27, %v9760_v17  ;;  %v5668_v28 = vor.u32 %v5667_v30, %v5664_v42  ;;  %vm13240_vm14 = vmmov %vm13229_vm2 }
 0x4b2   :  { %v5158_v23 = vor.u32 %v5157_v41, %v5156_v15  ;;  %v5161_v33 = vor.u32 %v5160_v6, %v5159_v43  ;;  %v5742_v9 = vshrl.u32 %v5019_v26, 16  ;;  %v5191_v55 = vsel %vm811_vm6, %v5188_v51, %v5190_v29 }
 0x4b3   :  { %v5745_v48 = vshll.u32 %v5019_v26, 16  ;;  %v5733_v50 = vshrl.u32 %v5191_v55, 16  ;;  %v5736_v25 = vshll.u32 %v5191_v55, 16  ;;  %9190 = vmatpush3.bf16.msra.mxu1 %v9576_v37  ;;  %v5823_v32 = vshrl.u32 %v5196_v21, 16 }
 0x4b4   :  { %v5620_v46 = vshrl.u32 %v5158_v23, 16  ;;  %v5623_v53 = vshll.u32 %v5158_v23, 16  ;;  %v5162_v11 = vsel %vm443_vm1, %v5158_v23, %v5161_v33  ;;  %v5744_v34 = vrot.slane %v5742_v9, 3  ;;  %9191 = vmatprep.subr.bf16.mxu1 %v9577_v1 }
 0x4b5   :  { %v5628_v16 = vshrl.u32 %v5162_v11, 16  ;;  %v5631_v7 = vshll.u32 %v5162_v11, 16  ;;  %6648 = vmatmul.mubr.bf16.gmra.mrb[188].mxu1 %v5546_v61  ;;  %v5735_v27 = vrot.slane %v5733_v50, 3  ;;  %v5738_v58 = vrot.slane %v5736_v25, 4 }
 0x4b6   :  { %v5622_v12 = vrot.slane %v5620_v46, 3  ;;  %v5625_v35 = vrot.slane %v5623_v53, 4  ;;  %v5747_v44 = vrot.slane %v5745_v48, 4  ;;  %6655 = vmatprep.mubr.bf16.mxu1 %v5652_v18  ;;  %v5669_v3 = vsel %vm535_vm15, %v5660_v13, %v5668_v28 }
 0x4b7   :  { %v5630_v51 = vrot.slane %v5628_v16, 3  ;;  %v5633_v24 = vrot.slane %v5631_v7, 4  ;;  %v5826_v45 = vshll.u32 %v5196_v21, 16  ;;  %v13238_v42 = vshrl.u32 %v12166_v19, 16  ;;  %6753 = vmatmul.mubr.bf16.gmra.mrb[208].mxu0 %v5669_v3  ;;  %9192 = vmatpush3.bf16.msra.mxu1 %v9577_v1 }
 0x4b8   :  { %v5626_v4 = vor.u32 %v5625_v35, %v5622_v12  ;;  %v5825_v37 = vrot.slane %v5823_v32, 3  ;;  %v13239_v61 = vshll.u32 %v12166_v19, 16  ;;  %v5012_v41 = vsel %vm13240_vm14, %v12161_v54, 0  ;;  %6760 = vmatprep.mubr.bf16.mxu0 %v12454_v56 }
 0x4b9   :  { %v5163_v22 = vrot.slane %v13238_v42, 4  ;;  %v5634_v15 = vor.u32 %v5633_v24, %v5630_v51  ;;  %v5739_v47 = vor.u32 %v5738_v58, %v5735_v27  ;;  %v5748_v43 = vor.u32 %v5747_v44, %v5744_v34 }
 0x4ba   :  { %v5164_v2 = vrot.slane %v13239_v61, 5  ;;  %v5828_v30 = vrot.slane %v5826_v45, 4  ;;  %v5192_v49 = vrot.slane %v5012_v41, 5  ;;  %v5020_v13 = vsel %vm481_vm9, %v12161_v54, 0 }
 0x4bb   :  { %v5635_v6 = vsel %vm535_vm15, %v5626_v4, %v5634_v15  ;;  %v5167_v23 = vrot.slane %v5090_v31, 4  ;;  %v5814_v18 = vshrl.u32 %v5020_v13, 16  ;;  %v5817_v9 = vshll.u32 %v5020_v13, 16 }
 0x4bc   :  { %v5165_v20 = vor.u32 %v5164_v2, %v5163_v22  ;;  %v5829_v26 = vor.u32 %v5828_v30, %v5825_v37  ;;  %v5193_v10 = vsel %vm811_vm6, %v5190_v29, %v5192_v49  ;;  %v13241_v46 = vshll.u32 %v12161_v54, 16 }
 0x4bd   :  { %v5805_v21 = vshrl.u32 %v5193_v10, 16  ;;  %v5808_v1 = vshll.u32 %v5193_v10, 16  ;;  %6656 = vmatmul.mubr.bf16.gmra.mrb[192].mxu1 %v5635_v6  ;;  %v5740_v40 = vsel %vm535_vm15, %v12573_v60, %v5739_v47  ;;  %v5749_v55 = vsel %vm535_vm15, %v5668_v28, %v5748_v43 }
 0x4be   :  { %v5166_v56 = vsel %vm443_vm1, %v5161_v33, %v5165_v20  ;;  %v5168_v53 = vrot.slane %v13241_v46, 5  ;;  %6663 = vmatprep.mubr.bf16.mxu1 %v5740_v40  ;;  %v5816_v50 = vrot.slane %v5814_v18, 3  ;;  %v5819_v25 = vrot.slane %v5817_v9, 4 }
 0x4bf   :  { %v5724_v48 = vshrl.u32 %v5166_v56, 16  ;;  %v5727_v31 = vshll.u32 %v5166_v56, 16  ;;  %v5807_v11 = vrot.slane %v5805_v21, 3  ;;  %v5810_v29 = vrot.slane %v5808_v1, 4  ;;  %6761 = vmatmul.mubr.bf16.gmra.mrb[212].mxu0 %v5749_v55 }
 0x4c0   :  { %v5169_v35 = vor.u32 %v5168_v53, %v5167_v23  ;;  %v5194_v16 = vsel %vm811_vm6, %v5192_v49, %v10755_v62  ;;  %v5830_v7 = vsel %vm535_vm15, %v12442_v39, %v5829_v26  ;;  %v5820_v24 = vor.u32 %v5819_v25, %v5816_v50 }
 0x4c1   :  { %v5726_v12 = vrot.slane %v5724_v48, 3  ;;  %v5729_v33 = vrot.slane %v5727_v31, 4  ;;  %v5811_v60 = vor.u32 %v5810_v29, %v5807_v11  ;;  %v5886_v27 = vshrl.u32 %v5194_v16, 16  ;;  %6768 = vmatprep.mubr.bf16.mxu0 %v5830_v7 }
 0x4c2   :  { %v5170_v58 = vsel %vm443_vm1, %v5165_v20, %v5169_v35  ;;  %v5889_v34 = vshll.u32 %v5194_v16, 16  ;;  %vm13242_vm9 = vcmp.ne.s16.totalorder %v13099_v8, 0  ;;  %v5022_v22 = vsel %vm571_vm4, %v12016_v52, 0 }
 0x4c3   :  { %v5730_v28 = vor.u32 %v5729_v33, %v5726_v12  ;;  %v5796_v44 = vshrl.u32 %v5170_v58, 16  ;;  %v5799_v4 = vshll.u32 %v5170_v58, 16  ;;  %v5812_v51 = vsel %vm535_vm15, %v5739_v47, %v5811_v60  ;;  %vm13245_vm1 = vmmov %vm13242_vm9 }
 0x4c4   :  { %v5888_v45 = vrot.slane %v5886_v27, 3  ;;  %v5891_v42 = vrot.slane %v5889_v34, 4  ;;  %v5021_v39 = vsel %vm13242_vm9, %v12018_v5, 0  ;;  %v5023_v61 = vsel %vm572_vm11, %v12068_v57, 0 }
 0x4c5   :  { %v5731_v32 = vsel %vm535_vm15, %v5634_v15, %v5730_v28  ;;  %v5798_v3 = vrot.slane %v5796_v44, 3  ;;  %v5801_v62 = vrot.slane %v5799_v4, 4  ;;  %v5205_v2 = vrot.slane %v5021_v39, 1 }
 0x4c6   :  { %6664 = vmatmul.mubr.bf16.gmra.mrb[196].mxu1 %v5731_v32  ;;  %v5206_v15 = vrot.slane %v5022_v22, 1  ;;  %v5821_v41 = vsel %vm535_vm15, %v5748_v43, %v5820_v24  ;;  %v5895_v47 = vsel %vm535_vm15, %v5829_v26, %v10789_v36  ;;  %v5208_v30 = vrot.slane %v5023_v61, 1 }
 0x4c7   :  { %6671 = vmatprep.mubr.bf16.mxu1 %v5812_v51  ;;  %v5024_v5 = vsel %vm573_vm5, %v12063_v38, 0  ;;  %6769 = vmatmul.mubr.bf16.gmra.mrb[216].mxu0 %v5821_v41  ;;  %v5802_v6 = vor.u32 %v5801_v62, %v5798_v3  ;;  %v5877_v52 = vshrl.u32 %v5169_v35, 16  ;;  %v5880_v20 = vshll.u32 %v5169_v35, 16 }
 0x4c8   :  { %v5207_v13 = vsel %vm729_vm3, %v5205_v2, %v5206_v15  ;;  %6776 = vmatprep.mubr.bf16.mxu0 %v5895_v47  ;;  %v5892_v57 = vor.u32 %v5891_v42, %v5888_v45  ;;  %v5209_v23 = vsel %vm729_vm3, %v5206_v15, %v5208_v30  ;;  %v5210_v10 = vrot.slane %v5024_v5, 1 }
 0x4c9   :  { %v5350_v43 = vshrl.u32 %v5209_v23, 16  ;;  %v5353_v18 = vshll.u32 %v5209_v23, 16  ;;  %v5342_v9 = vshrl.u32 %v5207_v13, 16  ;;  %v5345_v26 = vshll.u32 %v5207_v13, 16 }
 0x4ca   :  { %v5803_v56 = vsel %vm535_vm15, %v5730_v28, %v5802_v6  ;;  %v5879_v21 = vrot.slane %v5877_v52, 3  ;;  %v5882_v1 = vrot.slane %v5880_v20, 4  ;;  %v5893_v38 = vsel %vm535_vm15, %v5811_v60, %v5892_v57 }
 0x4cb   :  { %v5352_v46 = vrot.slane %v5350_v43, 3  ;;  %v5355_v53 = vrot.slane %v5353_v18, 4  ;;  %v5211_v40 = vsel %vm729_vm3, %v5208_v30, %v5210_v10  ;;  %v5212_v55 = vsel %vm729_vm3, %v5210_v10, %v9760_v17 }
 0x4cc   :  { %v5894_v48 = vsel %vm535_vm15, %v5820_v24, %v9912_v14  ;;  %v5344_v31 = vrot.slane %v5342_v9, 3  ;;  %v5347_v11 = vrot.slane %v5345_v26, 4  ;;  %v5027_v29 = vsel %vm572_vm11, %v12166_v19, 0 }
 0x4cd   :  { %v5883_v50 = vor.u32 %v5882_v1, %v5879_v21  ;;  %v5422_v25 = vshrl.u32 %v5211_v40, 16  ;;  %v5425_v12 = vshll.u32 %v5211_v40, 16  ;;  %v5025_v33 = vsel %vm13245_vm1, %v12111_v0, 0  ;;  %v9578_v1 = vld [vmem:[%s12896_s6 + $0x40] sm:$0xff]  }
 0x4ce   :  { %6672 = vmatmul.mubr.bf16.gmra.mrb[200].mxu1 %v5803_v56  ;;  %v5356_v35 = vor.u32 %v5355_v53, %v5352_v46  ;;  %v5494_v16 = vshrl.u32 %v5212_v55, 16  ;;  %v5497_v7 = vshll.u32 %v5212_v55, 16  ;;  %v5026_v14 = vsel %vm571_vm4, %v12098_v59, 0  ;;  %9209 = vmatprep.subr.bf16.mxu0 %v9578_v1  ;;  %v9580_v46 = vld [vmem:[%s12896_s6 + $0x50] sm:$0xff]   ;;  %v9581_v53 = vld [vmem:[%s12896_s6 + $0x58] sm:$0xff]  }
 0x4cf   :  { %6679 = vmatprep.mubr.bf16.mxu1 %v5893_v38  ;;  %6777 = vmatmul.mubr.bf16.gmra.mrb[220].mxu0 %v5894_v48  ;;  %v5216_v60 = vrot.slane %v5027_v29, 1  ;;  %v5884_v27 = vsel %vm535_vm15, %v5802_v6, %v5883_v50  ;;  %v5348_v28 = vor.u32 %v5347_v11, %v5344_v31  ;;  %v5424_v19 = vrot.slane %v5422_v25, 3  ;;  %v9579_v38 = vld [vmem:[%s12896_s6 + $0x48] sm:$0xff]   ;;  %v9582_v29 = vld [vmem:[%s12896_s6 + $0x60] sm:$0xff]  }
 0x4d0   :  { %v5427_v58 = vrot.slane %v5425_v12, 4  ;;  %v5213_v34 = vrot.slane %v5025_v33, 1  ;;  %v5214_v44 = vrot.slane %v5026_v14, 1  ;;  %v5496_v8 = vrot.slane %v5494_v16, 3  ;;  %9210 = vmatpush3.bf16.msra.mxu0 %v9578_v1  ;;  %v9583_v14 = vld [vmem:[%s12896_s6 + $0x68] sm:$0xff]  }
 0x4d1   :  { %v5357_v4 = vsel %vm535_vm15, %v5348_v28, %v5356_v35  ;;  %v5499_v0 = vrot.slane %v5497_v7, 4  ;;  %v5028_v63 = vsel %vm573_vm5, %v12161_v54, 0  ;;  %9211 = vmatprep.subr.bf16.mxu0 %v9579_v38  ;;  %vm7521_vm11 = vcmask 523264  }
 0x4d2   :  { %v5217_v51 = vsel %vm729_vm3, %v5214_v44, %v5216_v60  ;;  %v5428_v59 = vor.u32 %v5427_v58, %v5424_v19  ;;  %v5215_v24 = vsel %vm729_vm3, %v5213_v34, %v5214_v44  ;;  %v5218_v45 = vrot.slane %v5028_v63, 1 }
 0x4d3   :  { %v5500_v32 = vor.u32 %v5499_v0, %v5496_v8  ;;  %v5688_v3 = vshrl.u32 %v5217_v51, 16  ;;  %v5691_v62 = vshll.u32 %v5217_v51, 16  ;;  %v5680_v42 = vshrl.u32 %v5215_v24, 16 }
 0x4d4   :  { %v5683_v39 = vshll.u32 %v5215_v24, 16  ;;  %v5429_v22 = vsel %vm535_vm15, %v5356_v35, %v5428_v59  ;;  %v5219_v15 = vsel %vm729_vm3, %v5216_v60, %v5218_v45  ;;  %v5220_v54 = vsel %vm729_vm3, %v5218_v45, %v9760_v17  ;;  %9212 = vmatpush3.bf16.msra.mxu0 %v9579_v38 }
 0x4d5   :  { %v5501_v37 = vsel %vm535_vm15, %v5428_v59, %v5500_v32  ;;  %v5690_v61 = vrot.slane %v5688_v3, 3  ;;  %v5693_v2 = vrot.slane %v5691_v62, 4  ;;  %v5682_v41 = vrot.slane %v5680_v42, 3  ;;  %9213 = vmatprep.subr.bf16.mxu0 %v9580_v46  ;;  %v9584_v59 = vld [vmem:[%s12896_s6 + $0x70] sm:$0xff]  }
 0x4d6   :  { %6680 = vmatmul.mubr.bf16.gmra.mrb[204].mxu1 %v5884_v27  ;;  %v5685_v47 = vrot.slane %v5683_v39, 4  ;;  %v5760_v30 = vshrl.u32 %v5219_v15, 16  ;;  %v5763_v49 = vshll.u32 %v5219_v15, 16  ;;  %v5832_v6 = vshrl.u32 %v5220_v54, 16 }
 0x4d7   :  { %9193 = vmatprep.mubr.bf16.mxu1 %v5357_v4  ;;  %v5694_v5 = vor.u32 %v5693_v2, %v5690_v61  ;;  %v5835_v52 = vshll.u32 %v5220_v54, 16  ;;  %v5558_v13 = vsel %vm535_vm15, %v5500_v32, %v10789_v36  ;;  %vm7564_vm3 = vcmask 1040384  }
 0x4d8   :  { %v5686_v20 = vor.u32 %v5685_v47, %v5682_v41  ;;  %v5762_v57 = vrot.slane %v5760_v30, 3  ;;  %v5765_v23 = vrot.slane %v5763_v49, 4  ;;  %v5834_v43 = vrot.slane %v5832_v6, 3  ;;  %9214 = vmatpush3.bf16.msra.mxu0 %v9580_v46  ;;  %v9585_v49 = vld [vmem:[%s12896_s6 + $0x78] sm:$0xff]  }
 0x4d9   :  { %v5837_v18 = vrot.slane %v5835_v52, 4  ;;  %9215 = vmatprep.subr.bf16.mxu0 %v9581_v53 }
 0x4da   :  { %v5695_v10 = vsel %vm535_vm15, %v5686_v20, %v5694_v5  ;;  %v5766_v17 = vor.u32 %v5765_v23, %v5762_v57 }
 0x4db   :  { %v5838_v9 = vor.u32 %v5837_v18, %v5834_v43 }
 0x4dc   :  { %v5767_v26 = vsel %vm535_vm15, %v5694_v5, %v5766_v17  ;;  %9216 = vmatpush3.bf16.msra.mxu0 %v9581_v53 }
 0x4dd   :  { %v5839_v56 = vsel %vm535_vm15, %v5766_v17, %v5838_v9  ;;  %v5896_v21 = vsel %vm535_vm15, %v5838_v9, %v10789_v36  ;;  %9217 = vmatprep.subr.bf16.mxu0 %v9582_v29  ;;  %vm9639_vm15 = vmmov 0  }
 0x4de   :  { %9194 = vmatmul.mubr.bf16.vlgmr.msra.gmra.mrb[208].mxu1 %v5429_v22 }
 0x4df   :  { %9197 = vmatprep.mubr.bf16.mxu1 %v5501_v37 }
 0x4e0   :  { %9218 = vmatpush3.bf16.msra.mxu0 %v9582_v29 }
 0x4e1   :  { %9219 = vmatprep.subr.bf16.mxu0 %v9583_v14 }
 0x4e4   :  { %9220 = vmatpush3.bf16.msra.mxu0 %v9583_v14 }
 0x4e5   :  { %9221 = vmatprep.subr.bf16.mxu0 %v9584_v59 }
 0x4e6   :  { %9198 = vmatmul.mubr.bf16.gmra.mrb[212].mxu1 %v5558_v13 }
 0x4e7   :  { %9201 = vmatprep.mubr.bf16.mxu1 %v5695_v10 }
 0x4e8   :  { %9222 = vmatpush3.bf16.msra.mxu0 %v9584_v59 }
 0x4e9   :  { %9223 = vmatprep.subr.bf16.mxu0 %v9585_v49 }
 0x4ec   :  { %9224 = vmatpush3.bf16.msra.mxu0 %v9585_v49  ;;  %v9590_v49 = vld [vmem:[%s12897_s7 + $0x20] sm:$0xff]  }
 0x4ee   :  { %9202 = vmatmul.mubr.bf16.gmra.mrb[216].mxu1 %v5767_v26 }
 0x4ef   :  { %9205 = vmatprep.mubr.bf16.mxu1 %v5839_v56 }
 0x4f6   :  { %9206 = vmatmul.mubr.bf16.gmra.mrb[220].mxu1 %v5896_v21 }
 0x510   :  { %v8832_v36 = vpop.f32.mrb[160].mxu0 }
 0x511   :  { %v8833_v40 = vpop.f32.mrb[161].mxu0 }
 0x512   :  { %v8834_v55 = vadd.f32 %v8833_v40, %v8832_v36  ;;  %v8835_v48 = vpop.f32.mrb[162].mxu0 }
 0x513   :  { %v8836_v31 = vpop.f32.mrb[163].mxu0 }
 0x514   :  { %v8837_v11 = vadd.f32 %v8836_v31, %v8835_v48 }
 0x51b   :  { %v8768_v50 = vpop.f32.mrb[144].mxu1 }
 0x51c   :  { %v8769_v25 = vpop.f32.mrb[145].mxu1 }
 0x51d   :  { %v8770_v12 = vadd.f32 %v8769_v25, %v8768_v50  ;;  %v8771_v33 = vpop.f32.mrb[146].mxu1 }
 0x51e   :  { %v8772_v35 = vpop.f32.mrb[147].mxu1 }
 0x51f   :  { %v12690_v16 = vadd.f32 %v8834_v55, %v8770_v12  ;;  %v8773_v7 = vadd.f32 %v8772_v35, %v8771_v33 }
 0x521   :  { %v12695_v60 = vadd.f32 %v8837_v11, %v8773_v7 }
 0x525   :  { %v8774_v27 = vpop.f32.mrb[148].mxu1 }
 0x526   :  { %v8775_v28 = vpop.f32.mrb[149].mxu1  ;;  %v8838_v19 = vpop.f32.mrb[164].mxu0 }
 0x527   :  { %v8776_v58 = vadd.f32 %v8775_v28, %v8774_v27  ;;  %v8777_v34 = vpop.f32.mrb[150].mxu1  ;;  %v8839_v44 = vpop.f32.mrb[165].mxu0  ;;  %v9586_v27 = vld [vmem:[%s12897_s7] sm:$0xff]   ;;  %v9587_v28 = vld [vmem:[%s12897_s7 + $0x8] sm:$0xff]  }
 0x528   :  { %v8778_v4 = vpop.f32.mrb[151].mxu1  ;;  %v8840_v8 = vadd.f32 %v8839_v44, %v8838_v19  ;;  %v8841_v0 = vpop.f32.mrb[166].mxu0  ;;  %9241 = vmatprep.subr.bf16.mxu1 %v9586_v27 }
 0x529   :  { %v8779_v51 = vadd.f32 %v8778_v4, %v8777_v34  ;;  %v8842_v63 = vpop.f32.mrb[167].mxu0  ;;  %9242 = vmatpush3.bf16.msra.mxu1 %v9586_v27 }
 0x52a   :  { %v8843_v24 = vadd.f32 %v8842_v63, %v8841_v0  ;;  %v12700_v32 = vadd.f32 %v8840_v8, %v8776_v58  ;;  %9243 = vmatprep.subr.bf16.mxu1 %v9587_v28 }
 0x52c   :  { %v12702_v3 = vadd.f32 %v8843_v24, %v8779_v51  ;;  %v9588_v51 = vld [vmem:[%s12897_s7 + $0x10] sm:$0xff]  }
 0x52d   :  { %9244 = vmatpush3.bf16.msra.mxu1 %v9587_v28 }
 0x52e   :  { %9245 = vmatprep.subr.bf16.mxu1 %v9588_v51 }
 0x530   :  { %v8844_v62 = vpop.f32.mrb[168].mxu0  ;;  %v8780_v45 = vpop.f32.mrb[152].mxu1 }
 0x531   :  { %v8845_v42 = vpop.f32.mrb[169].mxu0  ;;  %v8781_v39 = vpop.f32.mrb[153].mxu1  ;;  %9246 = vmatpush3.bf16.msra.mxu1 %v9588_v51 }
 0x532   :  { %v8846_v22 = vadd.f32 %v8845_v42, %v8844_v62  ;;  %v8847_v37 = vpop.f32.mrb[170].mxu0  ;;  %v8782_v61 = vadd.f32 %v8781_v39, %v8780_v45  ;;  %v8783_v2 = vpop.f32.mrb[154].mxu1  ;;  %v9589_v45 = vld [vmem:[%s12897_s7 + $0x18] sm:$0xff]  }
 0x533   :  { %v8848_v15 = vpop.f32.mrb[171].mxu0  ;;  %v8784_v54 = vpop.f32.mrb[155].mxu1  ;;  %9247 = vmatprep.subr.bf16.mxu1 %v9589_v45 }
 0x534   :  { %v8849_v41 = vadd.f32 %v8848_v15, %v8847_v37  ;;  %v12704_v47 = vadd.f32 %v8846_v22, %v8782_v61  ;;  %v8785_v30 = vadd.f32 %v8784_v54, %v8783_v2 }
 0x535   :  { %9248 = vmatpush3.bf16.msra.mxu1 %v9589_v45 }
 0x536   :  { %v12709_v5 = vadd.f32 %v8849_v41, %v8785_v30  ;;  %9249 = vmatprep.subr.bf16.mxu1 %v9590_v49 }
 0x538   :  { %v8850_v6 = vpop.f32.mrb[172].mxu0 }
 0x539   :  { %v8851_v52 = vpop.f32.mrb[173].mxu0  ;;  %9250 = vmatpush3.bf16.msra.mxu1 %v9590_v49 }
 0x53a   :  { %v8786_v20 = vpop.f32.mrb[156].mxu1  ;;  %v8852_v13 = vadd.f32 %v8851_v52, %v8850_v6  ;;  %v8853_v57 = vpop.f32.mrb[174].mxu0 }
 0x53b   :  { %v8787_v23 = vpop.f32.mrb[157].mxu1  ;;  %v8854_v10 = vpop.f32.mrb[175].mxu0 }
 0x53c   :  { %v8788_v43 = vadd.f32 %v8787_v23, %v8786_v20  ;;  %v8789_v18 = vpop.f32.mrb[158].mxu1  ;;  %v8855_v17 = vadd.f32 %v8854_v10, %v8853_v57  ;;  %v9591_v57 = vld [vmem:[%s12897_s7 + $0x28] sm:$0xff]  }
 0x53d   :  { %v8790_v9 = vpop.f32.mrb[159].mxu1  ;;  %9251 = vmatprep.subr.bf16.mxu1 %v9591_v57 }
 0x53e   :  { %v12711_v26 = vadd.f32 %v8852_v13, %v8788_v43  ;;  %v8791_v56 = vadd.f32 %v8790_v9, %v8789_v18  ;;  %9252 = vmatpush3.bf16.msra.mxu1 %v9591_v57 }
 0x540   :  { %v12713_v21 = vadd.f32 %v8855_v17, %v8791_v56 }
 0x545   :  { %v8856_v1 = vpop.f32.mrb[176].mxu0 }
 0x546   :  { %v8857_v38 = vpop.f32.mrb[177].mxu0 }
 0x547   :  { %v8858_v46 = vadd.f32 %v8857_v38, %v8856_v1  ;;  %v8859_v36 = vpop.f32.mrb[178].mxu0  ;;  %v8792_v53 = vpop.f32.mrb[160].mxu1 }
 0x548   :  { %v8860_v40 = vpop.f32.mrb[179].mxu0  ;;  %v8793_v55 = vpop.f32.mrb[161].mxu1 }
 0x549   :  { %v8861_v48 = vadd.f32 %v8860_v40, %v8859_v36  ;;  %v8794_v31 = vadd.f32 %v8793_v55, %v8792_v53  ;;  %v8795_v11 = vpop.f32.mrb[162].mxu1 }
 0x54a   :  { %v8796_v29 = vpop.f32.mrb[163].mxu1 }
 0x54b   :  { %v12715_v50 = vadd.f32 %v8858_v46, %v8794_v31  ;;  %v8797_v25 = vadd.f32 %v8796_v29, %v8795_v11 }
 0x54d   :  { %v12717_v12 = vadd.f32 %v8861_v48, %v8797_v25 }
 0x54f   :  { %v8862_v33 = vpop.f32.mrb[180].mxu0 }
 0x550   :  { %v8863_v35 = vpop.f32.mrb[181].mxu0 }
 0x551   :  { %v8864_v7 = vadd.f32 %v8863_v35, %v8862_v33  ;;  %v8865_v14 = vpop.f32.mrb[182].mxu0  ;;  %v8798_v19 = vpop.f32.mrb[164].mxu1 }
 0x552   :  { %v8866_v58 = vpop.f32.mrb[183].mxu0  ;;  %v8799_v44 = vpop.f32.mrb[165].mxu1 }
 0x553   :  { %v8867_v34 = vadd.f32 %v8866_v58, %v8865_v14  ;;  %v8800_v4 = vadd.f32 %v8799_v44, %v8798_v19  ;;  %v8801_v8 = vpop.f32.mrb[166].mxu1 }
 0x554   :  { %v8802_v0 = vpop.f32.mrb[167].mxu1 }
 0x555   :  { %v12728_v63 = vadd.f32 %v8864_v7, %v8800_v4  ;;  %v8803_v59 = vadd.f32 %v8802_v0, %v8801_v8 }
 0x557   :  { %v12730_v24 = vadd.f32 %v8867_v34, %v8803_v59 }
 0x559   :  { %v8868_v62 = vpop.f32.mrb[184].mxu0 }
 0x55a   :  { %v8869_v42 = vpop.f32.mrb[185].mxu0  ;;  %v8804_v39 = vpop.f32.mrb[168].mxu1 }
 0x55b   :  { %v8870_v22 = vadd.f32 %v8869_v42, %v8868_v62  ;;  %v8871_v37 = vpop.f32.mrb[186].mxu0  ;;  %v8805_v61 = vpop.f32.mrb[169].mxu1 }
 0x55c   :  { %v8872_v2 = vpop.f32.mrb[187].mxu0  ;;  %v8806_v15 = vadd.f32 %v8805_v61, %v8804_v39  ;;  %v8807_v54 = vpop.f32.mrb[170].mxu1 }
 0x55d   :  { %v8873_v41 = vadd.f32 %v8872_v2, %v8871_v37  ;;  %v8808_v30 = vpop.f32.mrb[171].mxu1 }
 0x55e   :  { %v12738_v6 = vadd.f32 %v8870_v22, %v8806_v15  ;;  %v8809_v52 = vadd.f32 %v8808_v30, %v8807_v54 }
 0x560   :  { %v12740_v20 = vadd.f32 %v8873_v41, %v8809_v52 }
 0x561   :  { %v8874_v13 = vpop.f32.mrb[188].mxu0 }
 0x562   :  { %v8875_v23 = vpop.f32.mrb[189].mxu0  ;;  %v8810_v10 = vpop.f32.mrb[172].mxu1 }
 0x563   :  { %v8876_v43 = vadd.f32 %v8875_v23, %v8874_v13  ;;  %v8877_v18 = vpop.f32.mrb[190].mxu0  ;;  %v8811_v17 = vpop.f32.mrb[173].mxu1 }
 0x564   :  { %v8878_v9 = vpop.f32.mrb[191].mxu0  ;;  %v8812_v56 = vadd.f32 %v8811_v17, %v8810_v10  ;;  %v8813_v1 = vpop.f32.mrb[174].mxu1 }
 0x565   :  { %v8879_v38 = vadd.f32 %v8878_v9, %v8877_v18  ;;  %v8814_v46 = vpop.f32.mrb[175].mxu1 }
 0x566   :  { %v12745_v36 = vadd.f32 %v8876_v43, %v8812_v56  ;;  %v8815_v53 = vadd.f32 %v8814_v46, %v8813_v1 }
 0x568   :  { %v12747_v40 = vadd.f32 %v8879_v38, %v8815_v53 }
 0x569   :  { %v8960_v55 = vpop.f32.mrb[192].mxu0 }
 0x56a   :  { %v8961_v48 = vpop.f32.mrb[193].mxu0 }
 0x56b   :  { %v8962_v31 = vadd.f32 %v8961_v48, %v8960_v55  ;;  %v8963_v11 = vpop.f32.mrb[194].mxu0 }
 0x56c   :  { %v8896_v29 = vpop.f32.mrb[176].mxu1  ;;  %v8964_v25 = vpop.f32.mrb[195].mxu0 }
 0x56d   :  { %v8965_v33 = vadd.f32 %v8964_v25, %v8963_v11  ;;  %v8897_v35 = vpop.f32.mrb[177].mxu1 }
 0x56e   :  { %v8898_v7 = vadd.f32 %v8897_v35, %v8896_v29  ;;  %v8899_v14 = vpop.f32.mrb[178].mxu1 }
 0x56f   :  { %v8900_v27 = vpop.f32.mrb[179].mxu1 }
 0x570   :  { %v6626_v28 = vadd.f32 %v8898_v7, %v12690_v16  ;;  %v8901_v19 = vadd.f32 %v8900_v27, %v8899_v14 }
 0x571   :  { %v8966_v58 = vpop.f32.mrb[196].mxu0 }
 0x572   :  { %v6629_v34 = vadd.f32 %v8901_v19, %v12695_v60  ;;  %v8967_v44 = vpop.f32.mrb[197].mxu0  ;;  %v12751_v4 = vadd.f32 %v8962_v31, %v6626_v28 }
 0x573   :  { %v8968_v8 = vadd.f32 %v8967_v44, %v8966_v58  ;;  %v8969_v0 = vpop.f32.mrb[198].mxu0 }
 0x574   :  { %v8970_v51 = vpop.f32.mrb[199].mxu0  ;;  %v12753_v59 = vadd.f32 %v8965_v33, %v6629_v34 }
 0x575   :  { %v8971_v62 = vadd.f32 %v8970_v51, %v8969_v0 }
 0x578   :  { %v8902_v45 = vpop.f32.mrb[180].mxu1 }
 0x579   :  { %v8903_v42 = vpop.f32.mrb[181].mxu1  ;;  %v8972_v61 = vpop.f32.mrb[200].mxu0 }
 0x57a   :  { %v8904_v39 = vadd.f32 %v8903_v42, %v8902_v45  ;;  %v8905_v22 = vpop.f32.mrb[182].mxu1  ;;  %v8973_v15 = vpop.f32.mrb[201].mxu0 }
 0x57b   :  { %v8906_v37 = vpop.f32.mrb[183].mxu1  ;;  %v8974_v60 = vadd.f32 %v8973_v15, %v8972_v61  ;;  %v8975_v54 = vpop.f32.mrb[202].mxu0 }
 0x57c   :  { %v6634_v16 = vadd.f32 %v8904_v39, %v12700_v32  ;;  %v8907_v2 = vadd.f32 %v8906_v37, %v8905_v22  ;;  %v8976_v30 = vpop.f32.mrb[203].mxu0 }
 0x57d   :  { %v8977_v52 = vadd.f32 %v8976_v30, %v8975_v54 }
 0x57e   :  { %v6637_v41 = vadd.f32 %v8907_v2, %v12702_v3  ;;  %v12757_v49 = vadd.f32 %v8968_v8, %v6634_v16 }
 0x580   :  { %v8908_v13 = vpop.f32.mrb[184].mxu1  ;;  %v12759_v57 = vadd.f32 %v8971_v62, %v6637_v41 }
 0x581   :  { %v8909_v23 = vpop.f32.mrb[185].mxu1  ;;  %v8978_v17 = vpop.f32.mrb[204].mxu0 }
 0x582   :  { %v8910_v10 = vadd.f32 %v8909_v23, %v8908_v13  ;;  %v8911_v43 = vpop.f32.mrb[186].mxu1  ;;  %v8979_v56 = vpop.f32.mrb[205].mxu0 }
 0x583   :  { %v8912_v18 = vpop.f32.mrb[187].mxu1  ;;  %v8980_v1 = vadd.f32 %v8979_v56, %v8978_v17  ;;  %v8981_v38 = vpop.f32.mrb[206].mxu0 }
 0x584   :  { %v6642_v32 = vadd.f32 %v8910_v10, %v12704_v47  ;;  %v8913_v9 = vadd.f32 %v8912_v18, %v8911_v43  ;;  %v8982_v46 = vpop.f32.mrb[207].mxu0 }
 0x585   :  { %v8983_v55 = vadd.f32 %v8982_v46, %v8981_v38 }
 0x586   :  { %v6645_v3 = vadd.f32 %v8913_v9, %v12709_v5  ;;  %v12763_v53 = vadd.f32 %v8974_v60, %v6642_v32 }
 0x588   :  { %v8914_v48 = vpop.f32.mrb[188].mxu1  ;;  %v12765_v31 = vadd.f32 %v8977_v52, %v6645_v3 }
 0x589   :  { %v8915_v11 = vpop.f32.mrb[189].mxu1 }
 0x58a   :  { %v8916_v29 = vadd.f32 %v8915_v11, %v8914_v48  ;;  %v8917_v25 = vpop.f32.mrb[190].mxu1  ;;  %v8984_v35 = vpop.f32.mrb[208].mxu0 }
 0x58b   :  { %v8918_v33 = vpop.f32.mrb[191].mxu1  ;;  %v8985_v14 = vpop.f32.mrb[209].mxu0 }
 0x58c   :  { %v6650_v47 = vadd.f32 %v8916_v29, %v12711_v26  ;;  %v8919_v7 = vadd.f32 %v8918_v33, %v8917_v25  ;;  %v8986_v27 = vadd.f32 %v8985_v14, %v8984_v35  ;;  %v8987_v28 = vpop.f32.mrb[210].mxu0 }
 0x58d   :  { %v8988_v19 = vpop.f32.mrb[211].mxu0 }
 0x58e   :  { %v6653_v5 = vadd.f32 %v8919_v7, %v12713_v21  ;;  %v12769_v58 = vadd.f32 %v8980_v1, %v6650_v47  ;;  %v8989_v34 = vadd.f32 %v8988_v19, %v8987_v28 }
 0x590   :  { %v8920_v44 = vpop.f32.mrb[192].mxu1  ;;  %v12771_v8 = vadd.f32 %v8983_v55, %v6653_v5 }
 0x591   :  { %v8921_v0 = vpop.f32.mrb[193].mxu1 }
 0x592   :  { %v8922_v51 = vadd.f32 %v8921_v0, %v8920_v44  ;;  %v8923_v62 = vpop.f32.mrb[194].mxu1  ;;  %v8990_v42 = vpop.f32.mrb[212].mxu0 }
 0x593   :  { %v8924_v45 = vpop.f32.mrb[195].mxu1  ;;  %v8991_v22 = vpop.f32.mrb[213].mxu0 }
 0x594   :  { %v6658_v26 = vadd.f32 %v8922_v51, %v12715_v50  ;;  %v8925_v39 = vadd.f32 %v8924_v45, %v8923_v62  ;;  %v8992_v37 = vadd.f32 %v8991_v22, %v8990_v42  ;;  %v8993_v61 = vpop.f32.mrb[214].mxu0 }
 0x595   :  { %v8994_v16 = vpop.f32.mrb[215].mxu0 }
 0x596   :  { %v6661_v21 = vadd.f32 %v8925_v39, %v12717_v12  ;;  %v12775_v2 = vadd.f32 %v8986_v27, %v6658_v26  ;;  %v8995_v15 = vadd.f32 %v8994_v16, %v8993_v61 }
 0x598   :  { %v12777_v54 = vadd.f32 %v8989_v34, %v6661_v21 }
 0x599   :  { %v8926_v60 = vpop.f32.mrb[196].mxu1 }
 0x59a   :  { %v8927_v41 = vpop.f32.mrb[197].mxu1  ;;  %v8996_v23 = vpop.f32.mrb[216].mxu0 }
 0x59b   :  { %v8928_v30 = vadd.f32 %v8927_v41, %v8926_v60  ;;  %v8929_v52 = vpop.f32.mrb[198].mxu1  ;;  %v8997_v43 = vpop.f32.mrb[217].mxu0 }
 0x59c   :  { %v8930_v13 = vpop.f32.mrb[199].mxu1  ;;  %v8998_v18 = vadd.f32 %v8997_v43, %v8996_v23  ;;  %v8999_v17 = vpop.f32.mrb[218].mxu0 }
 0x59d   :  { %v6666_v50 = vadd.f32 %v8928_v30, %v12728_v63  ;;  %v8931_v10 = vadd.f32 %v8930_v13, %v8929_v52  ;;  %v9000_v32 = vpop.f32.mrb[219].mxu0 }
 0x59e   :  { %v9001_v56 = vadd.f32 %v9000_v32, %v8999_v17 }
 0x59f   :  { %v6669_v12 = vadd.f32 %v8931_v10, %v12730_v24  ;;  %v6763_v9 = vadd.f32 %v8992_v37, %v6666_v50 }
 0x5a1   :  { %v8932_v1 = vpop.f32.mrb[200].mxu1  ;;  %v6766_v38 = vadd.f32 %v8995_v15, %v6669_v12 }
 0x5a2   :  { %v8933_v3 = vpop.f32.mrb[201].mxu1  ;;  %v9002_v11 = vpop.f32.mrb[220].mxu0 }
 0x5a3   :  { %v8934_v46 = vadd.f32 %v8933_v3, %v8932_v1  ;;  %v8935_v55 = vpop.f32.mrb[202].mxu1  ;;  %v9003_v63 = vpop.f32.mrb[221].mxu0 }
 0x5a4   :  { %v8936_v48 = vpop.f32.mrb[203].mxu1  ;;  %v9004_v33 = vadd.f32 %v9003_v63, %v9002_v11  ;;  %v9005_v35 = vpop.f32.mrb[222].mxu0 }
 0x5a5   :  { %v6674_v29 = vadd.f32 %v8934_v46, %v12738_v6  ;;  %v8937_v25 = vadd.f32 %v8936_v48, %v8935_v55  ;;  %v9006_v7 = vpop.f32.mrb[223].mxu0 }
 0x5a6   :  { %v9007_v14 = vadd.f32 %v9006_v7, %v9005_v35 }
 0x5a7   :  { %v6677_v47 = vadd.f32 %v8937_v25, %v12740_v20  ;;  %v6771_v24 = vadd.f32 %v8998_v18, %v6674_v29 }
 0x5a9   :  { %v8938_v27 = vpop.f32.mrb[204].mxu1  ;;  %v12783_v28 = vadd.f32 %v9001_v56, %v6677_v47 }
 0x5aa   :  { %v8939_v5 = vpop.f32.mrb[205].mxu1 }
 0x5ab   :  { %v8940_v19 = vadd.f32 %v8939_v5, %v8938_v27  ;;  %v8941_v34 = vpop.f32.mrb[206].mxu1 }
 0x5ac   :  { %v8942_v44 = vpop.f32.mrb[207].mxu1 }
 0x5ad   :  { %v6682_v0 = vadd.f32 %v8940_v19, %v12745_v36  ;;  %v8943_v51 = vadd.f32 %v8942_v44, %v8941_v34  ;;  %v9592_v44 = vld [vmem:[%s12897_s7 + $0x30] sm:$0xff]  }
 0x5ae   :  { %9253 = vmatprep.subr.bf16.mxu1 %v9592_v44 }
 0x5af   :  { %v6685_v6 = vadd.f32 %v8943_v51, %v12747_v40  ;;  %v6779_v62 = vadd.f32 %v9004_v33, %v6682_v0  ;;  %9254 = vmatpush3.bf16.msra.mxu1 %v9592_v44  ;;  %v9595_v0 = vld [vmem:[%s12899_s9 + $0x8] sm:$0xff]   ;;  %v9596_v51 = vld [vmem:[%s12899_s9 + $0x10] sm:$0xff]  }
 0x5b1   :  { %v9195_v45 = vpop.f32.mrb[208].mxu1  ;;  %v6782_v42 = vadd.f32 %v9007_v14, %v6685_v6  ;;  %v9597_v6 = vld [vmem:[%s12899_s9 + $0x18] sm:$0xff]  }
 0x5b2   :  { %v6828_v20 = vadd.f32 %v9195_v45, %v12757_v49  ;;  %v6819_v26 = vpop.f32.mrb[209].mxu1  ;;  %v9599_v45 = vld [vmem:[%s12899_s9 + $0x28] sm:$0xff]  }
 0x5b3   :  { %v6820_v39 = vadd.f32 %v6819_v26, %v12751_v4  ;;  %v9196_v22 = vpop.f32.mrb[210].mxu1 }
 0x5b4   :  { %v6831_v37 = vadd.f32 %v9196_v22, %v12759_v57  ;;  %v6822_v61 = vpop.f32.mrb[211].mxu1  ;;  %v6884_v16 = vmax.f32 %v6828_v20, 0.0  ;;  %v13246_v20 = vld [vmem:[#allocation11_spill] sm:$0xff]  ;;  %v13247_v22 = vld [vmem:[#allocation16_spill] sm:$0xff] }
 0x5b5   :  { %v6823_v21 = vadd.f32 %v6822_v61, %v12753_v59  ;;  %v6882_v36 = vmax.f32 %v6820_v39, 0.0 }
 0x5b6   :  { %v6885_v15 = vmax.f32 %v6831_v37, 0.0 }
 0x5b7   :  { %v6883_v60 = vmax.f32 %v6823_v21, 0.0  ;;  %v13248_v21 = vld [vmem:[#allocation10_spill] sm:$0xff] }
 0x5b8   :  { %v6899_v41 = vpack.c.bf16 %v6885_v15, %v6884_v16 }
 0x5b9   :  { %v6898_v40 = vpack.c.bf16 %v6883_v60, %v6882_v36  ;;  %v9199_v30 = vpop.f32.mrb[212].mxu1  ;;  %v13249_v36 = vld [vmem:[#allocation17_spill] sm:$0xff] }
 0x5ba   :  { %v6844_v52 = vadd.f32 %v9199_v30, %v12769_v58  ;;  %v6835_v13 = vpop.f32.mrb[213].mxu1 }
 0x5bb   :  { %v6836_v49 = vadd.f32 %v6835_v13, %v12763_v53  ;;  %v9200_v23 = vpop.f32.mrb[214].mxu1  ;;  %9225 = vmatprep.mubr.bf16.mxu0 %v6898_v40 }
 0x5bc   :  { %v6847_v4 = vadd.f32 %v9200_v23, %v12771_v8  ;;  %v6838_v57 = vpop.f32.mrb[215].mxu1  ;;  %9226 = vmatmul.mubr.bf16.vlgmr.msra.gmra.mrb[224].mxu0 %v6899_v41  ;;  %v6888_v50 = vmax.f32 %v6844_v52, 0.0 }
 0x5bd   :  { %v6839_v59 = vadd.f32 %v6838_v57, %v12765_v31  ;;  %v6886_v43 = vmax.f32 %v6836_v49, 0.0 }
 0x5be   :  { %v6889_v10 = vmax.f32 %v6847_v4, 0.0  ;;  %v13250_v4 = vld [vmem:[#allocation18_spill] sm:$0xff] }
 0x5bf   :  { %v6887_v18 = vmax.f32 %v6839_v59, 0.0 }
 0x5c0   :  { %v6901_v17 = vpack.c.bf16 %v6889_v10, %v6888_v50  ;;  %v13251_v50 = vld [vmem:[#allocation19_spill] sm:$0xff] }
 0x5c1   :  { %v6900_v12 = vpack.c.bf16 %v6887_v18, %v6886_v43  ;;  %v9203_v32 = vpop.f32.mrb[216].mxu1  ;;  %v13252_v18 = vld [vmem:[#allocation9_spill] sm:$0xff] }
 0x5c2   :  { %v6860_v56 = vadd.f32 %v9203_v32, %v6763_v9  ;;  %v6851_v58 = vpop.f32.mrb[217].mxu1  ;;  %v13253_v32 = vld [vmem:[#allocation20_spill] sm:$0xff] }
 0x5c3   :  { %v6852_v1 = vadd.f32 %v6851_v58, %v12775_v2  ;;  %v9204_v53 = vpop.f32.mrb[218].mxu1  ;;  %9229 = vmatprep.mubr.bf16.mxu0 %v6900_v12 }
 0x5c4   :  { %v6863_v3 = vadd.f32 %v9204_v53, %v6766_v38  ;;  %v6854_v46 = vpop.f32.mrb[219].mxu1  ;;  %9230 = vmatmul.mubr.bf16.gmra.mrb[228].mxu0 %v6901_v17  ;;  %v6892_v55 = vmax.f32 %v6860_v56, 0.0 }
 0x5c5   :  { %v6855_v8 = vadd.f32 %v6854_v46, %v12777_v54  ;;  %v6890_v48 = vmax.f32 %v6852_v1, 0.0 }
 0x5c6   :  { %v6893_v31 = vmax.f32 %v6863_v3, 0.0 }
 0x5c7   :  { %v6891_v11 = vmax.f32 %v6855_v8, 0.0 }
 0x5c8   :  { %v6903_v29 = vpack.c.bf16 %v6893_v31, %v6892_v55  ;;  %v13254_v31 = vld [vmem:[#allocation8_spill] sm:$0xff] }
 0x5c9   :  { %v6902_v25 = vpack.c.bf16 %v6891_v11, %v6890_v48  ;;  %v9207_v63 = vpop.f32.mrb[220].mxu1 }
 0x5ca   :  { %v6876_v33 = vadd.f32 %v9207_v63, %v6779_v62  ;;  %v6867_v35 = vpop.f32.mrb[221].mxu1  ;;  %v9598_v62 = vld [vmem:[%s12899_s9 + $0x20] sm:$0xff]  }
 0x5cb   :  { %v6868_v9 = vadd.f32 %v6867_v35, %v6771_v24  ;;  %v9208_v47 = vpop.f32.mrb[222].mxu1  ;;  %9233 = vmatprep.mubr.bf16.mxu0 %v6902_v25  ;;  %v9593_v24 = vld [vmem:[%s12897_s7 + $0x38] sm:$0xff]  }
 0x5cc   :  { %v6879_v2 = vadd.f32 %v9208_v47, %v6782_v42  ;;  %v6870_v7 = vpop.f32.mrb[223].mxu1  ;;  %9234 = vmatmul.mubr.bf16.gmra.mrb[232].mxu0 %v6903_v29  ;;  %v6896_v14 = vmax.f32 %v6876_v33, 0.0  ;;  %9255 = vmatprep.subr.bf16.mxu1 %v9593_v24  ;;  %v13255_v29 = vld [vmem:[#allocation21_spill] sm:$0xff]  ;;  %v13256_v33 = vld [vmem:[#allocation22_spill] sm:$0xff] }
 0x5cd   :  { %v6871_v38 = vadd.f32 %v6870_v7, %v12783_v28  ;;  %v6894_v54 = vmax.f32 %v6868_v9, 0.0  ;;  %9256 = vmatpush3.bf16.msra.mxu1 %v9593_v24  ;;  %v9594_v28 = vld [vmem:[%s12899_s9] sm:$0xff]   ;;  %v13257_v47 = vld [vmem:[#allocation6_spill] sm:$0xff] }
 0x5ce   :  { %v6897_v27 = vmax.f32 %v6879_v2, 0.0  ;;  %9273 = vmatprep.subr.bf16.mxu0 %v9594_v28 }
 0x5cf   :  { %v6895_v5 = vmax.f32 %v6871_v38, 0.0  ;;  %9274 = vmatpush3.bf16.msra.mxu0 %v9594_v28  ;;  %v13259_v28 = vld [vmem:[#allocation24_spill] sm:$0xff] }
 0x5d0   :  { %v6905_v19 = vpack.c.bf16 %v6897_v27, %v6896_v14  ;;  %9275 = vmatprep.subr.bf16.mxu0 %v9595_v0 }
 0x5d1   :  { %v6904_v34 = vpack.c.bf16 %v6895_v5, %v6894_v54 }
 0x5d3   :  { %9237 = vmatprep.mubr.bf16.mxu0 %v6904_v34  ;;  %9276 = vmatpush3.bf16.msra.mxu0 %v9595_v0  ;;  %v13258_v34 = vld [vmem:[#allocation23_spill] sm:$0xff] }
 0x5d4   :  { %9238 = vmatmul.mubr.bf16.gmra.mrb[236].mxu0 %v6905_v19  ;;  %9277 = vmatprep.subr.bf16.mxu0 %v9596_v51 }
 0x5d7   :  { %9278 = vmatpush3.bf16.msra.mxu0 %v9596_v51 }
 0x5d8   :  { %9279 = vmatprep.subr.bf16.mxu0 %v9597_v6 }
 0x5db   :  { %9280 = vmatpush3.bf16.msra.mxu0 %v9597_v6  ;;  %v13260_v6 = vld [vmem:[#allocation25_spill] sm:$0xff] }
 0x5dc   :  { %9281 = vmatprep.subr.bf16.mxu0 %v9598_v62 }
 0x5df   :  { %9282 = vmatpush3.bf16.msra.mxu0 %v9598_v62 }
 0x5e0   :  { %9283 = vmatprep.subr.bf16.mxu0 %v9599_v45 }
 0x5e3   :  { %9284 = vmatpush3.bf16.msra.mxu0 %v9599_v45 }
 0x68f   :  { %v9227_v42 = vpop.f32.mrb[224].mxu0 }
 0x690   :  { %v7070_v26 = vadd.f32 %v9227_v42, %v13246_v20  ;;  %v7005_v39 = vpop.f32.mrb[225].mxu0  ;;  %v13261_v42 = vld [vmem:[#allocation26_spill] sm:$0xff] }
 0x691   :  { %v7068_v37 = vadd.f32 %v7005_v39, %v13247_v22  ;;  %v9228_v61 = vpop.f32.mrb[226].mxu0 }
 0x692   :  { %v7071_v16 = vadd.f32 %v9228_v61, %v13248_v21  ;;  %v7008_v15 = vpop.f32.mrb[227].mxu0  ;;  %v7086_v41 = vmax.f32 %v7070_v26, 0.0 }
 0x693   :  { %v7069_v60 = vadd.f32 %v7008_v15, %v13249_v36  ;;  %v7084_v30 = vmax.f32 %v7068_v37, 0.0  ;;  %v9601_v15 = vld [vmem:[%s12899_s9 + $0x38] sm:$0xff]   ;;  %v8124_v36 = vld [vmem:[%s12898_s8] ss:$0 sm:$0xff] }
 0x694   :  { %v7087_v40 = vmax.f32 %v7071_v16, 0.0  ;;  %v9600_v16 = vld [vmem:[%s12899_s9 + $0x30] sm:$0xff]  }
 0x695   :  { %v7085_v52 = vmax.f32 %v7069_v60, 0.0  ;;  %9285 = vmatprep.subr.bf16.mxu0 %v9600_v16 }
 0x696   :  { %v7101_v13 = vpack.c.bf16 %v7087_v40, %v7086_v41  ;;  %9286 = vmatpush3.bf16.msra.mxu0 %v9600_v16 }
 0x697   :  { %v7100_v49 = vpack.c.bf16 %v7085_v52, %v7084_v30  ;;  %v9231_v23 = vpop.f32.mrb[228].mxu0  ;;  %9287 = vmatprep.subr.bf16.mxu0 %v9601_v15 }
 0x698   :  { %v7074_v57 = vadd.f32 %v9231_v23, %v13250_v4  ;;  %v7021_v59 = vpop.f32.mrb[229].mxu0 }
 0x699   :  { %v7072_v10 = vadd.f32 %v7021_v59, %v13251_v50  ;;  %v9232_v43 = vpop.f32.mrb[230].mxu0  ;;  %9257 = vmatprep.mubr.bf16.mxu1 %v7100_v49 }
 0x69a   :  { %v7075_v17 = vadd.f32 %v9232_v43, %v13252_v18  ;;  %v7024_v12 = vpop.f32.mrb[231].mxu0  ;;  %9258 = vmatmul.mubr.bf16.vlgmr.msra.gmra.mrb[224].mxu1 %v7101_v13  ;;  %v7090_v58 = vmax.f32 %v7074_v57, 0.0  ;;  %9288 = vmatpush3.bf16.msra.mxu0 %v9601_v15 }
 0x69b   :  { %v7073_v56 = vadd.f32 %v7024_v12, %v13253_v32  ;;  %v7088_v53 = vmax.f32 %v7072_v10, 0.0 }
 0x69c   :  { %v7091_v1 = vmax.f32 %v7075_v17, 0.0 }
 0x69d   :  { %v7089_v3 = vmax.f32 %v7073_v56, 0.0 }
 0x69e   :  { %v7103_v46 = vpack.c.bf16 %v7091_v1, %v7090_v58 }
 0x69f   :  { %v7102_v8 = vpack.c.bf16 %v7089_v3, %v7088_v53  ;;  %v9235_v55 = vpop.f32.mrb[232].mxu0 }
 0x6a0   :  { %v7078_v48 = vadd.f32 %v9235_v55, %v13254_v31  ;;  %v7037_v11 = vpop.f32.mrb[233].mxu0 }
 0x6a1   :  { %v7076_v25 = vadd.f32 %v7037_v11, %v13255_v29  ;;  %v9236_v63 = vpop.f32.mrb[234].mxu0  ;;  %9261 = vmatprep.mubr.bf16.mxu1 %v7102_v8 }
 0x6a2   :  { %v7079_v35 = vadd.f32 %v9236_v63, %v13256_v33  ;;  %v7040_v9 = vpop.f32.mrb[235].mxu0  ;;  %9262 = vmatmul.mubr.bf16.gmra.mrb[228].mxu1 %v7103_v46  ;;  %v7094_v7 = vmax.f32 %v7078_v48, 0.0 }
 0x6a3   :  { %v7077_v2 = vadd.f32 %v7040_v9, %v13257_v47  ;;  %v7092_v14 = vmax.f32 %v7076_v25, 0.0 }
 0x6a4   :  { %v7095_v38 = vmax.f32 %v7079_v35, 0.0 }
 0x6a5   :  { %v7093_v27 = vmax.f32 %v7077_v2, 0.0 }
 0x6a6   :  { %v7105_v54 = vpack.c.bf16 %v7095_v38, %v7094_v7 }
 0x6a7   :  { %v7104_v5 = vpack.c.bf16 %v7093_v27, %v7092_v14  ;;  %v9239_v19 = vpop.f32.mrb[236].mxu0 }
 0x6a8   :  { %v7082_v44 = vadd.f32 %v9239_v19, %v13258_v34  ;;  %v7053_v24 = vpop.f32.mrb[237].mxu0 }
 0x6a9   :  { %v7080_v0 = vadd.f32 %v7053_v24, %v13259_v28  ;;  %v9240_v51 = vpop.f32.mrb[238].mxu0  ;;  %9265 = vmatprep.mubr.bf16.mxu1 %v7104_v5 }
 0x6aa   :  { %v7083_v62 = vadd.f32 %v9240_v51, %v13260_v6  ;;  %v7056_v45 = vpop.f32.mrb[239].mxu0  ;;  %9266 = vmatmul.mubr.bf16.gmra.mrb[232].mxu1 %v7105_v54  ;;  %v7098_v26 = vmax.f32 %v7082_v44, 0.0 }
 0x6ab   :  { %v7081_v20 = vadd.f32 %v7056_v45, %v13261_v42  ;;  %v7096_v22 = vmax.f32 %v7080_v0, 0.0 }
 0x6ac   :  { %v7099_v39 = vmax.f32 %v7083_v62, 0.0 }
 0x6ad   :  { %v7097_v37 = vmax.f32 %v7081_v20, 0.0 }
 0x6ae   :  { %v7107_v61 = vpack.c.bf16 %v7099_v39, %v7098_v26 }
 0x6af   :  { %v7106_v21 = vpack.c.bf16 %v7097_v37, %v7096_v22 }
 0x6b1   :  { %9269 = vmatprep.mubr.bf16.mxu1 %v7106_v21 }
 0x6b2   :  { %9270 = vmatmul.mubr.bf16.gmra.mrb[236].mxu1 %v7107_v61 }
 0x76d   :  { %v9259_v60 = vpop.f32.mrb[224].mxu1 }
 0x76e   :  { %v7222_v41 = vadd.f32 %v9259_v60, %v8124_v36  ;;  %v7213_v40 = vpop.f32.mrb[225].mxu1 }
 0x76f   :  { %v7214_v30 = vadd.f32 %v8124_v36, %v7213_v40  ;;  %v9260_v52 = vpop.f32.mrb[226].mxu1 }
 0x770   :  { %v7225_v13 = vadd.f32 %v9260_v52, %v8124_v36  ;;  %v7216_v49 = vpop.f32.mrb[227].mxu1  ;;  %v7278_v4 = vmax.f32 %v7222_v41, 0.0 }
 0x771   :  { %v7217_v23 = vadd.f32 %v8124_v36, %v7216_v49  ;;  %v7276_v59 = vmax.f32 %v7214_v30, 0.0 }
 0x772   :  { %v7279_v57 = vmax.f32 %v7225_v13, 0.0 }
 0x773   :  { %v7277_v50 = vmax.f32 %v7217_v23, 0.0 }
 0x774   :  { %v7293_v10 = vpack.c.bf16 %v7279_v57, %v7278_v4 }
 0x775   :  { %v7292_v43 = vpack.c.bf16 %v7277_v50, %v7276_v59  ;;  %v9263_v18 = vpop.f32.mrb[228].mxu1 }
 0x776   :  { %v7238_v17 = vadd.f32 %v9263_v18, %v8124_v36  ;;  %v7229_v12 = vpop.f32.mrb[229].mxu1 }
 0x777   :  { %v7230_v32 = vadd.f32 %v8124_v36, %v7229_v12  ;;  %v9264_v56 = vpop.f32.mrb[230].mxu1  ;;  %9289 = vmatprep.mubr.bf16.mxu0 %v7292_v43 }
 0x778   :  { %v7241_v58 = vadd.f32 %v9264_v56, %v8124_v36  ;;  %v7232_v1 = vpop.f32.mrb[231].mxu1  ;;  %9290 = vmatmul.mubr.bf16.vlgmr.msra.gmra.mrb[240].mxu0 %v7293_v10  ;;  %v7282_v3 = vmax.f32 %v7238_v17, 0.0 }
 0x779   :  { %v7233_v53 = vadd.f32 %v8124_v36, %v7232_v1  ;;  %v7280_v8 = vmax.f32 %v7230_v32, 0.0 }
 0x77a   :  { %v7283_v46 = vmax.f32 %v7241_v58, 0.0 }
 0x77b   :  { %v7281_v55 = vmax.f32 %v7233_v53, 0.0 }
 0x77c   :  { %v7295_v31 = vpack.c.bf16 %v7283_v46, %v7282_v3 }
 0x77d   :  { %v7294_v48 = vpack.c.bf16 %v7281_v55, %v7280_v8  ;;  %v9267_v11 = vpop.f32.mrb[232].mxu1 }
 0x77e   :  { %v7254_v29 = vadd.f32 %v9267_v11, %v8124_v36  ;;  %v7245_v25 = vpop.f32.mrb[233].mxu1 }
 0x77f   :  { %v7246_v63 = vadd.f32 %v8124_v36, %v7245_v25  ;;  %v9268_v33 = vpop.f32.mrb[234].mxu1  ;;  %9293 = vmatprep.mubr.bf16.mxu0 %v7294_v48 }
 0x780   :  { %v7257_v35 = vadd.f32 %v9268_v33, %v8124_v36  ;;  %v7248_v9 = vpop.f32.mrb[235].mxu1  ;;  %9294 = vmatmul.mubr.bf16.gmra.mrb[244].mxu0 %v7295_v31  ;;  %v7286_v2 = vmax.f32 %v7254_v29, 0.0 }
 0x781   :  { %v7249_v47 = vadd.f32 %v8124_v36, %v7248_v9  ;;  %v7284_v38 = vmax.f32 %v7246_v63, 0.0 }
 0x782   :  { %v7287_v7 = vmax.f32 %v7257_v35, 0.0 }
 0x783   :  { %v7285_v14 = vmax.f32 %v7249_v47, 0.0 }
 0x784   :  { %v7297_v27 = vpack.c.bf16 %v7287_v7, %v7286_v2 }
 0x785   :  { %v7296_v54 = vpack.c.bf16 %v7285_v14, %v7284_v38  ;;  %v9271_v5 = vpop.f32.mrb[236].mxu1 }
 0x786   :  { %v7270_v19 = vadd.f32 %v9271_v5, %v8124_v36  ;;  %v7261_v34 = vpop.f32.mrb[237].mxu1 }
 0x787   :  { %v7262_v44 = vadd.f32 %v8124_v36, %v7261_v34  ;;  %v9272_v24 = vpop.f32.mrb[238].mxu1  ;;  %9297 = vmatprep.mubr.bf16.mxu0 %v7296_v54 }
 0x788   :  { %v7273_v28 = vadd.f32 %v9272_v24, %v8124_v36  ;;  %v7264_v0 = vpop.f32.mrb[239].mxu1  ;;  %9298 = vmatmul.mubr.bf16.gmra.mrb[248].mxu0 %v7297_v27  ;;  %v7290_v6 = vmax.f32 %v7270_v19, 0.0 }
 0x789   :  { %v7265_v51 = vadd.f32 %v8124_v36, %v7264_v0  ;;  %v7288_v45 = vmax.f32 %v7262_v44, 0.0  ;;  %v8133_v36 = vld [vmem:[%s12900_s10] ss:$0 sm:$0xff] }
 0x78a   :  { %v7291_v62 = vmax.f32 %v7273_v28, 0.0 }
 0x78b   :  { %v7289_v42 = vmax.f32 %v7265_v51, 0.0  ;;  %v9602_v51 = vld [vmem:[%s12901_s11] sm:$0xff]  }
 0x78c   :  { %v7299_v20 = vpack.c.bf16 %v7291_v62, %v7290_v6  ;;  %v9638_v6 = vmov 0.0   ;;  %v9603_v62 = vld [vmem:[%s12901_s11 + $0x8] sm:$0xff]  }
 0x78d   :  { %v7298_v26 = vpack.c.bf16 %v7289_v42, %v7288_v45  ;;  %9305 = vmatprep.subr.bf16.mxu1 %v9638_v6  ;;  %v9604_v45 = vld [vmem:[%s12901_s11 + $0x10] sm:$0xff]   ;;  %v9605_v42 = vld [vmem:[%s12901_s11 + $0x18] sm:$0xff]   ;;  %9321 = vmatprep.mubr.msk.bf16.mxu1 %vm9639_vm15, %v9638_v6 }
 0x78e   :  { %9306 = vmatpush3.bf16.msra.mxu1 %v9602_v51 }
 0x78f   :  { %9301 = vmatprep.mubr.bf16.mxu0 %v7298_v26  ;;  %9307 = vmatprep.subr.bf16.mxu1 %v9638_v6  ;;  %v9607_v26 = vld [vmem:[%s12901_s11 + $0x28] sm:$0xff]  }
 0x790   :  { %9302 = vmatmul.mubr.bf16.gmra.mrb[252].mxu0 %v7299_v20  ;;  %v9606_v20 = vld [vmem:[%s12901_s11 + $0x20] sm:$0xff]  }
 0x792   :  { %9308 = vmatpush3.bf16.msra.mxu1 %v9603_v62 }
 0x793   :  { %9309 = vmatprep.subr.bf16.mxu1 %v9638_v6 }
 0x796   :  { %9310 = vmatpush3.bf16.msra.mxu1 %v9604_v45 }
 0x797   :  { %9311 = vmatprep.subr.bf16.mxu1 %v9638_v6 }
 0x79a   :  { %9312 = vmatpush3.bf16.msra.mxu1 %v9605_v42 }
 0x79b   :  { %9313 = vmatprep.subr.bf16.mxu1 %v9638_v6 }
 0x79e   :  { %9314 = vmatpush3.bf16.msra.mxu1 %v9606_v20 }
 0x79f   :  { %9315 = vmatprep.subr.bf16.mxu1 %v9638_v6 }
 0x7a2   :  { %9316 = vmatpush3.bf16.msra.mxu1 %v9607_v26 }
 0x7a3   :  { %9317 = vmatprep.subr.bf16.mxu1 %v9638_v6 }
 0x84b   :  { %v9291_v39 = vpop.f32.mrb[240].mxu0 }
 0x84c   :  { %v7405_v22 = vpop.f32.mrb[241].mxu0  ;;  %v7414_v41 = vadd.f32 %v9291_v39, %v8133_v36  ;;  %v9608_v39 = vld [vmem:[%s12901_s11 + $0x30] sm:$0xff]  }
 0x84d   :  { %v9292_v37 = vpop.f32.mrb[242].mxu0  ;;  %v7406_v40 = vadd.f32 %v8133_v36, %v7405_v22  ;;  %9318 = vmatpush3.bf16.msra.mxu1 %v9608_v39  ;;  %v9609_v22 = vld [vmem:[%s12901_s11 + $0x38] sm:$0xff]  }
 0x84e   :  { %v7408_v61 = vpop.f32.mrb[243].mxu0  ;;  %v7417_v52 = vadd.f32 %v9292_v37, %v8133_v36  ;;  %v7470_v59 = vmax.f32 %v7414_v41, 0.0  ;;  %9319 = vmatprep.subr.bf16.mxu1 %v9638_v6 }
 0x84f   :  { %v7409_v23 = vadd.f32 %v8133_v36, %v7408_v61  ;;  %v7468_v18 = vmax.f32 %v7406_v40, 0.0 }
 0x850   :  { %v7471_v32 = vmax.f32 %v7417_v52, 0.0 }
 0x851   :  { %v7469_v1 = vmax.f32 %v7409_v23, 0.0  ;;  %9320 = vmatpush3.bf16.msra.mxu1 %v9609_v22 }
 0x853   :  { %v9295_v21 = vpop.f32.mrb[244].mxu0 }
 0x854   :  { %v7421_v16 = vpop.f32.mrb[245].mxu0  ;;  %v7430_v46 = vadd.f32 %v9295_v21, %v8133_v36 }
 0x855   :  { %v9296_v15 = vpop.f32.mrb[246].mxu0  ;;  %v7422_v55 = vadd.f32 %v8133_v36, %v7421_v16 }
 0x856   :  { %v7424_v60 = vpop.f32.mrb[247].mxu0  ;;  %v7433_v11 = vadd.f32 %v9296_v15, %v8133_v36  ;;  %v7474_v9 = vmax.f32 %v7430_v46, 0.0 }
 0x857   :  { %v7425_v63 = vadd.f32 %v8133_v36, %v7424_v60  ;;  %v7472_v38 = vmax.f32 %v7422_v55, 0.0 }
 0x858   :  { %v7475_v54 = vmax.f32 %v7433_v11, 0.0 }
 0x859   :  { %v7473_v34 = vmax.f32 %v7425_v63, 0.0 }
 0x85b   :  { %v9299_v30 = vpop.f32.mrb[248].mxu0 }
 0x85c   :  { %v7446_v13 = vadd.f32 %v9299_v30, %v8133_v36  ;;  %v7437_v49 = vpop.f32.mrb[249].mxu0 }
 0x85d   :  { %v7438_v4 = vadd.f32 %v8133_v36, %v7437_v49  ;;  %v9300_v57 = vpop.f32.mrb[250].mxu0  ;;  %v9641_v49 = vmov 1966171168  }
 0x85e   :  { %v7478_v50 = vmax.f32 %v7446_v13, 0.0  ;;  %v7449_v10 = vadd.f32 %v9300_v57, %v8133_v36  ;;  %v7440_v43 = vpop.f32.mrb[251].mxu0  ;;  %v7680_v23 = vunpack.c.l.s4 %v9641_v49  ;;  %v8142_v57 = vld [vmem:[%s12902_s12] ss:$0 sm:$0xff] }
 0x85f   :  { %v7476_v17 = vmax.f32 %v7438_v4, 0.0  ;;  %v7441_v12 = vadd.f32 %v8133_v36, %v7440_v43 }
 0x860   :  { %v7479_v56 = vmax.f32 %v7449_v10, 0.0  ;;  %v9337_v58 = vpack.i.bf16 %v7470_v59, %v7478_v50  ;;  %v7681_v4 = vunpack.c.0.s8 %v7680_v23  ;;  %v13262_v59 = vld [vmem:[#allocation5_spill] sm:$0xff] }
 0x861   :  { %v7477_v53 = vmax.f32 %v7441_v12, 0.0  ;;  %v9333_v3 = vpack.i.bf16 %v7468_v18, %v7476_v17 }
 0x862   :  { %v9339_v8 = vpack.i.bf16 %v7471_v32, %v7479_v56  ;;  %v7684_v50 = vsub.s32 %v7681_v4, %v13262_v59 }
 0x863   :  { %9334 = vxpose.xlu0.b32.start [1/8] (short) (narrow) %v9333_v3, 8  ;;  %v9303_v31 = vpop.f32.mrb[252].mxu0  ;;  %v9335_v48 = vpack.i.bf16 %v7469_v1, %v7477_v53 }
 0x864   :  { %v7462_v29 = vadd.f32 %v9303_v31, %v8133_v36  ;;  %v7453_v25 = vpop.f32.mrb[253].mxu0 }
 0x865   :  { %v7454_v33 = vadd.f32 %v8133_v36, %v7453_v25  ;;  %v9304_v35 = vpop.f32.mrb[254].mxu0 }
 0x866   :  { %v7482_v47 = vmax.f32 %v7462_v29, 0.0  ;;  %v7465_v2 = vadd.f32 %v9304_v35, %v8133_v36  ;;  %v7456_v7 = vpop.f32.mrb[255].mxu0 }
 0x867   :  { %v7480_v14 = vmax.f32 %v7454_v33, 0.0  ;;  %v7457_v27 = vadd.f32 %v8133_v36, %v7456_v7  ;;  %9336 = vxpose.xlu0.b32.cont [2/8] (short) (narrow) %v9335_v48, 8 }
 0x868   :  { %v7483_v5 = vmax.f32 %v7465_v2, 0.0  ;;  %v9345_v19 = vpack.i.bf16 %v7474_v9, %v7482_v47 }
 0x869   :  { %v7481_v44 = vmax.f32 %v7457_v27, 0.0  ;;  %v9341_v24 = vpack.i.bf16 %v7472_v38, %v7480_v14 }
 0x86a   :  { %v9347_v28 = vpack.i.bf16 %v7475_v54, %v7483_v5 }
 0x86b   :  { %9338 = vxpose.xlu0.b32.cont [3/8] (short) (narrow) %v9337_v58, 8  ;;  %v9343_v0 = vpack.i.bf16 %v7473_v34, %v7481_v44 }
 0x86f   :  { %9340 = vxpose.xlu0.b32.cont [4/8] (short) (narrow) %v9339_v8, 8 }
 0x873   :  { %9342 = vxpose.xlu0.b32.cont [5/8] (short) (narrow) %v9341_v24, 8 }
 0x877   :  { %9344 = vxpose.xlu0.b32.cont [6/8] (short) (narrow) %v9343_v0, 8 }
 0x87b   :  { %9346 = vxpose.xlu0.b32.cont [7/8] (short) (narrow) %v9345_v19, 8 }
 0x87f   :  { %9348 = vxpose.xlu0.b32.end [8/8] (short) (narrow) %v9347_v28, 8 }
 0x8e3   :  { %v9349_v37 = vpop.trf.xlu0 }
 0x8e4   :  { %v9350_v61 = vunpack.i.l.bf16 %v9349_v37  ;;  %v9353_v21 = vunpack.i.h.bf16 %v9349_v37 }
 0x8e6   :  { %v7556_v16 = vrot.slane %v9350_v61, 1  ;;  %v7517_v15 = vrot.slane %v9353_v21, 1 }
 0x8e8   :  { %7557 = vrot.lane.b32.xlu1 %v7556_v16, %s9640_s29 }
 0x8ec   :  { %7518 = vrot.lane.b32.xlu1 %v7517_v15, %s9640_s29 }
 0x95a   :  { %v7558_v60 = vpop.permute.xlu1 %7557 }
 0x95b   :  { %v7560_v36 = vsel %vm7521_vm11, %v9350_v61, %v7558_v60 }
 0x95c   :  { %v7562_v41 = vrot.slane %v7560_v36, 7 }
 0x95e   :  { %v7519_v40 = vpop.permute.xlu1 %7518 }
 0x95f   :  { %v7522_v30 = vsel %vm7521_vm11, %v9353_v21, %v7519_v40 }
 0x960   :  { %v7565_v52 = vsel %vm7564_vm3, %v7522_v30, %v7562_v41 }
 0x961   :  { %v7566_v13 = vpack.c.bf16 %v7565_v52, %v7565_v52 }
 0x963   :  { %9322 = vmatmul.mubr.bf16.vlgmr.msra.gmra.mrb[240].mxu1 %v7566_v13 }
 0xa36   :  { %v7672_v10 = vpop.f32.mrb[240].mxu1 }
 0xa37   :  { %v7673_v43 = vadd.f32 %v8142_v57, %v7672_v10  ;;  %v9323_v18 = vpop.f32.mrb[241].mxu1 }
 0xa38   :  { %v7675_v17 = vpop.f32.mrb[242].mxu1 }
 0xa39   :  { %v7685_v12 = vrot.slane %v7673_v43, %v7684_v50  ;;  %v9324_v32 = vpop.f32.mrb[243].mxu1 }
 0xa3b   :  { %v7686_v56 = vcombine.high %v7685_v12, %v7685_v12  ;;  %8151 = vst.sshfl [vmem:[#allocation2] sm:$0x1 pattern:$0x73625140] %v7685_v12 }
 0xa3d   :  { %8152 = vst.sshfl [vmem:[#allocation2 + $0x1] sm:$0x1 pattern:$0x73625140] %v7686_v56 }
 0xa3e   :  { %9624 = shalt.err (!%p9621_p4)
}
 0xa3f   :  { %s9625_s17 = scalar_lea.hbm %s12903_s13, 32 }
 0xa40   :  { %p9626_p5 = scmp.ne.s32.totalorder %s12903_s13, %s9625_s17  ;;  %p9629_p6 = scmp.lt.u32.totalorder %s9625_s17, %s12903_s13 }
 0xa42   :  { %p9631_p7 = pnand %p9629_p6, %p9626_p5 }
 0xa44   :  { %9634 = shalt.err (!%p9631_p7)
}
 0xa45   :  { %s9643_s9 = smov 16   ;;  %s9644_s10 = smov 1  }
 0xa46   :  { %7716 = dma.vmem_to_hbm [thread:$0]  %s7711_s14, 32, %s12903_s13, [#allocation3], %s9643_s9, %s9643_s9, %s9644_s10  }
 0xa47   :  { %9635 = dma.done.wait [#allocation3], 32  }
 0xa48   :  { %9636 = vsyncadd [#allocation3], 4294967264 }
 0xa49   :  { %7720 = vsyncpa [#allocation3], 1 }

</bundles_post_ra>
